<compile_context>
chip_gen: v5e
topology: v5e:2x2
jax: 0.10.0
libtpu: 0.0.40
codegen_flags: <defaults>
</compile_context>

<pallas_src>
import functools

import jax
import jax.numpy as jnp
from jax.experimental import pallas as pl
from jax.experimental.pallas import tpu as pltpu

# Channel sizes fixed by the PyTorch module.
_C0, _C1, _C2, _C3 = 96, 64, 32, 3
_C0_PAD = 128   # layer-1 input channels padded 96->128 (aligned im2col slabs)
_C3_PAD = 128   # layer-3 output channels padded 3->128 (lane-dense output)


def _fused_kernel(x_ref, w1_ref, b1_ref, w2_ref, b2_ref, w3_ref, b3_ref,
                  o_ref, pad_ref, patch_ref, *, H, W):
    """Fused conv1+LeakyReLU -> conv2+ReLU -> conv3 for one batch element.

    x_ref:     (1, H, W, 96)        input activation (NHWC block)
    w1_ref:    (9*128, 64)          im2col-folded weights (Cin zero-padded)
    w2_ref:    (9*64, 32)
    w3_ref:    (9*32, 128)          Cout zero-padded 3->128
    b*_ref:    (1, Cout)            biases (b3 zero-padded to 128)
    o_ref:     (1, H*W, 128)        lane-dense output (columns >= 3 are zero)
    pad_ref:   VMEM (H+2, W+2, 128) zero-padded activation scratch (reused)
    patch_ref: VMEM (H*W, 9*128)    im2col scratch (reused per layer)
    """
    HW = H * W

    # Zero the padded-activation scratch once per step: the 1-pixel spatial
    # border and the padded channels [96:128) stay zero for every layer
    # because only the interior / real channels are ever written.
    pad_ref[...] = jnp.zeros_like(pad_ref)

    def conv3x3(cs, w_ref, b_ref):
        """3x3 same conv of pad_ref[..., :cs] as a single K=9*cs matmul."""
        for dy in range(3):
            for dx in range(3):
                j = dy * 3 + dx
                # Slab writes start at lane offsets that are multiples of cs
                # (cs in {128, 64, 32}) and never cross a 128-lane tile.
                patch_ref[:, j * cs:(j + 1) * cs] = (
                    pad_ref[dy:dy + H, dx:dx + W, :cs].reshape(HW, cs))
        acc = jnp.dot(patch_ref[:, :9 * cs], w_ref[...],
                      preferred_element_type=jnp.float32)
        return acc + b_ref[...]          # bias broadcast hoisted out of taps

    # Layer 1: Conv2d(96 -> 64) + LeakyReLU(0.01).
    pad_ref[1:H + 1, 1:W + 1, :_C0] = x_ref[0]
    h = conv3x3(_C0_PAD, w1_ref, b1_ref)          # (HW, 64)
    h = jnp.where(h >= 0, h, 0.01 * h)

    # Layer 2: Conv2d(64 -> 32) + ReLU. Intermediate never leaves VMEM.
    pad_ref[1:H + 1, 1:W + 1, :_C1] = h.reshape(H, W, _C1)
    h = conv3x3(_C1, w2_ref, b2_ref)              # (HW, 32)
    h = jnp.maximum(h, 0.0)

    # Layer 3: Conv2d(32 -> 3); Cout padded to 128 -> lane-dense stores.
    pad_ref[1:H + 1, 1:W + 1, :_C2] = h.reshape(H, W, _C2)
    h = conv3x3(_C2, w3_ref, b3_ref)              # (HW, 128)
    o_ref[...] = h.reshape(1, HW, _C3_PAD).astype(o_ref.dtype)


def _fold_weight(w_oihw, cin_pad=None, cout_pad=None):
    """OIHW torch weight -> (9*Cin[,padded], Cout[,padded]) im2col weight."""
    co, ci, kh, kw = w_oihw.shape
    w = jnp.transpose(w_oihw, (2, 3, 1, 0))        # -> (kh, kw, ci, co)
    if cin_pad is not None and cin_pad != ci:
        w = jnp.pad(w, ((0, 0), (0, 0), (0, cin_pad - ci), (0, 0)))
        ci = cin_pad
    w = w.reshape(kh * kw * ci, co)                # row = (dy*3+dx)*ci + c
    if cout_pad is not None and cout_pad != co:
        w = jnp.pad(w, ((0, 0), (0, cout_pad - co)))
    return w


def image_reconstruction_forward(x_nchw, params):
    """Matches ImageReconstruction.forward. Input/output are NCHW."""
    N, C, H, W = x_nchw.shape
    assert C == _C0, C
    x = jnp.transpose(x_nchw, (0, 2, 3, 1))        # NCHW -> NHWC

    (w1_t, b1), (w2_t, b2), (w3_t, b3) = params    # torch OIHW / (Cout,)
    w1 = _fold_weight(w1_t, cin_pad=_C0_PAD)                      # (1152, 64)
    w2 = _fold_weight(w2_t)                                       # (576, 32)
    w3 = _fold_weight(w3_t, cout_pad=_C3_PAD)                     # (288, 128)
    b1 = b1.reshape(1, _C1)
    b2 = b2.reshape(1, _C2)
    b3 = jnp.pad(b3.reshape(1, _C3), ((0, 0), (0, _C3_PAD - _C3)))

    kernel = functools.partial(_fused_kernel, H=H, W=W)

    out_flat = pl.pallas_call(
        kernel,
        out_shape=jax.ShapeDtypeStruct((N, H * W, _C3_PAD), x.dtype),
        grid=(N,),
        in_specs=[
            pl.BlockSpec((1, H, W, _C0), lambda n: (n, 0, 0, 0)),
            pl.BlockSpec((9 * _C0_PAD, _C1), lambda n: (0, 0)),
            pl.BlockSpec((1, _C1), lambda n: (0, 0)),
            pl.BlockSpec((9 * _C1, _C2), lambda n: (0, 0)),
            pl.BlockSpec((1, _C2), lambda n: (0, 0)),
            pl.BlockSpec((9 * _C2, _C3_PAD), lambda n: (0, 0)),
            pl.BlockSpec((1, _C3_PAD), lambda n: (0, 0)),
        ],
        out_specs=pl.BlockSpec((1, H * W, _C3_PAD), lambda n: (n, 0, 0)),
        scratch_shapes=[
            pltpu.VMEM((H + 2, W + 2, _C0_PAD), jnp.float32),   # padded acts
            pltpu.VMEM((H * W, 9 * _C0_PAD), jnp.float32),      # im2col tile
        ],
        compiler_params=pltpu.CompilerParams(
            dimension_semantics=("parallel",)),
    )(x, w1, b1, w2, b2, w3, b3)

    out = out_flat[:, :, :_C3].reshape(N, H, W, _C3)
    return jnp.transpose(out, (0, 3, 1, 2))        # NHWC -> NCHW


def init_params(key):
    """Deterministic synthetic parameters, PyTorch Conv2d shapes (OIHW)."""
    shapes = [
        (64, 96, 3, 3),
        (32, 64, 3, 3),
        (3, 32, 3, 3),
    ]
    params = []
    for i, (co, ci, kh, kw) in enumerate(shapes):
        kw_key, kb_key = jax.random.split(jax.random.fold_in(key, i))
        fan_in = ci * kh * kw
        bound = 1.0 / jnp.sqrt(fan_in)
        w_oihw = jax.random.uniform(
            kw_key, (co, ci, kh, kw), jnp.float32, -bound, bound)
        b = jax.random.uniform(kb_key, (co,), jnp.float32, -bound, bound)
        params.append((w_oihw, b))
    return params


def _reference_forward(x_nchw, params):
    """Pure-JAX reference (lax.conv) for a correctness check."""
    x = x_nchw
    acts = ["leaky_relu", "relu", "none"]
    for (w_oihw, b), act in zip(params, acts):
        x = jax.lax.conv_general_dilated(
            x, w_oihw, window_strides=(1, 1), padding="SAME",
            dimension_numbers=("NCHW", "OIHW", "NCHW"))
        x = x + b[None, :, None, None]
        if act == "leaky_relu":
            x = jnp.where(x >= 0, x, 0.01 * x)
        elif act == "relu":
            x = jnp.maximum(x, 0.0)
    return x


if __name__ == "__main__":
    key = jax.random.PRNGKey(0)
    k_x, k_p = jax.random.split(key)

    # Shapes consistent with the module: batch=2, Cin=96, spatial=16.
    x = jax.random.normal(k_x, (2, 96, 16, 16), jnp.float32)
    params = init_params(k_p)

    fwd = jax.jit(image_reconstruction_forward)
    out = jax.block_until_ready(fwd(x, params))
    assert out.shape == (2, 3, 16, 16), out.shape

    ref = jax.block_until_ready(_reference_forward(x, params))
    assert jnp.allclose(out, ref, rtol=1e-3, atol=1e-3), (
        float(jnp.max(jnp.abs(out - ref))))

    print("KERNEL_OK")
</pallas_src>

<mosaic_0001>
module attributes {stable_mosaic.version = 11 : i64} {
  func.func @_fused_kernel(%arg0: i32, %arg1: memref<1x16x16x96xf32, #tpu.memory_space<vmem>>, %arg2: memref<1152x64xf32, #tpu.memory_space<vmem>>, %arg3: memref<1x64xf32, #tpu.memory_space<vmem>>, %arg4: memref<576x32xf32, #tpu.memory_space<vmem>>, %arg5: memref<1x32xf32, #tpu.memory_space<vmem>>, %arg6: memref<288x128xf32, #tpu.memory_space<vmem>>, %arg7: memref<1x128xf32, #tpu.memory_space<vmem>>, %arg8: memref<1x256x128xf32, #tpu.memory_space<vmem>>, %arg9: memref<18x18x128xf32, #tpu.memory_space<vmem>>, %arg10: memref<256x1152xf32, #tpu.memory_space<vmem>>) attributes {dimension_semantics = [#tpu.dimension_semantics<parallel>], iteration_bounds = array<i64: 2>, scalar_prefetch = 0 : i64, scratch_operands = 2 : i64, tpu.core_type = #tpu.core_type<tc>, window_params = [{transform_indices = @transform_0, window_bounds = array<i64: 1, 16, 16, 96>}, {pipeline_mode = #tpu.pipeline_mode<synchronous>, transform_indices = @transform_1, window_bounds = array<i64: 1152, 64>}, {pipeline_mode = #tpu.pipeline_mode<synchronous>, transform_indices = @transform_2, window_bounds = array<i64: 1, 64>}, {pipeline_mode = #tpu.pipeline_mode<synchronous>, transform_indices = @transform_3, window_bounds = array<i64: 576, 32>}, {pipeline_mode = #tpu.pipeline_mode<synchronous>, transform_indices = @transform_4, window_bounds = array<i64: 1, 32>}, {pipeline_mode = #tpu.pipeline_mode<synchronous>, transform_indices = @transform_5, window_bounds = array<i64: 288, 128>}, {pipeline_mode = #tpu.pipeline_mode<synchronous>, transform_indices = @transform_6, window_bounds = array<i64: 1, 128>}, {transform_indices = @transform_7, window_bounds = array<i64: 1, 256, 128>}]} {
    %cst = arith.constant 0.000000e+00 : f32
    %0 = vector.broadcast %cst : f32 to vector<18x18x128xf32>
    %c0 = arith.constant 0 : index
    %c0_0 = arith.constant 0 : index
    %c0_1 = arith.constant 0 : index
    %1 = vector.load %arg9[%c0, %c0_0, %c0_1] : memref<18x18x128xf32, #tpu.memory_space<vmem>>, vector<18x18x128xf32>
    tpu.vector_store %arg9[%c0, %c0_0, %c0_1], %0 {strides = array<i32>} : memref<18x18x128xf32, #tpu.memory_space<vmem>>, vector<18x18x128xf32>,
    %c0_2 = arith.constant 0 : index
    %c0_3 = arith.constant 0 : index
    %c0_4 = arith.constant 0 : index
    %c0_5 = arith.constant 0 : index
    %2 = vector.load %arg1[%c0_2, %c0_3, %c0_4, %c0_5] : memref<1x16x16x96xf32, #tpu.memory_space<vmem>>, vector<1x16x16x96xf32>
    %3 = vector.shape_cast %2 : vector<1x16x16x96xf32> to vector<16x16x96xf32>
    %c1 = arith.constant 1 : index
    %c1_6 = arith.constant 1 : index
    %c0_7 = arith.constant 0 : index
    %4 = vector.load %arg9[%c1, %c1_6, %c0_7] : memref<18x18x128xf32, #tpu.memory_space<vmem>>, vector<16x16x96xf32>
    tpu.vector_store %arg9[%c1, %c1_6, %c0_7], %3 {strides = array<i32>} : memref<18x18x128xf32, #tpu.memory_space<vmem>>, vector<16x16x96xf32>,
    %c0_8 = arith.constant 0 : index
    %c0_9 = arith.constant 0 : index
    %c0_10 = arith.constant 0 : index
    %5 = vector.load %arg9[%c0_8, %c0_9, %c0_10] : memref<18x18x128xf32, #tpu.memory_space<vmem>>, vector<16x16x128xf32>
    %6 = vector.shape_cast %5 : vector<16x16x128xf32> to vector<256x128xf32>
    %c0_11 = arith.constant 0 : index
    %c0_12 = arith.constant 0 : index
    %7 = vector.load %arg10[%c0_11, %c0_12] : memref<256x1152xf32, #tpu.memory_space<vmem>>, vector<256x128xf32>
    tpu.vector_store %arg10[%c0_11, %c0_12], %6 {strides = array<i32>} : memref<256x1152xf32, #tpu.memory_space<vmem>>, vector<256x128xf32>,
    %c0_13 = arith.constant 0 : index
    %c1_14 = arith.constant 1 : index
    %c0_15 = arith.constant 0 : index
    %8 = vector.load %arg9[%c0_13, %c1_14, %c0_15] : memref<18x18x128xf32, #tpu.memory_space<vmem>>, vector<16x16x128xf32>
    %9 = vector.shape_cast %8 : vector<16x16x128xf32> to vector<256x128xf32>
    %c0_16 = arith.constant 0 : index
    %c128 = arith.constant 128 : index
    %10 = vector.load %arg10[%c0_16, %c128] : memref<256x1152xf32, #tpu.memory_space<vmem>>, vector<256x128xf32>
    tpu.vector_store %arg10[%c0_16, %c128], %9 {strides = array<i32>} : memref<256x1152xf32, #tpu.memory_space<vmem>>, vector<256x128xf32>,
    %c0_17 = arith.constant 0 : index
    %c2 = arith.constant 2 : index
    %c0_18 = arith.constant 0 : index
    %11 = vector.load %arg9[%c0_17, %c2, %c0_18] : memref<18x18x128xf32, #tpu.memory_space<vmem>>, vector<16x16x128xf32>
    %12 = vector.shape_cast %11 : vector<16x16x128xf32> to vector<256x128xf32>
    %c0_19 = arith.constant 0 : index
    %c256 = arith.constant 256 : index
    %13 = vector.load %arg10[%c0_19, %c256] : memref<256x1152xf32, #tpu.memory_space<vmem>>, vector<256x128xf32>
    tpu.vector_store %arg10[%c0_19, %c256], %12 {strides = array<i32>} : memref<256x1152xf32, #tpu.memory_space<vmem>>, vector<256x128xf32>,
    %c1_20 = arith.constant 1 : index
    %c0_21 = arith.constant 0 : index
    %c0_22 = arith.constant 0 : index
    %14 = vector.load %arg9[%c1_20, %c0_21, %c0_22] : memref<18x18x128xf32, #tpu.memory_space<vmem>>, vector<16x16x128xf32>
    %15 = vector.shape_cast %14 : vector<16x16x128xf32> to vector<256x128xf32>
    %c0_23 = arith.constant 0 : index
    %c384 = arith.constant 384 : index
    %16 = vector.load %arg10[%c0_23, %c384] : memref<256x1152xf32, #tpu.memory_space<vmem>>, vector<256x128xf32>
    tpu.vector_store %arg10[%c0_23, %c384], %15 {strides = array<i32>} : memref<256x1152xf32, #tpu.memory_space<vmem>>, vector<256x128xf32>,
    %c1_24 = arith.constant 1 : index
    %c1_25 = arith.constant 1 : index
    %c0_26 = arith.constant 0 : index
    %17 = vector.load %arg9[%c1_24, %c1_25, %c0_26] : memref<18x18x128xf32, #tpu.memory_space<vmem>>, vector<16x16x128xf32>
    %18 = vector.shape_cast %17 : vector<16x16x128xf32> to vector<256x128xf32>
    %c0_27 = arith.constant 0 : index
    %c512 = arith.constant 512 : index
    %19 = vector.load %arg10[%c0_27, %c512] : memref<256x1152xf32, #tpu.memory_space<vmem>>, vector<256x128xf32>
    tpu.vector_store %arg10[%c0_27, %c512], %18 {strides = array<i32>} : memref<256x1152xf32, #tpu.memory_space<vmem>>, vector<256x128xf32>,
    %c1_28 = arith.constant 1 : index
    %c2_29 = arith.constant 2 : index
    %c0_30 = arith.constant 0 : index
    %20 = vector.load %arg9[%c1_28, %c2_29, %c0_30] : memref<18x18x128xf32, #tpu.memory_space<vmem>>, vector<16x16x128xf32>
    %21 = vector.shape_cast %20 : vector<16x16x128xf32> to vector<256x128xf32>
    %c0_31 = arith.constant 0 : index
    %c640 = arith.constant 640 : index
    %22 = vector.load %arg10[%c0_31, %c640] : memref<256x1152xf32, #tpu.memory_space<vmem>>, vector<256x128xf32>
    tpu.vector_store %arg10[%c0_31, %c640], %21 {strides = array<i32>} : memref<256x1152xf32, #tpu.memory_space<vmem>>, vector<256x128xf32>,
    %c2_32 = arith.constant 2 : index
    %c0_33 = arith.constant 0 : index
    %c0_34 = arith.constant 0 : index
    %23 = vector.load %arg9[%c2_32, %c0_33, %c0_34] : memref<18x18x128xf32, #tpu.memory_space<vmem>>, vector<16x16x128xf32>
    %24 = vector.shape_cast %23 : vector<16x16x128xf32> to vector<256x128xf32>
    %c0_35 = arith.constant 0 : index
    %c768 = arith.constant 768 : index
    %25 = vector.load %arg10[%c0_35, %c768] : memref<256x1152xf32, #tpu.memory_space<vmem>>, vector<256x128xf32>
    tpu.vector_store %arg10[%c0_35, %c768], %24 {strides = array<i32>} : memref<256x1152xf32, #tpu.memory_space<vmem>>, vector<256x128xf32>,
    %c2_36 = arith.constant 2 : index
    %c1_37 = arith.constant 1 : index
    %c0_38 = arith.constant 0 : index
    %26 = vector.load %arg9[%c2_36, %c1_37, %c0_38] : memref<18x18x128xf32, #tpu.memory_space<vmem>>, vector<16x16x128xf32>
    %27 = vector.shape_cast %26 : vector<16x16x128xf32> to vector<256x128xf32>
    %c0_39 = arith.constant 0 : index
    %c896 = arith.constant 896 : index
    %28 = vector.load %arg10[%c0_39, %c896] : memref<256x1152xf32, #tpu.memory_space<vmem>>, vector<256x128xf32>
    tpu.vector_store %arg10[%c0_39, %c896], %27 {strides = array<i32>} : memref<256x1152xf32, #tpu.memory_space<vmem>>, vector<256x128xf32>,
    %c2_40 = arith.constant 2 : index
    %c2_41 = arith.constant 2 : index
    %c0_42 = arith.constant 0 : index
    %29 = vector.load %arg9[%c2_40, %c2_41, %c0_42] : memref<18x18x128xf32, #tpu.memory_space<vmem>>, vector<16x16x128xf32>
    %30 = vector.shape_cast %29 : vector<16x16x128xf32> to vector<256x128xf32>
    %c0_43 = arith.constant 0 : index
    %c1024 = arith.constant 1024 : index
    %31 = vector.load %arg10[%c0_43, %c1024] : memref<256x1152xf32, #tpu.memory_space<vmem>>, vector<256x128xf32>
    tpu.vector_store %arg10[%c0_43, %c1024], %30 {strides = array<i32>} : memref<256x1152xf32, #tpu.memory_space<vmem>>, vector<256x128xf32>,
    %c0_44 = arith.constant 0 : index
    %c0_45 = arith.constant 0 : index
    %32 = vector.load %arg10[%c0_44, %c0_45] : memref<256x1152xf32, #tpu.memory_space<vmem>>, vector<256x1152xf32>
    %c0_46 = arith.constant 0 : index
    %c0_47 = arith.constant 0 : index
    %33 = vector.load %arg2[%c0_46, %c0_47] : memref<1152x64xf32, #tpu.memory_space<vmem>>, vector<1152x64xf32>
    %cst_48 = arith.constant dense<0.000000e+00> : vector<256x64xf32>
    %34 = tpu.matmul %32, %33, %cst_48 {dimension_numbers = #tpu.dot_dimension_numbers<[1], [0], [0], [1], [0, 0, 1, 1], [], []>} : vector<256x1152xf32>, vector<1152x64xf32>, vector<256x64xf32> -> vector<256x64xf32>
    %c0_49 = arith.constant 0 : index
    %c0_50 = arith.constant 0 : index
    %35 = vector.load %arg3[%c0_49, %c0_50] : memref<1x64xf32, #tpu.memory_space<vmem>>, vector<1x64xf32>
    %36 = vector.broadcast %35 : vector<1x64xf32> to vector<256x64xf32>
    %37 = arith.addf %34, %36 : vector<256x64xf32>
    %cst_51 = arith.constant 0.000000e+00 : f32
    %38 = vector.broadcast %cst_51 : f32 to vector<256x64xf32>
    %39 = arith.cmpf oge, %37, %38 : vector<256x64xf32>
    %cst_52 = arith.constant 0.00999999977 : f32
    %40 = vector.broadcast %cst_52 : f32 to vector<256x64xf32>
    %41 = arith.mulf %40, %37 : vector<256x64xf32>
    %42 = arith.select %39, %37, %41 : vector<256x64xi1>, vector<256x64xf32>
    %43 = vector.shape_cast %42 : vector<256x64xf32> to vector<16x16x64xf32>
    %c1_53 = arith.constant 1 : index
    %c1_54 = arith.constant 1 : index
    %c0_55 = arith.constant 0 : index
    %44 = vector.load %arg9[%c1_53, %c1_54, %c0_55] : memref<18x18x128xf32, #tpu.memory_space<vmem>>, vector<16x16x64xf32>
    tpu.vector_store %arg9[%c1_53, %c1_54, %c0_55], %43 {strides = array<i32>} : memref<18x18x128xf32, #tpu.memory_space<vmem>>, vector<16x16x64xf32>,
    %c0_56 = arith.constant 0 : index
    %c0_57 = arith.constant 0 : index
    %c0_58 = arith.constant 0 : index
    %45 = vector.load %arg9[%c0_56, %c0_57, %c0_58] : memref<18x18x128xf32, #tpu.memory_space<vmem>>, vector<16x16x64xf32>
    %46 = vector.shape_cast %45 : vector<16x16x64xf32> to vector<256x64xf32>
    %c0_59 = arith.constant 0 : index
    %c0_60 = arith.constant 0 : index
    %47 = vector.load %arg10[%c0_59, %c0_60] : memref<256x1152xf32, #tpu.memory_space<vmem>>, vector<256x64xf32>
    tpu.vector_store %arg10[%c0_59, %c0_60], %46 {strides = array<i32>} : memref<256x1152xf32, #tpu.memory_space<vmem>>, vector<256x64xf32>,
    %c0_61 = arith.constant 0 : index
    %c1_62 = arith.constant 1 : index
    %c0_63 = arith.constant 0 : index
    %48 = vector.load %arg9[%c0_61, %c1_62, %c0_63] : memref<18x18x128xf32, #tpu.memory_space<vmem>>, vector<16x16x64xf32>
    %49 = vector.shape_cast %48 : vector<16x16x64xf32> to vector<256x64xf32>
    %c0_64 = arith.constant 0 : index
    %c64 = arith.constant 64 : index
    %50 = vector.load %arg10[%c0_64, %c64] : memref<256x1152xf32, #tpu.memory_space<vmem>>, vector<256x64xf32>
    tpu.vector_store %arg10[%c0_64, %c64], %49 {strides = array<i32>} : memref<256x1152xf32, #tpu.memory_space<vmem>>, vector<256x64xf32>,
    %c0_65 = arith.constant 0 : index
    %c2_66 = arith.constant 2 : index
    %c0_67 = arith.constant 0 : index
    %51 = vector.load %arg9[%c0_65, %c2_66, %c0_67] : memref<18x18x128xf32, #tpu.memory_space<vmem>>, vector<16x16x64xf32>
    %52 = vector.shape_cast %51 : vector<16x16x64xf32> to vector<256x64xf32>
    %c0_68 = arith.constant 0 : index
    %c128_69 = arith.constant 128 : index
    %53 = vector.load %arg10[%c0_68, %c128_69] : memref<256x1152xf32, #tpu.memory_space<vmem>>, vector<256x64xf32>
    tpu.vector_store %arg10[%c0_68, %c128_69], %52 {strides = array<i32>} : memref<256x1152xf32, #tpu.memory_space<vmem>>, vector<256x64xf32>,
    %c1_70 = arith.constant 1 : index
    %c0_71 = arith.constant 0 : index
    %c0_72 = arith.constant 0 : index
    %54 = vector.load %arg9[%c1_70, %c0_71, %c0_72] : memref<18x18x128xf32, #tpu.memory_space<vmem>>, vector<16x16x64xf32>
    %55 = vector.shape_cast %54 : vector<16x16x64xf32> to vector<256x64xf32>
    %c0_73 = arith.constant 0 : index
    %c192 = arith.constant 192 : index
    %56 = vector.load %arg10[%c0_73, %c192] : memref<256x1152xf32, #tpu.memory_space<vmem>>, vector<256x64xf32>
    tpu.vector_store %arg10[%c0_73, %c192], %55 {strides = array<i32>} : memref<256x1152xf32, #tpu.memory_space<vmem>>, vector<256x64xf32>,
    %c1_74 = arith.constant 1 : index
    %c1_75 = arith.constant 1 : index
    %c0_76 = arith.constant 0 : index
    %57 = vector.load %arg9[%c1_74, %c1_75, %c0_76] : memref<18x18x128xf32, #tpu.memory_space<vmem>>, vector<16x16x64xf32>
    %58 = vector.shape_cast %57 : vector<16x16x64xf32> to vector<256x64xf32>
    %c0_77 = arith.constant 0 : index
    %c256_78 = arith.constant 256 : index
    %59 = vector.load %arg10[%c0_77, %c256_78] : memref<256x1152xf32, #tpu.memory_space<vmem>>, vector<256x64xf32>
    tpu.vector_store %arg10[%c0_77, %c256_78], %58 {strides = array<i32>} : memref<256x1152xf32, #tpu.memory_space<vmem>>, vector<256x64xf32>,
    %c1_79 = arith.constant 1 : index
    %c2_80 = arith.constant 2 : index
    %c0_81 = arith.constant 0 : index
    %60 = vector.load %arg9[%c1_79, %c2_80, %c0_81] : memref<18x18x128xf32, #tpu.memory_space<vmem>>, vector<16x16x64xf32>
    %61 = vector.shape_cast %60 : vector<16x16x64xf32> to vector<256x64xf32>
    %c0_82 = arith.constant 0 : index
    %c320 = arith.constant 320 : index
    %62 = vector.load %arg10[%c0_82, %c320] : memref<256x1152xf32, #tpu.memory_space<vmem>>, vector<256x64xf32>
    tpu.vector_store %arg10[%c0_82, %c320], %61 {strides = array<i32>} : memref<256x1152xf32, #tpu.memory_space<vmem>>, vector<256x64xf32>,
    %c2_83 = arith.constant 2 : index
    %c0_84 = arith.constant 0 : index
    %c0_85 = arith.constant 0 : index
    %63 = vector.load %arg9[%c2_83, %c0_84, %c0_85] : memref<18x18x128xf32, #tpu.memory_space<vmem>>, vector<16x16x64xf32>
    %64 = vector.shape_cast %63 : vector<16x16x64xf32> to vector<256x64xf32>
    %c0_86 = arith.constant 0 : index
    %c384_87 = arith.constant 384 : index
    %65 = vector.load %arg10[%c0_86, %c384_87] : memref<256x1152xf32, #tpu.memory_space<vmem>>, vector<256x64xf32>
    tpu.vector_store %arg10[%c0_86, %c384_87], %64 {strides = array<i32>} : memref<256x1152xf32, #tpu.memory_space<vmem>>, vector<256x64xf32>,
    %c2_88 = arith.constant 2 : index
    %c1_89 = arith.constant 1 : index
    %c0_90 = arith.constant 0 : index
    %66 = vector.load %arg9[%c2_88, %c1_89, %c0_90] : memref<18x18x128xf32, #tpu.memory_space<vmem>>, vector<16x16x64xf32>
    %67 = vector.shape_cast %66 : vector<16x16x64xf32> to vector<256x64xf32>
    %c0_91 = arith.constant 0 : index
    %c448 = arith.constant 448 : index
    %68 = vector.load %arg10[%c0_91, %c448] : memref<256x1152xf32, #tpu.memory_space<vmem>>, vector<256x64xf32>
    tpu.vector_store %arg10[%c0_91, %c448], %67 {strides = array<i32>} : memref<256x1152xf32, #tpu.memory_space<vmem>>, vector<256x64xf32>,
    %c2_92 = arith.constant 2 : index
    %c2_93 = arith.constant 2 : index
    %c0_94 = arith.constant 0 : index
    %69 = vector.load %arg9[%c2_92, %c2_93, %c0_94] : memref<18x18x128xf32, #tpu.memory_space<vmem>>, vector<16x16x64xf32>
    %70 = vector.shape_cast %69 : vector<16x16x64xf32> to vector<256x64xf32>
    %c0_95 = arith.constant 0 : index
    %c512_96 = arith.constant 512 : index
    %71 = vector.load %arg10[%c0_95, %c512_96] : memref<256x1152xf32, #tpu.memory_space<vmem>>, vector<256x64xf32>
    tpu.vector_store %arg10[%c0_95, %c512_96], %70 {strides = array<i32>} : memref<256x1152xf32, #tpu.memory_space<vmem>>, vector<256x64xf32>,
    %c0_97 = arith.constant 0 : index
    %c0_98 = arith.constant 0 : index
    %72 = vector.load %arg10[%c0_97, %c0_98] : memref<256x1152xf32, #tpu.memory_space<vmem>>, vector<256x576xf32>
    %c0_99 = arith.constant 0 : index
    %c0_100 = arith.constant 0 : index
    %73 = vector.load %arg4[%c0_99, %c0_100] : memref<576x32xf32, #tpu.memory_space<vmem>>, vector<576x32xf32>
    %cst_101 = arith.constant dense<0.000000e+00> : vector<256x32xf32>
    %74 = tpu.matmul %72, %73, %cst_101 {dimension_numbers = #tpu.dot_dimension_numbers<[1], [0], [0], [1], [0, 0, 1, 1], [], []>} : vector<256x576xf32>, vector<576x32xf32>, vector<256x32xf32> -> vector<256x32xf32>
    %c0_102 = arith.constant 0 : index
    %c0_103 = arith.constant 0 : index
    %75 = vector.load %arg5[%c0_102, %c0_103] : memref<1x32xf32, #tpu.memory_space<vmem>>, vector<1x32xf32>
    %76 = vector.broadcast %75 : vector<1x32xf32> to vector<256x32xf32>
    %77 = arith.addf %74, %76 : vector<256x32xf32>
    %cst_104 = arith.constant 0.000000e+00 : f32
    %78 = vector.broadcast %cst_104 : f32 to vector<256x32xf32>
    %79 = arith.maximumf %77, %78 : vector<256x32xf32>
    %80 = vector.shape_cast %79 : vector<256x32xf32> to vector<16x16x32xf32>
    %c1_105 = arith.constant 1 : index
    %c1_106 = arith.constant 1 : index
    %c0_107 = arith.constant 0 : index
    %81 = vector.load %arg9[%c1_105, %c1_106, %c0_107] : memref<18x18x128xf32, #tpu.memory_space<vmem>>, vector<16x16x32xf32>
    tpu.vector_store %arg9[%c1_105, %c1_106, %c0_107], %80 {strides = array<i32>} : memref<18x18x128xf32, #tpu.memory_space<vmem>>, vector<16x16x32xf32>,
    %c0_108 = arith.constant 0 : index
    %c0_109 = arith.constant 0 : index
    %c0_110 = arith.constant 0 : index
    %82 = vector.load %arg9[%c0_108, %c0_109, %c0_110] : memref<18x18x128xf32, #tpu.memory_space<vmem>>, vector<16x16x32xf32>
    %83 = vector.shape_cast %82 : vector<16x16x32xf32> to vector<256x32xf32>
    %c0_111 = arith.constant 0 : index
    %c0_112 = arith.constant 0 : index
    %84 = vector.load %arg10[%c0_111, %c0_112] : memref<256x1152xf32, #tpu.memory_space<vmem>>, vector<256x32xf32>
    tpu.vector_store %arg10[%c0_111, %c0_112], %83 {strides = array<i32>} : memref<256x1152xf32, #tpu.memory_space<vmem>>, vector<256x32xf32>,
    %c0_113 = arith.constant 0 : index
    %c1_114 = arith.constant 1 : index
    %c0_115 = arith.constant 0 : index
    %85 = vector.load %arg9[%c0_113, %c1_114, %c0_115] : memref<18x18x128xf32, #tpu.memory_space<vmem>>, vector<16x16x32xf32>
    %86 = vector.shape_cast %85 : vector<16x16x32xf32> to vector<256x32xf32>
    %c0_116 = arith.constant 0 : index
    %c32 = arith.constant 32 : index
    %87 = vector.load %arg10[%c0_116, %c32] : memref<256x1152xf32, #tpu.memory_space<vmem>>, vector<256x32xf32>
    tpu.vector_store %arg10[%c0_116, %c32], %86 {strides = array<i32>} : memref<256x1152xf32, #tpu.memory_space<vmem>>, vector<256x32xf32>,
    %c0_117 = arith.constant 0 : index
    %c2_118 = arith.constant 2 : index
    %c0_119 = arith.constant 0 : index
    %88 = vector.load %arg9[%c0_117, %c2_118, %c0_119] : memref<18x18x128xf32, #tpu.memory_space<vmem>>, vector<16x16x32xf32>
    %89 = vector.shape_cast %88 : vector<16x16x32xf32> to vector<256x32xf32>
    %c0_120 = arith.constant 0 : index
    %c64_121 = arith.constant 64 : index
    %90 = vector.load %arg10[%c0_120, %c64_121] : memref<256x1152xf32, #tpu.memory_space<vmem>>, vector<256x32xf32>
    tpu.vector_store %arg10[%c0_120, %c64_121], %89 {strides = array<i32>} : memref<256x1152xf32, #tpu.memory_space<vmem>>, vector<256x32xf32>,
    %c1_122 = arith.constant 1 : index
    %c0_123 = arith.constant 0 : index
    %c0_124 = arith.constant 0 : index
    %91 = vector.load %arg9[%c1_122, %c0_123, %c0_124] : memref<18x18x128xf32, #tpu.memory_space<vmem>>, vector<16x16x32xf32>
    %92 = vector.shape_cast %91 : vector<16x16x32xf32> to vector<256x32xf32>
    %c0_125 = arith.constant 0 : index
    %c96 = arith.constant 96 : index
    %93 = vector.load %arg10[%c0_125, %c96] : memref<256x1152xf32, #tpu.memory_space<vmem>>, vector<256x32xf32>
    tpu.vector_store %arg10[%c0_125, %c96], %92 {strides = array<i32>} : memref<256x1152xf32, #tpu.memory_space<vmem>>, vector<256x32xf32>,
    %c1_126 = arith.constant 1 : index
    %c1_127 = arith.constant 1 : index
    %c0_128 = arith.constant 0 : index
    %94 = vector.load %arg9[%c1_126, %c1_127, %c0_128] : memref<18x18x128xf32, #tpu.memory_space<vmem>>, vector<16x16x32xf32>
    %95 = vector.shape_cast %94 : vector<16x16x32xf32> to vector<256x32xf32>
    %c0_129 = arith.constant 0 : index
    %c128_130 = arith.constant 128 : index
    %96 = vector.load %arg10[%c0_129, %c128_130] : memref<256x1152xf32, #tpu.memory_space<vmem>>, vector<256x32xf32>
    tpu.vector_store %arg10[%c0_129, %c128_130], %95 {strides = array<i32>} : memref<256x1152xf32, #tpu.memory_space<vmem>>, vector<256x32xf32>,
    %c1_131 = arith.constant 1 : index
    %c2_132 = arith.constant 2 : index
    %c0_133 = arith.constant 0 : index
    %97 = vector.load %arg9[%c1_131, %c2_132, %c0_133] : memref<18x18x128xf32, #tpu.memory_space<vmem>>, vector<16x16x32xf32>
    %98 = vector.shape_cast %97 : vector<16x16x32xf32> to vector<256x32xf32>
    %c0_134 = arith.constant 0 : index
    %c160 = arith.constant 160 : index
    %99 = vector.load %arg10[%c0_134, %c160] : memref<256x1152xf32, #tpu.memory_space<vmem>>, vector<256x32xf32>
    tpu.vector_store %arg10[%c0_134, %c160], %98 {strides = array<i32>} : memref<256x1152xf32, #tpu.memory_space<vmem>>, vector<256x32xf32>,
    %c2_135 = arith.constant 2 : index
    %c0_136 = arith.constant 0 : index
    %c0_137 = arith.constant 0 : index
    %100 = vector.load %arg9[%c2_135, %c0_136, %c0_137] : memref<18x18x128xf32, #tpu.memory_space<vmem>>, vector<16x16x32xf32>
    %101 = vector.shape_cast %100 : vector<16x16x32xf32> to vector<256x32xf32>
    %c0_138 = arith.constant 0 : index
    %c192_139 = arith.constant 192 : index
    %102 = vector.load %arg10[%c0_138, %c192_139] : memref<256x1152xf32, #tpu.memory_space<vmem>>, vector<256x32xf32>
    tpu.vector_store %arg10[%c0_138, %c192_139], %101 {strides = array<i32>} : memref<256x1152xf32, #tpu.memory_space<vmem>>, vector<256x32xf32>,
    %c2_140 = arith.constant 2 : index
    %c1_141 = arith.constant 1 : index
    %c0_142 = arith.constant 0 : index
    %103 = vector.load %arg9[%c2_140, %c1_141, %c0_142] : memref<18x18x128xf32, #tpu.memory_space<vmem>>, vector<16x16x32xf32>
    %104 = vector.shape_cast %103 : vector<16x16x32xf32> to vector<256x32xf32>
    %c0_143 = arith.constant 0 : index
    %c224 = arith.constant 224 : index
    %105 = vector.load %arg10[%c0_143, %c224] : memref<256x1152xf32, #tpu.memory_space<vmem>>, vector<256x32xf32>
    tpu.vector_store %arg10[%c0_143, %c224], %104 {strides = array<i32>} : memref<256x1152xf32, #tpu.memory_space<vmem>>, vector<256x32xf32>,
    %c2_144 = arith.constant 2 : index
    %c2_145 = arith.constant 2 : index
    %c0_146 = arith.constant 0 : index
    %106 = vector.load %arg9[%c2_144, %c2_145, %c0_146] : memref<18x18x128xf32, #tpu.memory_space<vmem>>, vector<16x16x32xf32>
    %107 = vector.shape_cast %106 : vector<16x16x32xf32> to vector<256x32xf32>
    %c0_147 = arith.constant 0 : index
    %c256_148 = arith.constant 256 : index
    %108 = vector.load %arg10[%c0_147, %c256_148] : memref<256x1152xf32, #tpu.memory_space<vmem>>, vector<256x32xf32>
    tpu.vector_store %arg10[%c0_147, %c256_148], %107 {strides = array<i32>} : memref<256x1152xf32, #tpu.memory_space<vmem>>, vector<256x32xf32>,
    %c0_149 = arith.constant 0 : index
    %c0_150 = arith.constant 0 : index
    %109 = vector.load %arg10[%c0_149, %c0_150] : memref<256x1152xf32, #tpu.memory_space<vmem>>, vector<256x288xf32>
    %c0_151 = arith.constant 0 : index
    %c0_152 = arith.constant 0 : index
    %110 = vector.load %arg6[%c0_151, %c0_152] : memref<288x128xf32, #tpu.memory_space<vmem>>, vector<288x128xf32>
    %cst_153 = arith.constant dense<0.000000e+00> : vector<256x128xf32>
    %111 = tpu.matmul %109, %110, %cst_153 {dimension_numbers = #tpu.dot_dimension_numbers<[1], [0], [0], [1], [0, 0, 1, 1], [], []>} : vector<256x288xf32>, vector<288x128xf32>, vector<256x128xf32> -> vector<256x128xf32>
    %c0_154 = arith.constant 0 : index
    %c0_155 = arith.constant 0 : index
    %112 = vector.load %arg7[%c0_154, %c0_155] : memref<1x128xf32, #tpu.memory_space<vmem>>, vector<1x128xf32>
    %113 = vector.broadcast %112 : vector<1x128xf32> to vector<256x128xf32>
    %114 = arith.addf %111, %113 : vector<256x128xf32>
    %115 = vector.shape_cast %114 : vector<256x128xf32> to vector<1x256x128xf32>
    %c0_156 = arith.constant 0 : index
    %c0_157 = arith.constant 0 : index
    %c0_158 = arith.constant 0 : index
    %116 = vector.load %arg8[%c0_156, %c0_157, %c0_158] : memref<1x256x128xf32, #tpu.memory_space<vmem>>, vector<1x256x128xf32>
    tpu.vector_store %arg8[%c0_156, %c0_157, %c0_158], %115 {strides = array<i32>} : memref<1x256x128xf32, #tpu.memory_space<vmem>>, vector<1x256x128xf32>,
    return
  }
  func.func @transform_0(%arg0: i32) -> (i32, i32, i32, i32) {
    %c0_i32 = arith.constant 0 : i32
    %c0_i32_0 = arith.constant 0 : i32
    %c0_i32_1 = arith.constant 0 : i32
    %c0_i32_2 = arith.constant 0 : i32
    return %arg0, %c0_i32, %c0_i32_0, %c0_i32_1 : i32, i32, i32, i32
  }
  func.func @transform_1(%arg0: i32) -> (i32, i32) {
    %c0_i32 = arith.constant 0 : i32
    %c0_i32_0 = arith.constant 0 : i32
    %c0_i32_1 = arith.constant 0 : i32
    return %c0_i32, %c0_i32_0 : i32, i32
  }
  func.func @transform_2(%arg0: i32) -> (i32, i32) {
    %c0_i32 = arith.constant 0 : i32
    %c0_i32_0 = arith.constant 0 : i32
    %c0_i32_1 = arith.constant 0 : i32
    return %c0_i32, %c0_i32_0 : i32, i32
  }
  func.func @transform_3(%arg0: i32) -> (i32, i32) {
    %c0_i32 = arith.constant 0 : i32
    %c0_i32_0 = arith.constant 0 : i32
    %c0_i32_1 = arith.constant 0 : i32
    return %c0_i32, %c0_i32_0 : i32, i32
  }
  func.func @transform_4(%arg0: i32) -> (i32, i32) {
    %c0_i32 = arith.constant 0 : i32
    %c0_i32_0 = arith.constant 0 : i32
    %c0_i32_1 = arith.constant 0 : i32
    return %c0_i32, %c0_i32_0 : i32, i32
  }
  func.func @transform_5(%arg0: i32) -> (i32, i32) {
    %c0_i32 = arith.constant 0 : i32
    %c0_i32_0 = arith.constant 0 : i32
    %c0_i32_1 = arith.constant 0 : i32
    return %c0_i32, %c0_i32_0 : i32, i32
  }
  func.func @transform_6(%arg0: i32) -> (i32, i32) {
    %c0_i32 = arith.constant 0 : i32
    %c0_i32_0 = arith.constant 0 : i32
    %c0_i32_1 = arith.constant 0 : i32
    return %c0_i32, %c0_i32_0 : i32, i32
  }
  func.func @transform_7(%arg0: i32) -> (i32, i32, i32) {
    %c0_i32 = arith.constant 0 : i32
    %c0_i32_0 = arith.constant 0 : i32
    %c0_i32_1 = arith.constant 0 : i32
    return %arg0, %c0_i32, %c0_i32_0 : i32, i32, i32
  }
}

</mosaic_0001>

<bundles_post_ra>
// kernel: image_reconstruction_forward.1
= control target key start
LH: loop header
LB: loop body
LE: loop exit
PB: predicated region body
PF: predicated region fallthrough
CT: control target
= control target key end

     0   :  { %s6835_s24 = smov 0   ;;  %s10849_s0 = inlined_call_operand.vmem [shape: f32[2,16,16,96], index: 0, kind: input, shape index: {}]   ;;  %s10850_s1 = inlined_call_operand.vmem [shape: f32[1152,64], index: 1, kind: input, shape index: {}]   ;;  %s10851_s2 = inlined_call_operand.vmem [shape: f32[1,64], index: 2, kind: input, shape index: {}]   ;;  %s10852_s3 = inlined_call_operand.vmem [shape: f32[576,32], index: 3, kind: input, shape index: {}]   ;;  %s10853_s4 = inlined_call_operand.vmem [shape: f32[1,32], index: 4, kind: input, shape index: {}]   ;;  %s10854_s5 = inlined_call_operand.vmem [shape: f32[288,128], index: 5, kind: input, shape index: {}]   ;;  %s10855_s6 = inlined_call_operand.vmem [shape: f32[1,128], index: 6, kind: input, shape index: {}]   ;;  %s10856_s7 = inlined_call_operand.vmem [shape: f32[2,256,128], index: 7, kind: output, shape index: {}]  }
   0x1 LB: > { %s6614_s25 = sadd.s32 4294967295, %s6789_s24   ;;  %p6618_p0 = scmp.ge.s32.totalorder %s6789_s24, 1  ;;  %s6789_s24 = sphi %s6835_s24, %s17_s24  }
   0x2   : > { %p237_p1 = scmp.lt.s32.totalorder %s6789_s24, 3 }
   0x4   : > { %p238_p2 = pnand %p6618_p0, %p237_p1 }
   0x6   : > { %241 = sbr.rel (%p238_p2) target bundleno = 1885 (0x75d), region = 48 }
   0xb   : > { %v1279_v0 = vld [vmem:[%s10850_s1 + $0x78] sm:$0xff]  ;;  %v1278_v1 = vld [vmem:[%s10850_s1 + $0x70] sm:$0xff]  ;;  %p269_p3 = scmp.lt.s32.totalorder %s6614_s25, 1  ;;  %v6791_v2 = vmov 0.0   ;;  %v1277_v3 = vld [vmem:[%s10850_s1 + $0x68] sm:$0xff]  ;;  %vm366_vm0 = vcmask 785408  }
   0xc   : > { %6691 = vmatpush.msra.mxu1 %v1279_v0  ;;  %6692 = vmatpush.msra.mxu2 %v1279_v0  ;;  %291 = vst [vmem:[#allocation2 + $0x60] sm:$0xff] %v6791_v2  ;;  %v1276_v4 = vld [vmem:[%s10850_s1 + $0x60] sm:$0xff]  ;;  %v1275_v5 = vld [vmem:[%s10850_s1 + $0x58] sm:$0xff]  ;;  %v1274_v7 = vld [vmem:[%s10850_s1 + $0x50] sm:$0xff]  ;;  %vm2525_vm1 = vcmask 523264   ;;  %s6792_s21 = smov 64  }
   0xd   : > { %6693 = vmatpush.msra.mxu3 %v1279_v0  ;;  %1412 = vmatpush.msra.mxu0 %v1279_v0  ;;  %s10868_s25 = smov (!%p269_p3, %s6614_s25), 1  ;;  %292 = vst [vmem:[#allocation2 + $0x68] sm:$0xff] %v6791_v2  ;;  %v1273_v8 = vld [vmem:[%s10850_s1 + $0x48] sm:$0xff]  ;;  %v1272_v9 = vld [vmem:[%s10850_s1 + $0x40] sm:$0xff]  ;;  %v1271_v10 = vld [vmem:[%s10850_s1 + $0x38] sm:$0xff]  ;;  %s6793_s22 = smov 32  }
   0xe   : > { %6694 = vmatpush.msra.mxu1 %v1278_v1  ;;  %6695 = vmatpush.msra.mxu2 %v1278_v1  ;;  %279 = vst [vmem:[#allocation2] sm:$0xff] %v6791_v2  ;;  %s6689_s11 = sshll.u32 %s10868_s25, 8  ;;  %v1270_v12 = vld [vmem:[%s10850_s1 + $0x30] sm:$0xff]  ;;  %v1269_v13 = vld [vmem:[%s10850_s1 + $0x28] sm:$0xff]  ;;  %v1268_v14 = vld [vmem:[%s10850_s1 + $0x20] sm:$0xff]  ;;  %vm2782_vm11 = vcmask 1048064  }
   0xf   : > { %6696 = vmatpush.msra.mxu3 %v1278_v1  ;;  %1413 = vmatpush.msra.mxu0 %v1278_v1  ;;  %280 = vst [vmem:[#allocation2 + $0x8] sm:$0xff] %v6791_v2  ;;  %s6867_s14 = scalar_lea.vmem %s10849_s0, %s6689_s11  ;;  %v1267_v15 = vld [vmem:[%s10850_s1 + $0x18] sm:$0xff]  ;;  %v1266_v16 = vld [vmem:[%s10850_s1 + $0x10] sm:$0xff]  ;;  %v1265_v17 = vld [vmem:[%s10850_s1 + $0x8] sm:$0xff]  ;;  %vm4576_vm15 = vcmask 261120   ;;  %s6794_s27 = smov 96  }
  0x10   : > { %6697 = vmatpush.msra.mxu1 %v1277_v3  ;;  %6698 = vmatpush.msra.mxu2 %v1277_v3  ;;  %281 = vst [vmem:[#allocation2 + $0x10] sm:$0x3] %v6791_v2  ;;  %v339_v6 = vld [vmem:[%s6867_s14 + $0x30] sm:$0xff]  ;;  %v1264_v18 = vld [vmem:[%s10850_s1] sm:$0xff]  ;;  %v1311_v19 = vld [vmem:[%s10850_s1 + $0x178] sm:$0xff]  ;;  %s10432_s30 = scalar_lea.vmem %s10856_s7, %s6689_s11 }
  0x11   : > { %6699 = vmatpush.msra.mxu3 %v1277_v3  ;;  %1414 = vmatpush.msra.mxu0 %v1277_v3  ;;  %282 = vst [vmem:[#allocation2 + $0x18] sm:$0xff] %v6791_v2  ;;  %v1327_v20 = vld [vmem:[%s10850_s1 + $0x1f8] sm:$0xff]  ;;  %v1310_v22 = vld [vmem:[%s10850_s1 + $0x170] sm:$0xff]  ;;  %v1309_v25 = vld [vmem:[%s10850_s1 + $0x168] sm:$0xff] }
  0x12   : > { %6700 = vmatpush.msra.mxu1 %v1276_v4  ;;  %6701 = vmatpush.msra.mxu2 %v1276_v4  ;;  %373 = vst.msk [vmem:[#allocation2 + $0x61] sm:$0xff] %vm366_vm0, %v339_v6  ;;  %v1295_v21 = vld [vmem:[%s10850_s1 + $0xf8] sm:$0xff]  ;;  %v1326_v23 = vld [vmem:[%s10850_s1 + $0x1f0] sm:$0xff]  ;;  %v1325_v26 = vld [vmem:[%s10850_s1 + $0x1e8] sm:$0xff] }
  0x13   : > { %6702 = vmatpush.msra.mxu3 %v1276_v4  ;;  %1415 = vmatpush.msra.mxu0 %v1276_v4  ;;  %283 = vst [vmem:[#allocation2 + $0x20] sm:$0xff] %v6791_v2  ;;  %v1294_v24 = vld [vmem:[%s10850_s1 + $0xf0] sm:$0xff]  ;;  %v1343_v27 = vld [vmem:[%s10850_s1 + $0x278] sm:$0xff]  ;;  %v1293_v28 = vld [vmem:[%s10850_s1 + $0xe8] sm:$0xff] }
  0x14   : > { %6703 = vmatpush.msra.mxu1 %v1275_v5  ;;  %6704 = vmatpush.msra.mxu2 %v1275_v5  ;;  %284 = vst [vmem:[#allocation2 + $0x28] sm:$0x3] %v6791_v2  ;;  %v1308_v29 = vld [vmem:[%s10850_s1 + $0x160] sm:$0xff]  ;;  %v1342_v31 = vld [vmem:[%s10850_s1 + $0x270] sm:$0xff]  ;;  %v1307_v33 = vld [vmem:[%s10850_s1 + $0x158] sm:$0xff] }
  0x15   : > { %6705 = vmatpush.msra.mxu3 %v1275_v5  ;;  %1416 = vmatpush.msra.mxu0 %v1275_v5  ;;  %285 = vst [vmem:[#allocation2 + $0x30] sm:$0xff] %v6791_v2  ;;  %v1324_v30 = vld [vmem:[%s10850_s1 + $0x1e0] sm:$0xff]  ;;  %v1323_v34 = vld [vmem:[%s10850_s1 + $0x1d8] sm:$0xff]  ;;  %v1341_v35 = vld [vmem:[%s10850_s1 + $0x268] sm:$0xff] }
  0x16   : > { %6706 = vmatpush.msra.mxu1 %v1274_v7  ;;  %6707 = vmatpush.msra.mxu2 %v1274_v7  ;;  %286 = vst [vmem:[#allocation2 + $0x38] sm:$0xff] %v6791_v2  ;;  %v1292_v32 = vld [vmem:[%s10850_s1 + $0xe0] sm:$0xff]  ;;  %v1291_v36 = vld [vmem:[%s10850_s1 + $0xd8] sm:$0xff]  ;;  %v1306_v37 = vld [vmem:[%s10850_s1 + $0x150] sm:$0xff] }
  0x17   : > { %6708 = vmatpush.msra.mxu3 %v1274_v7  ;;  %1417 = vmatpush.msra.mxu0 %v1274_v7  ;;  %287 = vst [vmem:[#allocation2 + $0x40] sm:$0x3] %v6791_v2  ;;  %v1322_v38 = vld [vmem:[%s10850_s1 + $0x1d0] sm:$0xff]  ;;  %v1340_v39 = vld [vmem:[%s10850_s1 + $0x260] sm:$0xff]  ;;  %v340_v42 = vld [vmem:[%s6867_s14 + $0x38] sm:$0xff] }
  0x18   : > { %6709 = vmatpush.msra.mxu1 %v1273_v8  ;;  %6710 = vmatpush.msra.mxu2 %v1273_v8  ;;  %288 = vst [vmem:[#allocation2 + $0x48] sm:$0xff] %v6791_v2  ;;  %v347_v40 = vld [vmem:[%s6867_s14 + $0x70] sm:$0xff]  ;;  %v348_v43 = vld [vmem:[%s6867_s14 + $0x78] sm:$0xff]  ;;  %v1305_v45 = vld [vmem:[%s10850_s1 + $0x148] sm:$0xff] }
  0x19   : > { %6711 = vmatpush.msra.mxu3 %v1273_v8  ;;  %1418 = vmatpush.msra.mxu0 %v1273_v8  ;;  %v6894_v11 = vld [vmem:[#allocation2 + $0x60] sm:$0xff]  ;;  %289 = vst [vmem:[#allocation2 + $0x50] sm:$0xff] %v6791_v2  ;;  %v355_v41 = vld [vmem:[%s6867_s14 + $0xb0] sm:$0xff]  ;;  %v1321_v46 = vld [vmem:[%s10850_s1 + $0x1c8] sm:$0xff] }
  0x1a   : > { %6712 = vmatpush.msra.mxu1 %v1272_v9  ;;  %6713 = vmatpush.msra.mxu2 %v1272_v9  ;;  %439 = vst [vmem:[#allocation3 + $0x240] sm:$0xff] %v6894_v11  ;;  %v1290_v44 = vld [vmem:[%s10850_s1 + $0xd0] sm:$0xff]  ;;  %v1339_v47 = vld [vmem:[%s10850_s1 + $0x258] sm:$0xff]  ;;  %v1289_v48 = vld [vmem:[%s10850_s1 + $0xc8] sm:$0xff] }
  0x1b   : > { %6714 = vmatpush.msra.mxu3 %v1272_v9  ;;  %1419 = vmatpush.msra.mxu0 %v1272_v9  ;;  %290 = vst [vmem:[#allocation2 + $0x58] sm:$0x3] %v6791_v2  ;;  %v1304_v49 = vld [vmem:[%s10850_s1 + $0x140] sm:$0xff]  ;;  %v1338_v51 = vld [vmem:[%s10850_s1 + $0x250] sm:$0xff]  ;;  %v356_v52 = vld [vmem:[%s6867_s14 + $0xb8] sm:$0xff] }
  0x1c   : > { %6715 = vmatpush.msra.mxu1 %v1271_v10  ;;  %6716 = vmatpush.msra.mxu2 %v1271_v10  ;;  %293 = vst [vmem:[#allocation2 + $0x70] sm:$0x3] %v6791_v2  ;;  %v1320_v50 = vld [vmem:[%s10850_s1 + $0x1c0] sm:$0xff]  ;;  %v1303_v58 = vld [vmem:[%s10850_s1 + $0x138] sm:$0xff]  ;;  %v1337_v61 = vld [vmem:[%s10850_s1 + $0x248] sm:$0xff] }
  0x1d   : > { %6717 = vmatpush.msra.mxu3 %v1271_v10  ;;  %1420 = vmatpush.msra.mxu0 %v1271_v10  ;;  %294 = vst [vmem:[#allocation2 + $0x78] sm:$0xff] %v6791_v2  ;;  %v341_v53 = vld [vmem:[%s6867_s14 + $0x40] sm:$0xff]  ;;  %v1319_v60 = vld [vmem:[%s10850_s1 + $0x1b8] sm:$0xff]  ;;  %v1302_v0 = vld [vmem:[%s10850_s1 + $0x130] sm:$0xff] }
  0x1e   : > { %6718 = vmatpush.msra.mxu1 %v1270_v12  ;;  %6719 = vmatpush.msra.mxu2 %v1270_v12  ;;  %295 = vst [vmem:[#allocation2 + $0x80] sm:$0xff] %v6791_v2  ;;  %v349_v55 = vld [vmem:[%s6867_s14 + $0x80] sm:$0xff]  ;;  %v1287_v63 = vld [vmem:[%s10850_s1 + $0xb8] sm:$0xff]  ;;  %v1318_v1 = vld [vmem:[%s10850_s1 + $0x1b0] sm:$0xff] }
  0x1f   : > { %6720 = vmatpush.msra.mxu3 %v1270_v12  ;;  %1421 = vmatpush.msra.mxu0 %v1270_v12  ;;  %296 = vst [vmem:[#allocation2 + $0x88] sm:$0x3] %v6791_v2  ;;  %v1288_v57 = vld [vmem:[%s10850_s1 + $0xc0] sm:$0xff]  ;;  %v342_v7 = vld [vmem:[%s6867_s14 + $0x48] sm:$0xff]  ;;  %v1286_v10 = vld [vmem:[%s10850_s1 + $0xb0] sm:$0xff] }
  0x20   : > { %6721 = vmatpush.msra.mxu1 %v1269_v13  ;;  %6722 = vmatpush.msra.mxu2 %v1269_v13  ;;  %297 = vst [vmem:[#allocation2 + $0x90] sm:$0xff] %v6791_v2  ;;  %v1336_v3 = vld [vmem:[%s10850_s1 + $0x240] sm:$0xff]  ;;  %v350_v8 = vld [vmem:[%s6867_s14 + $0x88] sm:$0xff] }
  0x21   : > { %6723 = vmatpush.msra.mxu3 %v1269_v13  ;;  %1422 = vmatpush.msra.mxu0 %v1269_v13  ;;  %298 = vst [vmem:[#allocation2 + $0x98] sm:$0xff] %v6791_v2  ;;  %v357_v6 = vld [vmem:[%s6867_s14 + $0xc0] sm:$0xff]  ;;  %v1301_v12 = vld [vmem:[%s10850_s1 + $0x128] sm:$0xff] }
  0x22   : > { %6724 = vmatpush.msra.mxu1 %v1268_v14  ;;  %6725 = vmatpush.msra.mxu2 %v1268_v14  ;;  %299 = vst [vmem:[#allocation2 + $0xa0] sm:$0x3] %v6791_v2  ;;  %v333_v9 = vld [vmem:[%s6867_s14] sm:$0xff]  ;;  %v1317_v13 = vld [vmem:[%s10850_s1 + $0x1a8] sm:$0xff] }
  0x23   : > { %6726 = vmatpush.msra.mxu3 %v1268_v14  ;;  %300 = vst [vmem:[#allocation2 + $0xa8] sm:$0xff] %v6791_v2  ;;  %1423 = vmatpush.msra.mxu0 %v1268_v14  ;;  %v1285_v14 = vld [vmem:[%s10850_s1 + $0xa8] sm:$0xff] }
  0x24   : > { %6727 = vmatpush.msra.mxu1 %v1267_v15  ;;  %6728 = vmatpush.msra.mxu2 %v1267_v15  ;;  %301 = vst [vmem:[#allocation2 + $0xb0] sm:$0xff] %v6791_v2 }
  0x25   : > { %6729 = vmatpush.msra.mxu3 %v1267_v15  ;;  %302 = vst [vmem:[#allocation2 + $0xb8] sm:$0x3] %v6791_v2  ;;  %1424 = vmatpush.msra.mxu0 %v1267_v15  ;;  %v1300_v15 = vld [vmem:[%s10850_s1 + $0x120] sm:$0xff] }
  0x26   : > { %6730 = vmatpush.msra.mxu1 %v1266_v16  ;;  %6731 = vmatpush.msra.mxu2 %v1266_v16  ;;  %303 = vst [vmem:[#allocation2 + $0xc0] sm:$0xff] %v6791_v2 }
  0x27   : > { %6732 = vmatpush.msra.mxu3 %v1266_v16  ;;  %304 = vst [vmem:[#allocation2 + $0xc8] sm:$0xff] %v6791_v2  ;;  %1425 = vmatpush.msra.mxu0 %v1266_v16  ;;  %v1316_v16 = vld [vmem:[%s10850_s1 + $0x1a0] sm:$0xff] }
  0x28   : > { %6733 = vmatpush.msra.mxu1 %v1265_v17  ;;  %6734 = vmatpush.msra.mxu2 %v1265_v17  ;;  %305 = vst [vmem:[#allocation2 + $0xd0] sm:$0x3] %v6791_v2 }
  0x29   : > { %6735 = vmatpush.msra.mxu3 %v1265_v17  ;;  %306 = vst [vmem:[#allocation2 + $0xd8] sm:$0xff] %v6791_v2  ;;  %1426 = vmatpush.msra.mxu0 %v1265_v17  ;;  %v1334_v17 = vld [vmem:[%s10850_s1 + $0x230] sm:$0xff] }
  0x2a   : > { %6736 = vmatpush.msra.mxu1 %v1264_v18  ;;  %6737 = vmatpush.msra.mxu2 %v1264_v18  ;;  %307 = vst [vmem:[#allocation2 + $0xe0] sm:$0xff] %v6791_v2 }
  0x2b   : > { %1452 = vmatmul.f32.vlgmr.msra.gmra.mxu1 %v6894_v11  ;;  %308 = vst [vmem:[#allocation2 + $0xe8] sm:$0x3] %v6791_v2  ;;  %6738 = vmatpush.msra.mxu3 %v1264_v18 }
  0x2c   : > { %309 = vst [vmem:[#allocation2 + $0xf0] sm:$0xff] %v6791_v2  ;;  %1427 = vmatpush.msra.mxu0 %v1264_v18  ;;  %1638 = vmatpush.msrb.mxu2 %v1311_v19  ;;  %v358_v19 = vld [vmem:[%s6867_s14 + $0xc8] sm:$0xff] }
  0x2d   : > { %310 = vst [vmem:[#allocation2 + $0xf8] sm:$0xff] %v6791_v2  ;;  %1428 = vmatmul.f32.vlgmr.msra.gmra.mxu0 %v6791_v2  ;;  %1751 = vmatpush.msrb.mxu3 %v1327_v20  ;;  %v343_v20 = vld [vmem:[%s6867_s14 + $0x50] sm:$0xff] }
  0x2e   : > { %311 = vst [vmem:[#allocation2 + $0x100] sm:$0x3] %v6791_v2  ;;  %1525 = vmatpush.msrb.mxu1 %v1295_v21  ;;  %1639 = vmatpush.msrb.mxu2 %v1310_v22  ;;  %v351_v21 = vld [vmem:[%s6867_s14 + $0x90] sm:$0xff]  ;;  %v334_v22 = vld [vmem:[%s6867_s14 + $0x8] sm:$0xff] }
  0x2f   : > { %312 = vst [vmem:[#allocation2 + $0x108] sm:$0xff] %v6791_v2  ;;  %1752 = vmatpush.msrb.mxu3 %v1326_v23  ;;  %1864 = vmatpush.msrb.mxu0 %v1343_v27  ;;  %v1315_v27 = vld [vmem:[%s10850_s1 + $0x198] sm:$0xff] }
  0x30   : > { %313 = vst [vmem:[#allocation2 + $0x110] sm:$0xff] %v6791_v2  ;;  %1526 = vmatpush.msrb.mxu1 %v1294_v24  ;;  %1640 = vmatpush.msrb.mxu2 %v1309_v25  ;;  %v1284_v24 = vld [vmem:[%s10850_s1 + $0xa0] sm:$0xff]  ;;  %v1299_v25 = vld [vmem:[%s10850_s1 + $0x118] sm:$0xff] }
  0x31   : > { %314 = vst [vmem:[#allocation2 + $0x118] sm:$0x3] %v6791_v2  ;;  %1753 = vmatpush.msrb.mxu3 %v1325_v26  ;;  %1865 = vmatpush.msrb.mxu0 %v1342_v31  ;;  %v1298_v31 = vld [vmem:[%s10850_s1 + $0x110] sm:$0xff] }
  0x32   : > { %315 = vst [vmem:[#allocation2 + $0x120] sm:$0xff] %v6791_v2  ;;  %1527 = vmatpush.msrb.mxu1 %v1293_v28  ;;  %1641 = vmatpush.msrb.mxu2 %v1308_v29  ;;  %v1333_v28 = vld [vmem:[%s10850_s1 + $0x228] sm:$0xff] }
  0x33   : > { %316 = vst [vmem:[#allocation2 + $0x128] sm:$0xff] %v6791_v2  ;;  %1754 = vmatpush.msrb.mxu3 %v1324_v30  ;;  %1866 = vmatpush.msrb.mxu0 %v1341_v35  ;;  %v1283_v30 = vld [vmem:[%s10850_s1 + $0x98] sm:$0xff] }
  0x34   : > { %317 = vst [vmem:[#allocation2 + $0x130] sm:$0x3] %v6791_v2  ;;  %1528 = vmatpush.msrb.mxu1 %v1292_v32  ;;  %1642 = vmatpush.msrb.mxu2 %v1307_v33  ;;  %v1314_v32 = vld [vmem:[%s10850_s1 + $0x190] sm:$0xff]  ;;  %v1332_v33 = vld [vmem:[%s10850_s1 + $0x220] sm:$0xff] }
  0x35   : > { %318 = vst [vmem:[#allocation2 + $0x138] sm:$0xff] %v6791_v2  ;;  %1431 = vmatmul.f32.gmra.mxu0 %v6791_v2  ;;  %1755 = vmatpush.msrb.mxu3 %v1323_v34 }
  0x36   : > { %319 = vst [vmem:[#allocation2 + $0x140] sm:$0xff] %v6791_v2  ;;  %1529 = vmatpush.msrb.mxu1 %v1291_v36  ;;  %1643 = vmatpush.msrb.mxu2 %v1306_v37  ;;  %v359_v37 = vld [vmem:[%s6867_s14 + $0xd0] sm:$0xff] }
  0x37   : > { %320 = vst [vmem:[#allocation2 + $0x148] sm:$0x3] %v6791_v2  ;;  %1756 = vmatpush.msrb.mxu3 %v1322_v38  ;;  %1867 = vmatpush.msrb.mxu0 %v1340_v39  ;;  %v344_v39 = vld [vmem:[%s6867_s14 + $0x58] sm:$0xff] }
  0x38   : > { %321 = vst [vmem:[#allocation2 + $0x150] sm:$0xff] %v6791_v2  ;;  %1530 = vmatpush.msrb.mxu1 %v1290_v44  ;;  %1644 = vmatpush.msrb.mxu2 %v1305_v45  ;;  %v1313_v44 = vld [vmem:[%s10850_s1 + $0x188] sm:$0xff]  ;;  %v1331_v45 = vld [vmem:[%s10850_s1 + $0x218] sm:$0xff] }
  0x39   : > { %322 = vst [vmem:[#allocation2 + $0x158] sm:$0xff] %v6791_v2  ;;  %1757 = vmatpush.msrb.mxu3 %v1321_v46  ;;  %1868 = vmatpush.msrb.mxu0 %v1339_v47  ;;  %v1281_v46 = vld [vmem:[%s10850_s1 + $0x88] sm:$0xff]  ;;  %v360_v47 = vld [vmem:[%s6867_s14 + $0xd8] sm:$0xff] }
  0x3a   : > { %323 = vst [vmem:[#allocation2 + $0x160] sm:$0x3] %v6791_v2  ;;  %1531 = vmatpush.msrb.mxu1 %v1289_v48  ;;  %1645 = vmatpush.msrb.mxu2 %v1304_v49  ;;  %v1296_v48 = vld [vmem:[%s10850_s1 + $0x100] sm:$0xff] }
  0x3b   : > { %324 = vst [vmem:[#allocation2 + $0x168] sm:$0xff] %v6791_v2  ;;  %1758 = vmatpush.msrb.mxu3 %v1320_v50  ;;  %1869 = vmatpush.msrb.mxu0 %v1338_v51  ;;  %v1312_v49 = vld [vmem:[%s10850_s1 + $0x180] sm:$0xff]  ;;  %v1330_v51 = vld [vmem:[%s10850_s1 + $0x210] sm:$0xff] }
  0x3c   : > { %325 = vst [vmem:[#allocation2 + $0x170] sm:$0xff] %v6791_v2  ;;  %1532 = vmatpush.msrb.mxu1 %v1288_v57  ;;  %1646 = vmatpush.msrb.mxu2 %v1303_v58  ;;  %v1375_v57 = vld [vmem:[%s10850_s1 + $0x378] sm:$0xff] }
  0x3d   : > { %326 = vst [vmem:[#allocation2 + $0x178] sm:$0x3] %v6791_v2  ;;  %1759 = vmatpush.msrb.mxu3 %v1319_v60  ;;  %1870 = vmatpush.msrb.mxu0 %v1337_v61  ;;  %v1329_v60 = vld [vmem:[%s10850_s1 + $0x208] sm:$0xff]  ;;  %v1391_v61 = vld [vmem:[%s10850_s1 + $0x3f8] sm:$0xff] }
  0x3e   : > { %327 = vst [vmem:[#allocation2 + $0x180] sm:$0xff] %v6791_v2  ;;  %1533 = vmatpush.msrb.mxu1 %v1287_v63  ;;  %1647 = vmatpush.msrb.mxu2 %v1302_v0  ;;  %v1359_v63 = vld [vmem:[%s10850_s1 + $0x2f8] sm:$0xff]  ;;  %v1328_v0 = vld [vmem:[%s10850_s1 + $0x200] sm:$0xff] }
  0x3f   : > { %328 = vst [vmem:[#allocation2 + $0x188] sm:$0xff] %v6791_v2  ;;  %1760 = vmatpush.msrb.mxu3 %v1318_v1  ;;  %1871 = vmatpush.msrb.mxu0 %v1336_v3 }
  0x40   : > { %329 = vst [vmem:[#allocation2 + $0x190] sm:$0x3] %v6791_v2  ;;  %1534 = vmatpush.msrb.mxu1 %v1286_v10  ;;  %1648 = vmatpush.msrb.mxu2 %v1301_v12  ;;  %v1407_v10 = vld [vmem:[%s10850_s1 + $0x478] sm:$0xff]  ;;  %v337_v12 = vld [vmem:[%s6867_s14 + $0x20] sm:$0xff] }
  0x41   : > { %330 = vst [vmem:[#allocation2 + $0x198] sm:$0xff] %v6791_v2  ;;  %1761 = vmatpush.msrb.mxu3 %v1317_v13 }
  0x42   : > { %331 = vst [vmem:[#allocation2 + $0x1a0] sm:$0xff] %v6791_v2  ;;  %1535 = vmatpush.msrb.mxu1 %v1285_v14  ;;  %1649 = vmatpush.msrb.mxu2 %v1300_v15  ;;  %v463_v14 = vld [vmem:[#allocation2 + $0x1] sm:$0xff] }
  0x43   : > { %332 = vst [vmem:[#allocation2 + $0x1a8] sm:$0x3] %v6791_v2  ;;  %1762 = vmatpush.msrb.mxu3 %v1316_v16  ;;  %v527_v15 = vld [vmem:[#allocation2 + $0x2] sm:$0xff] }
  0x44   : > { %381 = vst.msk [vmem:[#allocation2 + $0xc1] sm:$0xff] %vm366_vm0, %v347_v40  ;;  %1536 = vmatpush.msrb.mxu1 %v1284_v24  ;;  %1650 = vmatpush.msrb.mxu2 %v1299_v25  ;;  %v352_v40 = vld [vmem:[%s6867_s14 + $0x98] sm:$0xff]  ;;  %v464_v25 = vld [vmem:[#allocation2 + $0x9] sm:$0xff] }
  0x45   : > { %389 = vst.msk [vmem:[#allocation2 + $0x121] sm:$0xff] %vm366_vm0, %v355_v41  ;;  %1763 = vmatpush.msrb.mxu3 %v1315_v27  ;;  %v335_v41 = vld [vmem:[%s6867_s14 + $0x10] sm:$0xff] }
  0x46   : > { %374 = vst.msk [vmem:[#allocation2 + $0x69] sm:$0xff] %vm366_vm0, %v340_v42  ;;  %1537 = vmatpush.msrb.mxu1 %v1283_v30  ;;  %1651 = vmatpush.msrb.mxu2 %v1298_v31  ;;  %v1282_v42 = vld [vmem:[%s10850_s1 + $0x90] sm:$0xff] }
  0x47   : > { %382 = vst.msk [vmem:[#allocation2 + $0xc9] sm:$0xff] %vm366_vm0, %v348_v43  ;;  %1764 = vmatpush.msrb.mxu3 %v1314_v32  ;;  %v1297_v43 = vld [vmem:[%s10850_s1 + $0x108] sm:$0xff] }
  0x48   : > { %431 = vst [vmem:[#allocation3] sm:$0xff] %v6791_v2  ;;  %1538 = vmatpush.msrb.mxu1 %v1282_v42  ;;  %1652 = vmatpush.msrb.mxu2 %v1297_v43  ;;  %v528_v27 = vld [vmem:[#allocation2 + $0xa] sm:$0xff] }
  0x49   : > { %2590 = vst.msk [vmem:[#allocation3] sm:$0xff] %vm2525_vm1, %v6791_v2  ;;  %1765 = vmatpush.msrb.mxu3 %v1313_v44  ;;  %v1405_v42 = vld [vmem:[%s10850_s1 + $0x468] sm:$0xff] }
  0x4a   : > { %390 = vst.msk [vmem:[#allocation2 + $0x129] sm:$0xff] %vm366_vm0, %v356_v52  ;;  %v1280_v52 = vld [vmem:[%s10850_s1 + $0x80] sm:$0xff]  ;;  %1539 = vmatpush.msrb.mxu1 %v1281_v46  ;;  %1653 = vmatpush.msrb.mxu2 %v1296_v48 }
  0x4b   : > { %v415_v54 = vld [vmem:[#allocation2 + $0xc0] sm:$0xff]  ;;  %375 = vst.msk [vmem:[#allocation2 + $0x79] sm:$0xff] %vm366_vm0, %v341_v53  ;;  %1766 = vmatpush.msrb.mxu3 %v1312_v49 }
  0x4c   : > { %447 = vst [vmem:[#allocation3 + $0x480] sm:$0xff] %v415_v54  ;;  %1476 = vmatmul.f32.vlgmr.msra.gmra.mxu2 %v415_v54  ;;  %v423_v56 = vld [vmem:[#allocation2 + $0x120] sm:$0xff]  ;;  %1540 = vmatpush.msrb.mxu1 %v1280_v52 }
  0x4d   : > { %455 = vst [vmem:[#allocation3 + $0x6c0] sm:$0xff] %v423_v56  ;;  %1500 = vmatmul.f32.vlgmr.msra.gmra.mxu3 %v423_v56  ;;  %v7072_v59 = vld [vmem:[#allocation2 + $0x68] sm:$0xff]  ;;  %v345_v53 = vld [vmem:[%s6867_s14 + $0x60] sm:$0xff]  ;;  %v336_v56 = vld [vmem:[%s6867_s14 + $0x18] sm:$0xff]  ;;  %2090 = vmatpush.msra.mxu2 %v1375_v57 }
  0x4e   : > { %440 = vst [vmem:[#allocation3 + $0x288] sm:$0xff] %v7072_v59  ;;  %1455 = vmatmul.f32.gmra.mxu1 %v7072_v59  ;;  %v416_v62 = vld [vmem:[#allocation2 + $0xc8] sm:$0xff]  ;;  %v353_v54 = vld [vmem:[%s6867_s14 + $0xa0] sm:$0xff]  ;;  %2203 = vmatpush.msra.mxu3 %v1391_v61  ;;  %v1355_v57 = vld [vmem:[%s10850_s1 + $0x2d8] sm:$0xff] }
  0x4f   : > { %448 = vst [vmem:[#allocation3 + $0x4c8] sm:$0xff] %v416_v62  ;;  %1977 = vmatpush.msra.mxu1 %v1359_v63  ;;  %v1356_v48 = vld [vmem:[%s10850_s1 + $0x2e0] sm:$0xff] }
  0x50   : > { %383 = vst.msk [vmem:[#allocation2 + $0xd9] sm:$0xff] %vm366_vm0, %v349_v55  ;;  %v535_v52 = vld [vmem:[#allocation2 + $0x62] sm:$0xff] }
  0x51   : > { %v424_v4 = vld [vmem:[#allocation2 + $0x128] sm:$0xff]  ;;  %432 = vst [vmem:[#allocation3 + $0x48] sm:$0xff] %v6791_v2 }
  0x52   : > { %456 = vst [vmem:[#allocation3 + $0x708] sm:$0xff] %v424_v4  ;;  %v7096_v5 = vld [vmem:[#allocation2 + $0x78] sm:$0xff] }
  0x53   : > { %441 = vst [vmem:[#allocation3 + $0x2d0] sm:$0xff] %v7096_v5  ;;  %v663_v61 = vld [vmem:[#allocation2 + $0x79] sm:$0xff] }
  0x54   : > { %1479 = vmatmul.f32.gmra.mxu2 %v416_v62  ;;  %2591 = vst.msk [vmem:[#allocation3 + $0x48] sm:$0xff] %vm2525_vm1, %v6791_v2  ;;  %v1335_v2 = vld [vmem:[%s10850_s1 + $0x238] sm:$0xff] }
  0x55   : > { %1503 = vmatmul.f32.gmra.mxu3 %v424_v4  ;;  %391 = vst.msk [vmem:[#allocation2 + $0x139] sm:$0xff] %vm366_vm0, %v357_v6  ;;  %1872 = vmatpush.msrb.mxu0 %v1335_v2  ;;  %v361_v6 = vld [vmem:[%s6867_s14 + $0xe0] sm:$0xff]  ;;  %v362_v2 = vld [vmem:[%s6867_s14 + $0xe8] sm:$0xff] }
  0x56   : > { %1458 = vmatmul.f32.gmra.mxu1 %v7096_v5  ;;  %376 = vst.msk [vmem:[#allocation2 + $0x81] sm:$0xff] %vm366_vm0, %v342_v7 }
  0x57   : > { %v417_v18 = vld [vmem:[#allocation2 + $0xd8] sm:$0xff]  ;;  %384 = vst.msk [vmem:[#allocation2 + $0xe1] sm:$0xff] %vm366_vm0, %v350_v8  ;;  %1873 = vmatpush.msrb.mxu0 %v1334_v17  ;;  %v346_v8 = vld [vmem:[%s6867_s14 + $0x68] sm:$0xff]  ;;  %v1374_v17 = vld [vmem:[%s10850_s1 + $0x370] sm:$0xff] }
  0x58   : > { %449 = vst [vmem:[#allocation3 + $0x510] sm:$0xff] %v417_v18  ;;  %2091 = vmatpush.msra.mxu2 %v1374_v17 }
  0x59   : > { %367 = vst.msk [vmem:[#allocation2 + $0x19] sm:$0xff] %vm366_vm0, %v333_v9  ;;  %1874 = vmatpush.msrb.mxu0 %v1333_v28  ;;  %v354_v9 = vld [vmem:[%s6867_s14 + $0xa8] sm:$0xff]  ;;  %v1406_v28 = vld [vmem:[%s10850_s1 + $0x470] sm:$0xff] }
  0x5a   : > { %392 = vst.msk [vmem:[#allocation2 + $0x141] sm:$0xff] %vm366_vm0, %v358_v19  ;;  %v338_v19 = vld [vmem:[%s6867_s14 + $0x28] sm:$0xff] }
  0x5b   : > { %377 = vst.msk [vmem:[#allocation2 + $0x91] sm:$0xff] %vm366_vm0, %v343_v20  ;;  %1875 = vmatpush.msrb.mxu0 %v1332_v33  ;;  %v1390_v20 = vld [vmem:[%s10850_s1 + $0x3f0] sm:$0xff]  ;;  %v1373_v33 = vld [vmem:[%s10850_s1 + $0x368] sm:$0xff] }
  0x5c   : > { %1482 = vmatmul.f32.gmra.mxu2 %v417_v18  ;;  %v425_v23 = vld [vmem:[#allocation2 + $0x138] sm:$0xff]  ;;  %385 = vst.msk [vmem:[#allocation2 + $0xf1] sm:$0xff] %vm366_vm0, %v351_v21  ;;  %2204 = vmatpush.msra.mxu3 %v1390_v20 }
  0x5d   : > { %457 = vst [vmem:[#allocation3 + $0x750] sm:$0xff] %v425_v23  ;;  %1506 = vmatmul.f32.gmra.mxu3 %v425_v23  ;;  %v7147_v26 = vld [vmem:[#allocation2 + $0x80] sm:$0xff]  ;;  %1876 = vmatpush.msrb.mxu0 %v1331_v45 }
  0x5e   : > { %442 = vst [vmem:[#allocation3 + $0x318] sm:$0xff] %v7147_v26  ;;  %1461 = vmatmul.f32.gmra.mxu1 %v7147_v26  ;;  %v418_v29 = vld [vmem:[#allocation2 + $0xe0] sm:$0xff]  ;;  %2092 = vmatpush.msra.mxu2 %v1373_v33 }
  0x5f   : > { %450 = vst [vmem:[#allocation3 + $0x558] sm:$0xff] %v418_v29  ;;  %1877 = vmatpush.msrb.mxu0 %v1330_v51  ;;  %v1372_v45 = vld [vmem:[%s10850_s1 + $0x360] sm:$0xff] }
  0x60   : > { %v7169_v34 = vld [vmem:[#allocation2 + $0x18] sm:$0xff]  ;;  %368 = vst.msk [vmem:[#allocation2 + $0x21] sm:$0xff] %vm366_vm0, %v334_v22  ;;  %v1358_v22 = vld [vmem:[%s10850_s1 + $0x2f0] sm:$0xff]  ;;  %2093 = vmatpush.msra.mxu2 %v1372_v45  ;;  %v1404_v51 = vld [vmem:[%s10850_s1 + $0x460] sm:$0xff] }
  0x61   : > { %433 = vst [vmem:[#allocation3 + $0x90] sm:$0xff] %v7169_v34  ;;  %1434 = vmatmul.f32.gmra.mxu0 %v7169_v34  ;;  %v426_v35 = vld [vmem:[#allocation2 + $0x140] sm:$0xff]  ;;  %1978 = vmatpush.msra.mxu1 %v1358_v22  ;;  %v1401_v22 = vld [vmem:[%s10850_s1 + $0x448] sm:$0xff]  ;;  %v7493_v45 = vld [vmem:[#allocation2 + $0xd8] sm:$0xff] }
  0x62   : > { %458 = vst [vmem:[#allocation3 + $0x798] sm:$0xff] %v426_v35  ;;  %v7174_v36 = vld [vmem:[#allocation2 + $0x90] sm:$0xff]  ;;  %1878 = vmatpush.msrb.mxu0 %v1329_v60  ;;  %v7353_v63 = vld [vmem:[#allocation2 + $0x7a] sm:$0xff] }
  0x63   : > { %443 = vst [vmem:[#allocation3 + $0x360] sm:$0xff] %v7174_v36  ;;  %v419_v38 = vld [vmem:[#allocation2 + $0xf0] sm:$0xff]  ;;  %v1352_v33 = vld [vmem:[%s10850_s1 + $0x2c0] sm:$0xff] }
  0x64   : > { %1485 = vmatmul.f32.gmra.mxu2 %v418_v29  ;;  %451 = vst [vmem:[#allocation3 + $0x5a0] sm:$0xff] %v419_v38  ;;  %1879 = vmatpush.msrb.mxu0 %v1328_v0  ;;  %v655_v29 = vld [vmem:[#allocation2 + $0x19] sm:$0xff]  ;;  %v536_v60 = vld [vmem:[#allocation2 + $0x6a] sm:$0xff] }
  0x65   : > { %1509 = vmatmul.f32.gmra.mxu3 %v426_v35  ;;  %393 = vst.msk [vmem:[#allocation2 + $0x151] sm:$0xff] %vm366_vm0, %v359_v37  ;;  %v1389_v37 = vld [vmem:[%s10850_s1 + $0x3e8] sm:$0xff]  ;;  %v1370_v0 = vld [vmem:[%s10850_s1 + $0x350] sm:$0xff] }
  0x66   : > { %1464 = vmatmul.f32.gmra.mxu1 %v7174_v36  ;;  %378 = vst.msk [vmem:[#allocation2 + $0x99] sm:$0xff] %vm366_vm0, %v344_v39  ;;  %2316 = vmatpush.msra.mxu0 %v1407_v10 }
  0x67   : > { %v7206_v50 = vld [vmem:[#allocation2 + $0x20] sm:$0xff]  ;;  %386 = vst.msk [vmem:[#allocation2 + $0xf9] sm:$0xff] %vm366_vm0, %v352_v40  ;;  %2205 = vmatpush.msra.mxu3 %v1389_v37 }
  0x68   : > { %434 = vst [vmem:[#allocation3 + $0xd8] sm:$0xff] %v7206_v50  ;;  %2317 = vmatpush.msra.mxu0 %v1406_v28  ;;  %v529_v31 = vld [vmem:[#allocation2 + $0x1a] sm:$0xff]  ;;  %v530_v35 = vld [vmem:[#allocation2 + $0x22] sm:$0xff] }
  0x69   : > { %1437 = vmatmul.f32.gmra.mxu0 %v7206_v50  ;;  %369 = vst.msk [vmem:[#allocation2 + $0x31] sm:$0xff] %vm366_vm0, %v335_v41  ;;  %v656_v32 = vld [vmem:[#allocation2 + $0x21] sm:$0xff] }
  0x6a   : > { %394 = vst.msk [vmem:[#allocation2 + $0x159] sm:$0xff] %vm366_vm0, %v360_v47  ;;  %2318 = vmatpush.msra.mxu0 %v1405_v42  ;;  %v1388_v47 = vld [vmem:[%s10850_s1 + $0x3e0] sm:$0xff] }
  0x6b   : > { %379 = vst.msk [vmem:[#allocation2 + $0xa9] sm:$0xff] %vm366_vm0, %v345_v53  ;;  %2206 = vmatpush.msra.mxu3 %v1388_v47  ;;  %v7337_v53 = vld [vmem:[#allocation2] sm:$0xff]  ;;  %v1383_v47 = vld [vmem:[%s10850_s1 + $0x3b8] sm:$0xff] }
  0x6c   : > { %1488 = vmatmul.f32.gmra.mxu2 %v419_v38  ;;  %v427_v55 = vld [vmem:[#allocation2 + $0x150] sm:$0xff]  ;;  %387 = vst.msk [vmem:[#allocation2 + $0x109] sm:$0xff] %vm366_vm0, %v353_v54  ;;  %v1357_v38 = vld [vmem:[%s10850_s1 + $0x2e8] sm:$0xff]  ;;  %2319 = vmatpush.msra.mxu0 %v1404_v51  ;;  %v1371_v54 = vld [vmem:[%s10850_s1 + $0x358] sm:$0xff] }
  0x6d   : > { %459 = vst [vmem:[#allocation3 + $0x7e0] sm:$0xff] %v427_v55  ;;  %1512 = vmatmul.f32.gmra.mxu3 %v427_v55  ;;  %v7227_v58 = vld [vmem:[#allocation2 + $0x98] sm:$0xff]  ;;  %1979 = vmatpush.msra.mxu1 %v1357_v38  ;;  %v662_v55 = vld [vmem:[#allocation2 + $0x69] sm:$0xff]  ;;  %v7437_v28 = vld [vmem:[#allocation2 + $0xc0] sm:$0xff] }
  0x6e   : > { %444 = vst [vmem:[#allocation3 + $0x3a8] sm:$0xff] %v7227_v58  ;;  %1467 = vmatmul.f32.gmra.mxu1 %v7227_v58  ;;  %v420_v62 = vld [vmem:[#allocation2 + $0xf8] sm:$0xff]  ;;  %2094 = vmatpush.msra.mxu2 %v1371_v54  ;;  %v7465_v38 = vld [vmem:[#allocation2 + $0xc8] sm:$0xff]  ;;  %v7521_v54 = vld [vmem:[#allocation2 + $0xe0] sm:$0xff] }
  0x6f   : > { %452 = vst [vmem:[#allocation3 + $0x5e8] sm:$0xff] %v420_v62  ;;  %1980 = vmatpush.msra.mxu1 %v1356_v48  ;;  %v7383_v10 = vld [vmem:[#allocation2 + $0x92] sm:$0xff]  ;;  %v7408_v17 = vld [vmem:[#allocation2 + $0x9a] sm:$0xff]  ;;  %v7484_v42 = vld [vmem:[#allocation2 + $0xc2] sm:$0xff] }
  0x70   : > { %v7243_v1 = vld [vmem:[#allocation2 + $0x30] sm:$0xff]  ;;  %370 = vst.msk [vmem:[#allocation2 + $0x39] sm:$0xff] %vm366_vm0, %v336_v56  ;;  %v1387_v56 = vld [vmem:[%s10850_s1 + $0x3d8] sm:$0xff]  ;;  %2095 = vmatpush.msra.mxu2 %v1370_v0 }
  0x71   : > { %435 = vst [vmem:[#allocation3 + $0x120] sm:$0xff] %v7243_v1  ;;  %1440 = vmatmul.f32.gmra.mxu0 %v7243_v1  ;;  %v428_v3 = vld [vmem:[#allocation2 + $0x158] sm:$0xff]  ;;  %2207 = vmatpush.msra.mxu3 %v1387_v56  ;;  %v7549_v0 = vld [vmem:[#allocation2 + $0xf0] sm:$0xff] }
  0x72   : > { %460 = vst [vmem:[#allocation3 + $0x828] sm:$0xff] %v428_v3  ;;  %v7248_v4 = vld [vmem:[#allocation2 + $0xa8] sm:$0xff]  ;;  %v657_v39 = vld [vmem:[#allocation2 + $0x31] sm:$0xff]  ;;  %1981 = vmatpush.msra.mxu1 %v1355_v57 }
  0x73   : > { %445 = vst [vmem:[#allocation3 + $0x3f0] sm:$0xff] %v7248_v4  ;;  %v421_v7 = vld [vmem:[#allocation2 + $0x108] sm:$0xff]  ;;  %v1399_v56 = vld [vmem:[%s10850_s1 + $0x438] sm:$0xff] }
  0x74   : > { %1491 = vmatmul.f32.gmra.mxu2 %v420_v62  ;;  %453 = vst [vmem:[#allocation3 + $0x630] sm:$0xff] %v421_v7  ;;  %v1403_v62 = vld [vmem:[%s10850_s1 + $0x458] sm:$0xff] }
  0x75   : > { %1515 = vmatmul.f32.gmra.mxu3 %v428_v3  ;;  %395 = vst.msk [vmem:[#allocation2 + $0x169] sm:$0xff] %vm366_vm0, %v361_v6  ;;  %2320 = vmatpush.msra.mxu0 %v1403_v62  ;;  %v1386_v3 = vld [vmem:[%s10850_s1 + $0x3d0] sm:$0xff]  ;;  %v7542_v62 = vld [vmem:[#allocation2 + $0xda] sm:$0xff] }
  0x76   : > { %1470 = vmatmul.f32.gmra.mxu1 %v7248_v4  ;;  %380 = vst.msk [vmem:[#allocation2 + $0xb1] sm:$0xff] %vm366_vm0, %v346_v8  ;;  %2208 = vmatpush.msra.mxu3 %v1386_v3  ;;  %v1354_v6 = vld [vmem:[%s10850_s1 + $0x2d0] sm:$0xff] }
  0x77   : > { %v7261_v13 = vld [vmem:[#allocation2 + $0x38] sm:$0xff]  ;;  %388 = vst.msk [vmem:[#allocation2 + $0x111] sm:$0xff] %vm366_vm0, %v354_v9  ;;  %1982 = vmatpush.msra.mxu1 %v1354_v6  ;;  %v1402_v9 = vld [vmem:[%s10850_s1 + $0x450] sm:$0xff] }
  0x78   : > { %436 = vst [vmem:[#allocation3 + $0x168] sm:$0xff] %v7261_v13  ;;  %v658_v40 = vld [vmem:[#allocation2 + $0x39] sm:$0xff]  ;;  %v7376_v8 = vld [vmem:[#allocation2 + $0x91] sm:$0xff]  ;;  %2321 = vmatpush.msra.mxu0 %v1402_v9 }
  0x79   : > { %1443 = vmatmul.f32.gmra.mxu0 %v7261_v13  ;;  %371 = vst.msk [vmem:[#allocation2 + $0x49] sm:$0xff] %vm366_vm0, %v337_v12  ;;  %v532_v41 = vld [vmem:[#allocation2 + $0x3a] sm:$0xff]  ;;  %v1382_v3 = vld [vmem:[%s10850_s1 + $0x3b0] sm:$0xff] }
  0x7a   : > { %396 = vst.msk [vmem:[#allocation2 + $0x171] sm:$0xff] %vm366_vm0, %v362_v2  ;;  %v7394_v2 = vld [vmem:[#allocation2 + $0x99] sm:$0xff]  ;;  %2322 = vmatpush.msra.mxu0 %v1401_v22  ;;  %v1350_v9 = vld [vmem:[%s10850_s1 + $0x2b0] sm:$0xff] }
  0x7b   : > { %495 = vst [vmem:[#allocation3 + $0x8] sm:$0xff] %v463_v14 }
  0x7c   : > { %1494 = vmatmul.f32.gmra.mxu2 %v421_v7  ;;  %v429_v16 = vld [vmem:[#allocation2 + $0x168] sm:$0xff]  ;;  %559 = vst [vmem:[#allocation3 + $0x10] sm:$0xff] %v527_v15 }
  0x7d   : > { %461 = vst [vmem:[#allocation3 + $0x870] sm:$0xff] %v429_v16  ;;  %1518 = vmatmul.f32.gmra.mxu3 %v429_v16  ;;  %v7272_v18 = vld [vmem:[#allocation2 + $0xb0] sm:$0xff] }
  0x7e   : > { %446 = vst [vmem:[#allocation3 + $0x438] sm:$0xff] %v7272_v18  ;;  %1473 = vmatmul.f32.gmra.mxu1 %v7272_v18  ;;  %v422_v21 = vld [vmem:[#allocation2 + $0x110] sm:$0xff] }
  0x7f   : > { %454 = vst [vmem:[#allocation3 + $0x678] sm:$0xff] %v422_v21 }
  0x80   : > { %v7283_v23 = vld [vmem:[#allocation2 + $0x48] sm:$0xff]  ;;  %372 = vst.msk [vmem:[#allocation2 + $0x51] sm:$0xff] %vm366_vm0, %v338_v19 }
  0x81   : > { %437 = vst [vmem:[#allocation3 + $0x1b0] sm:$0xff] %v7283_v23  ;;  %1446 = vmatmul.f32.gmra.mxu0 %v7283_v23  ;;  %v430_v24 = vld [vmem:[#allocation2 + $0x170] sm:$0xff] }
  0x82   : > { %462 = vst [vmem:[#allocation3 + $0x8b8] sm:$0xff] %v430_v24  ;;  %v659_v43 = vld [vmem:[#allocation2 + $0x49] sm:$0xff] }
  0x83   : > { %623 = vst [vmem:[#allocation3 + $0x18] sm:$0xff] %v7169_v34 }
  0x84   : > { %1497 = vmatmul.f32.gmra.mxu2 %v422_v21  ;;  %496 = vst [vmem:[#allocation3 + $0x50] sm:$0xff] %v464_v25  ;;  %v7416_v21 = vld [vmem:[#allocation2 + $0xa9] sm:$0xff] }
  0x85   : > { %1521 = vmatmul.f32.gmra.mxu3 %v430_v24  ;;  %560 = vst [vmem:[#allocation3 + $0x58] sm:$0xff] %v528_v27 }
  0x86   : > { %1541 = vmatmul.f32.vlgmr.msrb.gmra.mxu1 %v463_v14  ;;  %624 = vst [vmem:[#allocation3 + $0x60] sm:$0xff] %v7206_v50  ;;  %v1385_v14 = vld [vmem:[%s10850_s1 + $0x3c8] sm:$0xff] }
  0x87   : > { %v7293_v30 = vld [vmem:[#allocation2 + $0x50] sm:$0xff]  ;;  %687 = vst [vmem:[#allocation3 + $0x20] sm:$0xff] %v655_v29  ;;  %2209 = vmatpush.msra.mxu3 %v1385_v14 }
  0x88   : > { %438 = vst [vmem:[#allocation3 + $0x1f8] sm:$0xff] %v7293_v30  ;;  %v533_v44 = vld [vmem:[#allocation2 + $0x4a] sm:$0xff]  ;;  %v534_v49 = vld [vmem:[#allocation2 + $0x52] sm:$0xff] }
  0x89   : > { %1449 = vmatmul.f32.gmra.mxu0 %v7293_v30  ;;  %497 = vst [vmem:[#allocation3 + $0x98] sm:$0xff] %v655_v29  ;;  %v660_v46 = vld [vmem:[#allocation2 + $0x51] sm:$0xff] }
  0x8a   : > { %561 = vst [vmem:[#allocation3 + $0xa0] sm:$0xff] %v529_v31  ;;  %v7579_v14 = vld [vmem:[#allocation2 + $0xf1] sm:$0xff] }
  0x8b   : > { %625 = vst [vmem:[#allocation3 + $0xa8] sm:$0xff] %v7243_v1 }
  0x8c   : > { %1654 = vmatmul.f32.vlgmr.msrb.gmra.mxu2 %v527_v15  ;;  %688 = vst [vmem:[#allocation3 + $0x68] sm:$0xff] %v656_v32 }
  0x8d   : > { %1767 = vmatmul.f32.vlgmr.msrb.gmra.mxu3 %v7169_v34  ;;  %498 = vst [vmem:[#allocation3 + $0xe0] sm:$0xff] %v656_v32  ;;  %v531_v34 = vld [vmem:[#allocation2 + $0x32] sm:$0xff] }
  0x8e   : > { %1544 = vmatmul.f32.gmra.mxu1 %v464_v25  ;;  %562 = vst [vmem:[#allocation3 + $0xe8] sm:$0xff] %v530_v35  ;;  %v7428_v25 = vld [vmem:[#allocation2 + $0xaa] sm:$0xff] }
  0x8f   : > { %626 = vst [vmem:[#allocation3 + $0xf0] sm:$0xff] %v7261_v13 }
  0x90   : > { %689 = vst [vmem:[#allocation3 + $0xb0] sm:$0xff] %v657_v39 }
  0x91   : > { %1880 = vmatmul.f32.vlgmr.msrb.gmra.mxu0 %v655_v29  ;;  %499 = vst [vmem:[#allocation3 + $0x128] sm:$0xff] %v657_v39 }
  0x92   : > { %563 = vst [vmem:[#allocation3 + $0x130] sm:$0xff] %v531_v34 }
  0x93   : > { %627 = vst [vmem:[#allocation3 + $0x138] sm:$0xff] %v7283_v23 }
  0x94   : > { %1657 = vmatmul.f32.gmra.mxu2 %v528_v27  ;;  %690 = vst [vmem:[#allocation3 + $0xf8] sm:$0xff] %v658_v40  ;;  %v1368_v27 = vld [vmem:[%s10850_s1 + $0x340] sm:$0xff] }
  0x95   : > { %1770 = vmatmul.f32.gmra.mxu3 %v7206_v50  ;;  %500 = vst [vmem:[#allocation3 + $0x170] sm:$0xff] %v658_v40  ;;  %v661_v50 = vld [vmem:[#allocation2 + $0x61] sm:$0xff] }
  0x96   : > { %1547 = vmatmul.f32.gmra.mxu1 %v655_v29  ;;  %564 = vst [vmem:[#allocation3 + $0x178] sm:$0xff] %v532_v41  ;;  %v7441_v29 = vld [vmem:[#allocation2 + $0xb1] sm:$0xff] }
  0x97   : > { %628 = vst [vmem:[#allocation3 + $0x180] sm:$0xff] %v7293_v30 }
  0x98   : > { %691 = vst [vmem:[#allocation3 + $0x140] sm:$0xff] %v659_v43 }
  0x99   : > { %1883 = vmatmul.f32.gmra.mxu0 %v656_v32  ;;  %501 = vst [vmem:[#allocation3 + $0x1b8] sm:$0xff] %v659_v43 }
  0x9a   : > { %565 = vst [vmem:[#allocation3 + $0x1c0] sm:$0xff] %v533_v44 }
  0x9b   : > { %629 = vst [vmem:[#allocation3 + $0x1c8] sm:$0xff] %v6894_v11 }
  0x9c   : > { %1660 = vmatmul.f32.gmra.mxu2 %v529_v31  ;;  %630 = vst [vmem:[#allocation3 + $0x210] sm:$0xff] %v7072_v59 }
  0x9d   : > { %1773 = vmatmul.f32.gmra.mxu3 %v7243_v1  ;;  %631 = vst [vmem:[#allocation3 + $0x258] sm:$0xff] %v7096_v5  ;;  %v7360_v1 = vld [vmem:[#allocation2 + $0x81] sm:$0xff] }
  0x9e   : > { %1550 = vmatmul.f32.gmra.mxu1 %v656_v32  ;;  %692 = vst [vmem:[#allocation3 + $0x188] sm:$0xff] %v660_v46 }
  0x9f   : > { %502 = vst [vmem:[#allocation3 + $0x200] sm:$0xff] %v660_v46 }
  0xa0   : > { %566 = vst [vmem:[#allocation3 + $0x208] sm:$0xff] %v534_v49 }
  0xa1   : > { %1886 = vmatmul.f32.gmra.mxu0 %v657_v39  ;;  %632 = vst [vmem:[#allocation3 + $0x2a0] sm:$0xff] %v7147_v26 }
  0xa2   : > { %633 = vst [vmem:[#allocation3 + $0x2e8] sm:$0xff] %v7174_v36 }
  0xa3   : > { %634 = vst [vmem:[#allocation3 + $0x330] sm:$0xff] %v7227_v58 }
  0xa4   : > { %1663 = vmatmul.f32.gmra.mxu2 %v530_v35  ;;  %635 = vst [vmem:[#allocation3 + $0x378] sm:$0xff] %v7248_v4  ;;  %v7459_v35 = vld [vmem:[#allocation2 + $0xb2] sm:$0xff] }
  0xa5   : > { %1776 = vmatmul.f32.gmra.mxu3 %v7261_v13  ;;  %636 = vst [vmem:[#allocation3 + $0x3c0] sm:$0xff] %v7272_v18  ;;  %v1369_v13 = vld [vmem:[%s10850_s1 + $0x348] sm:$0xff] }
  0xa6   : > { %1553 = vmatmul.f32.gmra.mxu1 %v657_v39  ;;  %693 = vst [vmem:[#allocation3 + $0x1d0] sm:$0xff] %v661_v50  ;;  %2096 = vmatpush.msra.mxu2 %v1369_v13  ;;  %v7469_v39 = vld [vmem:[#allocation2 + $0xc1] sm:$0xff] }
  0xa7   : > { %503 = vst [vmem:[#allocation3 + $0x248] sm:$0xff] %v661_v50  ;;  %v7571_v13 = vld [vmem:[#allocation2 + $0xe2] sm:$0xff] }
  0xa8   : > { %567 = vst [vmem:[#allocation3 + $0x250] sm:$0xff] %v535_v52  ;;  %v7370_v7 = vpop.f32.mrf.mxu1  ;;  %2097 = vmatpush.msra.mxu2 %v1368_v27 }
  0xa9   : > { %1889 = vmatmul.f32.gmra.mxu0 %v658_v40  ;;  %694 = vst [vmem:[#allocation3 + $0x218] sm:$0xff] %v662_v55 }
  0xaa   : > { %504 = vst [vmem:[#allocation3 + $0x290] sm:$0xff] %v662_v55  ;;  %v7385_v12 = vpop.f32.mrf.mxu0 }
  0xab   : > { %568 = vst [vmem:[#allocation3 + $0x298] sm:$0xff] %v536_v60 }
  0xac   : > { %1666 = vmatmul.f32.gmra.mxu2 %v531_v34  ;;  %695 = vst [vmem:[#allocation3 + $0x260] sm:$0xff] %v663_v61  ;;  %v1400_v34 = vld [vmem:[%s10850_s1 + $0x440] sm:$0xff] }
  0xad   : > { %1779 = vmatmul.f32.gmra.mxu3 %v7283_v23  ;;  %505 = vst [vmem:[#allocation3 + $0x2d8] sm:$0xff] %v663_v61  ;;  %2323 = vmatpush.msra.mxu0 %v1400_v34 }
  0xae   : > { %1556 = vmatmul.f32.gmra.mxu1 %v658_v40  ;;  %569 = vst [vmem:[#allocation3 + $0x2e0] sm:$0xff] %v7353_v63 }
  0xaf   : > { %696 = vst [vmem:[#allocation3 + $0x2a8] sm:$0xff] %v7360_v1  ;;  %2324 = vmatpush.msra.mxu0 %v1399_v56  ;;  %v7624_v56 = vld [vmem:[#allocation2 + $0xfa] sm:$0xff] }
  0xb0   : > { %506 = vst [vmem:[#allocation3 + $0x320] sm:$0xff] %v7360_v1 }
  0xb1   : > { %1892 = vmatmul.f32.gmra.mxu0 %v659_v43  ;;  %697 = vst [vmem:[#allocation3 + $0x2f0] sm:$0xff] %v7376_v8 }
  0xb2   : > { %507 = vst [vmem:[#allocation3 + $0x368] sm:$0xff] %v7376_v8  ;;  %v7413_v20 = vpop.f32.mrf.mxu0 }
  0xb3   : > { %571 = vst [vmem:[#allocation3 + $0x370] sm:$0xff] %v7383_v10 }
  0xb4   : > { %1669 = vmatmul.f32.gmra.mxu2 %v532_v41  ;;  %698 = vst [vmem:[#allocation3 + $0x338] sm:$0xff] %v7394_v2 }
  0xb5   : > { %1782 = vmatmul.f32.gmra.mxu3 %v7293_v30  ;;  %508 = vst [vmem:[#allocation3 + $0x3b0] sm:$0xff] %v7394_v2  ;;  %v1384_v30 = vld [vmem:[%s10850_s1 + $0x3c0] sm:$0xff] }
  0xb6   : > { %1559 = vmatmul.f32.gmra.mxu1 %v659_v43  ;;  %572 = vst [vmem:[#allocation3 + $0x3b8] sm:$0xff] %v7408_v17  ;;  %2210 = vmatpush.msra.mxu3 %v1384_v30  ;;  %v1365_v30 = vld [vmem:[%s10850_s1 + $0x328] sm:$0xff] }
  0xb7   : > { %699 = vst [vmem:[#allocation3 + $0x380] sm:$0xff] %v7416_v21 }
  0xb8   : > { %509 = vst [vmem:[#allocation3 + $0x3f8] sm:$0xff] %v7416_v21  ;;  %2211 = vmatpush.msra.mxu3 %v1383_v47 }
  0xb9   : > { %1895 = vmatmul.f32.gmra.mxu0 %v660_v46  ;;  %573 = vst [vmem:[#allocation3 + $0x400] sm:$0xff] %v7428_v25 }
  0xba   : > { %637 = vst [vmem:[#allocation3 + $0x408] sm:$0xff] %v7437_v28  ;;  %2212 = vmatpush.msra.mxu3 %v1382_v3  ;;  %v7632_v3 = vld [vmem:[#allocation2 + $0x110] sm:$0xff] }
  0xbb   : > { %700 = vst [vmem:[#allocation3 + $0x3c8] sm:$0xff] %v7441_v29 }
  0xbc   : > { %1672 = vmatmul.f32.gmra.mxu2 %v533_v44  ;;  %510 = vst [vmem:[#allocation3 + $0x440] sm:$0xff] %v7441_v29  ;;  %v1367_v44 = vld [vmem:[%s10850_s1 + $0x338] sm:$0xff] }
  0xbd   : > { %1785 = vmatmul.f32.gmra.mxu3 %v6894_v11  ;;  %v7372_v11 = vld [vmem:[#allocation2 + $0x82] sm:$0xff]  ;;  %574 = vst [vmem:[#allocation3 + $0x448] sm:$0xff] %v7459_v35  ;;  %2098 = vmatpush.msra.mxu2 %v1367_v44 }
  0xbe   : > { %1562 = vmatmul.f32.gmra.mxu1 %v660_v46  ;;  %570 = vst [vmem:[#allocation3 + $0x328] sm:$0xff] %v7372_v11  ;;  %v7497_v46 = vld [vmem:[#allocation2 + $0xc9] sm:$0xff] }
  0xbf   : > { %638 = vst [vmem:[#allocation3 + $0x450] sm:$0xff] %v7465_v38 }
  0xc0   : > { %701 = vst [vmem:[#allocation3 + $0x410] sm:$0xff] %v7469_v39 }
  0xc1   : > { %1898 = vmatmul.f32.gmra.mxu0 %v661_v50  ;;  %511 = vst [vmem:[#allocation3 + $0x488] sm:$0xff] %v7469_v39 }
  0xc2   : > { %575 = vst [vmem:[#allocation3 + $0x490] sm:$0xff] %v7484_v42 }
  0xc3   : > { %639 = vst [vmem:[#allocation3 + $0x498] sm:$0xff] %v7493_v45 }
  0xc4   : > { %1675 = vmatmul.f32.gmra.mxu2 %v534_v49  ;;  %702 = vst [vmem:[#allocation3 + $0x458] sm:$0xff] %v7497_v46 }
  0xc5   : > { %1788 = vmatmul.f32.gmra.mxu3 %v7072_v59  ;;  %512 = vst [vmem:[#allocation3 + $0x4d0] sm:$0xff] %v7497_v46 }
  0xc6   : > { %1565 = vmatmul.f32.gmra.mxu1 %v661_v50  ;;  %v1351_v50 = vld [vmem:[%s10850_s1 + $0x2b8] sm:$0xff]  ;;  %640 = vst [vmem:[#allocation3 + $0x4e0] sm:$0xff] %v7521_v54 }
  0xc7   : > { %577 = vst [vmem:[#allocation3 + $0x520] sm:$0xff] %v7542_v62 }
  0xc8   : > { %641 = vst [vmem:[#allocation3 + $0x528] sm:$0xff] %v7549_v0 }
  0xc9   : > { %1901 = vmatmul.f32.gmra.mxu0 %v662_v55  ;;  %578 = vst [vmem:[#allocation3 + $0x568] sm:$0xff] %v7571_v13 }
  0xca   : > { %705 = vst [vmem:[#allocation3 + $0x530] sm:$0xff] %v7579_v14 }
  0xcb   : > { %v7388_v59 = vpop.f32.mrf.mxu1  ;;  %515 = vst [vmem:[#allocation3 + $0x5a8] sm:$0xff] %v7579_v14 }
  0xcc   : > { %1678 = vmatmul.f32.gmra.mxu2 %v535_v52  ;;  %v7517_v52 = vld [vmem:[#allocation2 + $0xca] sm:$0xff]  ;;  %580 = vst [vmem:[#allocation3 + $0x5f8] sm:$0xff] %v7624_v56 }
  0xcd   : > { %1791 = vmatmul.f32.gmra.mxu3 %v7096_v5  ;;  %v1353_v5 = vld [vmem:[%s10850_s1 + $0x2c8] sm:$0xff]  ;;  %576 = vst [vmem:[#allocation3 + $0x4d8] sm:$0xff] %v7517_v52 }
  0xce   : > { %1568 = vmatmul.f32.gmra.mxu1 %v662_v55  ;;  %v7525_v55 = vld [vmem:[#allocation2 + $0xd9] sm:$0xff]  ;;  %644 = vst [vmem:[#allocation3 + $0x600] sm:$0xff] %v7632_v3 }
  0xcf   : > { %v7400_v15 = vpop.f32.mrf.mxu2  ;;  %1983 = vmatpush.msra.mxu1 %v1353_v5  ;;  %703 = vst [vmem:[#allocation3 + $0x4a0] sm:$0xff] %v7525_v55  ;;  %v1398_v5 = vld [vmem:[%s10850_s1 + $0x430] sm:$0xff] }
  0xd0   : > { %v7403_v16 = vpop.f32.mrf.mxu3  ;;  %513 = vst [vmem:[#allocation3 + $0x518] sm:$0xff] %v7525_v55  ;;  %2325 = vmatpush.msra.mxu0 %v1398_v5 }
  0xd1   : > { %1904 = vmatmul.f32.gmra.mxu0 %v663_v61  ;;  %1984 = vmatpush.msra.mxu1 %v1352_v33  ;;  %v7608_v33 = vld [vmem:[#allocation2 + $0x108] sm:$0xff] }
  0xd2   : > { %643 = vst [vmem:[#allocation3 + $0x5b8] sm:$0xff] %v7608_v33 }
  0xd3   : > { %v7411_v19 = vpop.f32.mrf.mxu1  ;;  %1985 = vmatpush.msra.mxu1 %v1351_v50 }
  0xd4   : > { %1681 = vmatmul.f32.gmra.mxu2 %v536_v60 }
  0xd5   : > { %1794 = vmatmul.f32.gmra.mxu3 %v7147_v26  ;;  %1986 = vmatpush.msra.mxu1 %v1350_v9  ;;  %v7636_v9 = vld [vmem:[#allocation2 + $0x109] sm:$0xff] }
  0xd6   : > { %1571 = vmatmul.f32.gmra.mxu1 %v663_v61  ;;  %707 = vst [vmem:[#allocation3 + $0x5c0] sm:$0xff] %v7636_v9 }
  0xd7   : > { %v7422_v23 = vpop.f32.mrf.mxu2  ;;  %517 = vst [vmem:[#allocation3 + $0x638] sm:$0xff] %v7636_v9 }
  0xd8   : > { %v7425_v24 = vpop.f32.mrf.mxu3 }
  0xd9   : > { %1907 = vmatmul.f32.gmra.mxu0 %v7360_v1 }
  0xdb   : > { %v7431_v26 = vpop.f32.mrf.mxu1 }
  0xdc   : > { %1684 = vmatmul.f32.gmra.mxu2 %v7353_v63  ;;  %v1366_v63 = vld [vmem:[%s10850_s1 + $0x330] sm:$0xff] }
  0xdd   : > { %1797 = vmatmul.f32.gmra.mxu3 %v7174_v36  ;;  %2099 = vmatpush.msra.mxu2 %v1366_v63 }
  0xde   : > { %v7446_v31 = vpop.f32.mrf.mxu0  ;;  %1574 = vmatmul.f32.gmra.mxu1 %v7360_v1  ;;  %v7553_v1 = vld [vmem:[#allocation2 + $0xe1] sm:$0xff] }
  0xdf   : > { %v7450_v32 = vpop.f32.mrf.mxu2  ;;  %704 = vst [vmem:[#allocation3 + $0x4e8] sm:$0xff] %v7553_v1  ;;  %2100 = vmatpush.msra.mxu2 %v1365_v30 }
  0xe0   : > { %v7453_v36 = vpop.f32.mrf.mxu3  ;;  %514 = vst [vmem:[#allocation3 + $0x560] sm:$0xff] %v7553_v1 }
  0xe1   : > { %1910 = vmatmul.f32.gmra.mxu0 %v7376_v8 }
  0xe3   : > { %v7462_v37 = vpop.f32.mrf.mxu1 }
  0xe4   : > { %1687 = vmatmul.f32.gmra.mxu2 %v7372_v11 }
  0xe5   : > { %1800 = vmatmul.f32.gmra.mxu3 %v7227_v58 }
  0xe6   : > { %v7474_v40 = vpop.f32.mrf.mxu0  ;;  %1577 = vmatmul.f32.gmra.mxu1 %v7376_v8 }
  0xe7   : > { %v7478_v41 = vpop.f32.mrf.mxu2 }
  0xe8   : > { %v7481_v58 = vpop.f32.mrf.mxu3 }
  0xe9   : > { %1913 = vmatmul.f32.gmra.mxu0 %v7394_v2 }
  0xeb   : > { %v7487_v43 = vpop.f32.mrf.mxu1 }
  0xec   : > { %1690 = vmatmul.f32.gmra.mxu2 %v7383_v10 }
  0xed   : > { %1803 = vmatmul.f32.gmra.mxu3 %v7248_v4 }
  0xee   : > { %v7502_v48 = vpop.f32.mrf.mxu0  ;;  %1580 = vmatmul.f32.gmra.mxu1 %v7394_v2  ;;  %v7575_v2 = vld [vmem:[#allocation2 + $0xf8] sm:$0xff] }
  0xef   : > { %v7506_v49 = vpop.f32.mrf.mxu2  ;;  %642 = vst [vmem:[#allocation3 + $0x570] sm:$0xff] %v7575_v2 }
  0xf0   : > { %v7509_v4 = vpop.f32.mrf.mxu3 }
  0xf1   : > { %1916 = vmatmul.f32.gmra.mxu0 %v7416_v21 }
  0xf3   : > { %v7515_v51 = vpop.f32.mrf.mxu1 }
  0xf4   : > { %1693 = vmatmul.f32.gmra.mxu2 %v7408_v17 }
  0xf5   : > { %1806 = vmatmul.f32.gmra.mxu3 %v7272_v18 }
  0xf6   : > { %v7530_v57 = vpop.f32.mrf.mxu0  ;;  %1583 = vmatmul.f32.gmra.mxu1 %v7416_v21 }
  0xf7   : > { %v7534_v60 = vpop.f32.mrf.mxu2 }
  0xf8   : > { %v7537_v18 = vpop.f32.mrf.mxu3 }
  0xf9   : > { %1919 = vmatmul.f32.gmra.mxu0 %v7441_v29 }
  0xfb   : > { %v7540_v61 = vpop.f32.mrf.mxu1 }
  0xfc   : > { %1696 = vmatmul.f32.gmra.mxu2 %v7428_v25  ;;  %v7597_v25 = vld [vmem:[%s10851_s2] ss:$0 sm:$0xff] }
  0xfd   : > { %1809 = vmatmul.f32.gmra.mxu3 %v7437_v28  ;;  %v7599_v28 = vld [vmem:[#allocation2 + $0xf2] sm:$0xff] }
  0xfe   : > { %v7558_v6 = vpop.f32.mrf.mxu0  ;;  %1586 = vmatmul.f32.gmra.mxu1 %v7441_v29  ;;  %v1430_v29 = vadd.f32 %v7597_v25, %v7385_v12  ;;  %579 = vst [vmem:[#allocation3 + $0x5b0] sm:$0xff] %v7599_v28  ;;  %v1381_v12 = vld [vmem:[%s10850_s1 + $0x3a8] sm:$0xff] }
  0xff   : > { %v7562_v11 = vpop.f32.mrf.mxu2  ;;  %2213 = vmatpush.msra.mxu3 %v1381_v12 }
 0x100   : > { %v7565_v8 = vpop.f32.mrf.mxu3 }
 0x101   : > { %1922 = vmatmul.f32.gmra.mxu0 %v7469_v39 }
 0x103   : > { %v1542_v10 = vpop.f32.mrf.mxu1 }
 0x104   : > { %1699 = vmatmul.f32.gmra.mxu2 %v7459_v35  ;;  %v7612_v35 = vld [vmem:[#allocation2 + $0xf9] sm:$0xff] }
 0x105   : > { %1812 = vmatmul.f32.gmra.mxu3 %v7465_v38  ;;  %v1543_v38 = vadd.f32 %v1542_v10, %v1430_v29  ;;  %706 = vst [vmem:[#allocation3 + $0x578] sm:$0xff] %v7612_v35  ;;  %v1397_v10 = vld [vmem:[%s10850_s1 + $0x428] sm:$0xff] }
 0x106   : > { %v7584_v17 = vpop.f32.mrf.mxu0  ;;  %1589 = vmatmul.f32.gmra.mxu1 %v7469_v39  ;;  %516 = vst [vmem:[#allocation3 + $0x5f0] sm:$0xff] %v7612_v35  ;;  %2326 = vmatpush.msra.mxu0 %v1397_v10 }
 0x107   : > { %v7588_v21 = vpop.f32.mrf.mxu2 }
 0x108   : > { %v7591_v22 = vpop.f32.mrf.mxu3 }
 0x109   : > { %1925 = vmatmul.f32.gmra.mxu0 %v7497_v46 }
 0x10b   : > { %v1545_v27 = vpop.f32.mrf.mxu1 }
 0x10c   : > { %1702 = vmatmul.f32.gmra.mxu2 %v7484_v42 }
 0x10d   : > { %1815 = vmatmul.f32.gmra.mxu3 %v7493_v45  ;;  %v1349_v45 = vld [vmem:[%s10850_s1 + $0x2a8] sm:$0xff] }
 0x10e   : > { %v1881_v39 = vpop.f32.mrf.mxu0  ;;  %1592 = vmatmul.f32.gmra.mxu1 %v7497_v46  ;;  %v1433_v46 = vadd.f32 %v7597_v25, %v7413_v20 }
 0x10f   : > { %v1655_v34 = vpop.f32.mrf.mxu2  ;;  %1987 = vmatpush.msra.mxu1 %v1349_v45 }
 0x110   : > { %v1656_v42 = vadd.f32 %v1655_v34, %v1543_v38  ;;  %v1768_v44 = vpop.f32.mrf.mxu3  ;;  %v1546_v5 = vadd.f32 %v1545_v27, %v1433_v46  ;;  %v7645_v38 = vld [vmem:[#allocation2 + $0x10a] sm:$0xff]  ;;  %v1436_v27 = vadd.f32 %v7597_v25, %v7446_v31  ;;  %v7656_v34 = vld [vmem:[#allocation2 + $0x120] sm:$0xff] }
 0x111   : > { %1928 = vmatmul.f32.gmra.mxu0 %v7525_v55  ;;  %581 = vst [vmem:[#allocation3 + $0x640] sm:$0xff] %v7645_v38  ;;  %v1380_v31 = vld [vmem:[%s10850_s1 + $0x3a0] sm:$0xff] }
 0x112   : > { %v1769_v47 = vadd.f32 %v1768_v44, %v1656_v42  ;;  %645 = vst [vmem:[#allocation3 + $0x648] sm:$0xff] %v7656_v34  ;;  %v7660_v42 = vld [vmem:[#allocation2 + $0x111] sm:$0xff]  ;;  %2214 = vmatpush.msra.mxu3 %v1380_v31  ;;  %v1348_v46 = vld [vmem:[%s10850_s1 + $0x2a0] sm:$0xff] }
 0x113   : > { %v1548_v50 = vpop.f32.mrf.mxu1  ;;  %708 = vst [vmem:[#allocation3 + $0x608] sm:$0xff] %v7660_v42  ;;  %1988 = vmatpush.msra.mxu1 %v1348_v46 }
 0x114   : > { %v7628_v63 = vadd.f32 %v1881_v39, %v1769_v47  ;;  %1705 = vmatmul.f32.gmra.mxu2 %v7517_v52  ;;  %518 = vst [vmem:[#allocation3 + $0x680] sm:$0xff] %v7660_v42 }
 0x115   : > { %1818 = vmatmul.f32.gmra.mxu3 %v7521_v54 }
 0x116   : > { %v1884_v20 = vpop.f32.mrf.mxu0  ;;  %1595 = vmatmul.f32.gmra.mxu1 %v7525_v55  ;;  %v1364_v55 = vld [vmem:[%s10850_s1 + $0x320] sm:$0xff] }
 0x117   : > { %v1658_v52 = vpop.f32.mrf.mxu2  ;;  %2101 = vmatpush.msra.mxu2 %v1364_v55 }
 0x118   : > { %v1659_v29 = vadd.f32 %v1658_v52, %v1546_v5  ;;  %v1771_v54 = vpop.f32.mrf.mxu3  ;;  %v7672_v5 = vld [vmem:[#allocation2 + $0x112] sm:$0xff]  ;;  %v7680_v52 = vld [vmem:[#allocation2 + $0x128] sm:$0xff] }
 0x119   : > { %1931 = vmatmul.f32.gmra.mxu0 %v7553_v1  ;;  %582 = vst [vmem:[#allocation3 + $0x688] sm:$0xff] %v7672_v5 }
 0x11a   : > { %v1772_v30 = vadd.f32 %v1771_v54, %v1659_v29  ;;  %646 = vst [vmem:[#allocation3 + $0x690] sm:$0xff] %v7680_v52  ;;  %v7684_v29 = vld [vmem:[#allocation2 + $0x121] sm:$0xff] }
 0x11b   : > { %v1551_v12 = vpop.f32.mrf.mxu1  ;;  %v1396_v54 = vld [vmem:[%s10850_s1 + $0x420] sm:$0xff]  ;;  %709 = vst [vmem:[#allocation3 + $0x650] sm:$0xff] %v7684_v29 }
 0x11c   : > { %v7649_v39 = vadd.f32 %v1884_v20, %v1772_v30  ;;  %1708 = vmatmul.f32.gmra.mxu2 %v7542_v62  ;;  %v1549_v62 = vadd.f32 %v1548_v50, %v1436_v27  ;;  %2327 = vmatpush.msra.mxu0 %v1396_v54  ;;  %519 = vst [vmem:[#allocation3 + $0x6c8] sm:$0xff] %v7684_v29 }
 0x11d   : > { %1821 = vmatmul.f32.gmra.mxu3 %v7549_v0 }
 0x11e   : > { %v1887_v44 = vpop.f32.mrf.mxu0  ;;  %1598 = vmatmul.f32.gmra.mxu1 %v7553_v1  ;;  %v1439_v1 = vadd.f32 %v7597_v25, %v7474_v40 }
 0x11f   : > { %v1661_v45 = vpop.f32.mrf.mxu2 }
 0x120   : > { %v1662_v0 = vadd.f32 %v1661_v45, %v1549_v62  ;;  %v1774_v47 = vpop.f32.mrf.mxu3  ;;  %v1552_v30 = vadd.f32 %v1551_v12, %v1439_v1  ;;  %v7693_v62 = vld [vmem:[#allocation2 + $0x122] sm:$0xff]  ;;  %v1442_v12 = vadd.f32 %v7597_v25, %v7502_v48  ;;  %v7704_v45 = vld [vmem:[#allocation2 + $0x138] sm:$0xff] }
 0x121   : > { %1934 = vmatmul.f32.gmra.mxu0 %v7579_v14  ;;  %583 = vst [vmem:[#allocation3 + $0x6d0] sm:$0xff] %v7693_v62  ;;  %v1379_v48 = vld [vmem:[%s10850_s1 + $0x398] sm:$0xff] }
 0x122   : > { %v1775_v10 = vadd.f32 %v1774_v47, %v1662_v0  ;;  %647 = vst [vmem:[#allocation3 + $0x6d8] sm:$0xff] %v7704_v45  ;;  %v7708_v0 = vld [vmem:[#allocation2 + $0x129] sm:$0xff]  ;;  %2215 = vmatpush.msra.mxu3 %v1379_v48  ;;  %v1347_v1 = vld [vmem:[%s10850_s1 + $0x298] sm:$0xff] }
 0x123   : > { %v1554_v50 = vpop.f32.mrf.mxu1  ;;  %710 = vst [vmem:[#allocation3 + $0x698] sm:$0xff] %v7708_v0  ;;  %1989 = vmatpush.msra.mxu1 %v1347_v1 }
 0x124   : > { %v7676_v20 = vadd.f32 %v1887_v44, %v1775_v10  ;;  %1711 = vmatmul.f32.gmra.mxu2 %v7571_v13  ;;  %520 = vst [vmem:[#allocation3 + $0x710] sm:$0xff] %v7708_v0 }
 0x125   : > { %1824 = vmatmul.f32.gmra.mxu3 %v7575_v2 }
 0x126   : > { %v1890_v40 = vpop.f32.mrf.mxu0  ;;  %1601 = vmatmul.f32.gmra.mxu1 %v7579_v14  ;;  %v1363_v14 = vld [vmem:[%s10850_s1 + $0x318] sm:$0xff] }
 0x127   : > { %v1664_v13 = vpop.f32.mrf.mxu2  ;;  %2102 = vmatpush.msra.mxu2 %v1363_v14 }
 0x128   : > { %v1665_v27 = vadd.f32 %v1664_v13, %v1552_v30  ;;  %v1777_v2 = vpop.f32.mrf.mxu3  ;;  %v7720_v30 = vld [vmem:[#allocation2 + $0x12a] sm:$0xff]  ;;  %v7728_v13 = vld [vmem:[#allocation2 + $0x140] sm:$0xff] }
 0x129   : > { %1937 = vmatmul.f32.gmra.mxu0 %v7612_v35  ;;  %584 = vst [vmem:[#allocation3 + $0x718] sm:$0xff] %v7720_v30 }
 0x12a   : > { %v1778_v55 = vadd.f32 %v1777_v2, %v1665_v27  ;;  %648 = vst [vmem:[#allocation3 + $0x720] sm:$0xff] %v7728_v13  ;;  %v7732_v27 = vld [vmem:[#allocation2 + $0x139] sm:$0xff] }
 0x12b   : > { %v1557_v31 = vpop.f32.mrf.mxu1  ;;  %v1395_v2 = vld [vmem:[%s10850_s1 + $0x418] sm:$0xff]  ;;  %711 = vst [vmem:[#allocation3 + $0x6e0] sm:$0xff] %v7732_v27 }
 0x12c   : > { %v7697_v44 = vadd.f32 %v1890_v40, %v1778_v55  ;;  %1714 = vmatmul.f32.gmra.mxu2 %v7599_v28  ;;  %v1555_v28 = vadd.f32 %v1554_v50, %v1442_v12  ;;  %2328 = vmatpush.msra.mxu0 %v1395_v2  ;;  %521 = vst [vmem:[#allocation3 + $0x758] sm:$0xff] %v7732_v27 }
 0x12d   : > { %1827 = vmatmul.f32.gmra.mxu3 %v7608_v33 }
 0x12e   : > { %v1893_v47 = vpop.f32.mrf.mxu0  ;;  %1604 = vmatmul.f32.gmra.mxu1 %v7612_v35  ;;  %v1445_v35 = vadd.f32 %v7597_v25, %v7530_v57 }
 0x12f   : > { %v1667_v46 = vpop.f32.mrf.mxu2 }
 0x130   : > { %v1668_v33 = vadd.f32 %v1667_v46, %v1555_v28  ;;  %v1780_v10 = vpop.f32.mrf.mxu3  ;;  %v1558_v55 = vadd.f32 %v1557_v31, %v1445_v35  ;;  %v7741_v28 = vld [vmem:[#allocation2 + $0x13a] sm:$0xff]  ;;  %v1448_v31 = vadd.f32 %v7597_v25, %v7558_v6  ;;  %v7752_v46 = vld [vmem:[#allocation2 + $0x150] sm:$0xff] }
 0x131   : > { %1940 = vmatmul.f32.gmra.mxu0 %v7636_v9  ;;  %585 = vst [vmem:[#allocation3 + $0x760] sm:$0xff] %v7741_v28  ;;  %v1378_v6 = vld [vmem:[%s10850_s1 + $0x390] sm:$0xff] }
 0x132   : > { %v1781_v54 = vadd.f32 %v1780_v10, %v1668_v33  ;;  %649 = vst [vmem:[#allocation3 + $0x768] sm:$0xff] %v7752_v46  ;;  %v7756_v33 = vld [vmem:[#allocation2 + $0x141] sm:$0xff]  ;;  %2216 = vmatpush.msra.mxu3 %v1378_v6  ;;  %v1346_v35 = vld [vmem:[%s10850_s1 + $0x290] sm:$0xff] }
 0x133   : > { %v1560_v50 = vpop.f32.mrf.mxu1  ;;  %712 = vst [vmem:[#allocation3 + $0x728] sm:$0xff] %v7756_v33  ;;  %1990 = vmatpush.msra.mxu1 %v1346_v35 }
 0x134   : > { %v7724_v40 = vadd.f32 %v1893_v47, %v1781_v54  ;;  %1717 = vmatmul.f32.gmra.mxu2 %v7624_v56  ;;  %522 = vst [vmem:[#allocation3 + $0x7a0] sm:$0xff] %v7756_v33 }
 0x135   : > { %1830 = vmatmul.f32.gmra.mxu3 %v7632_v3 }
 0x136   : > { %v1896_v57 = vpop.f32.mrf.mxu0  ;;  %1607 = vmatmul.f32.gmra.mxu1 %v7636_v9  ;;  %v1362_v9 = vld [vmem:[%s10850_s1 + $0x310] sm:$0xff] }
 0x137   : > { %v1670_v56 = vpop.f32.mrf.mxu2  ;;  %2103 = vmatpush.msra.mxu2 %v1362_v9 }
 0x138   : > { %v1671_v12 = vadd.f32 %v1670_v56, %v1558_v55  ;;  %v1783_v3 = vpop.f32.mrf.mxu3  ;;  %v7768_v55 = vld [vmem:[#allocation2 + $0x142] sm:$0xff]  ;;  %v7776_v56 = vld [vmem:[#allocation2 + $0x158] sm:$0xff] }
 0x139   : > { %1943 = vmatmul.f32.gmra.mxu0 %v7660_v42  ;;  %586 = vst [vmem:[#allocation3 + $0x7a8] sm:$0xff] %v7768_v55 }
 0x13a   : > { %v1784_v14 = vadd.f32 %v1783_v3, %v1671_v12  ;;  %650 = vst [vmem:[#allocation3 + $0x7b0] sm:$0xff] %v7776_v56  ;;  %v7780_v12 = vld [vmem:[#allocation2 + $0x151] sm:$0xff] }
 0x13b   : > { %v1563_v48 = vpop.f32.mrf.mxu1  ;;  %v1394_v3 = vld [vmem:[%s10850_s1 + $0x410] sm:$0xff]  ;;  %713 = vst [vmem:[#allocation3 + $0x770] sm:$0xff] %v7780_v12 }
 0x13c   : > { %v7745_v47 = vadd.f32 %v1896_v57, %v1784_v14  ;;  %1720 = vmatmul.f32.gmra.mxu2 %v7645_v38  ;;  %v1561_v38 = vadd.f32 %v1560_v50, %v1448_v31  ;;  %2329 = vmatpush.msra.mxu0 %v1394_v3  ;;  %523 = vst [vmem:[#allocation3 + $0x7e8] sm:$0xff] %v7780_v12 }
 0x13d   : > { %1833 = vmatmul.f32.gmra.mxu3 %v7656_v34 }
 0x13e   : > { %v1899_v10 = vpop.f32.mrf.mxu0  ;;  %1610 = vmatmul.f32.gmra.mxu1 %v7660_v42  ;;  %v1451_v42 = vadd.f32 %v7597_v25, %v7584_v17 }
 0x13f   : > { %v1673_v1 = vpop.f32.mrf.mxu2 }
 0x140   : > { %v1674_v34 = vadd.f32 %v1673_v1, %v1561_v38  ;;  %v1786_v54 = vpop.f32.mrf.mxu3  ;;  %v1564_v14 = vadd.f32 %v1563_v48, %v1451_v42  ;;  %v7789_v38 = vld [vmem:[#allocation2 + $0x152] sm:$0xff]  ;;  %v1454_v48 = vadd.f32 %v7597_v25, %v7370_v7  ;;  %v7800_v1 = vld [vmem:[#allocation2 + $0x168] sm:$0xff] }
 0x141   : > { %1946 = vmatmul.f32.gmra.mxu0 %v7684_v29  ;;  %587 = vst [vmem:[#allocation3 + $0x7f0] sm:$0xff] %v7789_v38  ;;  %v1377_v7 = vld [vmem:[%s10850_s1 + $0x388] sm:$0xff] }
 0x142   : > { %v1787_v2 = vadd.f32 %v1786_v54, %v1674_v34  ;;  %651 = vst [vmem:[#allocation3 + $0x7f8] sm:$0xff] %v7800_v1  ;;  %v7804_v34 = vld [vmem:[#allocation2 + $0x159] sm:$0xff]  ;;  %2217 = vmatpush.msra.mxu3 %v1377_v7  ;;  %v1345_v42 = vld [vmem:[%s10850_s1 + $0x288] sm:$0xff] }
 0x143   : > { %v1566_v50 = vpop.f32.mrf.mxu1  ;;  %714 = vst [vmem:[#allocation3 + $0x7b8] sm:$0xff] %v7804_v34  ;;  %1991 = vmatpush.msra.mxu1 %v1345_v42 }
 0x144   : > { %v7772_v57 = vadd.f32 %v1899_v10, %v1787_v2  ;;  %1723 = vmatmul.f32.gmra.mxu2 %v7672_v5  ;;  %524 = vst [vmem:[#allocation3 + $0x830] sm:$0xff] %v7804_v34 }
 0x145   : > { %1836 = vmatmul.f32.gmra.mxu3 %v7680_v52 }
 0x146   : > { %v1902_v17 = vpop.f32.mrf.mxu0  ;;  %1613 = vmatmul.f32.gmra.mxu1 %v7684_v29  ;;  %v1361_v29 = vld [vmem:[%s10850_s1 + $0x308] sm:$0xff] }
 0x147   : > { %v1676_v5 = vpop.f32.mrf.mxu2  ;;  %2104 = vmatpush.msra.mxu2 %v1361_v29 }
 0x148   : > { %v1677_v31 = vadd.f32 %v1676_v5, %v1564_v14  ;;  %v1789_v52 = vpop.f32.mrf.mxu3  ;;  %v7816_v14 = vld [vmem:[#allocation2 + $0x15a] sm:$0xff]  ;;  %v7824_v5 = vld [vmem:[#allocation2 + $0x170] sm:$0xff] }
 0x149   : > { %1949 = vmatmul.f32.gmra.mxu0 %v7708_v0  ;;  %588 = vst [vmem:[#allocation3 + $0x838] sm:$0xff] %v7816_v14 }
 0x14a   : > { %v1790_v9 = vadd.f32 %v1789_v52, %v1677_v31  ;;  %652 = vst [vmem:[#allocation3 + $0x840] sm:$0xff] %v7824_v5  ;;  %v7828_v31 = vld [vmem:[#allocation2 + $0x169] sm:$0xff] }
 0x14b   : > { %v1569_v6 = vpop.f32.mrf.mxu1  ;;  %v1393_v52 = vld [vmem:[%s10850_s1 + $0x408] sm:$0xff]  ;;  %715 = vst [vmem:[#allocation3 + $0x800] sm:$0xff] %v7828_v31 }
 0x14c   : > { %v7793_v10 = vadd.f32 %v1902_v17, %v1790_v9  ;;  %1726 = vmatmul.f32.gmra.mxu2 %v7693_v62  ;;  %v1567_v62 = vadd.f32 %v1566_v50, %v1454_v48  ;;  %v363_v9 = vld [vmem:[%s6867_s14 + $0xf0] sm:$0xff]  ;;  %2330 = vmatpush.msra.mxu0 %v1393_v52  ;;  %525 = vst [vmem:[#allocation3 + $0x878] sm:$0xff] %v7828_v31 }
 0x14d   : > { %1839 = vmatmul.f32.gmra.mxu3 %v7704_v45  ;;  %397 = vst.msk [vmem:[#allocation2 + $0x181] sm:$0xff] %vm366_vm0, %v363_v9 }
 0x14e   : > { %v1905_v54 = vpop.f32.mrf.mxu0  ;;  %1616 = vmatmul.f32.gmra.mxu1 %v7708_v0  ;;  %v1457_v0 = vadd.f32 %v7597_v25, %v7388_v59 }
 0x14f   : > { %v1679_v35 = vpop.f32.mrf.mxu2 }
 0x150   : > { %v1680_v45 = vadd.f32 %v1679_v35, %v1567_v62  ;;  %v1792_v2 = vpop.f32.mrf.mxu3  ;;  %v1570_v59 = vadd.f32 %v1569_v6, %v1457_v0  ;;  %v1460_v6 = vadd.f32 %v7597_v25, %v7411_v19  ;;  %v1360_v35 = vld [vmem:[%s10850_s1 + $0x300] sm:$0xff] }
 0x151   : > { %1952 = vmatmul.f32.gmra.mxu0 %v7732_v27  ;;  %2105 = vmatpush.msra.mxu2 %v1360_v35  ;;  %v1376_v19 = vld [vmem:[%s10850_s1 + $0x380] sm:$0xff] }
 0x152   : > { %v1793_v50 = vadd.f32 %v1792_v2, %v1680_v45  ;;  %v7851_v45 = vld [vmem:[#allocation2 + $0x171] sm:$0xff]  ;;  %2218 = vmatpush.msra.mxu3 %v1376_v19 }
 0x153   : > { %v1572_v3 = vpop.f32.mrf.mxu1  ;;  %716 = vst [vmem:[#allocation3 + $0x848] sm:$0xff] %v7851_v45 }
 0x154   : > { %v7820_v17 = vadd.f32 %v1905_v54, %v1793_v50  ;;  %1729 = vmatmul.f32.gmra.mxu2 %v7720_v30  ;;  %v7839_v54 = vld [vmem:[#allocation2 + $0x16a] sm:$0xff]  ;;  %v1573_v2 = vadd.f32 %v1572_v3, %v1460_v6  ;;  %v7858_v50 = vld [vmem:[#allocation2 + $0x180] sm:$0xff]  ;;  %526 = vst [vmem:[#allocation3 + $0x8c0] sm:$0xff] %v7851_v45 }
 0x155   : > { %1842 = vmatmul.f32.gmra.mxu3 %v7728_v13  ;;  %589 = vst [vmem:[#allocation3 + $0x880] sm:$0xff] %v7839_v54  ;;  %v1344_v3 = vld [vmem:[%s10850_s1 + $0x280] sm:$0xff] }
 0x156   : > { %v1908_v48 = vpop.f32.mrf.mxu0  ;;  %1619 = vmatmul.f32.gmra.mxu1 %v7732_v27  ;;  %653 = vst [vmem:[#allocation3 + $0x888] sm:$0xff] %v7858_v50 }
 0x157   : > { %v1682_v30 = vpop.f32.mrf.mxu2  ;;  %3389 = vst.msk [vmem:[#allocation3 + $0x888] sm:$0xff] %vm2525_vm1, %v7337_v53  ;;  %1992 = vmatpush.msra.mxu1 %v1344_v3 }
 0x158   : > { %v1683_v13 = vadd.f32 %v1682_v30, %v1570_v59  ;;  %v1795_v29 = vpop.f32.mrf.mxu3  ;;  %v7870_v59 = vld [vmem:[#allocation2 + $0x172] sm:$0xff] }
 0x159   : > { %1955 = vmatmul.f32.gmra.mxu0 %v7756_v33  ;;  %590 = vst [vmem:[#allocation3 + $0x8c8] sm:$0xff] %v7870_v59 }
 0x15a   : > { %v1796_v7 = vadd.f32 %v1795_v29, %v1683_v13  ;;  %v7879_v13 = vld [vmem:[#allocation2 + $0x181] sm:$0xff] }
 0x15b   : > { %v1575_v62 = vpop.f32.mrf.mxu1  ;;  %v3613_v29 = vld [vmem:[#allocation2 + $0x19a] sm:$0xff]  ;;  %717 = vst [vmem:[#allocation3 + $0x890] sm:$0xff] %v7879_v13 }
 0x15c   : > { %v7843_v27 = vadd.f32 %v1908_v48, %v1796_v7  ;;  %1732 = vmatmul.f32.gmra.mxu2 %v7741_v28  ;;  %v1463_v48 = vadd.f32 %v7597_v25, %v7431_v26  ;;  %v1392_v7 = vld [vmem:[%s10850_s1 + $0x400] sm:$0xff]  ;;  %3645 = vst.msk [vmem:[#allocation3 + $0x890] sm:$0xff] %vm2525_vm1, %v3613_v29 }
 0x15d   : > { %1845 = vmatmul.f32.gmra.mxu3 %v7752_v46  ;;  %v364_v46 = vld [vmem:[%s6867_s14 + $0xf8] sm:$0xff]  ;;  %2331 = vmatpush.msra.mxu0 %v1392_v7 }
 0x15e   : > { %v1911_v42 = vpop.f32.mrf.mxu0  ;;  %1622 = vmatmul.f32.gmra.mxu1 %v7756_v33  ;;  %398 = vst.msk [vmem:[#allocation2 + $0x189] sm:$0xff] %vm366_vm0, %v364_v46  ;;  %v1576_v6 = vadd.f32 %v1575_v62, %v1463_v48  ;;  %v719_v62 = vld [vmem:[#allocation2 + $0x1a] sm:$0xff]  ;;  %v7895_v46 = vld [vmem:[#allocation2 + $0x30] sm:$0xff] }
 0x15f   : > { %v1685_v28 = vpop.f32.mrf.mxu2  ;;  %v848_v48 = vld [vmem:[#allocation2 + $0x31] sm:$0xff] }
 0x160   : > { %v1686_v0 = vadd.f32 %v1685_v28, %v1573_v2  ;;  %v1798_v52 = vpop.f32.mrf.mxu3 }
 0x161   : > { %1958 = vmatmul.f32.gmra.mxu0 %v7780_v12 }
 0x162   : > { %v1799_v33 = vadd.f32 %v1798_v52, %v1686_v0  ;;  %v3614_v0 = vld [vmem:[#allocation2 + $0x1a2] sm:$0xff] }
 0x163   : > { %v1578_v9 = vpop.f32.mrf.mxu1 }
 0x164   : > { %v7874_v30 = vadd.f32 %v1911_v42, %v1799_v33  ;;  %1735 = vmatmul.f32.gmra.mxu2 %v7768_v55 }
 0x165   : > { %1848 = vmatmul.f32.gmra.mxu3 %v7776_v56  ;;  %v622_v56 = vld [vmem:[#allocation2 + $0x188] sm:$0xff] }
 0x166   : > { %v1914_v35 = vpop.f32.mrf.mxu0  ;;  %1625 = vmatmul.f32.gmra.mxu1 %v7780_v12  ;;  %654 = vst [vmem:[#allocation3 + $0x8d0] sm:$0xff] %v622_v56  ;;  %v1466_v12 = vadd.f32 %v7597_v25, %v7462_v37  ;;  %v686_v52 = vld [vmem:[#allocation2 + $0x189] sm:$0xff] }
 0x167   : > { %v1688_v26 = vpop.f32.mrf.mxu2  ;;  %3390 = vst.msk [vmem:[#allocation3 + $0x8d0] sm:$0xff] %vm2525_vm1, %v7337_v53 }
 0x168   : > { %v1689_v55 = vadd.f32 %v1688_v26, %v1576_v6  ;;  %v1801_v19 = vpop.f32.mrf.mxu3  ;;  %v1579_v3 = vadd.f32 %v1578_v9, %v1466_v12  ;;  %718 = vst [vmem:[#allocation3 + $0x8d8] sm:$0xff] %v686_v52  ;;  %v720_v6 = vld [vmem:[#allocation2 + $0x22] sm:$0xff]  ;;  %v7909_v9 = vld [vmem:[#allocation2 + $0x39] sm:$0xff] }
 0x169   : > { %1961 = vmatmul.f32.gmra.mxu0 %v7804_v34  ;;  %3646 = vst.msk [vmem:[#allocation3 + $0x8d8] sm:$0xff] %vm2525_vm1, %v3614_v0 }
 0x16a   : > { %v1802_v2 = vadd.f32 %v1801_v19, %v1689_v55  ;;  %v7912_v19 = vld [vmem:[#allocation2 + $0x32] sm:$0xff] }
 0x16b   : > { %v1581_v42 = vpop.f32.mrf.mxu1 }
 0x16c   : > { %v7892_v28 = vadd.f32 %v1914_v35, %v1802_v2  ;;  %1738 = vmatmul.f32.gmra.mxu2 %v7789_v38 }
 0x16d   : > { %1851 = vmatmul.f32.gmra.mxu3 %v7800_v1  ;;  %v1469_v1 = vadd.f32 %v7597_v25, %v7487_v43 }
 0x16e   : > { %v1917_v33 = vpop.f32.mrf.mxu0  ;;  %1628 = vmatmul.f32.gmra.mxu1 %v7804_v34  ;;  %v7906_v34 = vld [vmem:[#allocation2 + $0x38] sm:$0xff] }
 0x16f   : > { %v1691_v53 = vpop.f32.mrf.mxu2  ;;  %v1582_v26 = vadd.f32 %v1581_v42, %v1469_v1  ;;  %v7922_v42 = vld [vmem:[#allocation2 + $0x49] sm:$0xff] }
 0x170   : > { %v1692_v37 = vadd.f32 %v1691_v53, %v1579_v3  ;;  %v1804_v29 = vpop.f32.mrf.mxu3 }
 0x171   : > { %1964 = vmatmul.f32.gmra.mxu0 %v7828_v31 }
 0x172   : > { %v1805_v38 = vadd.f32 %v1804_v29, %v1692_v37 }
 0x173   : > { %v1584_v7 = vpop.f32.mrf.mxu1 }
 0x174   : > { %v7903_v35 = vadd.f32 %v1917_v33, %v1805_v38  ;;  %1741 = vmatmul.f32.gmra.mxu2 %v7816_v14  ;;  %v7915_v14 = vld [vmem:[#allocation2 + $0x48] sm:$0xff] }
 0x175   : > { %1854 = vmatmul.f32.gmra.mxu3 %v7824_v5  ;;  %v1472_v5 = vadd.f32 %v7597_v25, %v7515_v51 }
 0x176   : > { %v1920_v55 = vpop.f32.mrf.mxu0  ;;  %1631 = vmatmul.f32.gmra.mxu1 %v7828_v31  ;;  %v7925_v31 = vld [vmem:[#allocation2 + $0x3a] sm:$0xff] }
 0x177   : > { %v1694_v2 = vpop.f32.mrf.mxu2  ;;  %v1585_v53 = vadd.f32 %v1584_v7, %v1472_v5 }
 0x178   : > { %v1695_v12 = vadd.f32 %v1694_v2, %v1582_v26  ;;  %v1807_v0 = vpop.f32.mrf.mxu3 }
 0x179   : > { %1967 = vmatmul.f32.gmra.mxu0 %v7851_v45 }
 0x17a   : > { %v1808_v43 = vadd.f32 %v1807_v0, %v1695_v12 }
 0x17b   : > { %v1587_v3 = vpop.f32.mrf.mxu1 }
 0x17c   : > { %v7919_v33 = vadd.f32 %v1920_v55, %v1808_v43  ;;  %1744 = vmatmul.f32.gmra.mxu2 %v7839_v54  ;;  %v7929_v55 = vld [vmem:[#allocation2 + $0x50] sm:$0xff]  ;;  %v1475_v54 = vadd.f32 %v7597_v25, %v7540_v61  ;;  %v1478_v61 = vadd.f32 %v7597_v25, %v7400_v15  ;;  %v7952_v15 = vld [vmem:[#allocation2 + $0x68] sm:$0xff] }
 0x17d   : > { %1857 = vmatmul.f32.gmra.mxu3 %v7858_v50  ;;  %v7936_v50 = vld [vmem:[#allocation2 + $0x51] sm:$0xff] }
 0x17e   : > { %v1923_v37 = vpop.f32.mrf.mxu0  ;;  %1634 = vmatmul.f32.gmra.mxu1 %v7851_v45  ;;  %v7938_v45 = vld [vmem:[#allocation2 + $0x4a] sm:$0xff]  ;;  %v1588_v7 = vadd.f32 %v1587_v3, %v1475_v54  ;;  %v7949_v3 = vld [vmem:[#allocation2 + $0x52] sm:$0xff] }
 0x17f   : > { %v1697_v29 = vpop.f32.mrf.mxu2 }
 0x180   : > { %v1698_v38 = vadd.f32 %v1697_v29, %v1585_v53  ;;  %v1810_v1 = vpop.f32.mrf.mxu3  ;;  %v7940_v29 = vld [vmem:[#allocation2 + $0x60] sm:$0xff] }
 0x181   : > { %1970 = vmatmul.f32.gmra.mxu0 %v7879_v13 }
 0x182   : > { %v1811_v51 = vadd.f32 %v1810_v1, %v1698_v38 }
 0x183   : > { %v1590_v26 = vpop.f32.mrf.mxu1 }
 0x184   : > { %v7933_v2 = vadd.f32 %v1923_v37, %v1811_v51  ;;  %1747 = vmatmul.f32.gmra.mxu2 %v7870_v59 }
 0x185   : > { %1860 = vmatmul.f32.gmra.mxu3 %v622_v56  ;;  %v7947_v56 = vld [vmem:[#allocation2 + $0x61] sm:$0xff] }
 0x186   : > { %v1926_v12 = vpop.f32.mrf.mxu0  ;;  %1993 = vmatmul.f32.vlgmr.msra.gmra.mxu1 %v719_v62  ;;  %v1591_v62 = vadd.f32 %v1590_v26, %v1478_v61  ;;  %v7966_v61 = vld [vmem:[#allocation2 + $0x78] sm:$0xff] }
 0x187   : > { %v1700_v13 = vpop.f32.mrf.mxu2 }
 0x188   : > { %v1701_v0 = vadd.f32 %v1700_v13, %v1588_v7  ;;  %v1813_v43 = vpop.f32.mrf.mxu3 }
 0x189   : > { %1973 = vmatmul.f32.gmra.mxu0 %v686_v52 }
 0x18a   : > { %v1814_v5 = vadd.f32 %v1813_v43, %v1701_v0 }
 0x18b   : > { %v1593_v53 = vpop.f32.mrf.mxu1 }
 0x18c   : > { %v7944_v59 = vadd.f32 %v1926_v12, %v1814_v5  ;;  %2106 = vmatmul.f32.vlgmr.msra.gmra.mxu2 %v7895_v46  ;;  %v1481_v46 = vadd.f32 %v7597_v25, %v7422_v23 }
 0x18d   : > { %2219 = vmatmul.f32.vlgmr.msra.gmra.mxu3 %v848_v48  ;;  %v7959_v48 = vld [vmem:[#allocation2 + $0x69] sm:$0xff] }
 0x18e   : > { %v1929_v37 = vpop.f32.mrf.mxu0  ;;  %1996 = vmatmul.f32.gmra.mxu1 %v720_v6  ;;  %v7962_v6 = vld [vmem:[#allocation2 + $0x62] sm:$0xff]  ;;  %v1594_v26 = vadd.f32 %v1593_v53, %v1481_v46 }
 0x18f   : > { %v1703_v52 = vpop.f32.mrf.mxu2  ;;  %v7980_v46 = vld [vmem:[#allocation2 + $0x80] sm:$0xff] }
 0x190   : > { %v1704_v38 = vadd.f32 %v1703_v52, %v1591_v62  ;;  %v1816_v1 = vpop.f32.mrf.mxu3 }
 0x191   : > { %2332 = vmatmul.f32.vlgmr.msra.gmra.mxu0 %v7912_v19 }
 0x192   : > { %v1817_v51 = vadd.f32 %v1816_v1, %v1704_v38 }
 0x193   : > { %v1596_v54 = vpop.f32.mrf.mxu1 }
 0x194   : > { %v7956_v7 = vadd.f32 %v1929_v37, %v1817_v51  ;;  %2109 = vmatmul.f32.gmra.mxu2 %v7906_v34  ;;  %v1484_v34 = vadd.f32 %v7597_v25, %v7450_v32 }
 0x195   : > { %2222 = vmatmul.f32.gmra.mxu3 %v7909_v9  ;;  %v7973_v9 = vld [vmem:[#allocation2 + $0x79] sm:$0xff] }
 0x196   : > { %v1932_v12 = vpop.f32.mrf.mxu0  ;;  %1999 = vmatmul.f32.gmra.mxu1 %v7912_v19  ;;  %v7976_v19 = vld [vmem:[#allocation2 + $0x6a] sm:$0xff]  ;;  %v1597_v53 = vadd.f32 %v1596_v54, %v1484_v34 }
 0x197   : > { %v1706_v13 = vpop.f32.mrf.mxu2  ;;  %v7994_v34 = vld [vmem:[#allocation2 + $0x90] sm:$0xff] }
 0x198   : > { %v1707_v0 = vadd.f32 %v1706_v13, %v1594_v26  ;;  %v1819_v43 = vpop.f32.mrf.mxu3 }
 0x199   : > { %2335 = vmatmul.f32.gmra.mxu0 %v7925_v31 }
 0x19a   : > { %v1820_v23 = vadd.f32 %v1819_v43, %v1707_v0 }
 0x19b   : > { %v1599_v5 = vpop.f32.mrf.mxu1 }
 0x19c   : > { %v7970_v62 = vadd.f32 %v1932_v12, %v1820_v23  ;;  %2112 = vmatmul.f32.gmra.mxu2 %v7915_v14  ;;  %v1487_v14 = vadd.f32 %v7597_v25, %v7478_v41 }
 0x19d   : > { %2225 = vmatmul.f32.gmra.mxu3 %v7922_v42  ;;  %v7987_v42 = vld [vmem:[#allocation2 + $0x81] sm:$0xff] }
 0x19e   : > { %v1935_v37 = vpop.f32.mrf.mxu0  ;;  %2002 = vmatmul.f32.gmra.mxu1 %v7925_v31  ;;  %v7990_v31 = vld [vmem:[#allocation2 + $0x7a] sm:$0xff]  ;;  %v1600_v54 = vadd.f32 %v1599_v5, %v1487_v14 }
 0x19f   : > { %v1709_v52 = vpop.f32.mrf.mxu2  ;;  %v8008_v14 = vld [vmem:[#allocation2 + $0x98] sm:$0xff] }
 0x1a0   : > { %v1710_v38 = vadd.f32 %v1709_v52, %v1597_v53  ;;  %v1822_v1 = vpop.f32.mrf.mxu3 }
 0x1a1   : > { %2338 = vmatmul.f32.gmra.mxu0 %v7938_v45 }
 0x1a2   : > { %v1823_v32 = vadd.f32 %v1822_v1, %v1710_v38 }
 0x1a3   : > { %v1602_v51 = vpop.f32.mrf.mxu1 }
 0x1a4   : > { %v7984_v26 = vadd.f32 %v1935_v37, %v1823_v32  ;;  %2115 = vmatmul.f32.gmra.mxu2 %v7929_v55  ;;  %v1490_v55 = vadd.f32 %v7597_v25, %v7506_v49 }
 0x1a5   : > { %2228 = vmatmul.f32.gmra.mxu3 %v7936_v50  ;;  %v8001_v50 = vld [vmem:[#allocation2 + $0x91] sm:$0xff] }
 0x1a6   : > { %v1938_v12 = vpop.f32.mrf.mxu0  ;;  %2005 = vmatmul.f32.gmra.mxu1 %v7938_v45  ;;  %v8004_v45 = vld [vmem:[#allocation2 + $0x82] sm:$0xff]  ;;  %v1603_v5 = vadd.f32 %v1602_v51, %v1490_v55  ;;  %v8021_v51 = vld [vmem:[#allocation2 + $0x92] sm:$0xff] }
 0x1a7   : > { %v1712_v13 = vpop.f32.mrf.mxu2  ;;  %v8025_v55 = vld [vmem:[#allocation2 + $0xa8] sm:$0xff] }
 0x1a8   : > { %v1713_v0 = vadd.f32 %v1712_v13, %v1600_v54  ;;  %v1825_v43 = vpop.f32.mrf.mxu3 }
 0x1a9   : > { %2341 = vmatmul.f32.gmra.mxu0 %v7949_v3 }
 0x1aa   : > { %v1826_v41 = vadd.f32 %v1825_v43, %v1713_v0 }
 0x1ab   : > { %v1605_v23 = vpop.f32.mrf.mxu1 }
 0x1ac   : > { %v7998_v53 = vadd.f32 %v1938_v12, %v1826_v41  ;;  %2118 = vmatmul.f32.gmra.mxu2 %v7940_v29  ;;  %v1493_v29 = vadd.f32 %v7597_v25, %v7534_v60 }
 0x1ad   : > { %2231 = vmatmul.f32.gmra.mxu3 %v7947_v56  ;;  %v3822_v56 = vld [vmem:[%s10852_s3 + $0x78] sm:$0xff] }
 0x1ae   : > { %v1941_v37 = vpop.f32.mrf.mxu0  ;;  %2008 = vmatmul.f32.gmra.mxu1 %v7949_v3  ;;  %v8018_v3 = vld [vmem:[#allocation2 + $0x99] sm:$0xff]  ;;  %v1606_v12 = vadd.f32 %v1605_v23, %v1493_v29  ;;  %v8032_v23 = vld [vmem:[#allocation2 + $0xa9] sm:$0xff] }
 0x1af   : > { %v1715_v52 = vpop.f32.mrf.mxu2  ;;  %3979 = vmatpush.msrb.mxu1 %v3822_v56  ;;  %v8039_v29 = vld [vmem:[#allocation2 + $0xb0] sm:$0xff] }
 0x1b0   : > { %v1716_v38 = vadd.f32 %v1715_v52, %v1603_v5  ;;  %v1828_v1 = vpop.f32.mrf.mxu3  ;;  %v1496_v5 = vadd.f32 %v7597_v25, %v7562_v11  ;;  %v8054_v56 = vld [vmem:[#allocation2 + $0xb1] sm:$0xff] }
 0x1b1   : > { %2344 = vmatmul.f32.gmra.mxu0 %v7962_v6 }
 0x1b2   : > { %v1829_v49 = vadd.f32 %v1828_v1, %v1716_v38 }
 0x1b3   : > { %v1608_v32 = vpop.f32.mrf.mxu1 }
 0x1b4   : > { %v8012_v54 = vadd.f32 %v1941_v37, %v1829_v49  ;;  %2121 = vmatmul.f32.gmra.mxu2 %v7952_v15  ;;  %v1609_v37 = vadd.f32 %v1608_v32, %v1496_v5  ;;  %v8061_v5 = vld [vmem:[#allocation2 + $0xc0] sm:$0xff] }
 0x1b5   : > { %2234 = vmatmul.f32.gmra.mxu3 %v7959_v48 }
 0x1b6   : > { %v1944_v13 = vpop.f32.mrf.mxu0  ;;  %2011 = vmatmul.f32.gmra.mxu1 %v7962_v6  ;;  %v8035_v6 = vld [vmem:[#allocation2 + $0x9a] sm:$0xff] }
 0x1b7   : > { %v1718_v60 = vpop.f32.mrf.mxu2 }
 0x1b8   : > { %v1719_v0 = vadd.f32 %v1718_v60, %v1606_v12  ;;  %v1831_v43 = vpop.f32.mrf.mxu3  ;;  %v8057_v12 = vld [vmem:[#allocation2 + $0xaa] sm:$0xff] }
 0x1b9   : > { %2347 = vmatmul.f32.gmra.mxu0 %v7976_v19 }
 0x1ba   : > { %v1832_v15 = vadd.f32 %v1831_v43, %v1719_v0 }
 0x1bb   : > { %v1611_v41 = vpop.f32.mrf.mxu1 }
 0x1bc   : > { %v8029_v48 = vadd.f32 %v1944_v13, %v1832_v15  ;;  %2124 = vmatmul.f32.gmra.mxu2 %v7966_v61  ;;  %v8044_v61 = vld [vmem:[%s10851_s2] ss:$0 sm:$0xff] }
 0x1bd   : > { %2237 = vmatmul.f32.gmra.mxu3 %v7973_v9  ;;  %v1499_v9 = vadd.f32 %v8044_v61, %v7588_v21 }
 0x1be   : > { %v1947_v52 = vpop.f32.mrf.mxu0  ;;  %2014 = vmatmul.f32.gmra.mxu1 %v7976_v19  ;;  %v3821_v19 = vld [vmem:[%s10852_s3 + $0x70] sm:$0xff] }
 0x1bf   : > { %v1721_v38 = vpop.f32.mrf.mxu2  ;;  %3980 = vmatpush.msrb.mxu1 %v3821_v19  ;;  %v1612_v13 = vadd.f32 %v1611_v41, %v1499_v9  ;;  %v8068_v41 = vld [vmem:[#allocation2 + $0xc1] sm:$0xff] }
 0x1c0   : > { %v1722_v1 = vadd.f32 %v1721_v38, %v1609_v37  ;;  %v1834_v49 = vpop.f32.mrf.mxu3  ;;  %v1502_v37 = vadd.f32 %v8044_v61, %v7403_v16  ;;  %v8075_v19 = vld [vmem:[#allocation2 + $0xc8] sm:$0xff] }
 0x1c1   : > { %2350 = vmatmul.f32.gmra.mxu0 %v7990_v31 }
 0x1c2   : > { %v1835_v11 = vadd.f32 %v1834_v49, %v1722_v1 }
 0x1c3   : > { %v1614_v25 = vpop.f32.mrf.mxu1 }
 0x1c4   : > { %v8048_v32 = vadd.f32 %v1947_v52, %v1835_v11  ;;  %2127 = vmatmul.f32.gmra.mxu2 %v7980_v46  ;;  %v1615_v52 = vadd.f32 %v1614_v25, %v1502_v37  ;;  %v8088_v25 = vld [vmem:[#allocation2 + $0xc2] sm:$0xff]  ;;  %v8092_v37 = vld [vmem:[#allocation2 + $0xd8] sm:$0xff] }
 0x1c5   : > { %2240 = vmatmul.f32.gmra.mxu3 %v7987_v42 }
 0x1c6   : > { %v1950_v60 = vpop.f32.mrf.mxu0  ;;  %2017 = vmatmul.f32.gmra.mxu1 %v7990_v31  ;;  %v8071_v31 = vld [vmem:[#allocation2 + $0xb2] sm:$0xff] }
 0x1c7   : > { %v1724_v21 = vpop.f32.mrf.mxu2 }
 0x1c8   : > { %v1725_v0 = vadd.f32 %v1724_v21, %v1612_v13  ;;  %v1837_v43 = vpop.f32.mrf.mxu3 }
 0x1c9   : > { %2353 = vmatmul.f32.gmra.mxu0 %v8004_v45 }
 0x1ca   : > { %v1838_v46 = vadd.f32 %v1837_v43, %v1725_v0 }
 0x1cb   : > { %v1617_v15 = vpop.f32.mrf.mxu1 }
 0x1cc   : > { %v8065_v42 = vadd.f32 %v1950_v60, %v1838_v46  ;;  %2130 = vmatmul.f32.gmra.mxu2 %v7994_v34  ;;  %v1505_v34 = vadd.f32 %v8044_v61, %v7425_v24 }
 0x1cd   : > { %2243 = vmatmul.f32.gmra.mxu3 %v8001_v50  ;;  %v3820_v50 = vld [vmem:[%s10852_s3 + $0x68] sm:$0xff] }
 0x1ce   : > { %v1953_v38 = vpop.f32.mrf.mxu0  ;;  %2020 = vmatmul.f32.gmra.mxu1 %v8004_v45  ;;  %v8085_v45 = vld [vmem:[#allocation2 + $0xc9] sm:$0xff]  ;;  %v1618_v60 = vadd.f32 %v1617_v15, %v1505_v34  ;;  %v8099_v15 = vld [vmem:[#allocation2 + $0xd9] sm:$0xff] }
 0x1cf   : > { %v1727_v1 = vpop.f32.mrf.mxu2  ;;  %3981 = vmatpush.msrb.mxu1 %v3820_v50  ;;  %v8106_v50 = vld [vmem:[#allocation2 + $0xe0] sm:$0xff] }
 0x1d0   : > { %v1728_v49 = vadd.f32 %v1727_v1, %v1615_v52  ;;  %v1840_v11 = vpop.f32.mrf.mxu3  ;;  %v1508_v52 = vadd.f32 %v8044_v61, %v7453_v36 }
 0x1d1   : > { %2356 = vmatmul.f32.gmra.mxu0 %v8021_v51 }
 0x1d2   : > { %v1841_v16 = vadd.f32 %v1840_v11, %v1728_v49 }
 0x1d3   : > { %v1620_v9 = vpop.f32.mrf.mxu1 }
 0x1d4   : > { %v8079_v13 = vadd.f32 %v1953_v38, %v1841_v16  ;;  %2133 = vmatmul.f32.gmra.mxu2 %v8008_v14  ;;  %v1621_v38 = vadd.f32 %v1620_v9, %v1508_v52  ;;  %v8119_v9 = vld [vmem:[#allocation2 + $0xda] sm:$0xff]  ;;  %v8123_v52 = vld [vmem:[#allocation2 + $0xf0] sm:$0xff] }
 0x1d5   : > { %2246 = vmatmul.f32.gmra.mxu3 %v8018_v3 }
 0x1d6   : > { %v1956_v21 = vpop.f32.mrf.mxu0  ;;  %2023 = vmatmul.f32.gmra.mxu1 %v8021_v51  ;;  %v8102_v51 = vld [vmem:[#allocation2 + $0xca] sm:$0xff] }
 0x1d7   : > { %v1730_v24 = vpop.f32.mrf.mxu2 }
 0x1d8   : > { %v1731_v0 = vadd.f32 %v1730_v24, %v1618_v60  ;;  %v1843_v43 = vpop.f32.mrf.mxu3 }
 0x1d9   : > { %2359 = vmatmul.f32.gmra.mxu0 %v8035_v6 }
 0x1da   : > { %v1844_v14 = vadd.f32 %v1843_v43, %v1731_v0 }
 0x1db   : > { %v1623_v46 = vpop.f32.mrf.mxu1 }
 0x1dc   : > { %v8096_v3 = vadd.f32 %v1956_v21, %v1844_v14  ;;  %2136 = vmatmul.f32.gmra.mxu2 %v8025_v55  ;;  %v1511_v55 = vadd.f32 %v8044_v61, %v7481_v58 }
 0x1dd   : > { %2249 = vmatmul.f32.gmra.mxu3 %v8032_v23  ;;  %v3819_v23 = vld [vmem:[%s10852_s3 + $0x60] sm:$0xff] }
 0x1de   : > { %v1959_v1 = vpop.f32.mrf.mxu0  ;;  %2026 = vmatmul.f32.gmra.mxu1 %v8035_v6  ;;  %v8116_v6 = vld [vmem:[#allocation2 + $0xe1] sm:$0xff]  ;;  %v1624_v21 = vadd.f32 %v1623_v46, %v1511_v55  ;;  %v8130_v46 = vld [vmem:[#allocation2 + $0xf1] sm:$0xff] }
 0x1df   : > { %v1733_v49 = vpop.f32.mrf.mxu2  ;;  %3982 = vmatpush.msrb.mxu1 %v3819_v23 }
 0x1e0   : > { %v1734_v11 = vadd.f32 %v1733_v49, %v1621_v38  ;;  %v1846_v16 = vpop.f32.mrf.mxu3  ;;  %v1514_v38 = vadd.f32 %v8044_v61, %v7509_v4  ;;  %v8133_v49 = vld [vmem:[#allocation2 + $0xe2] sm:$0xff] }
 0x1e1   : > { %2362 = vmatmul.f32.gmra.mxu0 %v8057_v12 }
 0x1e2   : > { %v1847_v36 = vadd.f32 %v1846_v16, %v1734_v11 }
 0x1e3   : > { %v1626_v34 = vpop.f32.mrf.mxu1 }
 0x1e4   : > { %v8110_v60 = vadd.f32 %v1959_v1, %v1847_v36  ;;  %2139 = vmatmul.f32.gmra.mxu2 %v8039_v29  ;;  %v2622_v1 = vld [vmem:[#allocation2 + $0x1] sm:$0xff]  ;;  %v1627_v16 = vadd.f32 %v1626_v34, %v1514_v38  ;;  %v4867_v38 = vld [vmem:[#allocation2 + $0xa] sm:$0xff] }
 0x1e5   : > { %2252 = vmatmul.f32.gmra.mxu3 %v8054_v56  ;;  %2848 = vst.msk [vmem:[#allocation3 + $0x50] sm:$0xff] %vm2525_vm1, %v4867_v38 }
 0x1e6   : > { %v1962_v24 = vpop.f32.mrf.mxu0  ;;  %2029 = vmatmul.f32.gmra.mxu1 %v8057_v12  ;;  %v2623_v12 = vld [vmem:[#allocation2 + $0x9] sm:$0xff] }
 0x1e7   : > { %v1736_v58 = vpop.f32.mrf.mxu2  ;;  %v6751_v11 = vpack.i.bf16 %v2623_v12, %v2622_v1 }
 0x1e8   : > { %v1737_v0 = vadd.f32 %v1736_v58, %v1624_v21  ;;  %v1849_v43 = vpop.f32.mrf.mxu3 }
 0x1e9   : > { %2365 = vmatmul.f32.gmra.mxu0 %v8071_v31  ;;  %6752 = vrot.lane.b32.xlu0 %v6751_v11, %s6792_s21 }
 0x1ea   : > { %v1850_v29 = vadd.f32 %v1849_v43, %v1737_v0  ;;  %v8149_v43 = vld [vmem:[#allocation2 + $0xf2] sm:$0xff] }
 0x1eb   : > { %v1629_v14 = vpop.f32.mrf.mxu1 }
 0x1ec   : > { %v8127_v56 = vadd.f32 %v1962_v24, %v1850_v29  ;;  %2142 = vmatmul.f32.gmra.mxu2 %v8061_v5  ;;  %v8138_v24 = vld [vmem:[#allocation2 + $0xf8] sm:$0xff]  ;;  %v4866_v29 = vld [vmem:[#allocation2 + $0x2] sm:$0xff] }
 0x1ed   : > { %2255 = vmatmul.f32.gmra.mxu3 %v8068_v41  ;;  %v1517_v41 = vadd.f32 %v8044_v61, %v7537_v18  ;;  %v6766_v12 = vpack.i.bf16 %v4867_v38, %v4866_v29 }
 0x1ee   : > { %v1965_v36 = vpop.f32.mrf.mxu0  ;;  %2032 = vmatmul.f32.gmra.mxu1 %v8071_v31  ;;  %v8146_v31 = vld [vmem:[#allocation2 + $0xf9] sm:$0xff] }
 0x1ef   : > { %v1739_v55 = vpop.f32.mrf.mxu2  ;;  %v1630_v34 = vadd.f32 %v1629_v14, %v1517_v41  ;;  %6767 = vrot.lane.b32.xlu1 %v6766_v12, %s6792_s21  ;;  %v8158_v14 = vld [vmem:[#allocation2 + $0x108] sm:$0xff]  ;;  %v3421_v41 = vld [vmem:[#allocation2 + $0x199] sm:$0xff]  ;;  %v8181_v12 = vld [vmem:[#allocation2 + $0x111] sm:$0xff] }
 0x1f0   : > { %v1740_v4 = vadd.f32 %v1739_v55, %v1627_v16  ;;  %v1852_v23 = vpop.f32.mrf.mxu3  ;;  %v8166_v55 = vld [vmem:[#allocation2 + $0x109] sm:$0xff]  ;;  %910 = vst [vmem:[#allocation3 + $0x8a8] sm:$0xff] %v3421_v41 }
 0x1f1   : > { %2368 = vmatmul.f32.gmra.mxu0 %v8088_v25  ;;  %6762 = vrot.lane.b32.xlu0 %v6751_v11, %s6793_s22  ;;  %v1520_v11 = vadd.f32 %v8044_v61, %v7565_v8 }
 0x1f2   : > { %v1853_v5 = vadd.f32 %v1852_v23, %v1740_v4 }
 0x1f3   : > { %v1632_v21 = vpop.f32.mrf.mxu1 }
 0x1f4   : > { %v8142_v58 = vadd.f32 %v1965_v36, %v1853_v5  ;;  %2145 = vmatmul.f32.gmra.mxu2 %v8075_v19  ;;  %v3818_v19 = vld [vmem:[%s10852_s3 + $0x58] sm:$0xff]  ;;  %v1633_v4 = vadd.f32 %v1632_v21, %v1520_v11  ;;  %v8173_v21 = vld [vmem:[#allocation2 + $0x110] sm:$0xff] }
 0x1f5   : > { %2258 = vmatmul.f32.gmra.mxu3 %v8085_v45  ;;  %3983 = vmatpush.msrb.mxu1 %v3818_v19  ;;  %v8169_v5 = vld [vmem:[#allocation2 + $0xfa] sm:$0xff]  ;;  %v8184_v19 = vld [vmem:[#allocation2 + $0x10a] sm:$0xff] }
 0x1f6   : > { %v1968_v0 = vpop.f32.mrf.mxu0  ;;  %2035 = vmatmul.f32.gmra.mxu1 %v8088_v25 }
 0x1f7   : > { %v1742_v1 = vpop.f32.mrf.mxu2 }
 0x1f8   : > { %v1743_v18 = vadd.f32 %v1742_v1, %v1630_v34  ;;  %v1855_v16 = vpop.f32.mrf.mxu3  ;;  %v3422_v34 = vld [vmem:[#allocation2 + $0x1a1] sm:$0xff] }
 0x1f9   : > { %2371 = vmatmul.f32.gmra.mxu0 %v8102_v51  ;;  %v6756_v38 = vpack.i.bf16 %v3422_v34, %v3421_v41  ;;  %911 = vst [vmem:[#allocation3 + $0x8f0] sm:$0xff] %v3422_v34  ;;  %v8198_v41 = vld [vmem:[#allocation2 + $0x121] sm:$0xff] }
 0x1fa   : > { %v1856_v45 = vadd.f32 %v1855_v16, %v1743_v18 }
 0x1fb   : > { %v1635_v25 = vpop.f32.mrf.mxu1  ;;  %6757 = vrot.lane.b32.xlu2 %v6756_v38, %s6792_s21 }
 0x1fc   : > { %v8162_v36 = vadd.f32 %v1968_v0, %v1856_v45  ;;  %2148 = vmatmul.f32.gmra.mxu2 %v8092_v37 }
 0x1fd   : > { %2261 = vmatmul.f32.gmra.mxu3 %v8099_v15 }
 0x1fe   : > { %v1971_v23 = vpop.f32.mrf.mxu0  ;;  %2038 = vmatmul.f32.gmra.mxu1 %v8102_v51  ;;  %v1523_v51 = vadd.f32 %v8044_v61, %v7591_v22  ;;  %v3817_v22 = vld [vmem:[%s10852_s3 + $0x50] sm:$0xff] }
 0x1ff   : > { %v1745_v29 = vpop.f32.mrf.mxu2  ;;  %3984 = vmatpush.msrb.mxu1 %v3817_v22  ;;  %v8219_v22 = vld [vmem:[#allocation2 + $0x138] sm:$0xff] }
 0x200   : > { %v1746_v1 = vadd.f32 %v1745_v29, %v1633_v4  ;;  %v1858_v8 = vpop.f32.mrf.mxu3  ;;  %v1636_v18 = vadd.f32 %v1635_v25, %v1523_v51  ;;  %v8193_v25 = vld [vmem:[#allocation2 + $0x120] sm:$0xff]  ;;  %v8200_v29 = vld [vmem:[#allocation2 + $0x112] sm:$0xff]  ;;  %v8209_v51 = vld [vmem:[#allocation2 + $0x129] sm:$0xff] }
 0x201   : > { %2374 = vmatmul.f32.gmra.mxu0 %v8119_v9 }
 0x202   : > { %v1859_v37 = vadd.f32 %v1858_v8, %v1746_v1 }
 0x203   : > { %v1994_v15 = vpop.f32.mrf.mxu1 }
 0x204   : > { %v8177_v0 = vadd.f32 %v1971_v23, %v1859_v37  ;;  %2151 = vmatmul.f32.gmra.mxu2 %v8106_v50 }
 0x205   : > { %2264 = vmatmul.f32.gmra.mxu3 %v8116_v6 }
 0x206   : > { %v1974_v16 = vpop.f32.mrf.mxu0  ;;  %2041 = vmatmul.f32.gmra.mxu1 %v8119_v9  ;;  %v1995_v9 = vadd.f32 %v1994_v15, %v7628_v63 }
 0x207   : > { %v1748_v45 = vpop.f32.mrf.mxu2 }
 0x208   : > { %v1749_v11 = vadd.f32 %v1748_v45, %v1636_v18  ;;  %v1861_v4 = vpop.f32.mrf.mxu3 }
 0x209   : > { %2377 = vmatmul.f32.gmra.mxu0 %v8133_v49 }
 0x20a   : > { %v1862_v61 = vadd.f32 %v1861_v4, %v1749_v11 }
 0x20b   : > { %v1997_v50 = vpop.f32.mrf.mxu1 }
 0x20c   : > { %v8190_v6 = vadd.f32 %v1974_v16, %v1862_v61  ;;  %2154 = vmatmul.f32.gmra.mxu2 %v8123_v52  ;;  %v1998_v63 = vadd.f32 %v1997_v50, %v7649_v39  ;;  %v8211_v16 = vld [vmem:[#allocation2 + $0x122] sm:$0xff] }
 0x20d   : > { %2267 = vmatmul.f32.gmra.mxu3 %v8130_v46  ;;  %v8204_v46 = vld [vmem:[#allocation2 + $0x128] sm:$0xff] }
 0x20e   : > { %v2333_v23 = vpop.f32.mrf.mxu0  ;;  %2044 = vmatmul.f32.gmra.mxu1 %v8133_v49  ;;  %v3816_v39 = vld [vmem:[%s10852_s3 + $0x48] sm:$0xff] }
 0x20f   : > { %v2107_v34 = vpop.f32.mrf.mxu2  ;;  %3985 = vmatpush.msrb.mxu1 %v3816_v39 }
 0x210   : > { %v2108_v38 = vadd.f32 %v2107_v34, %v1995_v9  ;;  %v2220_v1 = vpop.f32.mrf.mxu3 }
 0x211   : > { %2380 = vmatmul.f32.gmra.mxu0 %v8149_v43 }
 0x212   : > { %v2221_v8 = vadd.f32 %v2220_v1, %v2108_v38  ;;  %v8226_v38 = vld [vmem:[#allocation2 + $0x12a] sm:$0xff] }
 0x213   : > { %v2000_v52 = vpop.f32.mrf.mxu1 }
 0x214   : > { %v2334_v37 = vadd.f32 %v2333_v23, %v2221_v8  ;;  %2157 = vmatmul.f32.gmra.mxu2 %v8138_v24  ;;  %v2001_v61 = vadd.f32 %v2000_v52, %v7676_v20  ;;  %v8224_v23 = vld [vmem:[#allocation2 + $0x139] sm:$0xff] }
 0x215   : > { %2270 = vmatmul.f32.gmra.mxu3 %v8146_v31 }
 0x216   : > { %vm2429_vm2 = vcmp.ge.f32.partialorder %v2334_v37, 0.0  ;;  %v2461_v49 = vmul.f32 0.01, %v2334_v37  ;;  %v2336_v15 = vpop.f32.mrf.mxu0  ;;  %2047 = vmatmul.f32.gmra.mxu1 %v8149_v43 }
 0x217   : > { %v2110_v18 = vpop.f32.mrf.mxu2 }
 0x218   : > { %v2493_v45 = vsel %vm2429_vm2, %v2334_v37, %v2461_v49  ;;  %v2111_v11 = vadd.f32 %v2110_v18, %v1998_v63  ;;  %v2223_v4 = vpop.f32.mrf.mxu3 }
 0x219   : > { %2526 = vst.msk [vmem:[#allocation2 + $0x19] sm:$0xff] %vm2525_vm1, %v2493_v45  ;;  %2383 = vmatmul.f32.gmra.mxu0 %v8169_v5 }
 0x21a   : > { %v2224_v24 = vadd.f32 %v2223_v4, %v2111_v11  ;;  %v8240_v4 = vld [vmem:[#allocation2 + $0x141] sm:$0xff] }
 0x21b   : > { %v2003_v31 = vpop.f32.mrf.mxu1 }
 0x21c   : > { %v2337_v43 = vadd.f32 %v2336_v15, %v2224_v24  ;;  %2160 = vmatmul.f32.gmra.mxu2 %v8158_v14  ;;  %v8234_v15 = vld [vmem:[#allocation2 + $0x140] sm:$0xff]  ;;  %v2004_v18 = vadd.f32 %v2003_v31, %v7697_v44 }
 0x21d   : > { %2273 = vmatmul.f32.gmra.mxu3 %v8166_v55  ;;  %v8242_v24 = vld [vmem:[#allocation2 + $0x13a] sm:$0xff] }
 0x21e   : > { %vm2430_vm3 = vcmp.ge.f32.partialorder %v2337_v43, 0.0  ;;  %v2462_v50 = vmul.f32 0.01, %v2337_v43  ;;  %v2339_v9 = vpop.f32.mrf.mxu0  ;;  %2050 = vmatmul.f32.gmra.mxu1 %v8169_v5  ;;  %v3815_v44 = vld [vmem:[%s10852_s3 + $0x40] sm:$0xff] }
 0x21f   : > { %v2113_v34 = vpop.f32.mrf.mxu2  ;;  %3986 = vmatpush.msrb.mxu1 %v3815_v44  ;;  %v8277_v44 = vld [vmem:[#allocation2 + $0x159] sm:$0xff] }
 0x220   : > { %v2494_v1 = vsel %vm2430_vm3, %v2337_v43, %v2462_v50  ;;  %v2114_v8 = vadd.f32 %v2113_v34, %v2001_v61  ;;  %v2226_v37 = vpop.f32.mrf.mxu3  ;;  %v2879_v14 = vld [vmem:[#allocation2 + $0x18] sm:$0xff] }
 0x221   : > { %v2624_v63 = vld [vmem:[#allocation2 + $0x19] sm:$0xff]  ;;  %2527 = vst.msk [vmem:[#allocation2 + $0x21] sm:$0xff] %vm2525_vm1, %v2494_v1  ;;  %2943 = vrot.lane.b32.xlu1 %v2879_v14, %s6792_s21  ;;  %2386 = vmatmul.f32.gmra.mxu0 %v8184_v19  ;;  %v8254_v14 = vld [vmem:[#allocation2 + $0x150] sm:$0xff] }
 0x222   : > { %v2560_v49 = vld [vmem:[#allocation2 + $0x18] sm:$0xff]  ;;  %2690 = vrot.lane.b32.xlu0 %v2624_v63, %s6792_s21  ;;  %v2227_v55 = vadd.f32 %v2226_v37, %v2114_v8 }
 0x223   : > { %v3071_v20 = vld [vmem:[#allocation2 + $0x19] sm:$0xff]  ;;  %v2006_v5 = vpop.f32.mrf.mxu1  ;;  %2592 = vst.msk [vmem:[#allocation3 + $0x90] sm:$0xff] %vm2525_vm1, %v2560_v49 }
 0x224   : > { %v2340_v52 = vadd.f32 %v2339_v9, %v2227_v55  ;;  %2163 = vmatmul.f32.gmra.mxu2 %v8173_v21  ;;  %3103 = vst.msk [vmem:[#allocation3 + $0x10] sm:$0xff] %vm2525_vm1, %v3071_v20  ;;  %v2007_v63 = vadd.f32 %v2006_v5, %v7724_v40  ;;  %v8260_v55 = vld [vmem:[#allocation2 + $0x151] sm:$0xff] }
 0x225   : > { %2276 = vmatmul.f32.gmra.mxu3 %v8181_v12 }
 0x226   : > { %vm2431_vm4 = vcmp.ge.f32.partialorder %v2340_v52, 0.0  ;;  %v2463_v45 = vmul.f32 0.01, %v2340_v52  ;;  %v2342_v11 = vpop.f32.mrf.mxu0  ;;  %2053 = vmatmul.f32.gmra.mxu1 %v8184_v19 }
 0x227   : > { %v2116_v39 = vpop.f32.mrf.mxu2 }
 0x228   : > { %v2495_v43 = vsel %vm2431_vm4, %v2340_v52, %v2463_v45  ;;  %v2117_v21 = vadd.f32 %v2116_v39, %v2004_v18  ;;  %v2229_v61 = vpop.f32.mrf.mxu3  ;;  %v2880_v50 = vld [vmem:[#allocation2 + $0x20] sm:$0xff] }
 0x229   : > { %v2625_v9 = vld [vmem:[#allocation2 + $0x21] sm:$0xff]  ;;  %2528 = vst.msk [vmem:[#allocation2 + $0x31] sm:$0xff] %vm2525_vm1, %v2495_v43  ;;  %2945 = vrot.lane.b32.xlu2 %v2880_v50, %s6792_s21  ;;  %2389 = vmatmul.f32.gmra.mxu0 %v8200_v29 }
 0x22a   : > { %v3135_v34 = vld [vmem:[#allocation2 + $0x1a] sm:$0xff]  ;;  %2692 = vrot.lane.b32.xlu1 %v2625_v9, %s6792_s21  ;;  %v2230_v19 = vadd.f32 %v2229_v61, %v2117_v21  ;;  %v8263_v18 = vld [vmem:[#allocation2 + $0x142] sm:$0xff] }
 0x22b   : > { %v2561_v12 = vld [vmem:[#allocation2 + $0x20] sm:$0xff]  ;;  %3199 = vrot.lane.b32.xlu0 %v3135_v34, %s6792_s21  ;;  %v2009_v1 = vpop.f32.mrf.mxu1  ;;  %v8271_v61 = vld [vmem:[#allocation2 + $0x158] sm:$0xff] }
 0x22c   : > { %v3072_v31 = vld [vmem:[#allocation2 + $0x21] sm:$0xff]  ;;  %2593 = vst.msk [vmem:[#allocation3 + $0xd8] sm:$0xff] %vm2525_vm1, %v2561_v12  ;;  %v2343_v37 = vadd.f32 %v2342_v11, %v2230_v19  ;;  %2166 = vmatmul.f32.gmra.mxu2 %v8193_v25  ;;  %v2010_v50 = vadd.f32 %v2009_v1, %v7745_v47  ;;  %v8280_v19 = vld [vmem:[#allocation2 + $0x152] sm:$0xff] }
 0x22d   : > { %v2817_v8 = vld [vmem:[#allocation2 + $0x1a] sm:$0xff]  ;;  %3104 = vst.msk [vmem:[#allocation3 + $0x58] sm:$0xff] %vm2525_vm1, %v3072_v31  ;;  %2279 = vmatmul.f32.gmra.mxu3 %v8198_v41  ;;  %v3136_v39 = vld [vmem:[#allocation2 + $0x22] sm:$0xff] }
 0x22e   : > { %vm2432_vm5 = vcmp.ge.f32.partialorder %v2343_v37, 0.0  ;;  %v2464_v49 = vmul.f32 0.01, %v2343_v37  ;;  %v2345_v20 = vpop.f32.mrf.mxu0  ;;  %2056 = vmatmul.f32.gmra.mxu1 %v8200_v29  ;;  %2849 = vst.msk [vmem:[#allocation3 + $0x98] sm:$0xff] %vm2525_vm1, %v2817_v8 }
 0x22f   : > { %v2119_v52 = vpop.f32.mrf.mxu2 }
 0x230   : > { %v2496_v25 = vsel %vm2432_vm5, %v2343_v37, %v2464_v49  ;;  %v2120_v45 = vadd.f32 %v2119_v52, %v2007_v63  ;;  %v2232_v11 = vpop.f32.mrf.mxu3  ;;  %v2881_v43 = vld [vmem:[#allocation2 + $0x30] sm:$0xff] }
 0x231   : > { %v3073_v41 = vld [vmem:[#allocation2 + $0x31] sm:$0xff]  ;;  %2529 = vst.msk [vmem:[#allocation2 + $0x39] sm:$0xff] %vm2525_vm1, %v2496_v25  ;;  %2392 = vmatmul.f32.gmra.mxu0 %v8211_v16  ;;  %v8295_v25 = vld [vmem:[#allocation2 + $0x168] sm:$0xff] }
 0x232   : > { %3201 = vrot.lane.b32.xlu1 %v3136_v39, %s6792_s21  ;;  %v3327_v40 = vld [vmem:[#allocation2 + $0x30] sm:$0xff]  ;;  %v2233_v5 = vadd.f32 %v2232_v11, %v2120_v45  ;;  %3105 = vst.msk [vmem:[#allocation3 + $0xa0] sm:$0xff] %vm2525_vm1, %v3073_v41 }
 0x233   : > { %2947 = vrot.lane.b32.xlu0 %v2881_v43, %s6792_s21  ;;  %v2012_v29 = vpop.f32.mrf.mxu1  ;;  %3359 = vst.msk [vmem:[#allocation3 + $0x18] sm:$0xff] %vm2525_vm1, %v3327_v40  ;;  %v8301_v43 = vld [vmem:[#allocation2 + $0x169] sm:$0xff] }
 0x234   : > { %v2346_v21 = vadd.f32 %v2345_v20, %v2233_v5  ;;  %2169 = vmatmul.f32.gmra.mxu2 %v8204_v46  ;;  %2594 = vst.msk [vmem:[#allocation3 + $0x120] sm:$0xff] %vm2525_vm1, %v3327_v40  ;;  %v2013_v45 = vadd.f32 %v2012_v29, %v7772_v57  ;;  %v8304_v40 = vld [vmem:[#allocation2 + $0x15a] sm:$0xff] }
 0x235   : > { %2282 = vmatmul.f32.gmra.mxu3 %v8209_v51  ;;  %v3391_v51 = vld [vmem:[#allocation2 + $0x31] sm:$0xff] }
 0x236   : > { %vm2433_vm6 = vcmp.ge.f32.partialorder %v2346_v21, 0.0  ;;  %v2465_v9 = vmul.f32 0.01, %v2346_v21  ;;  %v2348_v34 = vpop.f32.mrf.mxu0  ;;  %2059 = vmatmul.f32.gmra.mxu1 %v8211_v16  ;;  %v3814_v16 = vld [vmem:[%s10852_s3 + $0x38] sm:$0xff] }
 0x237   : > { %v2122_v12 = vpop.f32.mrf.mxu2  ;;  %3987 = vmatpush.msrb.mxu1 %v3814_v16 }
 0x238   : > { %v2497_v46 = vsel %vm2433_vm6, %v2346_v21, %v2465_v9  ;;  %v2123_v31 = vadd.f32 %v2122_v12, %v2010_v50  ;;  %v2235_v8 = vpop.f32.mrf.mxu3  ;;  %v8282_v37 = vld [vmem:[#allocation2 + $0x39] sm:$0xff] }
 0x239   : > { %2530 = vst.msk [vmem:[#allocation2 + $0x49] sm:$0xff] %vm2525_vm1, %v2497_v46  ;;  %2696 = vrot.lane.b32.xlu2 %v8282_v37, %s6792_s21  ;;  %v2882_v47 = vld [vmem:[#allocation2 + $0x38] sm:$0xff]  ;;  %2395 = vmatmul.f32.gmra.mxu0 %v8226_v38  ;;  %v8313_v46 = vld [vmem:[#allocation2 + $0x170] sm:$0xff] }
 0x23a   : > { %2694 = vrot.lane.b32.xlu1 %v3391_v51, %s6792_s21  ;;  %v2819_v1 = vld [vmem:[#allocation2 + $0x32] sm:$0xff]  ;;  %v2236_v63 = vadd.f32 %v2235_v8, %v2123_v31  ;;  %2595 = vst.msk [vmem:[#allocation3 + $0x168] sm:$0xff] %vm2525_vm1, %v2882_v47  ;;  %v3138_v57 = vld [vmem:[#allocation2 + $0x3a] sm:$0xff] }
 0x23b   : > { %3455 = vrot.lane.b32.xlu0 %v3391_v51, %s6792_s21  ;;  %v2015_v49 = vpop.f32.mrf.mxu1  ;;  %v3074_v20 = vld [vmem:[#allocation2 + $0x39] sm:$0xff]  ;;  %2851 = vst.msk [vmem:[#allocation3 + $0x128] sm:$0xff] %vm2525_vm1, %v2819_v1  ;;  %v8322_v1 = vld [vmem:[#allocation2 + $0x16a] sm:$0xff] }
 0x23c   : > { %v2349_v52 = vadd.f32 %v2348_v34, %v2236_v63  ;;  %2172 = vmatmul.f32.gmra.mxu2 %v8219_v22  ;;  %3106 = vst.msk [vmem:[#allocation3 + $0xe8] sm:$0xff] %vm2525_vm1, %v3074_v20  ;;  %v3137_v50 = vld [vmem:[#allocation2 + $0x32] sm:$0xff]  ;;  %v2016_v31 = vadd.f32 %v2015_v49, %v7793_v10 }
 0x23d   : > { %2285 = vmatmul.f32.gmra.mxu3 %v8224_v23  ;;  %v2818_v23 = vld [vmem:[#allocation2 + $0x22] sm:$0xff]  ;;  %v3328_v34 = vld [vmem:[#allocation2 + $0x38] sm:$0xff]  ;;  %v3813_v10 = vld [vmem:[%s10852_s3 + $0x30] sm:$0xff] }
 0x23e   : > { %vm2434_vm7 = vcmp.ge.f32.partialorder %v2349_v52, 0.0  ;;  %v2466_v11 = vmul.f32 0.01, %v2349_v52  ;;  %v2351_v39 = vpop.f32.mrf.mxu0  ;;  %2062 = vmatmul.f32.gmra.mxu1 %v8226_v38  ;;  %2850 = vst.msk [vmem:[#allocation3 + $0xe0] sm:$0xff] %vm2525_vm1, %v2818_v23 }
 0x23f   : > { %v2125_v41 = vpop.f32.mrf.mxu2  ;;  %3360 = vst.msk [vmem:[#allocation3 + $0x60] sm:$0xff] %vm2525_vm1, %v3328_v34  ;;  %3988 = vmatpush.msrb.mxu1 %v3813_v10 }
 0x240   : > { %v2498_v22 = vsel %vm2434_vm7, %v2349_v52, %v2466_v11  ;;  %v2126_v5 = vadd.f32 %v2125_v41, %v2013_v45  ;;  %v2238_v21 = vpop.f32.mrf.mxu3  ;;  %v2883_v9 = vld [vmem:[#allocation2 + $0x48] sm:$0xff]  ;;  %v8335_v41 = vld [vmem:[#allocation2 + $0x180] sm:$0xff] }
 0x241   : > { %2531 = vst.msk [vmem:[#allocation2 + $0x51] sm:$0xff] %vm2525_vm1, %v2498_v22  ;;  %3203 = vrot.lane.b32.xlu2 %v3137_v50, %s6792_s21  ;;  %2398 = vmatmul.f32.gmra.mxu0 %v8242_v24  ;;  %v2628_v52 = vld [vmem:[#allocation2 + $0x49] sm:$0xff] }
 0x242   : > { %2949 = vrot.lane.b32.xlu1 %v2882_v47, %s6792_s21  ;;  %v2239_v38 = vadd.f32 %v2238_v21, %v2126_v5  ;;  %2596 = vst.msk [vmem:[#allocation3 + $0x1b0] sm:$0xff] %vm2525_vm1, %v2883_v9  ;;  %v8319_v47 = vld [vmem:[#allocation2 + $0x171] sm:$0xff]  ;;  %v3329_v11 = vld [vmem:[#allocation2 + $0x48] sm:$0xff] }
 0x243   : > { %3205 = vrot.lane.b32.xlu0 %v3138_v57, %s6792_s21  ;;  %v2018_v29 = vpop.f32.mrf.mxu1  ;;  %v8341_v21 = vld [vmem:[#allocation2 + $0x181] sm:$0xff]  ;;  %3361 = vst.msk [vmem:[#allocation3 + $0xa8] sm:$0xff] %vm2525_vm1, %v3329_v11  ;;  %v8344_v57 = vld [vmem:[#allocation2 + $0x172] sm:$0xff] }
 0x244   : > { %v2352_v12 = vadd.f32 %v2351_v39, %v2239_v38  ;;  %2175 = vmatmul.f32.gmra.mxu2 %v8234_v15  ;;  %v2019_v22 = vadd.f32 %v2018_v29, %v7820_v17 }
 0x245   : > { %2288 = vmatmul.f32.gmra.mxu3 %v8240_v4 }
 0x246   : > { %vm2435_vm8 = vcmp.ge.f32.partialorder %v2352_v12, 0.0  ;;  %v2467_v8 = vmul.f32 0.01, %v2352_v12  ;;  %v2354_v51 = vpop.f32.mrf.mxu0  ;;  %2065 = vmatmul.f32.gmra.mxu1 %v8242_v24 }
 0x247   : > { %v2128_v16 = vpop.f32.mrf.mxu2 }
 0x248   : > { %v2499_v15 = vsel %vm2435_vm8, %v2352_v12, %v2467_v8  ;;  %v2129_v63 = vadd.f32 %v2128_v16, %v2016_v31  ;;  %v2241_v20 = vpop.f32.mrf.mxu3  ;;  %v3076_v4 = vld [vmem:[#allocation2 + $0x51] sm:$0xff]  ;;  %v8356_v8 = vld [vmem:[#allocation2 + $0x188] sm:$0xff] }
 0x249   : > { %2532 = vst.msk [vmem:[#allocation2 + $0x61] sm:$0xff] %vm2525_vm1, %v2499_v15  ;;  %2698 = vrot.lane.b32.xlu2 %v2628_v52, %s6792_s21  ;;  %2401 = vmatmul.f32.gmra.mxu0 %v8263_v18  ;;  %v3330_v49 = vld [vmem:[#allocation2 + $0x50] sm:$0xff] }
 0x24a   : > { %3459 = vrot.lane.b32.xlu1 %v2628_v52, %s6792_s21  ;;  %v2242_v24 = vadd.f32 %v2241_v20, %v2129_v63  ;;  %3108 = vst.msk [vmem:[#allocation3 + $0x178] sm:$0xff] %vm2525_vm1, %v3076_v4  ;;  %v3139_v34 = vld [vmem:[#allocation2 + $0x4a] sm:$0xff]  ;;  %v2822_v12 = vld [vmem:[#allocation2 + $0x52] sm:$0xff]  ;;  %v8365_v20 = vld [vmem:[#allocation2 + $0x182] sm:$0xff] }
 0x24b   : > { %3457 = vrot.lane.b32.xlu0 %v8282_v37, %s6792_s21  ;;  %v2021_v45 = vpop.f32.mrf.mxu1  ;;  %3362 = vst.msk [vmem:[#allocation3 + $0xf0] sm:$0xff] %vm2525_vm1, %v3330_v49  ;;  %v8348_v17 = vld [vmem:[#allocation2 + $0x51] sm:$0xff]  ;;  %v8362_v15 = vld [vmem:[#allocation2 + $0x189] sm:$0xff] }
 0x24c   : > { %v2355_v39 = vadd.f32 %v2354_v51, %v2242_v24  ;;  %2178 = vmatmul.f32.gmra.mxu2 %v8254_v14  ;;  %2597 = vst.msk [vmem:[#allocation3 + $0x1f8] sm:$0xff] %vm2525_vm1, %v3330_v49  ;;  %v3140_v4 = vld [vmem:[#allocation2 + $0x52] sm:$0xff]  ;;  %v3812_v49 = vld [vmem:[%s10852_s3 + $0x28] sm:$0xff] }
 0x24d   : > { %2291 = vmatmul.f32.gmra.mxu3 %v8260_v55  ;;  %v3075_v55 = vld [vmem:[#allocation2 + $0x49] sm:$0xff]  ;;  %2854 = vst.msk [vmem:[#allocation3 + $0x200] sm:$0xff] %vm2525_vm1, %v2822_v12  ;;  %3989 = vmatpush.msrb.mxu1 %v3812_v49 }
 0x24e   : > { %vm2436_vm9 = vcmp.ge.f32.partialorder %v2355_v39, 0.0  ;;  %v2468_v37 = vmul.f32 0.01, %v2355_v39  ;;  %v2357_v5 = vpop.f32.mrf.mxu0  ;;  %2068 = vmatmul.f32.gmra.mxu1 %v8263_v18  ;;  %3107 = vst.msk [vmem:[#allocation3 + $0x130] sm:$0xff] %vm2525_vm1, %v3075_v55  ;;  %v3837_v55 = vld [vmem:[%s10852_s3 + $0xf0] sm:$0xff] }
 0x24f   : > { %v2131_v50 = vpop.f32.mrf.mxu2 }
 0x250   : > { %v2500_v14 = vsel %vm2436_vm9, %v2355_v39, %v2468_v37  ;;  %v2132_v23 = vadd.f32 %v2131_v50, %v2019_v22  ;;  %v2244_v38 = vpop.f32.mrf.mxu3  ;;  %v2630_v24 = vld [vmem:[#allocation2 + $0x61] sm:$0xff] }
 0x251   : > { %2533 = vst.msk [vmem:[#allocation2 + $0x69] sm:$0xff] %vm2525_vm1, %v2500_v14  ;;  %2951 = vrot.lane.b32.xlu2 %v2883_v9, %s6792_s21  ;;  %2404 = vmatmul.f32.gmra.mxu0 %v8280_v19  ;;  %v2022_v9 = vadd.f32 %v2021_v45, %v7843_v27  ;;  %v2884_v27 = vld [vmem:[#allocation2 + $0x50] sm:$0xff]  ;;  %v8377_v11 = vld [vmem:[#allocation2 + $0x60] sm:$0xff]  ;;  %v3838_v14 = vld [vmem:[%s10852_s3 + $0xf8] sm:$0xff] }
 0x252   : > { %3207 = vrot.lane.b32.xlu1 %v3139_v34, %s6792_s21  ;;  %v2245_v18 = vadd.f32 %v2244_v38, %v2132_v23  ;;  %2598 = vst.msk [vmem:[#allocation3 + $0x240] sm:$0xff] %vm2525_vm1, %v8377_v11  ;;  %4092 = vmatpush.msrb.mxu2 %v3838_v14 }
 0x253   : > { %2700 = vrot.lane.b32.xlu0 %v8348_v17, %s6792_s21  ;;  %v2024_v29 = vpop.f32.mrf.mxu1  ;;  %3363 = vst.msk [vmem:[#allocation3 + $0x138] sm:$0xff] %vm2525_vm1, %v8377_v11  ;;  %v3833_v11 = vld [vmem:[%s10852_s3 + $0xd0] sm:$0xff] }
 0x254   : > { %v2358_v31 = vadd.f32 %v2357_v5, %v2245_v18  ;;  %2181 = vmatmul.f32.gmra.mxu2 %v8271_v61  ;;  %v2025_v23 = vadd.f32 %v2024_v29, %v7874_v30  ;;  %v2885_v29 = vld [vmem:[#allocation2 + $0x60] sm:$0xff] }
 0x255   : > { %2294 = vmatmul.f32.gmra.mxu3 %v8277_v44  ;;  %v2820_v44 = vld [vmem:[#allocation2 + $0x3a] sm:$0xff]  ;;  %v6758_v22 = vpop.permute.xlu2 %6757  ;;  %4093 = vmatpush.msrb.mxu2 %v3837_v55 }
 0x256   : > { %vm2437_vm10 = vcmp.ge.f32.partialorder %v2358_v31, 0.0  ;;  %v2469_v51 = vmul.f32 0.01, %v2358_v31  ;;  %v2360_v16 = vpop.f32.mrf.mxu0  ;;  %2071 = vmatmul.f32.gmra.mxu1 %v8280_v19  ;;  %v6760_v5 = vunpack.i.h.bf16 %v6758_v22  ;;  %v6759_v50 = vunpack.i.l.bf16 %v6758_v22  ;;  %2852 = vst.msk [vmem:[#allocation3 + $0x170] sm:$0xff] %vm2525_vm1, %v2820_v44  ;;  %v3834_v44 = vld [vmem:[%s10852_s3 + $0xd8] sm:$0xff]  ;;  %v3077_v22 = vld [vmem:[#allocation2 + $0x61] sm:$0xff] }
 0x257   : > { %v2134_v63 = vpop.f32.mrf.mxu2  ;;  %3109 = vst.msk [vmem:[#allocation3 + $0x1c0] sm:$0xff] %vm2525_vm1, %v3077_v22 }
 0x258   : > { %v2501_v61 = vsel %vm2437_vm10, %v2358_v31, %v2469_v51  ;;  %v2135_v52 = vadd.f32 %v2134_v63, %v2022_v9  ;;  %v2247_v10 = vpop.f32.mrf.mxu3  ;;  %v8370_v19 = vld [vmem:[#allocation2 + $0x68] sm:$0xff]  ;;  %3581 = vst.msk [vmem:[#allocation3 + $0x888] sm:$0xff] %vm2782_vm11, %v6759_v50 }
 0x259   : > { %2534 = vst.msk [vmem:[#allocation2 + $0x79] sm:$0xff] %vm2525_vm1, %v2501_v61  ;;  %3209 = vrot.lane.b32.xlu2 %v3140_v4, %s6792_s21  ;;  %2407 = vmatmul.f32.gmra.mxu0 %v8304_v40  ;;  %v3836_v9 = vld [vmem:[%s10852_s3 + $0xe8] sm:$0xff] }
 0x25a   : > { %2702 = vrot.lane.b32.xlu1 %v2630_v24, %s6792_s21  ;;  %v2248_v45 = vadd.f32 %v2247_v10, %v2135_v52  ;;  %2599 = vst.msk [vmem:[#allocation3 + $0x288] sm:$0xff] %vm2525_vm1, %v8370_v19  ;;  %4094 = vmatpush.msrb.mxu2 %v3836_v9  ;;  %v3835_v52 = vld [vmem:[%s10852_s3 + $0xe0] sm:$0xff]  ;;  %v2821_v4 = vld [vmem:[#allocation2 + $0x4a] sm:$0xff] }
 0x25b   : > { %2953 = vrot.lane.b32.xlu0 %v2884_v27, %s6792_s21  ;;  %v2027_v39 = vpop.f32.mrf.mxu1  ;;  %3582 = vst.msk [vmem:[#allocation3 + $0x8d0] sm:$0xff] %vm2782_vm11, %v6760_v5  ;;  %v8438_v5 = vld [vmem:[#allocation2 + $0x69] sm:$0xff] }
 0x25c   : > { %v2361_v37 = vadd.f32 %v2360_v16, %v2248_v45  ;;  %2184 = vmatmul.f32.gmra.mxu2 %v8295_v25  ;;  %v2028_v27 = vadd.f32 %v2027_v39, %v7892_v28  ;;  %v8434_v45 = vld [vmem:[#allocation2 + $0x19a] sm:$0xff]  ;;  %v3853_v28 = vld [vmem:[%s10852_s3 + $0x170] sm:$0xff]  ;;  %2853 = vst.msk [vmem:[#allocation3 + $0x1b8] sm:$0xff] %vm2525_vm1, %v2821_v4 }
 0x25d   : > { %2297 = vmatmul.f32.gmra.mxu3 %v8301_v43  ;;  %v8393_v43 = vld [vmem:[#allocation2 + $0x18a] sm:$0xff]  ;;  %4095 = vmatpush.msrb.mxu2 %v3835_v52 }
 0x25e   : > { %vm2438_vm12 = vcmp.ge.f32.partialorder %v2361_v37, 0.0  ;;  %v2470_v38 = vmul.f32 0.01, %v2361_v37  ;;  %v2363_v34 = vpop.f32.mrf.mxu0  ;;  %2074 = vmatmul.f32.gmra.mxu1 %v8304_v40  ;;  %v6753_v40 = vpop.permute.xlu0 %6752 }
 0x25f   : > { %v2137_v25 = vpop.f32.mrf.mxu2  ;;  %v6755_v16 = vunpack.i.h.bf16 %v6753_v40  ;;  %v6754_v63 = vunpack.i.l.bf16 %v6753_v40  ;;  %4096 = vmatpush.msrb.mxu2 %v3834_v44  ;;  %v3832_v40 = vld [vmem:[%s10852_s3 + $0xc8] sm:$0xff] }
 0x260   : > { %v2502_v18 = vsel %vm2438_vm12, %v2361_v37, %v2470_v38  ;;  %v2138_v12 = vadd.f32 %v2137_v25, %v2025_v23  ;;  %v2250_v30 = vpop.f32.mrf.mxu3  ;;  %v8398_v31 = vld [vmem:[#allocation2 + $0x78] sm:$0xff]  ;;  %v3142_v23 = vld [vmem:[#allocation2 + $0x6a] sm:$0xff] }
 0x261   : > { %2535 = vst.msk [vmem:[#allocation2 + $0x81] sm:$0xff] %vm2525_vm1, %v2502_v18  ;;  %3461 = vrot.lane.b32.xlu2 %v8348_v17, %s6792_s21  ;;  %2410 = vmatmul.f32.gmra.mxu0 %v8322_v1  ;;  %v3811_v17 = vld [vmem:[%s10852_s3 + $0x20] sm:$0xff]  ;;  %v3809_v38 = vld [vmem:[%s10852_s3 + $0x10] sm:$0xff]  ;;  %v3808_v18 = vld [vmem:[%s10852_s3 + $0x8] sm:$0xff] }
 0x262   : > { %2955 = vrot.lane.b32.xlu1 %v2885_v29, %s6792_s21  ;;  %v2251_v51 = vadd.f32 %v2250_v30, %v2138_v12  ;;  %3365 = vst.msk [vmem:[#allocation3 + $0x1c8] sm:$0xff] %vm2525_vm1, %v8398_v31  ;;  %3990 = vmatpush.msrb.mxu1 %v3811_v17  ;;  %v3079_v39 = vld [vmem:[#allocation2 + $0x79] sm:$0xff]  ;;  %v3078_v25 = vld [vmem:[#allocation2 + $0x69] sm:$0xff] }
 0x263   : > { %3463 = vrot.lane.b32.xlu0 %v2630_v24, %s6792_s21  ;;  %v8409_v61 = vpop.f32.mrf.mxu1  ;;  %2784 = vst.msk [vmem:[#allocation3 + $0x48] sm:$0xff] %vm2782_vm11, %v6755_v16  ;;  %v3810_v24 = vld [vmem:[%s10852_s3 + $0x18] sm:$0xff]  ;;  %v3852_v12 = vld [vmem:[%s10852_s3 + $0x168] sm:$0xff]  ;;  %4097 = vmatpush.msrb.mxu2 %v3833_v11  ;;  %v3851_v16 = vld [vmem:[%s10852_s3 + $0x160] sm:$0xff] }
 0x264   : > { %v2364_v10 = vadd.f32 %v2363_v34, %v2251_v51  ;;  %2187 = vmatmul.f32.gmra.mxu2 %v8313_v46  ;;  %2783 = vst.msk [vmem:[#allocation3] sm:$0xff] %vm2782_vm11, %v6754_v63  ;;  %v3854_v46 = vld [vmem:[%s10852_s3 + $0x178] sm:$0xff]  ;;  %3991 = vmatpush.msrb.mxu1 %v3810_v24  ;;  %v3141_v34 = vld [vmem:[#allocation2 + $0x62] sm:$0xff] }
 0x265   : > { %2300 = vmatmul.f32.gmra.mxu3 %v8319_v47  ;;  %3111 = vst.msk [vmem:[#allocation3 + $0x250] sm:$0xff] %vm2525_vm1, %v3079_v39  ;;  %v2568_v30 = vld [vmem:[#allocation2 + $0x78] sm:$0xff]  ;;  %v3807_v51 = vld [vmem:[%s10852_s3] sm:$0xff]  ;;  %4098 = vmatpush.msrb.mxu2 %v3832_v40  ;;  %v3332_v24 = vld [vmem:[#allocation2 + $0x68] sm:$0xff] }
 0x266   : > { %vm2439_vm13 = vcmp.ge.f32.partialorder %v2364_v10, 0.0  ;;  %v2471_v49 = vmul.f32 0.01, %v2364_v10  ;;  %v2366_v47 = vpop.f32.mrf.mxu0  ;;  %2077 = vmatmul.f32.gmra.mxu1 %v8322_v1  ;;  %4205 = vmatpush.msrb.mxu3 %v3854_v46  ;;  %3110 = vst.msk [vmem:[#allocation3 + $0x208] sm:$0xff] %vm2525_vm1, %v3078_v25  ;;  %v3831_v63 = vld [vmem:[%s10852_s3 + $0xc0] sm:$0xff] }
 0x267   : > { %v2140_v37 = vpop.f32.mrf.mxu2  ;;  %3992 = vmatpush.msrb.mxu1 %v3809_v38  ;;  %2600 = vst.msk [vmem:[#allocation3 + $0x2d0] sm:$0xff] %vm2525_vm1, %v2568_v30  ;;  %4099 = vmatpush.msrb.mxu2 %v3831_v63  ;;  %v3847_v40 = vld [vmem:[%s10852_s3 + $0x140] sm:$0xff]  ;;  %v3826_v63 = vld [vmem:[%s10852_s3 + $0x98] sm:$0xff] }
 0x268   : > { %v2503_v50 = vsel %vm2439_vm13, %v2364_v10, %v2471_v49  ;;  %v2141_v14 = vadd.f32 %v2140_v37, %v2028_v27  ;;  %v2253_v1 = vpop.f32.mrf.mxu3  ;;  %4206 = vmatpush.msrb.mxu3 %v3853_v28  ;;  %v8485_v10 = vld [vmem:[#allocation2 + $0x1a2] sm:$0xff]  ;;  %v3829_v37 = vld [vmem:[%s10852_s3 + $0xb0] sm:$0xff]  ;;  %v2825_v28 = vld [vmem:[#allocation2 + $0x7a] sm:$0xff]  ;;  %3364 = vst.msk [vmem:[#allocation3 + $0x180] sm:$0xff] %vm2525_vm1, %v3332_v24 }
 0x269   : > { %2536 = vst.msk [vmem:[#allocation2 + $0x91] sm:$0xff] %vm2525_vm1, %v2503_v50  ;;  %2704 = vrot.lane.b32.xlu2 %v8438_v5, %s6792_s21  ;;  %2413 = vmatmul.f32.gmra.mxu0 %v8344_v57  ;;  %v8497_v49 = vld [vmem:[#allocation2] sm:$0xff]  ;;  %v3868_v24 = vld [vmem:[%s10852_s3 + $0x1e8] sm:$0xff] }
 0x26a   : > { %3213 = vrot.lane.b32.xlu1 %v3142_v23, %s6792_s21  ;;  %v2254_v55 = vadd.f32 %v2253_v1, %v2141_v14  ;;  %4207 = vmatpush.msrb.mxu3 %v3852_v12  ;;  %v8487_v4 = vld [vmem:[#allocation3 + $0x48] sm:$0xff]  ;;  %v3828_v14 = vld [vmem:[%s10852_s3 + $0xa8] sm:$0xff]  ;;  %2857 = vst.msk [vmem:[#allocation3 + $0x2d8] sm:$0xff] %vm2525_vm1, %v2825_v28  ;;  %v2569_v38 = vld [vmem:[#allocation2 + $0x80] sm:$0xff] }
 0x26b   : > { %3211 = vrot.lane.b32.xlu0 %v3141_v34, %s6792_s21  ;;  %v8463_v29 = vpop.f32.mrf.mxu1  ;;  %3993 = vmatpush.msrb.mxu1 %v3808_v18  ;;  %4642 = vst.msk [vmem:[#allocation3 + $0x48] sm:$0xff] %vm4576_vm15, %v8497_v49  ;;  %v2823_v1 = vld [vmem:[#allocation2 + $0x62] sm:$0xff]  ;;  %v3143_v28 = vld [vmem:[#allocation2 + $0x7a] sm:$0xff] }
 0x26c   : > { %v2367_v9 = vadd.f32 %v2366_v47, %v2254_v55  ;;  %2190 = vmatmul.f32.gmra.mxu2 %v8335_v41  ;;  %v2031_v41 = vadd.f32 %v8409_v61, %v7903_v35  ;;  %4208 = vmatpush.msrb.mxu3 %v3851_v16  ;;  %v3830_v35 = vld [vmem:[%s10852_s3 + $0xb8] sm:$0xff]  ;;  %v3848_v23 = vld [vmem:[%s10852_s3 + $0x148] sm:$0xff]  ;;  %2855 = vst.msk [vmem:[#allocation3 + $0x248] sm:$0xff] %vm2525_vm1, %v2823_v1 }
 0x26d   : > { %2303 = vmatmul.f32.gmra.mxu3 %v8341_v21  ;;  %3994 = vmatpush.msrb.mxu1 %v3807_v51  ;;  %v2632_v47 = vld [vmem:[#allocation2 + $0x79] sm:$0xff]  ;;  %v8535_v55 = vld [vmem:[#allocation2 + $0x81] sm:$0xff]  ;;  %2601 = vst.msk [vmem:[#allocation3 + $0x318] sm:$0xff] %vm2525_vm1, %v2569_v38  ;;  %v2824_v51 = vld [vmem:[#allocation2 + $0x6a] sm:$0xff] }
 0x26e   : > { %vm2440_vm14 = vcmp.ge.f32.partialorder %v2367_v9, 0.0  ;;  %v2472_v17 = vmul.f32 0.01, %v2367_v9  ;;  %v2369_v52 = vpop.f32.mrf.mxu0  ;;  %2080 = vmatmul.f32.gmra.mxu1 %v8344_v57  ;;  %v3850_v57 = vld [vmem:[%s10852_s3 + $0x158] sm:$0xff]  ;;  %4100 = vmatpush.msrb.mxu2 %v3830_v35  ;;  %v3080_v18 = vld [vmem:[#allocation2 + $0x81] sm:$0xff]  ;;  %2856 = vst.msk [vmem:[#allocation3 + $0x290] sm:$0xff] %vm2525_vm1, %v2824_v51 }
 0x26f   : > { %v2143_v21 = vpop.f32.mrf.mxu2  ;;  %4209 = vmatpush.msrb.mxu3 %v3850_v57  ;;  %3112 = vst.msk [vmem:[#allocation3 + $0x298] sm:$0xff] %vm2525_vm1, %v3080_v18  ;;  %v3647_v18 = vld [vmem:[#allocation3] sm:$0xff] }
 0x270   : > { %v2504_v44 = vsel %vm2440_vm14, %v2367_v9, %v2472_v17  ;;  %v2144_v46 = vadd.f32 %v2143_v21, %v2031_v41  ;;  %v2256_v27 = vpop.f32.mrf.mxu3  ;;  %v8495_v61 = vld [vmem:[#allocation2 + $0x90] sm:$0xff]  ;;  %4101 = vmatpush.msrb.mxu2 %v3829_v37  ;;  %v3846_v17 = vld [vmem:[%s10852_s3 + $0x138] sm:$0xff]  ;;  %3366 = vst.msk [vmem:[#allocation3 + $0x210] sm:$0xff] %vm2525_vm1, %v2569_v38  ;;  %v3867_v38 = vld [vmem:[%s10852_s3 + $0x1e0] sm:$0xff] }
 0x271   : > { %2537 = vst.msk [vmem:[#allocation2 + $0x99] sm:$0xff] %vm2525_vm1, %v2504_v44  ;;  %2957 = vrot.lane.b32.xlu2 %v8370_v19, %s6792_s21  ;;  %2416 = vmatmul.f32.gmra.mxu0 %v8365_v20  ;;  %v3849_v19 = vld [vmem:[%s10852_s3 + $0x150] sm:$0xff] }
 0x272   : > { %3465 = vrot.lane.b32.xlu1 %v8438_v5, %s6792_s21  ;;  %v2257_v22 = vadd.f32 %v2256_v27, %v2144_v46  ;;  %2602 = vst.msk [vmem:[#allocation3 + $0x360] sm:$0xff] %vm2525_vm1, %v8495_v61  ;;  %v2815_v5 = vld [vmem:[#allocation2 + $0x2] sm:$0xff]  ;;  %4210 = vmatpush.msrb.mxu3 %v3849_v19  ;;  %v3869_v9 = vld [vmem:[%s10852_s3 + $0x1f0] sm:$0xff]  ;;  %v6777_v46 = vld [vmem:[#allocation3 + $0x8a8] sm:$0xff] }
 0x273   : > { %2706 = vrot.lane.b32.xlu0 %v2632_v47, %s6792_s21  ;;  %v8513_v39 = vpop.f32.mrf.mxu1  ;;  %2847 = vst.msk [vmem:[#allocation3 + $0x8] sm:$0xff] %vm2525_vm1, %v2815_v5  ;;  %4102 = vmatpush.msrb.mxu2 %v3828_v14  ;;  %v3825_v21 = vld [vmem:[%s10852_s3 + $0x90] sm:$0xff]  ;;  %v2888_v19 = vld [vmem:[#allocation2 + $0x80] sm:$0xff] }
 0x274   : > { %v2370_v50 = vadd.f32 %v2369_v52, %v2257_v22  ;;  %2193 = vmatmul.f32.gmra.mxu2 %v8356_v8  ;;  %v2034_v8 = vadd.f32 %v8463_v29, %v7919_v33  ;;  %4211 = vmatpush.msrb.mxu3 %v3848_v23  ;;  %v3335_v44 = vld [vmem:[#allocation2 + $0x90] sm:$0xff]  ;;  %v2037_v57 = vadd.f32 %v8513_v39, %v7933_v2  ;;  %v3824_v2 = vld [vmem:[%s10852_s3 + $0x88] sm:$0xff] }
 0x275   : > { %2306 = vmatmul.f32.gmra.mxu3 %v8362_v15  ;;  %v3870_v15 = vld [vmem:[%s10852_s3 + $0x1f8] sm:$0xff]  ;;  %v3845_v27 = vld [vmem:[%s10852_s3 + $0x130] sm:$0xff]  ;;  %3367 = vst.msk [vmem:[#allocation3 + $0x258] sm:$0xff] %vm2525_vm1, %v3335_v44  ;;  %v3144_v23 = vld [vmem:[#allocation2 + $0x82] sm:$0xff] }
 0x276   : > { %vm2441_vm0 = vcmp.ge.f32.partialorder %v2370_v50, 0.0  ;;  %v2473_v11 = vmul.f32 0.01, %v2370_v50  ;;  %v2372_v34 = vpop.f32.mrf.mxu0  ;;  %2083 = vmatmul.f32.gmra.mxu1 %v8365_v20  ;;  %4318 = vmatpush.msrb.mxu0 %v3870_v15  ;;  %v3827_v20 = vld [vmem:[%s10852_s3 + $0xa0] sm:$0xff]  ;;  %v3081_v5 = vld [vmem:[#allocation2 + $0x91] sm:$0xff] }
 0x277   : > { %v2146_v25 = vpop.f32.mrf.mxu2  ;;  %4103 = vmatpush.msrb.mxu2 %v3827_v20  ;;  %4212 = vmatpush.msrb.mxu3 %v3847_v40  ;;  %3113 = vst.msk [vmem:[#allocation3 + $0x2e0] sm:$0xff] %vm2525_vm1, %v3081_v5  ;;  %v6778_v40 = vld [vmem:[#allocation3 + $0x8f0] sm:$0xff] }
 0x278   : > { %v2505_v12 = vsel %vm2441_vm0, %v2370_v50, %v2473_v11  ;;  %v2147_v33 = vadd.f32 %v2146_v25, %v2034_v8  ;;  %v2259_v30 = vpop.f32.mrf.mxu3  ;;  %v8538_v29 = vld [vmem:[#allocation2 + $0x99] sm:$0xff]  ;;  %4319 = vmatpush.msrb.mxu0 %v3869_v9 }
 0x279   : > { %2538 = vst.msk [vmem:[#allocation2 + $0xa9] sm:$0xff] %vm2525_vm1, %v2505_v12  ;;  %3467 = vrot.lane.b32.xlu2 %v2632_v47, %s6792_s21  ;;  %2419 = vmatmul.f32.gmra.mxu0 %v8393_v43  ;;  %v8567_v52 = vld [vmem:[#allocation2 + $0x98] sm:$0xff]  ;;  %v3823_v11 = vld [vmem:[%s10852_s3 + $0x80] sm:$0xff] }
 0x27a   : > { %2708 = vrot.lane.b32.xlu1 %v8535_v55, %s6792_s21  ;;  %v2260_v16 = vadd.f32 %v2259_v30, %v2147_v33  ;;  %3114 = vst.msk [vmem:[#allocation3 + $0x328] sm:$0xff] %vm2525_vm1, %v8538_v29  ;;  %4104 = vmatpush.msrb.mxu2 %v3826_v63  ;;  %v2571_v35 = vld [vmem:[#allocation2 + $0x98] sm:$0xff]  ;;  %v3843_v12 = vld [vmem:[%s10852_s3 + $0x120] sm:$0xff] }
 0x27b   : > { %2959 = vrot.lane.b32.xlu0 %v8398_v31, %s6792_s21  ;;  %v8562_v41 = vpop.f32.mrf.mxu1  ;;  %3368 = vst.msk [vmem:[#allocation3 + $0x2a0] sm:$0xff] %vm2525_vm1, %v8567_v52  ;;  %4213 = vmatpush.msrb.mxu3 %v3846_v17  ;;  %v2828_v39 = vld [vmem:[#allocation2 + $0x9a] sm:$0xff]  ;;  %v2827_v51 = vld [vmem:[#allocation2 + $0x92] sm:$0xff] }
 0x27c   : > { %v2373_v31 = vadd.f32 %v2372_v34, %v2260_v16  ;;  %2196 = vmatmul.f32.gmra.mxu2 %v8497_v49  ;;  %4320 = vmatpush.msrb.mxu0 %v3868_v24  ;;  %2603 = vst.msk [vmem:[#allocation3 + $0x3a8] sm:$0xff] %vm2525_vm1, %v2571_v35  ;;  %v2826_v34 = vld [vmem:[#allocation2 + $0x82] sm:$0xff]  ;;  %v3866_v30 = vld [vmem:[%s10852_s3 + $0x1d8] sm:$0xff]  ;;  %v2040_v16 = vadd.f32 %v8562_v41, %v7944_v59  ;;  %v3841_v59 = vld [vmem:[%s10852_s3 + $0x110] sm:$0xff]  ;;  %v8641_v35 = vpop.permute.xlu0 %6762 }
 0x27d   : > { %2309 = vmatmul.f32.gmra.mxu3 %v6777_v46  ;;  %4105 = vmatpush.msrb.mxu2 %v3825_v21  ;;  %2860 = vst.msk [vmem:[#allocation3 + $0x3b0] sm:$0xff] %vm2525_vm1, %v2828_v39  ;;  %v3842_v9 = vld [vmem:[%s10852_s3 + $0x118] sm:$0xff]  ;;  %v3865_v41 = vld [vmem:[%s10852_s3 + $0x1d0] sm:$0xff] }
 0x27e   : > { %vm2442_vm2 = vcmp.ge.f32.partialorder %v2373_v31, 0.0  ;;  %v2474_v47 = vmul.f32 0.01, %v2373_v31  ;;  %v2375_v22 = vpop.f32.mrf.mxu0  ;;  %2086 = vmatmul.f32.gmra.mxu1 %v8393_v43  ;;  %4214 = vmatpush.msrb.mxu3 %v3845_v27  ;;  %v3844_v43 = vld [vmem:[%s10852_s3 + $0x128] sm:$0xff]  ;;  %2858 = vst.msk [vmem:[#allocation3 + $0x320] sm:$0xff] %vm2525_vm1, %v2826_v34  ;;  %v8639_v27 = vpop.permute.xlu1 %6767 }
 0x27f   : > { %v2149_v37 = vpop.f32.mrf.mxu2  ;;  %4106 = vmatpush.msrb.mxu2 %v3824_v2  ;;  %4321 = vmatpush.msrb.mxu0 %v3867_v38  ;;  %2859 = vst.msk [vmem:[#allocation3 + $0x368] sm:$0xff] %vm2525_vm1, %v2827_v51  ;;  %v3862_v38 = vld [vmem:[%s10852_s3 + $0x1b8] sm:$0xff] }
 0x280   : > { %v2506_v50 = vsel %vm2442_vm2, %v2373_v31, %v2474_v47  ;;  %v2150_v14 = vadd.f32 %v2149_v37, %v2037_v57  ;;  %v2262_v1 = vpop.f32.mrf.mxu3  ;;  %4215 = vmatpush.msrb.mxu3 %v3844_v43  ;;  %v8612_v33 = vld [vmem:[#allocation2 + $0xa8] sm:$0xff]  ;;  %v2634_v31 = vld [vmem:[#allocation2 + $0x91] sm:$0xff]  ;;  %v3584_v51 = vld [vmem:[#allocation2 + $0x3a] sm:$0xff] }
 0x281   : > { %2539 = vst.msk [vmem:[#allocation2 + $0xb1] sm:$0xff] %vm2525_vm1, %v2506_v50  ;;  %3215 = vrot.lane.b32.xlu2 %v3143_v28, %s6792_s21  ;;  %2422 = vmatmul.f32.gmra.mxu0 %v8434_v45  ;;  %v3337_v20 = vld [vmem:[#allocation2 + $0xa8] sm:$0xff]  ;;  %v3863_v50 = vld [vmem:[%s10852_s3 + $0x1c0] sm:$0xff] }
 0x282   : > { %2961 = vrot.lane.b32.xlu1 %v2888_v19, %s6792_s21  ;;  %v2263_v8 = vadd.f32 %v2262_v1, %v2150_v14  ;;  %4107 = vmatpush.msrb.mxu2 %v3823_v11  ;;  %2604 = vst.msk [vmem:[#allocation3 + $0x3f0] sm:$0xff] %vm2525_vm1, %v8612_v33  ;;  %v3083_v46 = vld [vmem:[#allocation2 + $0xa9] sm:$0xff]  ;;  %v3583_v1 = vld [vmem:[#allocation2 + $0x32] sm:$0xff] }
 0x283   : > { %3217 = vrot.lane.b32.xlu0 %v3144_v23, %s6792_s21  ;;  %v2946_v15 = vpop.permute.xlu2 %2945  ;;  %v8607_v25 = vpop.f32.mrf.mxu1  ;;  %4216 = vmatpush.msrb.mxu3 %v3843_v12  ;;  %3369 = vst.msk [vmem:[#allocation3 + $0x2e8] sm:$0xff] %vm2525_vm1, %v3337_v20  ;;  %v3864_v37 = vld [vmem:[%s10852_s3 + $0x1c8] sm:$0xff] }
 0x284   : > { %v2376_v45 = vadd.f32 %v2375_v22, %v2263_v8  ;;  %3040 = vst.msk [vmem:[#allocation3 + $0x50] sm:$0xff] %vm2782_vm11, %v2946_v15  ;;  %2199 = vmatmul.f32.gmra.mxu2 %v8497_v49  ;;  %4322 = vmatpush.msrb.mxu0 %v3866_v30  ;;  %v3840_v22 = vld [vmem:[%s10852_s3 + $0x108] sm:$0xff]  ;;  %v2043_v2 = vadd.f32 %v8607_v25, %v7956_v7  ;;  %v3145_v7 = vld [vmem:[#allocation2 + $0x92] sm:$0xff] }
 0x285   : > { %2312 = vmatmul.f32.gmra.mxu3 %v6778_v40  ;;  %3115 = vst.msk [vmem:[#allocation3 + $0x370] sm:$0xff] %vm2525_vm1, %v3083_v46  ;;  %v3857_v46 = vld [vmem:[%s10852_s3 + $0x190] sm:$0xff] }
 0x286   : > { %vm2443_vm3 = vcmp.ge.f32.partialorder %v2376_v45, 0.0  ;;  %v2475_v49 = vmul.f32 0.01, %v2376_v45  ;;  %v2378_v63 = vpop.f32.mrf.mxu0  ;;  %3995 = vmatmul.f32.vlgmr.msrb.gmra.mxu1 %v3647_v18  ;;  %4217 = vmatpush.msrb.mxu3 %v3842_v9  ;;  %3615 = vst.msk [vmem:[#allocation3 + $0x20] sm:$0xff] %vm2525_vm1, %v3583_v1  ;;  %v3859_v9 = vld [vmem:[%s10852_s3 + $0x1a0] sm:$0xff] }
 0x287   : > { %v2152_v17 = vpop.f32.mrf.mxu2  ;;  %4323 = vmatpush.msrb.mxu0 %v3865_v41  ;;  %v2636_v41 = vld [vmem:[#allocation2 + $0xa9] sm:$0xff]  ;;  %3616 = vst.msk [vmem:[#allocation3 + $0x68] sm:$0xff] %vm2525_vm1, %v3584_v51  ;;  %v3855_v1 = vld [vmem:[%s10852_s3 + $0x180] sm:$0xff] }
 0x288   : > { %v2507_v21 = vsel %vm2443_vm3, %v2376_v45, %v2475_v49  ;;  %v2153_v24 = vadd.f32 %v2152_v17, %v2040_v16  ;;  %v2265_v44 = vpop.f32.mrf.mxu3  ;;  %v8643_v57 = vld [vmem:[#allocation2 + $0xb0] sm:$0xff]  ;;  %4218 = vmatpush.msrb.mxu3 %v3841_v59  ;;  %v3146_v59 = vld [vmem:[#allocation2 + $0x9a] sm:$0xff] }
 0x289   : > { %2540 = vst.msk [vmem:[#allocation2 + $0xc1] sm:$0xff] %vm2525_vm1, %v2507_v21  ;;  %2710 = vrot.lane.b32.xlu2 %v2634_v31, %s6792_s21  ;;  %2425 = vmatmul.f32.gmra.mxu0 %v8485_v10  ;;  %v3084_v19 = vld [vmem:[#allocation2 + $0xb1] sm:$0xff]  ;;  %v3839_v10 = vld [vmem:[%s10852_s3 + $0x100] sm:$0xff] }
 0x28a   : > { %3471 = vrot.lane.b32.xlu1 %v2634_v31, %s6792_s21  ;;  %v2266_v47 = vadd.f32 %v2265_v44, %v2153_v24  ;;  %2605 = vst.msk [vmem:[#allocation3 + $0x438] sm:$0xff] %vm2525_vm1, %v8643_v57  ;;  %v2830_v14 = vld [vmem:[#allocation2 + $0xb2] sm:$0xff]  ;;  %4219 = vmatpush.msrb.mxu3 %v3840_v22 }
 0x28b   : > { %3469 = vrot.lane.b32.xlu0 %v8535_v55, %s6792_s21  ;;  %v2045_v28 = vpop.f32.mrf.mxu1  ;;  %v2829_v55 = vld [vmem:[#allocation2 + $0xaa] sm:$0xff]  ;;  %3116 = vst.msk [vmem:[#allocation3 + $0x3b8] sm:$0xff] %vm2525_vm1, %v3084_v19  ;;  %4324 = vmatpush.msrb.mxu0 %v3864_v37  ;;  %v3858_v31 = vld [vmem:[%s10852_s3 + $0x198] sm:$0xff] }
 0x28c   : > { %v2379_v5 = vadd.f32 %v2378_v63, %v2266_v47  ;;  %3370 = vst.msk [vmem:[#allocation3 + $0x330] sm:$0xff] %vm2525_vm1, %v8643_v57  ;;  %4220 = vmatpush.msrb.mxu3 %v3839_v10  ;;  %v2046_v16 = vadd.f32 %v2045_v28, %v7970_v62  ;;  %v3856_v19 = vld [vmem:[%s10852_s3 + $0x188] sm:$0xff] }
 0x28d   : > { %2861 = vst.msk [vmem:[#allocation3 + $0x3f8] sm:$0xff] %vm2525_vm1, %v2829_v55  ;;  %4325 = vmatpush.msrb.mxu0 %v3863_v50 }
 0x28e   : > { %vm2444_vm4 = vcmp.ge.f32.partialorder %v2379_v5, 0.0  ;;  %v2476_v43 = vmul.f32 0.01, %v2379_v5  ;;  %v2381_v39 = vpop.f32.mrf.mxu0  ;;  %3998 = vmatmul.f32.gmra.mxu1 %v8487_v4  ;;  %2862 = vst.msk [vmem:[#allocation3 + $0x440] sm:$0xff] %vm2525_vm1, %v2830_v14  ;;  %v3861_v4 = vld [vmem:[%s10852_s3 + $0x1b0] sm:$0xff] }
 0x28f   : > { %v2155_v23 = vpop.f32.mrf.mxu2  ;;  %4326 = vmatpush.msrb.mxu0 %v3862_v38 }
 0x290   : > { %v2508_v8 = vsel %vm2444_vm4, %v2379_v5, %v2476_v43  ;;  %v2156_v11 = vadd.f32 %v2155_v23, %v2043_v2  ;;  %v2268_v34 = vpop.f32.mrf.mxu3  ;;  %v8674_v15 = vld [vmem:[#allocation2 + $0xc1] sm:$0xff] }
 0x291   : > { %v8676_v25 = vld [vmem:[#allocation2 + $0xc0] sm:$0xff]  ;;  %2541 = vst.msk [vmem:[#allocation2 + $0xc9] sm:$0xff] %vm2525_vm1, %v2508_v8  ;;  %2963 = vrot.lane.b32.xlu2 %v8495_v61, %s6792_s21  ;;  %v3860_v61 = vld [vmem:[%s10852_s3 + $0x1a8] sm:$0xff]  ;;  %4327 = vmatpush.msrb.mxu0 %v3861_v4 }
 0x292   : > { %3219 = vrot.lane.b32.xlu1 %v3145_v7, %s6792_s21  ;;  %v2269_v18 = vadd.f32 %v2268_v34, %v2156_v11  ;;  %3371 = vst.msk [vmem:[#allocation3 + $0x378] sm:$0xff] %vm2525_vm1, %v8676_v25  ;;  %v3585_v4 = vld [vmem:[#allocation2 + $0x4a] sm:$0xff] }
 0x293   : > { %2712 = vrot.lane.b32.xlu0 %v8538_v29, %s6792_s21  ;;  %v2944_v12 = vpop.permute.xlu1 %2943  ;;  %3117 = vst.msk [vmem:[#allocation3 + $0x400] sm:$0xff] %vm2525_vm1, %v8674_v15  ;;  %v2697_v20 = vpop.permute.xlu2 %2696  ;;  %4328 = vmatpush.msrb.mxu0 %v3860_v61 }
 0x294   : > { %v2691_v45 = vpop.permute.xlu0 %2690  ;;  %v2382_v30 = vadd.f32 %v2381_v39, %v2269_v18  ;;  %3039 = vst.msk [vmem:[#allocation3 + $0x8] sm:$0xff] %vm2782_vm11, %v2944_v12  ;;  %v2048_v40 = vpop.f32.mrf.mxu1 }
 0x295   : > { %2785 = vst.msk [vmem:[#allocation3 + $0x90] sm:$0xff] %vm2782_vm11, %v2691_v45  ;;  %4329 = vmatpush.msrb.mxu0 %v3859_v9  ;;  %v2049_v43 = vadd.f32 %v2048_v40, %v7984_v26  ;;  %v3653_v45 = vld [vmem:[#allocation3 + $0x50] sm:$0xff] }
 0x296   : > { %vm2445_vm5 = vcmp.ge.f32.partialorder %v2382_v30, 0.0  ;;  %v2477_v49 = vmul.f32 0.01, %v2382_v30  ;;  %2788 = vst.msk [vmem:[#allocation3 + $0x168] sm:$0xff] %vm2782_vm11, %v2697_v20  ;;  %v2384_v63 = vpop.f32.mrf.mxu0 }
 0x297   : > { %v2158_v17 = vpop.f32.mrf.mxu2  ;;  %2606 = vst.msk [vmem:[#allocation3 + $0x480] sm:$0xff] %vm2525_vm1, %v8676_v25  ;;  %4330 = vmatpush.msrb.mxu0 %v3858_v31 }
 0x298   : > { %v2509_v21 = vsel %vm2445_vm5, %v2382_v30, %v2477_v49  ;;  %v2159_v24 = vadd.f32 %v2158_v17, %v2046_v16  ;;  %v2271_v44 = vpop.f32.mrf.mxu3  ;;  %v8707_v62 = vld [vmem:[#allocation2 + $0xc2] sm:$0xff]  ;;  %v2832_v8 = vld [vmem:[#allocation2 + $0xca] sm:$0xff]  ;;  %3617 = vst.msk [vmem:[#allocation3 + $0xb0] sm:$0xff] %vm2525_vm1, %v3585_v4 }
 0x299   : > { %2542 = vst.msk [vmem:[#allocation2 + $0xd9] sm:$0xff] %vm2525_vm1, %v2509_v21  ;;  %3221 = vrot.lane.b32.xlu2 %v3146_v59, %s6792_s21  ;;  %v8716_v47 = vld [vmem:[#allocation2 + $0xc8] sm:$0xff]  ;;  %4331 = vmatpush.msrb.mxu0 %v3857_v46  ;;  %v3586_v59 = vld [vmem:[#allocation2 + $0x52] sm:$0xff] }
 0x29a   : > { %2714 = vrot.lane.b32.xlu1 %v2636_v41, %s6792_s21  ;;  %v2272_v22 = vadd.f32 %v2271_v44, %v2159_v24  ;;  %2863 = vst.msk [vmem:[#allocation3 + $0x488] sm:$0xff] %vm2525_vm1, %v8707_v62  ;;  %v3340_v2 = vld [vmem:[#allocation2 + $0xc8] sm:$0xff]  ;;  %v2637_v24 = vld [vmem:[#allocation2 + $0xb1] sm:$0xff] }
 0x29b   : > { %2965 = vrot.lane.b32.xlu0 %v8567_v52, %s6792_s21  ;;  %v3648_v28 = vld [vmem:[#allocation3 + $0x8] sm:$0xff]  ;;  %2607 = vst.msk [vmem:[#allocation3 + $0x4c8] sm:$0xff] %vm2525_vm1, %v8716_v47  ;;  %v3204_v10 = vpop.permute.xlu2 %3203  ;;  %v3086_v52 = vld [vmem:[#allocation2 + $0xc9] sm:$0xff]  ;;  %4332 = vmatpush.msrb.mxu0 %v3856_v19 }
 0x29c   : > { %v2693_v37 = vpop.permute.xlu1 %2692  ;;  %v2385_v55 = vadd.f32 %v2384_v63, %v2272_v22  ;;  %v3657_v50 = vld [vmem:[#allocation3 + $0x90] sm:$0xff]  ;;  %4108 = vmatmul.f32.vlgmr.msrb.gmra.mxu2 %v3648_v28  ;;  %v2051_v14 = vpop.f32.mrf.mxu1  ;;  %3297 = vst.msk [vmem:[#allocation3 + $0xa0] sm:$0xff] %vm2782_vm11, %v3204_v10  ;;  %v3148_v44 = vld [vmem:[#allocation2 + $0xb2] sm:$0xff] }
 0x29d   : > { %2786 = vst.msk [vmem:[#allocation3 + $0xd8] sm:$0xff] %vm2782_vm11, %v2693_v37  ;;  %v3200_v5 = vpop.permute.xlu0 %3199  ;;  %4001 = vmatmul.f32.gmra.mxu1 %v3657_v50  ;;  %4333 = vmatpush.msrb.mxu0 %v3855_v1  ;;  %v2052_v9 = vadd.f32 %v2051_v14, %v7998_v53  ;;  %v3147_v53 = vld [vmem:[#allocation2 + $0xaa] sm:$0xff] }
 0x29e   : > { %3295 = vst.msk [vmem:[#allocation3 + $0x10] sm:$0xff] %vm2782_vm11, %v3200_v5  ;;  %vm2446_vm6 = vcmp.ge.f32.partialorder %v2385_v55, 0.0  ;;  %v2478_v39 = vmul.f32 0.01, %v2385_v55  ;;  %v2387_v38 = vpop.f32.mrf.mxu0 }
 0x29f   : > { %v2161_v23 = vpop.f32.mrf.mxu2  ;;  %3118 = vst.msk [vmem:[#allocation3 + $0x448] sm:$0xff] %vm2525_vm1, %v3086_v52 }
 0x2a0   : > { %v2510_v11 = vsel %vm2446_vm6, %v2385_v55, %v2478_v39  ;;  %v2162_v34 = vadd.f32 %v2161_v23, %v2049_v43  ;;  %v2274_v7 = vpop.f32.mrf.mxu3  ;;  %3372 = vst.msk [vmem:[#allocation3 + $0x3c0] sm:$0xff] %vm2525_vm1, %v3340_v2  ;;  %v8745_v40 = vld [vmem:[#allocation2 + $0xd8] sm:$0xff] }
 0x2a1   : > { %2543 = vst.msk [vmem:[#allocation2 + $0xe1] sm:$0xff] %vm2525_vm1, %v2510_v11  ;;  %3473 = vrot.lane.b32.xlu2 %v8538_v29, %s6792_s21  ;;  %v3087_v63 = vld [vmem:[#allocation2 + $0xd9] sm:$0xff] }
 0x2a2   : > { %2967 = vrot.lane.b32.xlu1 %v8612_v33, %s6792_s21  ;;  %v2275_v26 = vadd.f32 %v2274_v7, %v2162_v34  ;;  %2864 = vst.msk [vmem:[#allocation3 + $0x4d0] sm:$0xff] %vm2525_vm1, %v2832_v8 }
 0x2a3   : > { %3475 = vrot.lane.b32.xlu0 %v2636_v41, %s6792_s21  ;;  %v2699_v30 = vpop.permute.xlu2 %2698  ;;  %2608 = vst.msk [vmem:[#allocation3 + $0x510] sm:$0xff] %vm2525_vm1, %v8745_v40 }
 0x2a4   : > { %v3202_v18 = vpop.permute.xlu1 %3201  ;;  %v3662_v12 = vld [vmem:[#allocation3 + $0xd8] sm:$0xff]  ;;  %v2388_v61 = vadd.f32 %v2387_v38, %v2275_v26  ;;  %4111 = vmatmul.f32.gmra.mxu2 %v3653_v45  ;;  %2789 = vst.msk [vmem:[#allocation3 + $0x1b0] sm:$0xff] %vm2782_vm11, %v2699_v30  ;;  %v2054_v33 = vpop.f32.mrf.mxu1 }
 0x2a5   : > { %3296 = vst.msk [vmem:[#allocation3 + $0x58] sm:$0xff] %vm2782_vm11, %v3202_v18  ;;  %v2948_v20 = vpop.permute.xlu0 %2947  ;;  %v3649_v29 = vld [vmem:[#allocation3 + $0x10] sm:$0xff]  ;;  %4004 = vmatmul.f32.gmra.mxu1 %v3662_v12  ;;  %v2055_v52 = vadd.f32 %v2054_v33, %v8012_v54 }
 0x2a6   : > { %4221 = vmatmul.f32.vlgmr.msrb.gmra.mxu3 %v3649_v29  ;;  %vm2447_vm7 = vcmp.ge.f32.partialorder %v2388_v61, 0.0  ;;  %v2479_v51 = vmul.f32 0.01, %v2388_v61  ;;  %3041 = vst.msk [vmem:[#allocation3 + $0x98] sm:$0xff] %vm2782_vm11, %v2948_v20  ;;  %v2390_v49 = vpop.f32.mrf.mxu0 }
 0x2a7   : > { %v2164_v16 = vpop.f32.mrf.mxu2  ;;  %3373 = vst.msk [vmem:[#allocation3 + $0x408] sm:$0xff] %vm2525_vm1, %v8745_v40 }
 0x2a8   : > { %v2511_v17 = vsel %vm2447_vm7, %v2388_v61, %v2479_v51  ;;  %v2165_v31 = vadd.f32 %v2164_v16, %v2052_v9  ;;  %v2277_v21 = vpop.f32.mrf.mxu3  ;;  %3119 = vst.msk [vmem:[#allocation3 + $0x490] sm:$0xff] %vm2525_vm1, %v3087_v63  ;;  %v8761_v55 = vld [vmem:[#allocation2 + $0xe1] sm:$0xff]  ;;  %v8792_v16 = vld [vmem:[#allocation2 + $0xc9] sm:$0xff] }
 0x2a9   : > { %2544 = vst.msk [vmem:[#allocation2 + $0xf1] sm:$0xff] %vm2525_vm1, %v2511_v17  ;;  %2716 = vrot.lane.b32.xlu2 %v2637_v24, %s6792_s21  ;;  %v8764_v50 = vld [vmem:[#allocation2 + $0xe0] sm:$0xff] }
 0x2aa   : > { %3225 = vrot.lane.b32.xlu1 %v3148_v44, %s6792_s21  ;;  %v2278_v41 = vadd.f32 %v2277_v21, %v2165_v31  ;;  %3618 = vst.msk [vmem:[#allocation3 + $0xf8] sm:$0xff] %vm2525_vm1, %v3586_v59  ;;  %v8770_v38 = vld [vmem:[#allocation2 + $0xe2] sm:$0xff]  ;;  %v2833_v29 = vld [vmem:[#allocation2 + $0xda] sm:$0xff] }
 0x2ab   : > { %3223 = vrot.lane.b32.xlu0 %v3147_v53, %s6792_s21  ;;  %v2952_v28 = vpop.permute.xlu2 %2951  ;;  %3120 = vst.msk [vmem:[#allocation3 + $0x4d8] sm:$0xff] %vm2525_vm1, %v8761_v55  ;;  %v3672_v31 = vld [vmem:[#allocation3 + $0x168] sm:$0xff] }
 0x2ac   : > { %v2695_v46 = vpop.permute.xlu1 %2694  ;;  %v3654_v22 = vld [vmem:[#allocation3 + $0x58] sm:$0xff]  ;;  %v2391_v37 = vadd.f32 %v2390_v49, %v2278_v41  ;;  %3043 = vst.msk [vmem:[#allocation3 + $0x128] sm:$0xff] %vm2782_vm11, %v2952_v28  ;;  %v2057_v10 = vpop.f32.mrf.mxu1  ;;  %v3878_v49 = vld [vmem:[%s10852_s3 + $0x238] sm:$0xff] }
 0x2ad   : > { %v3456_v19 = vpop.permute.xlu0 %3455  ;;  %2787 = vst.msk [vmem:[#allocation3 + $0x120] sm:$0xff] %vm2782_vm11, %v2695_v46  ;;  %v3658_v5 = vld [vmem:[#allocation3 + $0x98] sm:$0xff]  ;;  %v2058_v45 = vadd.f32 %v2057_v10, %v8029_v48  ;;  %4439 = vmatpush.msra.mxu1 %v3878_v49 }
 0x2ae   : > { %4224 = vmatmul.f32.gmra.mxu3 %v3654_v22  ;;  %vm2448_vm8 = vcmp.ge.f32.partialorder %v2391_v37, 0.0  ;;  %v2480_v14 = vmul.f32 0.01, %v2391_v37  ;;  %3551 = vst.msk [vmem:[#allocation3 + $0x18] sm:$0xff] %vm2782_vm11, %v3456_v19  ;;  %4114 = vmatmul.f32.gmra.mxu2 %v3658_v5  ;;  %v2393_v2 = vpop.f32.mrf.mxu0 }
 0x2af   : > { %v2167_v1 = vpop.f32.mrf.mxu2  ;;  %3374 = vst.msk [vmem:[#allocation3 + $0x450] sm:$0xff] %vm2525_vm1, %v8764_v50 }
 0x2b0   : > { %v2512_v43 = vsel %vm2448_vm8, %v2391_v37, %v2480_v14  ;;  %v2168_v39 = vadd.f32 %v2167_v1, %v2055_v52  ;;  %v2280_v23 = vpop.f32.mrf.mxu3  ;;  %2609 = vst.msk [vmem:[#allocation3 + $0x558] sm:$0xff] %vm2525_vm1, %v8764_v50  ;;  %v8785_v26 = vld [vmem:[#allocation2 + $0xf0] sm:$0xff]  ;;  %vm4833_vm8 = vcmask 523520  }
 0x2b1   : > { %2545 = vst.msk [vmem:[#allocation2 + $0xf9] sm:$0xff] %vm2525_vm1, %v2512_v43  ;;  %2969 = vrot.lane.b32.xlu2 %v8643_v57, %s6792_s21  ;;  %v3659_v57 = vld [vmem:[#allocation3 + $0xa0] sm:$0xff] }
 0x2b2   : > { %3477 = vrot.lane.b32.xlu1 %v2637_v24, %s6792_s21  ;;  %v2281_v54 = vadd.f32 %v2280_v23, %v2168_v39  ;;  %2866 = vst.msk [vmem:[#allocation3 + $0x560] sm:$0xff] %vm2525_vm1, %v8770_v38  ;;  %v3089_v48 = vld [vmem:[#allocation2 + $0xf1] sm:$0xff] }
 0x2b3   : > { %2718 = vrot.lane.b32.xlu0 %v8674_v15, %s6792_s21  ;;  %v3210_v7 = vpop.permute.xlu2 %3209  ;;  %2610 = vst.msk [vmem:[#allocation3 + $0x5a0] sm:$0xff] %vm2525_vm1, %v8785_v26  ;;  %v3668_v43 = vld [vmem:[#allocation3 + $0x128] sm:$0xff] }
 0x2b4   : > { %v2950_v8 = vpop.permute.xlu1 %2949  ;;  %v3667_v11 = vld [vmem:[#allocation3 + $0x120] sm:$0xff]  ;;  %v2394_v34 = vadd.f32 %v2393_v2, %v2281_v54  ;;  %3300 = vst.msk [vmem:[#allocation3 + $0x178] sm:$0xff] %vm2782_vm11, %v3210_v7  ;;  %v2060_v12 = vpop.f32.mrf.mxu1  ;;  %v3677_v2 = vld [vmem:[#allocation3 + $0x1b0] sm:$0xff] }
 0x2b5   : > { %v3206_v4 = vpop.permute.xlu0 %3205  ;;  %3042 = vst.msk [vmem:[#allocation3 + $0xe0] sm:$0xff] %vm2782_vm11, %v2950_v8  ;;  %4007 = vmatmul.f32.gmra.mxu1 %v3667_v11  ;;  %v3650_v18 = vld [vmem:[#allocation3 + $0x18] sm:$0xff]  ;;  %v2061_v46 = vadd.f32 %v2060_v12, %v8048_v32 }
 0x2b6   : > { %4227 = vmatmul.f32.gmra.mxu3 %v3659_v57  ;;  %vm2449_vm9 = vcmp.ge.f32.partialorder %v2394_v34, 0.0  ;;  %v2481_v61 = vmul.f32 0.01, %v2394_v34  ;;  %3298 = vst.msk [vmem:[#allocation3 + $0xe8] sm:$0xff] %vm2782_vm11, %v3206_v4  ;;  %4334 = vmatmul.f32.vlgmr.msrb.gmra.mxu0 %v3650_v18  ;;  %v2396_v20 = vpop.f32.mrf.mxu0  ;;  %v3150_v32 = vld [vmem:[#allocation2 + $0xca] sm:$0xff] }
 0x2b7   : > { %v2170_v30 = vpop.f32.mrf.mxu2  ;;  %3375 = vst.msk [vmem:[#allocation3 + $0x498] sm:$0xff] %vm2525_vm1, %v8785_v26 }
 0x2b8   : > { %v2513_v33 = vsel %vm2449_vm9, %v2394_v34, %v2481_v61  ;;  %v2171_v9 = vadd.f32 %v2170_v30, %v2058_v45  ;;  %v2283_v51 = vpop.f32.mrf.mxu3  ;;  %2865 = vst.msk [vmem:[#allocation3 + $0x518] sm:$0xff] %vm2525_vm1, %v2833_v29  ;;  %v8809_v59 = vld [vmem:[#allocation2 + $0xf8] sm:$0xff]  ;;  %vm5026_vm9 = vcmask 785920  }
 0x2b9   : > { %2546 = vst.msk [vmem:[#allocation2 + $0x109] sm:$0xff] %vm2525_vm1, %v2513_v33  ;;  %3479 = vrot.lane.b32.xlu2 %v8674_v15, %s6792_s21  ;;  %v8812_v41 = vld [vmem:[#allocation2 + $0xf9] sm:$0xff] }
 0x2ba   : > { %2720 = vrot.lane.b32.xlu1 %v8792_v16, %s6792_s21  ;;  %v2284_v63 = vadd.f32 %v2283_v51, %v2171_v9  ;;  %3121 = vst.msk [vmem:[#allocation3 + $0x520] sm:$0xff] %vm2525_vm1, %v3089_v48  ;;  %v2835_v52 = vld [vmem:[#allocation2 + $0xf2] sm:$0xff]  ;;  %v8841_v30 = vld [vmem:[#allocation2 + $0xfa] sm:$0xff] }
 0x2bb   : > { %2971 = vrot.lane.b32.xlu0 %v8676_v25, %s6792_s21  ;;  %v3462_v24 = vpop.permute.xlu2 %3461  ;;  %2611 = vst.msk [vmem:[#allocation3 + $0x5e8] sm:$0xff] %vm2525_vm1, %v8809_v59  ;;  %v2640_v61 = vld [vmem:[#allocation2 + $0xd9] sm:$0xff] }
 0x2bc   : > { %v3460_v17 = vpop.permute.xlu1 %3459  ;;  %v3663_v21 = vld [vmem:[#allocation3 + $0xe0] sm:$0xff]  ;;  %v2397_v15 = vadd.f32 %v2396_v20, %v2284_v63  ;;  %3554 = vst.msk [vmem:[#allocation3 + $0xf0] sm:$0xff] %vm2782_vm11, %v3462_v24  ;;  %v2063_v53 = vpop.f32.mrf.mxu1 }
 0x2bd   : > { %v3458_v44 = vpop.permute.xlu0 %3457  ;;  %3553 = vst.msk [vmem:[#allocation3 + $0xa8] sm:$0xff] %vm2782_vm11, %v3460_v17  ;;  %4010 = vmatmul.f32.gmra.mxu1 %v3672_v31  ;;  %4117 = vmatmul.f32.gmra.mxu2 %v3663_v21  ;;  %v3664_v25 = vld [vmem:[#allocation3 + $0xe8] sm:$0xff]  ;;  %v2064_v34 = vadd.f32 %v2063_v53, %v8065_v42 }
 0x2be   : > { %vm2450_vm10 = vcmp.ge.f32.partialorder %v2397_v15, 0.0  ;;  %v2482_v22 = vmul.f32 0.01, %v2397_v15  ;;  %3552 = vst.msk [vmem:[#allocation3 + $0x60] sm:$0xff] %vm2782_vm11, %v3458_v44  ;;  %4230 = vmatmul.f32.gmra.mxu3 %v3664_v25  ;;  %v2399_v28 = vpop.f32.mrf.mxu0 }
 0x2bf   : > { %v2173_v37 = vpop.f32.mrf.mxu2  ;;  %3122 = vst.msk [vmem:[#allocation3 + $0x568] sm:$0xff] %vm2525_vm1, %v8812_v41 }
 0x2c0   : > { %v2514_v19 = vsel %vm2450_vm10, %v2397_v15, %v2482_v22  ;;  %v2174_v5 = vadd.f32 %v2173_v37, %v2061_v46  ;;  %v2286_v10 = vpop.f32.mrf.mxu3  ;;  %3376 = vst.msk [vmem:[#allocation3 + $0x4e0] sm:$0xff] %vm2525_vm1, %v8809_v59  ;;  %v8833_v11 = vld [vmem:[#allocation2 + $0x109] sm:$0xff]  ;;  %v3151_v22 = vld [vmem:[#allocation2 + $0xda] sm:$0xff] }
 0x2c1   : > { %2547 = vst.msk [vmem:[#allocation2 + $0x111] sm:$0xff] %vm2525_vm1, %v2514_v19  ;;  %3227 = vrot.lane.b32.xlu2 %v8707_v62, %s6792_s21  ;;  %v8830_v62 = vld [vmem:[#allocation2 + $0x108] sm:$0xff] }
 0x2c2   : > { %2973 = vrot.lane.b32.xlu1 %v8716_v47, %s6792_s21  ;;  %v2287_v14 = vadd.f32 %v2286_v10, %v2174_v5  ;;  %2867 = vst.msk [vmem:[#allocation3 + $0x5a8] sm:$0xff] %vm2525_vm1, %v2835_v52  ;;  %v3674_v19 = vld [vmem:[#allocation3 + $0x178] sm:$0xff] }
 0x2c3   : > { %3229 = vrot.lane.b32.xlu0 %v3150_v32, %s6792_s21  ;;  %v2705_v23 = vpop.permute.xlu2 %2704  ;;  %3377 = vst.msk [vmem:[#allocation3 + $0x528] sm:$0xff] %vm2525_vm1, %v8830_v62 }
 0x2c4   : > { %v3208_v1 = vpop.permute.xlu1 %3207  ;;  %v2400_v39 = vadd.f32 %v2399_v28, %v2287_v14  ;;  %2792 = vst.msk [vmem:[#allocation3 + $0x288] sm:$0xff] %vm2782_vm11, %v2705_v23  ;;  %v2066_v8 = vpop.f32.mrf.mxu1 }
 0x2c5   : > { %v2701_v54 = vpop.permute.xlu0 %2700  ;;  %3299 = vst.msk [vmem:[#allocation3 + $0x130] sm:$0xff] %vm2782_vm11, %v3208_v1  ;;  %4013 = vmatmul.f32.gmra.mxu1 %v3677_v2  ;;  %4120 = vmatmul.f32.gmra.mxu2 %v3668_v43  ;;  %v3655_v47 = vld [vmem:[#allocation3 + $0x60] sm:$0xff]  ;;  %v2067_v31 = vadd.f32 %v2066_v8, %v8079_v13  ;;  %v3665_v43 = vld [vmem:[#allocation3 + $0xf0] sm:$0xff] }
 0x2c6   : > { %vm2451_vm12 = vcmp.ge.f32.partialorder %v2400_v39, 0.0  ;;  %v2483_v7 = vmul.f32 0.01, %v2400_v39  ;;  %2790 = vst.msk [vmem:[#allocation3 + $0x1f8] sm:$0xff] %vm2782_vm11, %v2701_v54  ;;  %4337 = vmatmul.f32.gmra.mxu0 %v3655_v47  ;;  %v2402_v57 = vpop.f32.mrf.mxu0 }
 0x2c7   : > { %v2176_v4 = vpop.f32.mrf.mxu2  ;;  %3123 = vst.msk [vmem:[#allocation3 + $0x5b0] sm:$0xff] %vm2525_vm1, %v8833_v11 }
 0x2c8   : > { %v2515_v18 = vsel %vm2451_vm12, %v2400_v39, %v2483_v7  ;;  %v2177_v12 = vadd.f32 %v2176_v4, %v2064_v34  ;;  %v2289_v45 = vpop.f32.mrf.mxu3  ;;  %2612 = vst.msk [vmem:[#allocation3 + $0x630] sm:$0xff] %vm2525_vm1, %v8830_v62  ;;  %v8853_v48 = vld [vmem:[#allocation2 + $0x10a] sm:$0xff] }
 0x2c9   : > { %2548 = vst.msk [vmem:[#allocation2 + $0x121] sm:$0xff] %vm2525_vm1, %v2515_v18  ;;  %2722 = vrot.lane.b32.xlu2 %v2640_v61, %s6792_s21  ;;  %v8856_v17 = vld [vmem:[#allocation2 + $0x110] sm:$0xff] }
 0x2ca   : > { %3483 = vrot.lane.b32.xlu1 %v2640_v61, %s6792_s21  ;;  %v2290_v42 = vadd.f32 %v2289_v45, %v2177_v12  ;;  %2868 = vst.msk [vmem:[#allocation3 + $0x5f0] sm:$0xff] %vm2525_vm1, %v8841_v30  ;;  %v8860_v44 = vld [vmem:[#allocation2 + $0x111] sm:$0xff] }
 0x2cb   : > { %3481 = vrot.lane.b32.xlu0 %v8792_v16, %s6792_s21  ;;  %v2958_v9 = vpop.permute.xlu2 %2957  ;;  %v3660_v16 = vld [vmem:[#allocation3 + $0xa8] sm:$0xff]  ;;  %2869 = vst.msk [vmem:[#allocation3 + $0x638] sm:$0xff] %vm2525_vm1, %v8853_v48  ;;  %v3877_v4 = vld [vmem:[%s10852_s3 + $0x230] sm:$0xff] }
 0x2cc   : > { %v2703_v20 = vpop.permute.xlu1 %2702  ;;  %v3669_v29 = vld [vmem:[#allocation3 + $0x130] sm:$0xff]  ;;  %v2403_v33 = vadd.f32 %v2402_v57, %v2290_v42  ;;  %3046 = vst.msk [vmem:[#allocation3 + $0x200] sm:$0xff] %vm2782_vm11, %v2958_v9  ;;  %v2069_v63 = vpop.f32.mrf.mxu1  ;;  %v2642_v7 = vld [vmem:[#allocation2 + $0xf1] sm:$0xff]  ;;  %4440 = vmatpush.msra.mxu1 %v3877_v4 }
 0x2cd   : > { %v2954_v51 = vpop.permute.xlu0 %2953  ;;  %2791 = vst.msk [vmem:[#allocation3 + $0x240] sm:$0xff] %vm2782_vm11, %v2703_v20  ;;  %4233 = vmatmul.f32.gmra.mxu3 %v3669_v29  ;;  %v3682_v49 = vld [vmem:[#allocation3 + $0x1f8] sm:$0xff]  ;;  %v2070_v1 = vadd.f32 %v2069_v63, %v8096_v3  ;;  %v8886_v3 = vld [vmem:[#allocation2 + $0x112] sm:$0xff] }
 0x2ce   : > { %vm2452_vm13 = vcmp.ge.f32.partialorder %v2403_v33, 0.0  ;;  %v2484_v21 = vmul.f32 0.01, %v2403_v33  ;;  %3044 = vst.msk [vmem:[#allocation3 + $0x170] sm:$0xff] %vm2782_vm11, %v2954_v51  ;;  %4016 = vmatmul.f32.gmra.mxu1 %v3682_v49  ;;  %4340 = vmatmul.f32.gmra.mxu0 %v3660_v16  ;;  %v2405_v24 = vpop.f32.mrf.mxu0  ;;  %v3692_v20 = vld [vmem:[#allocation3 + $0x288] sm:$0xff] }
 0x2cf   : > { %v2179_v15 = vpop.f32.mrf.mxu2  ;;  %2613 = vst.msk [vmem:[#allocation3 + $0x678] sm:$0xff] %vm2525_vm1, %v8856_v17 }
 0x2d0   : > { %v2516_v25 = vsel %vm2452_vm13, %v2403_v33, %v2484_v21  ;;  %v2180_v53 = vadd.f32 %v2179_v15, %v2067_v31  ;;  %v2292_v46 = vpop.f32.mrf.mxu3  ;;  %3124 = vst.msk [vmem:[#allocation3 + $0x5f8] sm:$0xff] %vm2525_vm1, %v8860_v44  ;;  %v8882_v54 = vld [vmem:[#allocation2 + $0x121] sm:$0xff] }
 0x2d1   : > { %2549 = vst.msk [vmem:[#allocation2 + $0x129] sm:$0xff] %vm2525_vm1, %v2516_v25  ;;  %2975 = vrot.lane.b32.xlu2 %v8745_v40, %s6792_s21  ;;  %v8877_v40 = vld [vmem:[#allocation2 + $0x120] sm:$0xff] }
 0x2d2   : > { %3231 = vrot.lane.b32.xlu1 %v3151_v22, %s6792_s21  ;;  %v2293_v13 = vadd.f32 %v2292_v46, %v2180_v53  ;;  %3378 = vst.msk [vmem:[#allocation3 + $0x570] sm:$0xff] %vm2525_vm1, %v8856_v17 }
 0x2d3   : > { %2724 = vrot.lane.b32.xlu0 %v8761_v55, %s6792_s21  ;;  %v3468_v10 = vpop.permute.xlu2 %3467  ;;  %2614 = vst.msk [vmem:[#allocation3 + $0x6c0] sm:$0xff] %vm2525_vm1, %v8877_v40 }
 0x2d4   : > { %v2956_v37 = vpop.permute.xlu1 %2955  ;;  %v3687_v28 = vld [vmem:[#allocation3 + $0x240] sm:$0xff]  ;;  %v2406_v5 = vadd.f32 %v2405_v24, %v2293_v13  ;;  %3557 = vst.msk [vmem:[#allocation3 + $0x1c8] sm:$0xff] %vm2782_vm11, %v3468_v10  ;;  %v2072_v14 = vpop.f32.mrf.mxu1 }
 0x2d5   : > { %v3464_v52 = vpop.permute.xlu0 %3463  ;;  %3045 = vst.msk [vmem:[#allocation3 + $0x1b8] sm:$0xff] %vm2782_vm11, %v2956_v37  ;;  %4236 = vmatmul.f32.gmra.mxu3 %v3674_v19  ;;  %v3673_v32 = vld [vmem:[#allocation3 + $0x170] sm:$0xff]  ;;  %v2073_v9 = vadd.f32 %v2072_v14, %v8110_v60 }
 0x2d6   : > { %vm2453_vm14 = vcmp.ge.f32.partialorder %v2406_v5, 0.0  ;;  %v2485_v2 = vmul.f32 0.01, %v2406_v5  ;;  %3555 = vst.msk [vmem:[#allocation3 + $0x138] sm:$0xff] %vm2782_vm11, %v3464_v52  ;;  %4019 = vmatmul.f32.gmra.mxu1 %v3687_v28  ;;  %4123 = vmatmul.f32.gmra.mxu2 %v3673_v32  ;;  %v2408_v23 = vpop.f32.mrf.mxu0 }
 0x2d7   : > { %4343 = vmatmul.f32.gmra.mxu0 %v3665_v43  ;;  %v2182_v39 = vpop.f32.mrf.mxu2  ;;  %3379 = vst.msk [vmem:[#allocation3 + $0x5b8] sm:$0xff] %vm2525_vm1, %v8877_v40 }
 0x2d8   : > { %v2517_v47 = vsel %vm2453_vm14, %v2406_v5, %v2485_v2  ;;  %v2183_v8 = vadd.f32 %v2182_v39, %v2070_v1  ;;  %v2295_v34 = vpop.f32.mrf.mxu3  ;;  %3125 = vst.msk [vmem:[#allocation3 + $0x640] sm:$0xff] %vm2525_vm1, %v8882_v54  ;;  %v8904_v42 = vld [vmem:[#allocation2 + $0x129] sm:$0xff]  ;;  %v3154_v1 = vld [vmem:[#allocation2 + $0xfa] sm:$0xff] }
 0x2d9   : > { %2550 = vst.msk [vmem:[#allocation2 + $0x139] sm:$0xff] %vm2525_vm1, %v2517_v47  ;;  %3233 = vrot.lane.b32.xlu2 %v8770_v38, %s6792_s21  ;;  %v8907_v33 = vld [vmem:[#allocation2 + $0x128] sm:$0xff] }
 0x2da   : > { %2726 = vrot.lane.b32.xlu1 %v2642_v7, %s6792_s21  ;;  %v2296_v57 = vadd.f32 %v2295_v34, %v2183_v8  ;;  %2870 = vst.msk [vmem:[#allocation3 + $0x680] sm:$0xff] %vm2525_vm1, %v8886_v3  ;;  %v8913_v15 = vld [vmem:[#allocation2 + $0x12a] sm:$0xff]  ;;  %v8933_v10 = vld [vmem:[#allocation2 + $0x122] sm:$0xff] }
 0x2db   : > { %2977 = vrot.lane.b32.xlu0 %v8764_v50, %s6792_s21  ;;  %v3216_v45 = vpop.permute.xlu2 %3215  ;;  %3126 = vst.msk [vmem:[#allocation3 + $0x688] sm:$0xff] %vm2525_vm1, %v8904_v42 }
 0x2dc   : > { %v3214_v18 = vpop.permute.xlu1 %3213  ;;  %v3678_v12 = vld [vmem:[#allocation3 + $0x1b8] sm:$0xff]  ;;  %v2409_v38 = vadd.f32 %v2408_v23, %v2296_v57  ;;  %3303 = vst.msk [vmem:[#allocation3 + $0x250] sm:$0xff] %vm2782_vm11, %v3216_v45  ;;  %v2075_v29 = vpop.f32.mrf.mxu1 }
 0x2dd   : > { %v3212_v61 = vpop.permute.xlu0 %3211  ;;  %3302 = vst.msk [vmem:[#allocation3 + $0x208] sm:$0xff] %vm2782_vm11, %v3214_v18  ;;  %v3670_v50 = vld [vmem:[#allocation3 + $0x138] sm:$0xff]  ;;  %v2076_v37 = vadd.f32 %v2075_v29, %v8127_v56  ;;  %v3153_v56 = vld [vmem:[#allocation2 + $0xf2] sm:$0xff] }
 0x2de   : > { %vm2454_vm0 = vcmp.ge.f32.partialorder %v2409_v38, 0.0  ;;  %v2486_v51 = vmul.f32 0.01, %v2409_v38  ;;  %3301 = vst.msk [vmem:[#allocation3 + $0x1c0] sm:$0xff] %vm2782_vm11, %v3212_v61  ;;  %4022 = vmatmul.f32.gmra.mxu1 %v3692_v20  ;;  %4126 = vmatmul.f32.gmra.mxu2 %v3678_v12  ;;  %v2411_v16 = vpop.f32.mrf.mxu0 }
 0x2df   : > { %4346 = vmatmul.f32.gmra.mxu0 %v3670_v50  ;;  %v2185_v49 = vpop.f32.mrf.mxu2  ;;  %3380 = vst.msk [vmem:[#allocation3 + $0x600] sm:$0xff] %vm2525_vm1, %v8907_v33 }
 0x2e0   : > { %v2518_v63 = vsel %vm2454_vm0, %v2409_v38, %v2486_v51  ;;  %v2186_v31 = vadd.f32 %v2185_v49, %v2073_v9  ;;  %v2298_v21 = vpop.f32.mrf.mxu3  ;;  %2615 = vst.msk [vmem:[#allocation3 + $0x708] sm:$0xff] %vm2525_vm1, %v8907_v33  ;;  %v8928_v22 = vld [vmem:[#allocation2 + $0x138] sm:$0xff] }
 0x2e1   : > { %2551 = vst.msk [vmem:[#allocation2 + $0x141] sm:$0xff] %vm2525_vm1, %v2518_v63  ;;  %3485 = vrot.lane.b32.xlu2 %v8761_v55, %s6792_s21  ;;  %v3683_v55 = vld [vmem:[#allocation3 + $0x200] sm:$0xff]  ;;  %v8937_v2 = vld [vmem:[#allocation2 + $0x139] sm:$0xff] }
 0x2e2   : > { %2979 = vrot.lane.b32.xlu1 %v8785_v26, %s6792_s21  ;;  %v2299_v60 = vadd.f32 %v2298_v21, %v2186_v31  ;;  %2872 = vst.msk [vmem:[#allocation3 + $0x710] sm:$0xff] %vm2525_vm1, %v8913_v15  ;;  %v3680_v63 = vld [vmem:[#allocation3 + $0x1c8] sm:$0xff] }
 0x2e3   : > { %3487 = vrot.lane.b32.xlu0 %v2642_v7, %s6792_s21  ;;  %v2711_v53 = vpop.permute.xlu2 %2710  ;;  %2616 = vst.msk [vmem:[#allocation3 + $0x750] sm:$0xff] %vm2525_vm1, %v8928_v22 }
 0x2e4   : > { %v3466_v24 = vpop.permute.xlu1 %3465  ;;  %v2412_v25 = vadd.f32 %v2411_v16, %v2299_v60  ;;  %2795 = vst.msk [vmem:[#allocation3 + $0x360] sm:$0xff] %vm2782_vm11, %v2711_v53  ;;  %v2078_v13 = vpop.f32.mrf.mxu1  ;;  %v3684_v57 = vld [vmem:[#allocation3 + $0x208] sm:$0xff] }
 0x2e5   : > { %v2707_v46 = vpop.permute.xlu0 %2706  ;;  %3556 = vst.msk [vmem:[#allocation3 + $0x180] sm:$0xff] %vm2782_vm11, %v3466_v24  ;;  %v3679_v26 = vld [vmem:[#allocation3 + $0x1c0] sm:$0xff]  ;;  %v2079_v12 = vadd.f32 %v2078_v13, %v8142_v58  ;;  %v3876_v13 = vld [vmem:[%s10852_s3 + $0x228] sm:$0xff] }
 0x2e6   : > { %vm2455_vm2 = vcmp.ge.f32.partialorder %v2412_v25, 0.0  ;;  %v2487_v28 = vmul.f32 0.01, %v2412_v25  ;;  %2793 = vst.msk [vmem:[#allocation3 + $0x2d0] sm:$0xff] %vm2782_vm11, %v2707_v46  ;;  %4129 = vmatmul.f32.gmra.mxu2 %v3683_v55  ;;  %4239 = vmatmul.f32.gmra.mxu3 %v3679_v26  ;;  %v2414_v5 = vpop.f32.mrf.mxu0  ;;  %v3689_v46 = vld [vmem:[#allocation3 + $0x250] sm:$0xff] }
 0x2e7   : > { %v2188_v19 = vpop.f32.mrf.mxu2  ;;  %3381 = vst.msk [vmem:[#allocation3 + $0x648] sm:$0xff] %vm2525_vm1, %v8928_v22  ;;  %4441 = vmatpush.msra.mxu1 %v3876_v13 }
 0x2e8   : > { %v2519_v52 = vsel %vm2455_vm2, %v2412_v25, %v2487_v28  ;;  %v2189_v32 = vadd.f32 %v2188_v19, %v2076_v37  ;;  %v2301_v14 = vpop.f32.mrf.mxu3  ;;  %2871 = vst.msk [vmem:[#allocation3 + $0x6c8] sm:$0xff] %vm2525_vm1, %v8933_v10  ;;  %v8951_v7 = vld [vmem:[#allocation2 + $0x140] sm:$0xff] }
 0x2e9   : > { %2552 = vst.msk [vmem:[#allocation2 + $0x151] sm:$0xff] %vm2525_vm1, %v2519_v52  ;;  %2728 = vrot.lane.b32.xlu2 %v8812_v41, %s6792_s21  ;;  %v8954_v18 = vld [vmem:[#allocation2 + $0x141] sm:$0xff] }
 0x2ea   : > { %3237 = vrot.lane.b32.xlu1 %v3154_v1, %s6792_s21  ;;  %v2302_v43 = vadd.f32 %v2301_v14, %v2189_v32  ;;  %3127 = vst.msk [vmem:[#allocation3 + $0x6d0] sm:$0xff] %vm2525_vm1, %v8937_v2  ;;  %v8960_v51 = vld [vmem:[#allocation2 + $0x13a] sm:$0xff]  ;;  %v8988_v19 = vld [vmem:[#allocation2 + $0x142] sm:$0xff] }
 0x2eb   : > { %3235 = vrot.lane.b32.xlu0 %v3153_v56, %s6792_s21  ;;  %v2964_v8 = vpop.permute.xlu2 %2963  ;;  %2617 = vst.msk [vmem:[#allocation3 + $0x798] sm:$0xff] %vm2525_vm1, %v8951_v7 }
 0x2ec   : > { %v2709_v39 = vpop.permute.xlu1 %2708  ;;  %v3675_v23 = vld [vmem:[#allocation3 + $0x180] sm:$0xff]  ;;  %v2415_v47 = vadd.f32 %v2414_v5, %v2302_v43  ;;  %3049 = vst.msk [vmem:[#allocation3 + $0x2d8] sm:$0xff] %vm2782_vm11, %v2964_v8  ;;  %v2081_v45 = vpop.f32.mrf.mxu1 }
 0x2ed   : > { %v2960_v34 = vpop.permute.xlu0 %2959  ;;  %2794 = vst.msk [vmem:[#allocation3 + $0x318] sm:$0xff] %vm2782_vm11, %v2709_v39  ;;  %4349 = vmatmul.f32.gmra.mxu0 %v3675_v23  ;;  %v3697_v4 = vld [vmem:[#allocation3 + $0x2d0] sm:$0xff]  ;;  %v2082_v25 = vadd.f32 %v2081_v45, %v8162_v36  ;;  %v3707_v39 = vld [vmem:[#allocation3 + $0x360] sm:$0xff] }
 0x2ee   : > { %vm2456_vm3 = vcmp.ge.f32.partialorder %v2415_v47, 0.0  ;;  %v2488_v38 = vmul.f32 0.01, %v2415_v47  ;;  %3047 = vst.msk [vmem:[#allocation3 + $0x248] sm:$0xff] %vm2782_vm11, %v2960_v34  ;;  %4025 = vmatmul.f32.gmra.mxu1 %v3697_v4  ;;  %4242 = vmatmul.f32.gmra.mxu3 %v3684_v57  ;;  %v2417_v20 = vpop.f32.mrf.mxu0 }
 0x2ef   : > { %v2191_v61 = vpop.f32.mrf.mxu2  ;;  %3128 = vst.msk [vmem:[#allocation3 + $0x718] sm:$0xff] %vm2525_vm1, %v8954_v18 }
 0x2f0   : > { %v2520_v50 = vsel %vm2456_vm3, %v2415_v47, %v2488_v38  ;;  %v2192_v29 = vadd.f32 %v2191_v61, %v2079_v12  ;;  %v2304_v9 = vpop.f32.mrf.mxu3  ;;  %3382 = vst.msk [vmem:[#allocation3 + $0x690] sm:$0xff] %vm2525_vm1, %v8951_v7  ;;  %v8979_v24 = vld [vmem:[#allocation2 + $0x151] sm:$0xff] }
 0x2f1   : > { %2553 = vst.msk [vmem:[#allocation2 + $0x159] sm:$0xff] %vm2525_vm1, %v2520_v50  ;;  %2981 = vrot.lane.b32.xlu2 %v8809_v59, %s6792_s21  ;;  %v8976_v59 = vld [vmem:[#allocation2 + $0x150] sm:$0xff] }
 0x2f2   : > { %3489 = vrot.lane.b32.xlu1 %v8812_v41, %s6792_s21  ;;  %v2305_v58 = vadd.f32 %v2304_v9, %v2192_v29  ;;  %2873 = vst.msk [vmem:[#allocation3 + $0x758] sm:$0xff] %vm2525_vm1, %v8960_v51 }
 0x2f3   : > { %2730 = vrot.lane.b32.xlu0 %v8833_v11, %s6792_s21  ;;  %v3222_v21 = vpop.permute.xlu2 %3221  ;;  %3383 = vst.msk [vmem:[#allocation3 + $0x6d8] sm:$0xff] %vm2525_vm1, %v8976_v59 }
 0x2f4   : > { %v2962_v49 = vpop.permute.xlu1 %2961  ;;  %v3702_v16 = vld [vmem:[#allocation3 + $0x318] sm:$0xff]  ;;  %v2418_v31 = vadd.f32 %v2417_v20, %v2305_v58  ;;  %3306 = vst.msk [vmem:[#allocation3 + $0x328] sm:$0xff] %vm2782_vm11, %v3222_v21  ;;  %v2084_v5 = vpop.f32.mrf.mxu1 }
 0x2f5   : > { %v3218_v60 = vpop.permute.xlu0 %3217  ;;  %3048 = vst.msk [vmem:[#allocation3 + $0x290] sm:$0xff] %vm2782_vm11, %v2962_v49  ;;  %4352 = vmatmul.f32.gmra.mxu0 %v3680_v63  ;;  %v3688_v41 = vld [vmem:[#allocation3 + $0x248] sm:$0xff]  ;;  %v2085_v47 = vadd.f32 %v2084_v5, %v8177_v0 }
 0x2f6   : > { %vm2457_vm4 = vcmp.ge.f32.partialorder %v2418_v31, 0.0  ;;  %v2489_v53 = vmul.f32 0.01, %v2418_v31  ;;  %3304 = vst.msk [vmem:[#allocation3 + $0x298] sm:$0xff] %vm2782_vm11, %v3218_v60  ;;  %4028 = vmatmul.f32.gmra.mxu1 %v3702_v16  ;;  %4132 = vmatmul.f32.gmra.mxu2 %v3688_v41  ;;  %v2420_v26 = vpop.f32.mrf.mxu0 }
 0x2f7   : > { %4245 = vmatmul.f32.gmra.mxu3 %v3689_v46  ;;  %v2194_v55 = vpop.f32.mrf.mxu2  ;;  %3129 = vst.msk [vmem:[#allocation3 + $0x760] sm:$0xff] %vm2525_vm1, %v8979_v24 }
 0x2f8   : > { %v2521_v37 = vsel %vm2457_vm4, %v2418_v31, %v2489_v53  ;;  %v2195_v28 = vadd.f32 %v2194_v55, %v2082_v25  ;;  %v2307_v36 = vpop.f32.mrf.mxu3  ;;  %2618 = vst.msk [vmem:[#allocation3 + $0x7e0] sm:$0xff] %vm2525_vm1, %v8976_v59  ;;  %v9011_v57 = vld [vmem:[#allocation2 + $0x159] sm:$0xff] }
 0x2f9   : > { %2554 = vst.msk [vmem:[#allocation2 + $0x169] sm:$0xff] %vm2525_vm1, %v2521_v37  ;;  %3491 = vrot.lane.b32.xlu2 %v8833_v11, %s6792_s21  ;;  %v9004_v11 = vld [vmem:[#allocation2 + $0x152] sm:$0xff]  ;;  %v9038_v41 = vld [vmem:[#allocation2 + $0x15a] sm:$0xff] }
 0x2fa   : > { %2732 = vrot.lane.b32.xlu1 %v8860_v44, %s6792_s21  ;;  %v2308_v52 = vadd.f32 %v2307_v36, %v2195_v28  ;;  %2874 = vst.msk [vmem:[#allocation3 + $0x7a0] sm:$0xff] %vm2525_vm1, %v8988_v19 }
 0x2fb   : > { %2983 = vrot.lane.b32.xlu0 %v8830_v62, %s6792_s21  ;;  %v3474_v56 = vpop.permute.xlu2 %3473  ;;  %v9007_v62 = vld [vmem:[#allocation2 + $0x158] sm:$0xff]  ;;  %2875 = vst.msk [vmem:[#allocation3 + $0x7e8] sm:$0xff] %vm2525_vm1, %v9004_v11 }
 0x2fc   : > { %v3472_v32 = vpop.permute.xlu1 %3471  ;;  %v3693_v14 = vld [vmem:[#allocation3 + $0x290] sm:$0xff]  ;;  %v2421_v1 = vadd.f32 %v2420_v26, %v2308_v52  ;;  %3560 = vst.msk [vmem:[#allocation3 + $0x2a0] sm:$0xff] %vm2782_vm11, %v3474_v56  ;;  %v2087_v61 = vpop.f32.mrf.mxu1 }
 0x2fd   : > { %v3470_v43 = vpop.permute.xlu0 %3469  ;;  %3559 = vst.msk [vmem:[#allocation3 + $0x258] sm:$0xff] %vm2782_vm11, %v3472_v32  ;;  %v3694_v23 = vld [vmem:[#allocation3 + $0x298] sm:$0xff] }
 0x2fe   : > { %vm2458_vm5 = vcmp.ge.f32.partialorder %v2421_v1, 0.0  ;;  %v2490_v8 = vmul.f32 0.01, %v2421_v1  ;;  %3558 = vst.msk [vmem:[#allocation3 + $0x210] sm:$0xff] %vm2782_vm11, %v3470_v43  ;;  %4031 = vmatmul.f32.gmra.mxu1 %v3707_v39  ;;  %4135 = vmatmul.f32.gmra.mxu2 %v3693_v14  ;;  %v2423_v4 = vpop.f32.mrf.mxu0 }
 0x2ff   : > { %4248 = vmatmul.f32.gmra.mxu3 %v3694_v23  ;;  %v2197_v34 = vpop.f32.mrf.mxu2  ;;  %2619 = vst.msk [vmem:[#allocation3 + $0x828] sm:$0xff] %vm2525_vm1, %v9007_v62 }
 0x300   : > { %v2522_v12 = vsel %vm2458_vm5, %v2421_v1, %v2490_v8  ;;  %v2198_v38 = vadd.f32 %v2197_v34, %v2085_v47  ;;  %v2310_v45 = vpop.f32.mrf.mxu3  ;;  %3130 = vst.msk [vmem:[#allocation3 + $0x7a8] sm:$0xff] %vm2525_vm1, %v9011_v57  ;;  %v9034_v63 = vld [vmem:[#allocation2 + $0x169] sm:$0xff]  ;;  %v3704_v1 = vld [vmem:[#allocation3 + $0x328] sm:$0xff]  ;;  %v3875_v8 = vld [vmem:[%s10852_s3 + $0x220] sm:$0xff] }
 0x301   : > { %2555 = vst.msk [vmem:[#allocation2 + $0x171] sm:$0xff] %vm2525_vm1, %v2522_v12  ;;  %3239 = vrot.lane.b32.xlu2 %v8853_v48, %s6792_s21  ;;  %v9029_v48 = vld [vmem:[#allocation2 + $0x168] sm:$0xff]  ;;  %4442 = vmatpush.msra.mxu1 %v3875_v8 }
 0x302   : > { %2985 = vrot.lane.b32.xlu1 %v8856_v17, %s6792_s21  ;;  %v2311_v0 = vadd.f32 %v2310_v45, %v2198_v38  ;;  %3384 = vst.msk [vmem:[#allocation3 + $0x720] sm:$0xff] %vm2525_vm1, %v9007_v62  ;;  %v3698_v17 = vld [vmem:[#allocation3 + $0x2d8] sm:$0xff] }
 0x303   : > { %3241 = vrot.lane.b32.xlu0 %v8886_v3, %s6792_s21  ;;  %v2717_v29 = vpop.permute.xlu2 %2716  ;;  %v2088_v3 = vadd.f32 %v2087_v61, %v8190_v6  ;;  %2620 = vst.msk [vmem:[#allocation3 + $0x870] sm:$0xff] %vm2525_vm1, %v9029_v48  ;;  %v3695_v23 = vld [vmem:[#allocation3 + $0x2a0] sm:$0xff]  ;;  %v3587_v34 = vld [vmem:[#allocation2 + $0x62] sm:$0xff] }
 0x304   : > { %v3220_v20 = vpop.permute.xlu1 %3219  ;;  %v2424_v50 = vadd.f32 %v2423_v4, %v2311_v0  ;;  %2798 = vst.msk [vmem:[#allocation3 + $0x438] sm:$0xff] %vm2782_vm11, %v2717_v29  ;;  %v3588_v4 = vld [vmem:[#allocation2 + $0x6a] sm:$0xff]  ;;  %v3590_v29 = vld [vmem:[#allocation2 + $0x82] sm:$0xff] }
 0x305   : > { %v2713_v9 = vpop.permute.xlu0 %2712  ;;  %3305 = vst.msk [vmem:[#allocation3 + $0x2e0] sm:$0xff] %vm2782_vm11, %v3220_v20  ;;  %v3685_v58 = vld [vmem:[#allocation3 + $0x210] sm:$0xff] }
 0x306   : > { %vm2459_vm6 = vcmp.ge.f32.partialorder %v2424_v50, 0.0  ;;  %v2491_v49 = vmul.f32 0.01, %v2424_v50  ;;  %2796 = vst.msk [vmem:[#allocation3 + $0x3a8] sm:$0xff] %vm2782_vm11, %v2713_v9  ;;  %4138 = vmatmul.f32.gmra.mxu2 %v3698_v17  ;;  %4355 = vmatmul.f32.gmra.mxu0 %v3685_v58  ;;  %v2426_v6 = vpop.f32.mrf.mxu0  ;;  %v3591_v9 = vld [vmem:[#allocation2 + $0x92] sm:$0xff] }
 0x307   : > { %v2200_v16 = vpop.f32.mrf.mxu2  ;;  %3385 = vst.msk [vmem:[#allocation3 + $0x768] sm:$0xff] %vm2525_vm1, %v9029_v48 }
 0x308   : > { %v2523_v31 = vsel %vm2459_vm6, %v2424_v50, %v2491_v49  ;;  %v2201_v21 = vadd.f32 %v2200_v16, %v2088_v3  ;;  %v2313_v60 = vpop.f32.mrf.mxu3  ;;  %3131 = vst.msk [vmem:[#allocation3 + $0x7f0] sm:$0xff] %vm2525_vm1, %v9034_v63  ;;  %v9057_v28 = vld [vmem:[#allocation2 + $0x170] sm:$0xff]  ;;  %v3592_v49 = vld [vmem:[#allocation2 + $0x9a] sm:$0xff]  ;;  %v9124_v16 = vpop.f32.mrf.mxu1 }
 0x309   : > { %2556 = vst.msk [vmem:[#allocation2 + $0x181] sm:$0xff] %vm2525_vm1, %v2523_v31  ;;  %2734 = vrot.lane.b32.xlu2 %v8882_v54, %s6792_s21  ;;  %v9060_v5 = vld [vmem:[#allocation2 + $0x172] sm:$0xff]  ;;  %v3593_v31 = vld [vmem:[#allocation2 + $0xaa] sm:$0xff] }
 0x30a   : > { %3495 = vrot.lane.b32.xlu1 %v8882_v54, %s6792_s21  ;;  %v2314_v25 = vadd.f32 %v2313_v60, %v2201_v21  ;;  %2876 = vst.msk [vmem:[#allocation3 + $0x830] sm:$0xff] %vm2525_vm1, %v9038_v41  ;;  %v9054_v54 = vld [vmem:[#allocation2 + $0x171] sm:$0xff] }
 0x30b   : > { %3493 = vrot.lane.b32.xlu0 %v8860_v44, %s6792_s21  ;;  %v2970_v26 = vpop.permute.xlu2 %2969  ;;  %v3690_v44 = vld [vmem:[#allocation3 + $0x258] sm:$0xff]  ;;  %3132 = vst.msk [vmem:[#allocation3 + $0x838] sm:$0xff] %vm2525_vm1, %v9054_v54 }
 0x30c   : > { %v2715_v53 = vpop.permute.xlu1 %2714  ;;  %v3699_v46 = vld [vmem:[#allocation3 + $0x2e0] sm:$0xff]  ;;  %v2427_v55 = vadd.f32 %v2426_v6, %v2314_v25  ;;  %3052 = vst.msk [vmem:[#allocation3 + $0x3b0] sm:$0xff] %vm2782_vm11, %v2970_v26  ;;  %v3722_v61 = vld [vmem:[#allocation3 + $0x438] sm:$0xff]  ;;  %v6765_v6 = vunpack.i.h.bf16 %v8641_v35 }
 0x30d   : > { %v2966_v13 = vpop.permute.xlu0 %2965  ;;  %2797 = vst.msk [vmem:[#allocation3 + $0x3f0] sm:$0xff] %vm2782_vm11, %v2715_v53  ;;  %4251 = vmatmul.f32.gmra.mxu3 %v3699_v46  ;;  %v3712_v37 = vld [vmem:[#allocation3 + $0x3a8] sm:$0xff] }
 0x30e   : > { %vm2460_vm7 = vcmp.ge.f32.partialorder %v2427_v55, 0.0  ;;  %v2492_v36 = vmul.f32 0.01, %v2427_v55  ;;  %3050 = vst.msk [vmem:[#allocation3 + $0x320] sm:$0xff] %vm2782_vm11, %v2966_v13  ;;  %4034 = vmatmul.f32.gmra.mxu1 %v3712_v37  ;;  %4358 = vmatmul.f32.gmra.mxu0 %v3690_v44  ;;  %v3594_v53 = vld [vmem:[#allocation2 + $0xb2] sm:$0xff]  ;;  %v6770_v37 = vunpack.i.h.bf16 %v8639_v27 }
 0x30f   : > { %3386 = vst.msk [vmem:[#allocation3 + $0x7b0] sm:$0xff] %vm2525_vm1, %v9057_v28 }
 0x310   : > { %v2524_v52 = vsel %vm2460_vm7, %v2427_v55, %v2492_v36  ;;  %2878 = vst.msk [vmem:[#allocation3 + $0x8c0] sm:$0xff] %vm2525_vm1, %v9060_v5  ;;  %v9081_v39 = vld [vmem:[#allocation2 + $0x180] sm:$0xff] }
 0x311   : > { %2557 = vst.msk [vmem:[#allocation2 + $0x189] sm:$0xff] %vm2525_vm1, %v2524_v52  ;;  %2987 = vrot.lane.b32.xlu2 %v8877_v40, %s6792_s21  ;;  %v9078_v40 = vld [vmem:[#allocation2 + $0x16a] sm:$0xff]  ;;  %v9084_v47 = vld [vmem:[#allocation2 + $0x181] sm:$0xff] }
 0x312   : > { %3243 = vrot.lane.b32.xlu1 %v8933_v10, %s6792_s21  ;;  %2621 = vst.msk [vmem:[#allocation3 + $0x8b8] sm:$0xff] %vm2525_vm1, %v9057_v28 }
 0x313   : > { %2736 = vrot.lane.b32.xlu0 %v8904_v42, %s6792_s21  ;;  %v3480_v56 = vpop.permute.xlu2 %3479  ;;  %2877 = vst.msk [vmem:[#allocation3 + $0x878] sm:$0xff] %vm2525_vm1, %v9078_v40 }
 0x314   : > { %v2968_v32 = vpop.permute.xlu1 %2967  ;;  %v3717_v14 = vld [vmem:[#allocation3 + $0x3f0] sm:$0xff]  ;;  %3563 = vst.msk [vmem:[#allocation3 + $0x378] sm:$0xff] %vm2782_vm11, %v3480_v56 }
 0x315   : > { %v3476_v43 = vpop.permute.xlu0 %3475  ;;  %3051 = vst.msk [vmem:[#allocation3 + $0x368] sm:$0xff] %vm2782_vm11, %v2968_v32  ;;  %4254 = vmatmul.f32.gmra.mxu3 %v3704_v1  ;;  %v3703_v10 = vld [vmem:[#allocation3 + $0x320] sm:$0xff]  ;;  %v3874_v32 = vld [vmem:[%s10852_s3 + $0x218] sm:$0xff] }
 0x316   : > { %3561 = vst.msk [vmem:[#allocation3 + $0x2e8] sm:$0xff] %vm2782_vm11, %v3476_v43  ;;  %4037 = vmatmul.f32.gmra.mxu1 %v3717_v14  ;;  %4141 = vmatmul.f32.gmra.mxu2 %v3703_v10 }
 0x317   : > { %4361 = vmatmul.f32.gmra.mxu0 %v3695_v23  ;;  %3387 = vst.msk [vmem:[#allocation3 + $0x7f8] sm:$0xff] %vm2525_vm1, %v9081_v39  ;;  %4443 = vmatpush.msra.mxu1 %v3874_v32  ;;  %v3596_v23 = vld [vmem:[#allocation2 + $0xca] sm:$0xff] }
 0x318   : > { %3133 = vst.msk [vmem:[#allocation3 + $0x880] sm:$0xff] %vm2525_vm1, %v9084_v47  ;;  %v9107_v50 = vld [vmem:[#allocation2 + $0x188] sm:$0xff] }
 0x319   : > { %3245 = vrot.lane.b32.xlu2 %v8913_v15, %s6792_s21  ;;  %3619 = vst.msk [vmem:[#allocation3 + $0x140] sm:$0xff] %vm2525_vm1, %v3587_v34  ;;  %v9104_v15 = vld [vmem:[#allocation2 + $0x189] sm:$0xff] }
 0x31a   : > { %2738 = vrot.lane.b32.xlu1 %v8937_v2, %s6792_s21  ;;  %3620 = vst.msk [vmem:[#allocation3 + $0x188] sm:$0xff] %vm2525_vm1, %v3588_v4 }
 0x31b   : > { %2989 = vrot.lane.b32.xlu0 %v8907_v33, %s6792_s21  ;;  %v3228_v45 = vpop.permute.xlu2 %3227  ;;  %v3589_v33 = vld [vmem:[#allocation2 + $0x7a] sm:$0xff]  ;;  %3134 = vst.msk [vmem:[#allocation3 + $0x8c8] sm:$0xff] %vm2525_vm1, %v9104_v15  ;;  %v3710_v13 = vld [vmem:[#allocation3 + $0x378] sm:$0xff] }
 0x31c   : > { %v3226_v12 = vpop.permute.xlu1 %3225  ;;  %v3708_v38 = vld [vmem:[#allocation3 + $0x368] sm:$0xff]  ;;  %3309 = vst.msk [vmem:[#allocation3 + $0x400] sm:$0xff] %vm2782_vm11, %v3228_v45 }
 0x31d   : > { %v3224_v0 = vpop.permute.xlu0 %3223  ;;  %3308 = vst.msk [vmem:[#allocation3 + $0x3b8] sm:$0xff] %vm2782_vm11, %v3226_v12  ;;  %v3700_v20 = vld [vmem:[#allocation3 + $0x2e8] sm:$0xff] }
 0x31e   : > { %3307 = vst.msk [vmem:[#allocation3 + $0x370] sm:$0xff] %vm2782_vm11, %v3224_v0  ;;  %4040 = vmatmul.f32.gmra.mxu1 %v3722_v61  ;;  %4144 = vmatmul.f32.gmra.mxu2 %v3708_v38 }
 0x31f   : > { %4364 = vmatmul.f32.gmra.mxu0 %v3700_v20  ;;  %3388 = vst.msk [vmem:[#allocation3 + $0x840] sm:$0xff] %vm2525_vm1, %v9107_v50 }
 0x320   : > { %3621 = vst.msk [vmem:[#allocation3 + $0x1d0] sm:$0xff] %vm2525_vm1, %v3589_v33 }
 0x321   : > { %3497 = vrot.lane.b32.xlu2 %v8904_v42, %s6792_s21  ;;  %3622 = vst.msk [vmem:[#allocation3 + $0x218] sm:$0xff] %vm2525_vm1, %v3590_v29  ;;  %v3713_v42 = vld [vmem:[#allocation3 + $0x3b0] sm:$0xff] }
 0x322   : > { %2991 = vrot.lane.b32.xlu1 %v8928_v22, %s6792_s21  ;;  %3623 = vst.msk [vmem:[#allocation3 + $0x260] sm:$0xff] %vm2525_vm1, %v3591_v9 }
 0x323   : > { %3499 = vrot.lane.b32.xlu0 %v8937_v2, %s6792_s21  ;;  %v2723_v58 = vpop.permute.xlu2 %2722  ;;  %3624 = vst.msk [vmem:[#allocation3 + $0x2a8] sm:$0xff] %vm2525_vm1, %v3592_v49  ;;  %v6779_v2 = vld [vmem:[#allocation2] sm:$0xff]  ;;  %v3719_v52 = vld [vmem:[#allocation3 + $0x400] sm:$0xff] }
 0x324   : > { %v3478_v17 = vpop.permute.xlu1 %3477  ;;  %2801 = vst.msk [vmem:[#allocation3 + $0x510] sm:$0xff] %vm2782_vm11, %v2723_v58  ;;  %v3714_v55 = vld [vmem:[#allocation3 + $0x3b8] sm:$0xff] }
 0x325   : > { %v2719_v3 = vpop.permute.xlu0 %2718  ;;  %3562 = vst.msk [vmem:[#allocation3 + $0x330] sm:$0xff] %vm2782_vm11, %v3478_v17  ;;  %v3709_v22 = vld [vmem:[#allocation3 + $0x370] sm:$0xff] }
 0x326   : > { %2799 = vst.msk [vmem:[#allocation3 + $0x480] sm:$0xff] %vm2782_vm11, %v2719_v3  ;;  %4147 = vmatmul.f32.gmra.mxu2 %v3713_v42  ;;  %4257 = vmatmul.f32.gmra.mxu3 %v3709_v22  ;;  %v3599_v22 = vld [vmem:[#allocation2 + $0xf2] sm:$0xff] }
 0x327   : > { %3632 = vst.msk [vmem:[#allocation3 + $0x4e8] sm:$0xff] %vm2525_vm1, %v8841_v30 }
 0x328   : > { %4641 = vst.msk [vmem:[#allocation3] sm:$0xff] %vm4576_vm15, %v6779_v2 }
 0x329   : > { %2740 = vrot.lane.b32.xlu2 %v8954_v18, %s6792_s21  ;;  %3625 = vst.msk [vmem:[#allocation3 + $0x2f0] sm:$0xff] %vm2525_vm1, %v3593_v31 }
 0x32a   : > { %3249 = vrot.lane.b32.xlu1 %v8988_v19, %s6792_s21  ;;  %v6764_v19 = vunpack.i.l.bf16 %v8641_v35  ;;  %3626 = vst.msk [vmem:[#allocation3 + $0x338] sm:$0xff] %vm2525_vm1, %v3594_v53 }
 0x32b   : > { %3247 = vrot.lane.b32.xlu0 %v8960_v51, %s6792_s21  ;;  %v2976_v30 = vpop.permute.xlu2 %2975  ;;  %v9144_v51 = vpop.f32.mrf.mxu1  ;;  %4835 = vst.msk [vmem:[#allocation3 + $0x48] sm:$0xff] %vm4833_vm8, %v6765_v6 }
 0x32c   : > { %v2721_v21 = vpop.permute.xlu1 %2720  ;;  %v3705_v60 = vld [vmem:[#allocation3 + $0x330] sm:$0xff]  ;;  %3055 = vst.msk [vmem:[#allocation3 + $0x488] sm:$0xff] %vm2782_vm11, %v2976_v30 }
 0x32d   : > { %v2972_v25 = vpop.permute.xlu0 %2971  ;;  %2800 = vst.msk [vmem:[#allocation3 + $0x4c8] sm:$0xff] %vm2782_vm11, %v2721_v21  ;;  %4367 = vmatmul.f32.gmra.mxu0 %v3705_v60  ;;  %v3727_v46 = vld [vmem:[#allocation3 + $0x480] sm:$0xff] }
 0x32e   : > { %3053 = vst.msk [vmem:[#allocation3 + $0x3f8] sm:$0xff] %vm2782_vm11, %v2972_v25  ;;  %4043 = vmatmul.f32.gmra.mxu1 %v3727_v46  ;;  %4260 = vmatmul.f32.gmra.mxu3 %v3714_v55  ;;  %v3602_v55 = vld [vmem:[#allocation2 + $0x112] sm:$0xff] }
 0x32f   : > { %4834 = vst.msk [vmem:[#allocation3] sm:$0xff] %vm4833_vm8, %v6764_v19 }
 0x330   : > { %5028 = vst.msk [vmem:[#allocation3 + $0x48] sm:$0xff] %vm5026_vm9, %v6770_v37 }
 0x331   : > { %2993 = vrot.lane.b32.xlu2 %v8951_v7, %s6792_s21  ;;  %v6769_v7 = vunpack.i.l.bf16 %v8639_v27  ;;  %v3595_v27 = vld [vmem:[#allocation2 + $0xc2] sm:$0xff]  ;;  %3628 = vst.msk [vmem:[#allocation3 + $0x3c8] sm:$0xff] %vm2525_vm1, %v3596_v23  ;;  %v3604_v23 = vld [vmem:[#allocation2 + $0x12a] sm:$0xff] }
 0x332   : > { %3501 = vrot.lane.b32.xlu1 %v8954_v18, %s6792_s21  ;;  %3627 = vst.msk [vmem:[#allocation3 + $0x380] sm:$0xff] %vm2525_vm1, %v3595_v27 }
 0x333   : > { %2742 = vrot.lane.b32.xlu0 %v8979_v24, %s6792_s21  ;;  %v3234_v44 = vpop.permute.xlu2 %3233  ;;  %v9164_v14 = vpop.f32.mrf.mxu1  ;;  %5027 = vst.msk [vmem:[#allocation3] sm:$0xff] %vm5026_vm9, %v6769_v7  ;;  %v3728_v38 = vld [vmem:[#allocation3 + $0x488] sm:$0xff] }
 0x334   : > { %v2974_v35 = vpop.permute.xlu1 %2973  ;;  %v3732_v26 = vld [vmem:[#allocation3 + $0x4c8] sm:$0xff]  ;;  %3312 = vst.msk [vmem:[#allocation3 + $0x4d8] sm:$0xff] %vm2782_vm11, %v3234_v44 }
 0x335   : > { %v3230_v36 = vpop.permute.xlu0 %3229  ;;  %3054 = vst.msk [vmem:[#allocation3 + $0x440] sm:$0xff] %vm2782_vm11, %v2974_v35  ;;  %4370 = vmatmul.f32.gmra.mxu0 %v3710_v13  ;;  %v3718_v18 = vld [vmem:[#allocation3 + $0x3f8] sm:$0xff] }
 0x336   : > { %3310 = vst.msk [vmem:[#allocation3 + $0x448] sm:$0xff] %vm2782_vm11, %v3230_v36  ;;  %4046 = vmatmul.f32.gmra.mxu1 %v3732_v26  ;;  %4150 = vmatmul.f32.gmra.mxu2 %v3718_v18 }
 0x337   : > { %4263 = vmatmul.f32.gmra.mxu3 %v3719_v52  ;;  %3631 = vst.msk [vmem:[#allocation3 + $0x4a0] sm:$0xff] %vm2525_vm1, %v3599_v22 }
 0x338   : > { %3634 = vst.msk [vmem:[#allocation3 + $0x578] sm:$0xff] %vm2525_vm1, %v3602_v55 }
 0x339   : > { %3503 = vrot.lane.b32.xlu2 %v8979_v24, %s6792_s21  ;;  %v3737_v24 = vld [vmem:[#allocation3 + $0x510] sm:$0xff]  ;;  %3636 = vst.msk [vmem:[#allocation3 + $0x608] sm:$0xff] %vm2525_vm1, %v3604_v23 }
 0x33a   : > { %2744 = vrot.lane.b32.xlu1 %v9011_v57, %s6792_s21 }
 0x33b   : > { %2995 = vrot.lane.b32.xlu0 %v8976_v59, %s6792_s21  ;;  %v3486_v43 = vpop.permute.xlu2 %3485  ;;  %v9184_v59 = vpop.f32.mrf.mxu1 }
 0x33c   : > { %v3484_v1 = vpop.permute.xlu1 %3483  ;;  %v3723_v56 = vld [vmem:[#allocation3 + $0x440] sm:$0xff]  ;;  %3566 = vst.msk [vmem:[#allocation3 + $0x450] sm:$0xff] %vm2782_vm11, %v3486_v43  ;;  %v3872_v43 = vld [vmem:[%s10852_s3 + $0x208] sm:$0xff] }
 0x33d   : > { %v3482_v10 = vpop.permute.xlu0 %3481  ;;  %3565 = vst.msk [vmem:[#allocation3 + $0x408] sm:$0xff] %vm2782_vm11, %v3484_v1  ;;  %v3724_v8 = vld [vmem:[#allocation3 + $0x448] sm:$0xff] }
 0x33e   : > { %3564 = vst.msk [vmem:[#allocation3 + $0x3c0] sm:$0xff] %vm2782_vm11, %v3482_v10  ;;  %4049 = vmatmul.f32.gmra.mxu1 %v3737_v24  ;;  %4153 = vmatmul.f32.gmra.mxu2 %v3723_v56  ;;  %v3603_v10 = vld [vmem:[#allocation2 + $0x122] sm:$0xff] }
 0x33f   : > { %4266 = vmatmul.f32.gmra.mxu3 %v3724_v8  ;;  %3635 = vst.msk [vmem:[#allocation3 + $0x5c0] sm:$0xff] %vm2525_vm1, %v3603_v10 }
 0x341   : > { %3251 = vrot.lane.b32.xlu2 %v9004_v11, %s6792_s21  ;;  %v3597_v11 = vld [vmem:[#allocation2 + $0xda] sm:$0xff] }
 0x342   : > { %2997 = vrot.lane.b32.xlu1 %v9007_v62, %s6792_s21  ;;  %v3598_v62 = vld [vmem:[#allocation2 + $0xe2] sm:$0xff]  ;;  %3629 = vst.msk [vmem:[#allocation3 + $0x410] sm:$0xff] %vm2525_vm1, %v3597_v11 }
 0x343   : > { %3253 = vrot.lane.b32.xlu0 %v9038_v41, %s6792_s21  ;;  %v2729_v4 = vpop.permute.xlu2 %2728  ;;  %v9195_v41 = vpop.f32.mrf.mxu1  ;;  %3630 = vst.msk [vmem:[#allocation3 + $0x458] sm:$0xff] %vm2525_vm1, %v3598_v62  ;;  %v3725_v49 = vld [vmem:[#allocation3 + $0x450] sm:$0xff] }
 0x344   : > { %v3232_v34 = vpop.permute.xlu1 %3231  ;;  %2804 = vst.msk [vmem:[#allocation3 + $0x5e8] sm:$0xff] %vm2782_vm11, %v2729_v4 }
 0x345   : > { %v2725_v12 = vpop.permute.xlu0 %2724  ;;  %3311 = vst.msk [vmem:[#allocation3 + $0x490] sm:$0xff] %vm2782_vm11, %v3232_v34  ;;  %v3715_v45 = vld [vmem:[#allocation3 + $0x3c0] sm:$0xff] }
 0x346   : > { %2802 = vst.msk [vmem:[#allocation3 + $0x558] sm:$0xff] %vm2782_vm11, %v2725_v12  ;;  %4156 = vmatmul.f32.gmra.mxu2 %v3728_v38  ;;  %4373 = vmatmul.f32.gmra.mxu0 %v3715_v45 }
 0x349   : > { %2746 = vrot.lane.b32.xlu2 %v9034_v63, %s6792_s21 }
 0x34a   : > { %3507 = vrot.lane.b32.xlu1 %v9034_v63, %s6792_s21  ;;  %v3720_v63 = vld [vmem:[#allocation3 + $0x408] sm:$0xff] }
 0x34b   : > { %3505 = vrot.lane.b32.xlu0 %v9011_v57, %s6792_s21  ;;  %v2982_v61 = vpop.permute.xlu2 %2981  ;;  %v3734_v57 = vld [vmem:[#allocation3 + $0x4d8] sm:$0xff]  ;;  %v9209_v42 = vpop.f32.mrf.mxu1  ;;  %v3752_v6 = vld [vmem:[#allocation3 + $0x5e8] sm:$0xff] }
 0x34c   : > { %v3729_v0 = vld [vmem:[#allocation3 + $0x490] sm:$0xff]  ;;  %3058 = vst.msk [vmem:[#allocation3 + $0x560] sm:$0xff] %vm2782_vm11, %v2982_v61  ;;  %v2727_v33 = vpop.permute.xlu1 %2726 }
 0x34d   : > { %v2978_v20 = vpop.permute.xlu0 %2977  ;;  %4269 = vmatmul.f32.gmra.mxu3 %v3729_v0  ;;  %v3742_v29 = vld [vmem:[#allocation3 + $0x558] sm:$0xff]  ;;  %2803 = vst.msk [vmem:[#allocation3 + $0x5a0] sm:$0xff] %vm2782_vm11, %v2727_v33 }
 0x34e   : > { %3056 = vst.msk [vmem:[#allocation3 + $0x4d0] sm:$0xff] %vm2782_vm11, %v2978_v20  ;;  %4052 = vmatmul.f32.gmra.mxu1 %v3742_v29  ;;  %4376 = vmatmul.f32.gmra.mxu0 %v3720_v63  ;;  %v3605_v29 = vld [vmem:[#allocation2 + $0x13a] sm:$0xff]  ;;  %v3606_v63 = vld [vmem:[#allocation2 + $0x142] sm:$0xff] }
 0x34f   : > { %3637 = vst.msk [vmem:[#allocation3 + $0x650] sm:$0xff] %vm2525_vm1, %v3605_v29 }
 0x350   : > { %3638 = vst.msk [vmem:[#allocation3 + $0x698] sm:$0xff] %vm2525_vm1, %v3606_v63 }
 0x351   : > { %2999 = vrot.lane.b32.xlu2 %v9029_v48, %s6792_s21 }
 0x352   : > { %3255 = vrot.lane.b32.xlu1 %v9078_v40, %s6792_s21  ;;  %v3873_v40 = vld [vmem:[%s10852_s3 + $0x210] sm:$0xff] }
 0x353   : > { %2748 = vrot.lane.b32.xlu0 %v9054_v54, %s6792_s21  ;;  %v3492_v9 = vpop.permute.xlu2 %3491  ;;  %4444 = vmatpush.msra.mxu1 %v3873_v40  ;;  %v3743_v46 = vld [vmem:[#allocation3 + $0x560] sm:$0xff] }
 0x354   : > { %3569 = vst.msk [vmem:[#allocation3 + $0x528] sm:$0xff] %vm2782_vm11, %v3492_v9  ;;  %v2980_v58 = vpop.permute.xlu1 %2979  ;;  %v3747_v48 = vld [vmem:[#allocation3 + $0x5a0] sm:$0xff] }
 0x355   : > { %4272 = vmatmul.f32.gmra.mxu3 %v3734_v57  ;;  %v3488_v17 = vpop.permute.xlu0 %3487  ;;  %v3733_v3 = vld [vmem:[#allocation3 + $0x4d0] sm:$0xff]  ;;  %3057 = vst.msk [vmem:[#allocation3 + $0x518] sm:$0xff] %vm2782_vm11, %v2980_v58  ;;  %4445 = vmatpush.msra.mxu1 %v3872_v43 }
 0x356   : > { %3567 = vst.msk [vmem:[#allocation3 + $0x498] sm:$0xff] %vm2782_vm11, %v3488_v17  ;;  %4159 = vmatmul.f32.gmra.mxu2 %v3733_v3  ;;  %4379 = vmatmul.f32.gmra.mxu0 %v3725_v49 }
 0x357   : > { %4055 = vmatmul.f32.gmra.mxu1 %v3747_v48 }
 0x359   : > { %3257 = vrot.lane.b32.xlu2 %v9060_v5, %s6792_s21  ;;  %v9226_v5 = vpop.f32.mrf.mxu1 }
 0x35a   : > { %3003 = vrot.lane.b32.xlu1 %v9081_v39, %s6792_s21 }
 0x35b   : > { %3001 = vrot.lane.b32.xlu0 %v9057_v28, %s6792_s21  ;;  %v3240_v2 = vpop.permute.xlu2 %3239  ;;  %v3165_v28 = vld [vmem:[#allocation2 + $0x182] sm:$0xff]  ;;  %v3740_v56 = vld [vmem:[#allocation3 + $0x528] sm:$0xff] }
 0x35c   : > { %3315 = vst.msk [vmem:[#allocation3 + $0x5b0] sm:$0xff] %vm2782_vm11, %v3240_v2  ;;  %v3238_v21 = vpop.permute.xlu1 %3237  ;;  %v3738_v30 = vld [vmem:[#allocation3 + $0x518] sm:$0xff] }
 0x35d   : > { %v3236_v31 = vpop.permute.xlu0 %3235  ;;  %v3730_v60 = vld [vmem:[#allocation3 + $0x498] sm:$0xff]  ;;  %3314 = vst.msk [vmem:[#allocation3 + $0x568] sm:$0xff] %vm2782_vm11, %v3238_v21 }
 0x35e   : > { %3313 = vst.msk [vmem:[#allocation3 + $0x520] sm:$0xff] %vm2782_vm11, %v3236_v31  ;;  %4382 = vmatmul.f32.gmra.mxu0 %v3730_v60  ;;  %4162 = vmatmul.f32.gmra.mxu2 %v3738_v30  ;;  %v3871_v30 = vld [vmem:[%s10852_s3 + $0x200] sm:$0xff] }
 0x35f   : > { %4058 = vmatmul.f32.gmra.mxu1 %v3752_v6 }
 0x360   : > { %4446 = vmatpush.msra.mxu1 %v3871_v30 }
 0x361   : > { %3509 = vrot.lane.b32.xlu2 %v9054_v54, %s6792_s21  ;;  %v9240_v54 = vpop.f32.mrf.mxu1 }
 0x362   : > { %3259 = vrot.lane.b32.xlu1 %v3165_v28, %s6792_s21 }
 0x363   : > { %3511 = vrot.lane.b32.xlu0 %v9084_v47, %s6792_s21  ;;  %v2735_v39 = vpop.permute.xlu2 %2734  ;;  %v3601_v47 = vld [vmem:[#allocation2 + $0x10a] sm:$0xff]  ;;  %v3749_v27 = vld [vmem:[#allocation3 + $0x5b0] sm:$0xff] }
 0x364   : > { %2807 = vst.msk [vmem:[#allocation3 + $0x6c0] sm:$0xff] %vm2782_vm11, %v2735_v39  ;;  %v3490_v53 = vpop.permute.xlu1 %3489  ;;  %v3744_v44 = vld [vmem:[#allocation3 + $0x568] sm:$0xff] }
 0x365   : > { %v2731_v25 = vpop.permute.xlu0 %2730  ;;  %v3739_v19 = vld [vmem:[#allocation3 + $0x520] sm:$0xff]  ;;  %3568 = vst.msk [vmem:[#allocation3 + $0x4e0] sm:$0xff] %vm2782_vm11, %v3490_v53  ;;  %v9284_v53 = vpop.f32.mrf.mxu2 }
 0x366   : > { %2805 = vst.msk [vmem:[#allocation3 + $0x630] sm:$0xff] %vm2782_vm11, %v2731_v25  ;;  %4275 = vmatmul.f32.gmra.mxu3 %v3739_v19  ;;  %4165 = vmatmul.f32.gmra.mxu2 %v3743_v46  ;;  %v3607_v39 = vld [vmem:[#allocation2 + $0x152] sm:$0xff]  ;;  %v3608_v25 = vld [vmem:[#allocation2 + $0x15a] sm:$0xff] }
 0x367   : > { %3633 = vst.msk [vmem:[#allocation3 + $0x530] sm:$0xff] %vm2525_vm1, %v3601_v47 }
 0x368   : > { %3639 = vst.msk [vmem:[#allocation3 + $0x6e0] sm:$0xff] %vm2525_vm1, %v3607_v39 }
 0x369   : > { %3005 = vrot.lane.b32.xlu2 %v9107_v50, %s6792_s21  ;;  %v3166_v50 = vld [vmem:[#allocation2 + $0x18a] sm:$0xff]  ;;  %v9248_v36 = vpop.f32.mrf.mxu1  ;;  %3640 = vst.msk [vmem:[#allocation3 + $0x728] sm:$0xff] %vm2525_vm1, %v3608_v25 }
 0x36a   : > { %3513 = vrot.lane.b32.xlu1 %v9104_v15, %s6792_s21 }
 0x36b   : > { %v2988_v35 = vpop.permute.xlu2 %2987  ;;  %v3767_v38 = vld [vmem:[#allocation3 + $0x6c0] sm:$0xff] }
 0x36c   : > { %3061 = vst.msk [vmem:[#allocation3 + $0x638] sm:$0xff] %vm2782_vm11, %v2988_v35  ;;  %v2733_v13 = vpop.permute.xlu1 %2732  ;;  %v3735_v15 = vld [vmem:[#allocation3 + $0x4e0] sm:$0xff] }
 0x36d   : > { %v2984_v26 = vpop.permute.xlu0 %2983  ;;  %v3757_v37 = vld [vmem:[#allocation3 + $0x630] sm:$0xff]  ;;  %2806 = vst.msk [vmem:[#allocation3 + $0x678] sm:$0xff] %vm2782_vm11, %v2733_v13  ;;  %4385 = vmatmul.f32.gmra.mxu0 %v3735_v15  ;;  %v9290_v13 = vpop.f32.mrf.mxu3 }
 0x36e   : > { %3059 = vst.msk [vmem:[#allocation3 + $0x5a8] sm:$0xff] %vm2782_vm11, %v2984_v26  ;;  %4061 = vmatmul.f32.gmra.mxu1 %v3757_v37  ;;  %4278 = vmatmul.f32.gmra.mxu3 %v3744_v44 }
 0x371   : > { %3261 = vrot.lane.b32.xlu2 %v3166_v50, %s6792_s21  ;;  %v9259_v12 = vpop.f32.mrf.mxu1 }
 0x373   : > { %v3246_v7 = vpop.permute.xlu2 %3245  ;;  %v3758_v33 = vld [vmem:[#allocation3 + $0x638] sm:$0xff] }
 0x374   : > { %3318 = vst.msk [vmem:[#allocation3 + $0x688] sm:$0xff] %vm2782_vm11, %v3246_v7  ;;  %v2986_v52 = vpop.permute.xlu1 %2985  ;;  %v3762_v1 = vld [vmem:[#allocation3 + $0x678] sm:$0xff] }
 0x375   : > { %v3242_v18 = vpop.permute.xlu0 %3241  ;;  %v3748_v32 = vld [vmem:[#allocation3 + $0x5a8] sm:$0xff]  ;;  %3060 = vst.msk [vmem:[#allocation3 + $0x5f0] sm:$0xff] %vm2782_vm11, %v2986_v52  ;;  %4388 = vmatmul.f32.gmra.mxu0 %v3740_v56  ;;  %v9296_v52 = vpop.f32.mrf.mxu2 }
 0x376   : > { %3316 = vst.msk [vmem:[#allocation3 + $0x5f8] sm:$0xff] %vm2782_vm11, %v3242_v18  ;;  %4168 = vmatmul.f32.gmra.mxu2 %v3748_v32  ;;  %4281 = vmatmul.f32.gmra.mxu3 %v3749_v27  ;;  %v9299_v32 = vpop.f32.mrf.mxu3  ;;  %v3609_v27 = vld [vmem:[#allocation2 + $0x16a] sm:$0xff] }
 0x377   : > { %4064 = vmatmul.f32.gmra.mxu1 %v3762_v1  ;;  %v3610_v1 = vld [vmem:[#allocation2 + $0x172] sm:$0xff]  ;;  %3641 = vst.msk [vmem:[#allocation3 + $0x770] sm:$0xff] %vm2525_vm1, %v3609_v27 }
 0x378   : > { %3642 = vst.msk [vmem:[#allocation3 + $0x7b8] sm:$0xff] %vm2525_vm1, %v3610_v1 }
 0x379   : > { %v9264_v20 = vpop.f32.mrf.mxu1 }
 0x37b   : > { %v3498_v24 = vpop.permute.xlu2 %3497  ;;  %v3764_v6 = vld [vmem:[#allocation3 + $0x688] sm:$0xff] }
 0x37c   : > { %3572 = vst.msk [vmem:[#allocation3 + $0x600] sm:$0xff] %vm2782_vm11, %v3498_v24  ;;  %v3496_v34 = vpop.permute.xlu1 %3495  ;;  %v3753_v45 = vld [vmem:[#allocation3 + $0x5f0] sm:$0xff] }
 0x37d   : > { %v3494_v8 = vpop.permute.xlu0 %3493  ;;  %v3754_v4 = vld [vmem:[#allocation3 + $0x5f8] sm:$0xff]  ;;  %3571 = vst.msk [vmem:[#allocation3 + $0x5b8] sm:$0xff] %vm2782_vm11, %v3496_v34 }
 0x37e   : > { %3570 = vst.msk [vmem:[#allocation3 + $0x570] sm:$0xff] %vm2782_vm11, %v3494_v8  ;;  %4284 = vmatmul.f32.gmra.mxu3 %v3754_v4  ;;  %4171 = vmatmul.f32.gmra.mxu2 %v3753_v45  ;;  %v9308_v4 = vpop.f32.mrf.mxu2 }
 0x37f   : > { %4067 = vmatmul.f32.gmra.mxu1 %v3767_v38  ;;  %v9310_v38 = vpop.f32.mrf.mxu3 }
 0x381   : > { %v9273_v48 = vpop.f32.mrf.mxu1 }
 0x383   : > { %v2741_v11 = vpop.permute.xlu2 %2740  ;;  %v3755_v21 = vld [vmem:[#allocation3 + $0x600] sm:$0xff] }
 0x384   : > { %2810 = vst.msk [vmem:[#allocation3 + $0x798] sm:$0xff] %vm2782_vm11, %v2741_v11  ;;  %v3244_v0 = vpop.permute.xlu1 %3243  ;;  %v3750_v3 = vld [vmem:[#allocation3 + $0x5b8] sm:$0xff] }
 0x385   : > { %v2737_v62 = vpop.permute.xlu0 %2736  ;;  %v3745_v61 = vld [vmem:[#allocation3 + $0x570] sm:$0xff]  ;;  %3317 = vst.msk [vmem:[#allocation3 + $0x640] sm:$0xff] %vm2782_vm11, %v3244_v0 }
 0x386   : > { %2808 = vst.msk [vmem:[#allocation3 + $0x708] sm:$0xff] %vm2782_vm11, %v2737_v62  ;;  %4391 = vmatmul.f32.gmra.mxu0 %v3745_v61  ;;  %4174 = vmatmul.f32.gmra.mxu2 %v3758_v33  ;;  %v9313_v33 = vpop.f32.mrf.mxu0 }
 0x389   : > { %v9281_v28 = vpop.f32.mrf.mxu1 }
 0x38b   : > { %v2994_v57 = vpop.permute.xlu2 %2993  ;;  %v3782_v35 = vld [vmem:[#allocation3 + $0x798] sm:$0xff] }
 0x38c   : > { %3064 = vst.msk [vmem:[#allocation3 + $0x710] sm:$0xff] %vm2782_vm11, %v2994_v57  ;;  %v2739_v17 = vpop.permute.xlu1 %2738  ;;  %v3759_v49 = vld [vmem:[#allocation3 + $0x640] sm:$0xff] }
 0x38d   : > { %v2990_v9 = vpop.permute.xlu0 %2989  ;;  %v3772_v58 = vld [vmem:[#allocation3 + $0x708] sm:$0xff]  ;;  %2809 = vst.msk [vmem:[#allocation3 + $0x750] sm:$0xff] %vm2782_vm11, %v2739_v17  ;;  %4287 = vmatmul.f32.gmra.mxu3 %v3759_v49  ;;  %v3612_v17 = vld [vmem:[#allocation2 + $0x18a] sm:$0xff] }
 0x38e   : > { %3062 = vst.msk [vmem:[#allocation3 + $0x680] sm:$0xff] %vm2782_vm11, %v2990_v9  ;;  %4070 = vmatmul.f32.gmra.mxu1 %v3772_v58  ;;  %4394 = vmatmul.f32.gmra.mxu0 %v3750_v3  ;;  %v3611_v9 = vld [vmem:[#allocation2 + $0x182] sm:$0xff]  ;;  %v9320_v58 = vpop.f32.mrf.mxu2 }
 0x38f   : > { %3643 = vst.msk [vmem:[#allocation3 + $0x800] sm:$0xff] %vm2525_vm1, %v3611_v9 }
 0x390   : > { %3644 = vst.msk [vmem:[#allocation3 + $0x848] sm:$0xff] %vm2525_vm1, %v3612_v17  ;;  %v5922_v17 = vld [vmem:[#allocation2 + $0x19a] sm:$0xff] }
 0x391   : > { %v9292_v37 = vpop.f32.mrf.mxu1 }
 0x393   : > { %v3504_v40 = vpop.permute.xlu2 %3503  ;;  %v3773_v18 = vld [vmem:[#allocation3 + $0x710] sm:$0xff] }
 0x394   : > { %3575 = vst.msk [vmem:[#allocation3 + $0x6d8] sm:$0xff] %vm2782_vm11, %v3504_v40  ;;  %v2992_v2 = vpop.permute.xlu1 %2991  ;;  %v3777_v60 = vld [vmem:[#allocation3 + $0x750] sm:$0xff] }
 0x395   : > { %v3500_v22 = vpop.permute.xlu0 %3499  ;;  %v3763_v31 = vld [vmem:[#allocation3 + $0x680] sm:$0xff]  ;;  %3063 = vst.msk [vmem:[#allocation3 + $0x6c8] sm:$0xff] %vm2782_vm11, %v2992_v2  ;;  %4290 = vmatmul.f32.gmra.mxu3 %v3764_v6  ;;  %v9324_v2 = vpop.f32.mrf.mxu3 }
 0x396   : > { %3573 = vst.msk [vmem:[#allocation3 + $0x648] sm:$0xff] %vm2782_vm11, %v3500_v22  ;;  %4177 = vmatmul.f32.gmra.mxu2 %v3763_v31  ;;  %4397 = vmatmul.f32.gmra.mxu0 %v3755_v21  ;;  %v9326_v31 = vpop.f32.mrf.mxu0 }
 0x397   : > { %4073 = vmatmul.f32.gmra.mxu1 %v3777_v60 }
 0x399   : > { %v9302_v56 = vpop.f32.mrf.mxu1 }
 0x39b   : > { %v3252_v19 = vpop.permute.xlu2 %3251  ;;  %v3770_v63 = vld [vmem:[#allocation3 + $0x6d8] sm:$0xff] }
 0x39c   : > { %3321 = vst.msk [vmem:[#allocation3 + $0x760] sm:$0xff] %vm2782_vm11, %v3252_v19  ;;  %v3250_v47 = vpop.permute.xlu1 %3249  ;;  %v3768_v26 = vld [vmem:[#allocation3 + $0x6c8] sm:$0xff] }
 0x39d   : > { %v3248_v46 = vpop.permute.xlu0 %3247  ;;  %v3760_v55 = vld [vmem:[#allocation3 + $0x648] sm:$0xff]  ;;  %3320 = vst.msk [vmem:[#allocation3 + $0x718] sm:$0xff] %vm2782_vm11, %v3250_v47  ;;  %v9334_v47 = vpop.f32.mrf.mxu2 }
 0x39e   : > { %3319 = vst.msk [vmem:[#allocation3 + $0x6d0] sm:$0xff] %vm2782_vm11, %v3248_v46  ;;  %4400 = vmatmul.f32.gmra.mxu0 %v3760_v55  ;;  %4180 = vmatmul.f32.gmra.mxu2 %v3768_v26  ;;  %v9337_v55 = vpop.f32.mrf.mxu0  ;;  %v9341_v26 = vpop.f32.mrf.mxu3 }
 0x39f   : > { %4076 = vmatmul.f32.gmra.mxu1 %v3782_v35 }
 0x3a1   : > { %v9316_v57 = vpop.f32.mrf.mxu1 }
 0x3a3   : > { %v2747_v44 = vpop.permute.xlu2 %2746  ;;  %v3779_v61 = vld [vmem:[#allocation3 + $0x760] sm:$0xff] }
 0x3a4   : > { %2813 = vst.msk [vmem:[#allocation3 + $0x870] sm:$0xff] %vm2782_vm11, %v2747_v44  ;;  %v3502_v50 = vpop.permute.xlu1 %3501  ;;  %v3774_v8 = vld [vmem:[#allocation3 + $0x718] sm:$0xff] }
 0x3a5   : > { %v2743_v15 = vpop.permute.xlu0 %2742  ;;  %v3769_v7 = vld [vmem:[#allocation3 + $0x6d0] sm:$0xff]  ;;  %3574 = vst.msk [vmem:[#allocation3 + $0x690] sm:$0xff] %vm2782_vm11, %v3502_v50 }
 0x3a6   : > { %2811 = vst.msk [vmem:[#allocation3 + $0x7e0] sm:$0xff] %vm2782_vm11, %v2743_v15  ;;  %4293 = vmatmul.f32.gmra.mxu3 %v3769_v7  ;;  %4183 = vmatmul.f32.gmra.mxu2 %v3773_v18  ;;  %v9346_v1 = vpop.f32.mrf.mxu0 }
 0x3ab   : > { %v3000_v43 = vpop.permute.xlu2 %2999  ;;  %v3797_v21 = vld [vmem:[#allocation3 + $0x870] sm:$0xff]  ;;  %v9329_v6 = vpop.f32.mrf.mxu1 }
 0x3ac   : > { %3067 = vst.msk [vmem:[#allocation3 + $0x7e8] sm:$0xff] %vm2782_vm11, %v3000_v43  ;;  %v2745_v23 = vpop.permute.xlu1 %2744  ;;  %v3765_v34 = vld [vmem:[#allocation3 + $0x690] sm:$0xff]  ;;  %v9348_v43 = vpop.f32.mrf.mxu2 }
 0x3ad   : > { %v2996_v10 = vpop.permute.xlu0 %2995  ;;  %v3787_v24 = vld [vmem:[#allocation3 + $0x7e0] sm:$0xff]  ;;  %2812 = vst.msk [vmem:[#allocation3 + $0x828] sm:$0xff] %vm2782_vm11, %v2745_v23  ;;  %4403 = vmatmul.f32.gmra.mxu0 %v3765_v34 }
 0x3ae   : > { %3065 = vst.msk [vmem:[#allocation3 + $0x758] sm:$0xff] %vm2782_vm11, %v2996_v10  ;;  %4079 = vmatmul.f32.gmra.mxu1 %v3787_v24  ;;  %4296 = vmatmul.f32.gmra.mxu3 %v3774_v8  ;;  %v5923_v10 = vld [vmem:[#allocation2 + $0x1a2] sm:$0xff]  ;;  %v9352_v24 = vpop.f32.mrf.mxu3 }
 0x3b3   : > { %v3258_v45 = vpop.permute.xlu2 %3257  ;;  %v3788_v46 = vld [vmem:[#allocation3 + $0x7e8] sm:$0xff]  ;;  %v9339_v35 = vpop.f32.mrf.mxu1 }
 0x3b4   : > { %3324 = vst.msk [vmem:[#allocation3 + $0x838] sm:$0xff] %vm2782_vm11, %v3258_v45  ;;  %v2998_v62 = vpop.permute.xlu1 %2997  ;;  %v3792_v29 = vld [vmem:[#allocation3 + $0x828] sm:$0xff]  ;;  %v9362_v9 = vpop.f32.mrf.mxu2 }
 0x3b5   : > { %v3254_v11 = vpop.permute.xlu0 %3253  ;;  %v3778_v0 = vld [vmem:[#allocation3 + $0x758] sm:$0xff]  ;;  %3066 = vst.msk [vmem:[#allocation3 + $0x7a0] sm:$0xff] %vm2782_vm11, %v2998_v62  ;;  %4406 = vmatmul.f32.gmra.mxu0 %v3770_v63  ;;  %v9360_v63 = vpop.f32.mrf.mxu0 }
 0x3b6   : > { %3322 = vst.msk [vmem:[#allocation3 + $0x7a8] sm:$0xff] %vm2782_vm11, %v3254_v11  ;;  %4186 = vmatmul.f32.gmra.mxu2 %v3778_v0  ;;  %4299 = vmatmul.f32.gmra.mxu3 %v3779_v61  ;;  %v3651_v61 = vld [vmem:[#allocation3 + $0x20] sm:$0xff] }
 0x3b7   : > { %4082 = vmatmul.f32.gmra.mxu1 %v3792_v29 }
 0x3bb   : > { %v3510_v3 = vpop.permute.xlu2 %3509  ;;  %v9350_v23 = vpop.f32.mrf.mxu1  ;;  %v3794_v0 = vld [vmem:[#allocation3 + $0x838] sm:$0xff] }
 0x3bc   : > { %3578 = vst.msk [vmem:[#allocation3 + $0x7b0] sm:$0xff] %vm2782_vm11, %v3510_v3  ;;  %v3508_v40 = vpop.permute.xlu1 %3507  ;;  %v3783_v60 = vld [vmem:[#allocation3 + $0x7a0] sm:$0xff]  ;;  %v9364_v3 = vpop.f32.mrf.mxu3 }
 0x3bd   : > { %v3506_v49 = vpop.permute.xlu0 %3505  ;;  %v3784_v22 = vld [vmem:[#allocation3 + $0x7a8] sm:$0xff]  ;;  %3577 = vst.msk [vmem:[#allocation3 + $0x768] sm:$0xff] %vm2782_vm11, %v3508_v40 }
 0x3be   : > { %3576 = vst.msk [vmem:[#allocation3 + $0x720] sm:$0xff] %vm2782_vm11, %v3506_v49  ;;  %4302 = vmatmul.f32.gmra.mxu3 %v3784_v22  ;;  %4189 = vmatmul.f32.gmra.mxu2 %v3783_v60  ;;  %v3656_v60 = vld [vmem:[#allocation3 + $0x68] sm:$0xff] }
 0x3bf   : > { %4085 = vmatmul.f32.gmra.mxu1 %v3797_v21 }
 0x3c3   : > { %v3006_v30 = vpop.permute.xlu2 %3005  ;;  %v3785_v62 = vld [vmem:[#allocation3 + $0x7b0] sm:$0xff] }
 0x3c4   : > { %3070 = vst.msk [vmem:[#allocation3 + $0x8c0] sm:$0xff] %vm2782_vm11, %v3006_v30  ;;  %v3256_v25 = vpop.permute.xlu1 %3255  ;;  %v3780_v18 = vld [vmem:[#allocation3 + $0x768] sm:$0xff]  ;;  %v9369_v30 = vpop.f32.mrf.mxu0 }
 0x3c5   : > { %v2749_v39 = vpop.permute.xlu0 %2748  ;;  %v3775_v19 = vld [vmem:[#allocation3 + $0x720] sm:$0xff]  ;;  %3323 = vst.msk [vmem:[#allocation3 + $0x7f0] sm:$0xff] %vm2782_vm11, %v3256_v25 }
 0x3c6   : > { %2814 = vst.msk [vmem:[#allocation3 + $0x8b8] sm:$0xff] %vm2782_vm11, %v2749_v39  ;;  %4409 = vmatmul.f32.gmra.mxu0 %v3775_v19  ;;  %4192 = vmatmul.f32.gmra.mxu2 %v3788_v46  ;;  %v9373_v46 = vpop.f32.mrf.mxu2 }
 0x3cb   : > { %v3262_v44 = vpop.permute.xlu2 %3261  ;;  %v9358_v29 = vpop.f32.mrf.mxu1  ;;  %v3803_v25 = vld [vmem:[#allocation3 + $0x8c0] sm:$0xff] }
 0x3cc   : > { %3326 = vst.msk [vmem:[#allocation3 + $0x8c8] sm:$0xff] %vm2782_vm11, %v3262_v44  ;;  %v3004_v50 = vpop.permute.xlu1 %3003  ;;  %v3789_v27 = vld [vmem:[#allocation3 + $0x7f0] sm:$0xff] }
 0x3cd   : > { %v3002_v15 = vpop.permute.xlu0 %3001  ;;  %v3802_v7 = vld [vmem:[#allocation3 + $0x8b8] sm:$0xff]  ;;  %3069 = vst.msk [vmem:[#allocation3 + $0x878] sm:$0xff] %vm2782_vm11, %v3004_v50  ;;  %4305 = vmatmul.f32.gmra.mxu3 %v3789_v27  ;;  %v3661_v44 = vld [vmem:[#allocation3 + $0xb0] sm:$0xff]  ;;  %v3800_v50 = vld [vmem:[#allocation3 + $0x888] sm:$0xff] }
 0x3ce   : > { %3068 = vst.msk [vmem:[#allocation3 + $0x830] sm:$0xff] %vm2782_vm11, %v3002_v15  ;;  %4088 = vmatmul.f32.gmra.mxu1 %v3802_v7  ;;  %4412 = vmatmul.f32.gmra.mxu0 %v3780_v18  ;;  %v9375_v15 = vpop.f32.mrf.mxu3  ;;  %v9378_v7 = vpop.f32.mrf.mxu0  ;;  %v3666_v18 = vld [vmem:[#allocation3 + $0xf8] sm:$0xff] }
 0x3d3   : > { %v3804_v8 = vld [vmem:[#allocation3 + $0x8c8] sm:$0xff] }
 0x3d4   : > { %v3260_v45 = vpop.permute.xlu1 %3259  ;;  %5955 = vst.msk [vmem:[#allocation3 + $0x8c8] sm:$0xff] %vm4576_vm15, %v5923_v10  ;;  %v3798_v40 = vld [vmem:[#allocation3 + $0x878] sm:$0xff]  ;;  %v9371_v39 = vpop.f32.mrf.mxu1  ;;  %v3805_v10 = vld [vmem:[#allocation3 + $0x8d0] sm:$0xff] }
 0x3d5   : > { %v3512_v34 = vpop.permute.xlu0 %3511  ;;  %v3793_v11 = vld [vmem:[#allocation3 + $0x830] sm:$0xff]  ;;  %3325 = vst.msk [vmem:[#allocation3 + $0x880] sm:$0xff] %vm2782_vm11, %v3260_v45  ;;  %4308 = vmatmul.f32.gmra.mxu3 %v3794_v0  ;;  %v3671_v45 = vld [vmem:[#allocation3 + $0x140] sm:$0xff] }
 0x3d6   : > { %3579 = vst.msk [vmem:[#allocation3 + $0x7f8] sm:$0xff] %vm2782_vm11, %v3512_v34  ;;  %4195 = vmatmul.f32.gmra.mxu2 %v3793_v11  ;;  %4415 = vmatmul.f32.gmra.mxu0 %v3785_v62  ;;  %v9383_v34 = vpop.f32.mrf.mxu0  ;;  %v3681_v0 = vld [vmem:[#allocation3 + $0x1d0] sm:$0xff] }
 0x3d7   : > { %6623 = vmatmul.msk.f32.vlgmr.msra.gmra.mxu1 %vm2525_vm1, %v3651_v61 }
 0x3dc   : > { %v3514_v49 = vpop.permute.xlu1 %3513  ;;  %v3799_v21 = vld [vmem:[#allocation3 + $0x880] sm:$0xff]  ;;  %v9380_v27 = vpop.f32.mrf.mxu1 }
 0x3dd   : > { %v3790_v22 = vld [vmem:[#allocation3 + $0x7f8] sm:$0xff]  ;;  %3580 = vst.msk [vmem:[#allocation3 + $0x840] sm:$0xff] %vm2782_vm11, %v3514_v49  ;;  %4311 = vmatmul.f32.gmra.mxu3 %v3799_v21  ;;  %v3696_v21 = vld [vmem:[#allocation3 + $0x2a8] sm:$0xff] }
 0x3de   : > { %4198 = vmatmul.f32.gmra.mxu2 %v3798_v40  ;;  %4418 = vmatmul.f32.gmra.mxu0 %v3790_v22  ;;  %5954 = vst.msk [vmem:[#allocation3 + $0x880] sm:$0xff] %vm4576_vm15, %v5922_v17  ;;  %v3686_v17 = vld [vmem:[#allocation3 + $0x218] sm:$0xff]  ;;  %v3691_v40 = vld [vmem:[#allocation3 + $0x260] sm:$0xff] }
 0x3df   : > { %6624 = vmatmul.msk.f32.gmra.mxu1 %vm2525_vm1, %v3656_v60  ;;  %v3701_v60 = vld [vmem:[#allocation3 + $0x2f0] sm:$0xff] }
 0x3e4   : > { %v3795_v19 = vld [vmem:[#allocation3 + $0x840] sm:$0xff] }
 0x3e5   : > { %4314 = vmatmul.f32.gmra.mxu3 %v3804_v8  ;;  %v3676_v8 = vld [vmem:[#allocation3 + $0x188] sm:$0xff] }
 0x3e6   : > { %4201 = vmatmul.f32.gmra.mxu2 %v3803_v25  ;;  %4421 = vmatmul.f32.gmra.mxu0 %v3795_v19  ;;  %v3706_v19 = vld [vmem:[#allocation3 + $0x338] sm:$0xff] }
 0x3e7   : > { %6625 = vmatmul.msk.f32.gmra.mxu1 %vm2525_vm1, %v3661_v44 }
 0x3eb   : > { %v9385_v11 = vpop.f32.mrf.mxu1 }
 0x3ee   : > { %4424 = vmatmul.f32.gmra.mxu0 %v3800_v50  ;;  %v3711_v50 = vld [vmem:[#allocation3 + $0x380] sm:$0xff] }
 0x3ef   : > { %6626 = vmatmul.msk.f32.gmra.mxu1 %vm2525_vm1, %v3666_v18 }
 0x3f4   : > { %v9389_v62 = vpop.f32.mrf.mxu1 }
 0x3f6   : > { %4427 = vmatmul.f32.gmra.mxu0 %v3805_v10  ;;  %v3716_v10 = vld [vmem:[#allocation3 + $0x3c8] sm:$0xff] }
 0x3f7   : > { %6627 = vmatmul.msk.f32.gmra.mxu1 %vm2525_vm1, %v3671_v45 }
 0x3fc   : > { %v9392_v61 = vpop.f32.mrf.mxu1 }
 0x3ff   : > { %6628 = vmatmul.msk.f32.gmra.mxu1 %vm2525_vm1, %v3676_v8  ;;  %v3721_v8 = vld [vmem:[#allocation3 + $0x410] sm:$0xff] }
 0x407   : > { %6629 = vmatmul.msk.f32.gmra.mxu1 %vm2525_vm1, %v3681_v0  ;;  %v9417_v0 = vld [vmem:[%s10853_s4] ss:$0 sm:$0xff] }
 0x40b   : > { %v9395_v49 = vpop.f32.mrf.mxu1 }
 0x40f   : > { %6630 = vmatmul.msk.f32.gmra.mxu1 %vm2525_vm1, %v3686_v17 }
 0x414   : > { %v9398_v22 = vpop.f32.mrf.mxu1 }
 0x417   : > { %6631 = vmatmul.msk.f32.gmra.mxu1 %vm2525_vm1, %v3691_v40  ;;  %v3997_v40 = vadd.f32 %v9417_v0, %v9124_v16 }
 0x41c   : > { %v9401_v25 = vpop.f32.mrf.mxu1 }
 0x41d   : > { %10857 = vst [vmem:[#allocation4_spill] sm:$0xff] %v9401_v25 }
 0x41f   : > { %6632 = vmatmul.msk.f32.gmra.mxu1 %vm2525_vm1, %v3696_v21  ;;  %v9423_v21 = vpop.f32.mrf.mxu0 }
 0x427   : > { %6633 = vmatmul.msk.f32.gmra.mxu1 %vm2525_vm1, %v3701_v60  ;;  %v3726_v60 = vld [vmem:[#allocation3 + $0x458] sm:$0xff]  ;;  %v9433_v25 = vpop.f32.mrf.mxu0 }
 0x42b   : > { %v9404_v44 = vpop.f32.mrf.mxu1 }
 0x42c   : > { %10858 = vst [vmem:[#allocation5_spill] sm:$0xff] %v9404_v44 }
 0x42f   : > { %6634 = vmatmul.msk.f32.gmra.mxu1 %vm2525_vm1, %v3706_v19  ;;  %v4110_v19 = vadd.f32 %v9284_v53, %v3997_v40 }
 0x434   : > { %v9408_v18 = vpop.f32.mrf.mxu1 }
 0x435   : > { %10859 = vst [vmem:[#allocation6_spill] sm:$0xff] %v9408_v18 }
 0x437   : > { %6635 = vmatmul.msk.f32.gmra.mxu1 %vm2525_vm1, %v3711_v50  ;;  %v4223_v50 = vadd.f32 %v9290_v13, %v4110_v19  ;;  %v6087_v13 = vld [vmem:[%s10854_s5 + $0x118] sm:$0xff] }
 0x438   : > { %6426 = vmatpush.msra.mxu0 %v6087_v13  ;;  %v3741_v13 = vld [vmem:[#allocation3 + $0x530] sm:$0xff] }
 0x43c   : > { %v9411_v45 = vpop.f32.mrf.mxu1 }
 0x43d   : > { %10860 = vst [vmem:[#allocation7_spill] sm:$0xff] %v9411_v45  ;;  %v4000_v45 = vadd.f32 %v9417_v0, %v9144_v51 }
 0x43f   : > { %6636 = vmatmul.msk.f32.gmra.mxu1 %vm2525_vm1, %v3716_v10  ;;  %v4336_v10 = vadd.f32 %v9313_v33, %v4223_v50  ;;  %v4113_v44 = vadd.f32 %v9296_v52, %v4000_v45  ;;  %v4003_v52 = vadd.f32 %v9417_v0, %v9164_v14  ;;  %v3736_v45 = vld [vmem:[#allocation3 + $0x4e8] sm:$0xff]  ;;  %v6085_v14 = vld [vmem:[%s10854_s5 + $0x108] sm:$0xff]  ;;  %v6084_v50 = vld [vmem:[%s10854_s5 + $0x100] sm:$0xff] }
 0x441   : > { %v4226_v53 = vadd.f32 %v9299_v32, %v4113_v44 }
 0x443   : > { %v4339_v33 = vadd.f32 %v9326_v31, %v4226_v53  ;;  %v6086_v31 = vld [vmem:[%s10854_s5 + $0x110] sm:$0xff]  ;;  %v9465_v53 = vpop.f32.mrf.mxu2 }
 0x444   : > { %6427 = vmatpush.msra.mxu0 %v6086_v31 }
 0x446   : > { %6428 = vmatpush.msra.mxu0 %v6085_v14 }
 0x447   : > { %6637 = vmatmul.msk.f32.gmra.mxu1 %vm2525_vm1, %v3721_v8 }
 0x448   : > { %6429 = vmatpush.msra.mxu0 %v6084_v50 }
 0x44b   : > { %v9419_v17 = vpop.f32.mrf.mxu1  ;;  %v9487_v14 = vpop.f32.mrf.mxu2 }
 0x44c   : > { %10861 = vst [vmem:[#allocation8_spill] sm:$0xff] %v9419_v17  ;;  %v3731_v17 = vld [vmem:[#allocation3 + $0x4a0] sm:$0xff] }
 0x44f   : > { %6638 = vmatmul.msk.f32.gmra.mxu1 %vm2525_vm1, %v3726_v60 }
 0x454   : > { %v4448_v8 = vpop.f32.mrf.mxu1 }
 0x455   : > { %v4449_v18 = vadd.f32 %v4448_v8, %v4336_v10 }
 0x457   : > { %v4544_v16 = vmax.f32 %v4449_v18, 0.0  ;;  %6639 = vmatmul.msk.f32.gmra.mxu1 %vm2525_vm1, %v3731_v17  ;;  %v4116_v17 = vadd.f32 %v9308_v4, %v4003_v52  ;;  %v9454_v4 = vpop.f32.mrf.mxu0  ;;  %v9469_v52 = vpop.f32.mrf.mxu3 }
 0x459   : > { %4577 = vst.msk [vmem:[#allocation2 + $0x19] sm:$0xff] %vm4576_vm15, %v4544_v16  ;;  %v4229_v60 = vadd.f32 %v9310_v38, %v4116_v17  ;;  %v4006_v38 = vadd.f32 %v9417_v0, %v9184_v59  ;;  %v4009_v17 = vadd.f32 %v9417_v0, %v9195_v41  ;;  %v4012_v41 = vadd.f32 %v9417_v0, %v9209_v42 }
 0x45b   : > { %v4342_v19 = vadd.f32 %v9337_v55, %v4229_v60  ;;  %v4119_v8 = vadd.f32 %v9320_v58, %v4006_v38  ;;  %v4122_v60 = vadd.f32 %v9334_v47, %v4009_v17 }
 0x45c   : > { %v4451_v51 = vpop.f32.mrf.mxu1 }
 0x45d   : > { %v4452_v18 = vadd.f32 %v4451_v51, %v4339_v33  ;;  %v4232_v51 = vadd.f32 %v9324_v2, %v4119_v8  ;;  %v4125_v8 = vadd.f32 %v9348_v43, %v4012_v41  ;;  %v4018_v41 = vadd.f32 %v9417_v0, %v9240_v54 }
 0x45f   : > { %v4545_v40 = vmax.f32 %v4452_v18, 0.0  ;;  %6640 = vmatmul.msk.f32.gmra.mxu1 %vm2525_vm1, %v3736_v45  ;;  %v9476_v18 = vpop.f32.mrf.mxu0  ;;  %v4345_v2 = vadd.f32 %v9346_v1, %v4232_v51  ;;  %v4235_v1 = vadd.f32 %v9341_v26, %v4122_v60  ;;  %v9501_v50 = vpop.f32.mrf.mxu3  ;;  %v3756_v60 = vld [vmem:[#allocation3 + $0x608] sm:$0xff] }
 0x460   : > { %v4675_v32 = vld [vmem:[#allocation2 + $0x19] sm:$0xff]  ;;  %v9520_v51 = vpop.f32.mrf.mxu2 }
 0x461   : > { %v5059_v44 = vld [vmem:[#allocation2 + $0x18] sm:$0xff]  ;;  %4578 = vst.msk [vmem:[#allocation2 + $0x21] sm:$0xff] %vm4576_vm15, %v4545_v40  ;;  %4741 = vrot.lane.b32.xlu1 %v4675_v32, %s6793_s22  ;;  %v4348_v47 = vadd.f32 %v9360_v63, %v4235_v1  ;;  %v4238_v63 = vadd.f32 %v9352_v24, %v4125_v8  ;;  %v3761_v8 = vld [vmem:[#allocation3 + $0x650] sm:$0xff] }
 0x462   : > { %5284 = vst.msk [vmem:[#allocation3 + $0x8] sm:$0xff] %vm4576_vm15, %v4675_v32  ;;  %v3746_v32 = vld [vmem:[#allocation3 + $0x578] sm:$0xff] }
 0x463   : > { %4643 = vst.msk [vmem:[#allocation3 + $0x90] sm:$0xff] %vm4576_vm15, %v5059_v44 }
 0x464   : > { %v4454_v10 = vpop.f32.mrf.mxu1 }
 0x465   : > { %v4455_v16 = vadd.f32 %v4454_v10, %v4342_v19 }
 0x467   : > { %v4546_v33 = vmax.f32 %v4455_v16, 0.0  ;;  %6641 = vmatmul.msk.f32.gmra.mxu1 %vm2525_vm1, %v3741_v13  ;;  %v9504_v26 = vpop.f32.mrf.mxu0  ;;  %v3751_v13 = vld [vmem:[#allocation3 + $0x5c0] sm:$0xff] }
 0x468   : > { %v4869_v59 = vld [vmem:[#allocation2 + $0x22] sm:$0xff] }
 0x469   : > { %v4676_v55 = vld [vmem:[#allocation2 + $0x21] sm:$0xff]  ;;  %4579 = vst.msk [vmem:[#allocation2 + $0x31] sm:$0xff] %vm4576_vm15, %v4546_v33  ;;  %4936 = vrot.lane.b32.xlu0 %v4869_v59, %s6792_s21  ;;  %5123 = vrot.lane.b32.xlu1 %v5059_v44, %s6794_s27 }
 0x46a   : > { %4743 = vrot.lane.b32.xlu2 %v4676_v55, %s6793_s22  ;;  %v9474_v58 = vld [vmem:[#allocation2 + $0x20] sm:$0xff]  ;;  %5285 = vst.msk [vmem:[#allocation3 + $0x50] sm:$0xff] %vm4576_vm15, %v4676_v55 }
 0x46b   : > { %4644 = vst.msk [vmem:[#allocation3 + $0xd8] sm:$0xff] %vm4576_vm15, %v9474_v58  ;;  %v4868_v44 = vld [vmem:[#allocation2 + $0x1a] sm:$0xff] }
 0x46c   : > { %v4457_v45 = vpop.f32.mrf.mxu1 }
 0x46d   : > { %v4458_v40 = vadd.f32 %v4457_v45, %v4345_v2  ;;  %v4351_v2 = vadd.f32 %v9369_v30, %v4238_v63  ;;  %v9527_v45 = vpop.f32.mrf.mxu3 }
 0x46f   : > { %v4547_v31 = vmax.f32 %v4458_v40, 0.0  ;;  %6642 = vmatmul.msk.f32.gmra.mxu1 %vm2525_vm1, %v3746_v32  ;;  %v9531_v24 = vpop.f32.mrf.mxu0  ;;  %v4015_v40 = vadd.f32 %v9417_v0, %v9226_v5  ;;  %v9549_v5 = vpop.f32.mrf.mxu2 }
 0x470   : > { %v5700_v38 = vld [vmem:[#allocation2 + $0x31] sm:$0xff] }
 0x471   : > { %v9489_v19 = vld [vmem:[#allocation2 + $0x30] sm:$0xff]  ;;  %4580 = vst.msk [vmem:[#allocation2 + $0x39] sm:$0xff] %vm4576_vm15, %v4547_v31  ;;  %5382 = vrot.lane.b32.xlu0 %v4869_v59, %s6793_s22  ;;  %5764 = vrot.lane.b32.xlu1 %v5700_v38, %s6794_s27  ;;  %v4128_v30 = vadd.f32 %v9362_v9, %v4015_v40 }
 0x472   : > { %4934 = vrot.lane.b32.xlu2 %v4868_v44, %s6792_s21  ;;  %4645 = vst.msk [vmem:[#allocation3 + $0x120] sm:$0xff] %vm4576_vm15, %v9489_v19 }
 0x473   : > { %5286 = vst.msk [vmem:[#allocation3 + $0x98] sm:$0xff] %vm4576_vm15, %v5700_v38 }
 0x474   : > { %v4460_v10 = vpop.f32.mrf.mxu1 }
 0x475   : > { %v4461_v16 = vadd.f32 %v4460_v10, %v4348_v47  ;;  %v9559_v47 = vpop.f32.mrf.mxu3 }
 0x477   : > { %v4548_v33 = vmax.f32 %v4461_v16, 0.0  ;;  %6643 = vmatmul.msk.f32.gmra.mxu1 %vm2525_vm1, %v3751_v13  ;;  %v4131_v16 = vadd.f32 %v9373_v46, %v4018_v41  ;;  %v9591_v40 = vpop.f32.mrf.mxu2 }
 0x478   : > { %v9508_v59 = vld [vmem:[#allocation2 + $0x39] sm:$0xff] }
 0x479   : > { %v9510_v55 = vld [vmem:[#allocation2 + $0x32] sm:$0xff]  ;;  %v9512_v42 = vld [vmem:[#allocation2 + $0x3a] sm:$0xff]  ;;  %4581 = vst.msk [vmem:[#allocation2 + $0x49] sm:$0xff] %vm4576_vm15, %v4548_v33  ;;  %4745 = vrot.lane.b32.xlu0 %v5700_v38, %s6793_s22  ;;  %4747 = vrot.lane.b32.xlu1 %v9508_v59, %s6793_s22  ;;  %v4241_v38 = vadd.f32 %v9364_v3, %v4128_v30 }
 0x47a   : > { %5380 = vrot.lane.b32.xlu2 %v4868_v44, %s6793_s22  ;;  %v9518_v43 = vld [vmem:[#allocation2 + $0x38] sm:$0xff]  ;;  %5924 = vst.msk [vmem:[#allocation3 + $0x10] sm:$0xff] %vm4576_vm15, %v9510_v55 }
 0x47b   : > { %5925 = vst.msk [vmem:[#allocation3 + $0x58] sm:$0xff] %vm4576_vm15, %v9512_v42  ;;  %v4354_v9 = vadd.f32 %v9378_v7, %v4241_v38  ;;  %v4244_v7 = vadd.f32 %v9375_v15, %v4131_v16 }
 0x47c   : > { %v4463_v17 = vpop.f32.mrf.mxu1  ;;  %4646 = vst.msk [vmem:[#allocation3 + $0x168] sm:$0xff] %vm4576_vm15, %v9518_v43 }
 0x47d   : > { %v4464_v32 = vadd.f32 %v4463_v17, %v4351_v2  ;;  %5287 = vst.msk [vmem:[#allocation3 + $0xe0] sm:$0xff] %vm4576_vm15, %v9508_v59  ;;  %v4021_v2 = vadd.f32 %v9417_v0, %v9248_v36  ;;  %v9596_v30 = vpop.f32.mrf.mxu3  ;;  %v3766_v36 = vld [vmem:[#allocation3 + $0x698] sm:$0xff] }
 0x47f   : > { %v4549_v31 = vmax.f32 %v4464_v32, 0.0  ;;  %6644 = vmatmul.msk.f32.gmra.mxu1 %vm2525_vm1, %v3756_v60  ;;  %v4134_v60 = vadd.f32 %v9465_v53, %v4021_v2  ;;  %v4027_v2 = vadd.f32 %v9417_v0, %v9264_v20 }
 0x480   : > { %v9541_v44 = vld [vmem:[#allocation2 + $0x49] sm:$0xff] }
 0x481   : > { %4582 = vst.msk [vmem:[#allocation2 + $0x51] sm:$0xff] %vm4576_vm15, %v4549_v31  ;;  %v5958_v1 = vld [vmem:[#allocation3 + $0x10] sm:$0xff]  ;;  %5572 = vrot.lane.b32.xlu0 %v9489_v19, %s6792_s21  ;;  %4938 = vrot.lane.b32.xlu1 %v9510_v55, %s6792_s21  ;;  %v9582_v15 = vld [vmem:[#allocation2 + $0x48] sm:$0xff] }
 0x482   : > { %5125 = vrot.lane.b32.xlu2 %v9474_v58, %s6794_s27  ;;  %6655 = vmatmul.msk.f32.vlgmr.msra.gmra.mxu0 %vm4576_vm15, %v5958_v1  ;;  %5288 = vst.msk [vmem:[#allocation3 + $0x128] sm:$0xff] %vm4576_vm15, %v9541_v44  ;;  %v9561_v58 = vpop.f32.mrf.mxu0  ;;  %v5961_v54 = vld [vmem:[#allocation3 + $0x58] sm:$0xff]  ;;  %v4247_v1 = vadd.f32 %v9469_v52, %v4134_v60  ;;  %v4140_v60 = vadd.f32 %v9520_v51, %v4027_v2 }
 0x483   : > { %4647 = vst.msk [vmem:[#allocation3 + $0x1b0] sm:$0xff] %vm4576_vm15, %v9582_v15  ;;  %v4033_v2 = vadd.f32 %v9417_v0, %v9281_v28 }
 0x484   : > { %v4466_v3 = vpop.f32.mrf.mxu1 }
 0x485   : > { %v4467_v10 = vadd.f32 %v4466_v3, %v4354_v9  ;;  %v4024_v9 = vadd.f32 %v9417_v0, %v9259_v12  ;;  %v4360_v3 = vadd.f32 %v9423_v21, %v4247_v1  ;;  %v9620_v16 = vpop.f32.mrf.mxu3 }
 0x487   : > { %v4550_v13 = vmax.f32 %v4467_v10, 0.0  ;;  %6645 = vmatmul.msk.f32.gmra.mxu1 %vm2525_vm1, %v3761_v8  ;;  %v4137_v41 = vadd.f32 %v9487_v14, %v4024_v9  ;;  %v9618_v8 = vpop.f32.mrf.mxu2 }
 0x488   : > { %v9565_v33 = vld [vmem:[#allocation2 + $0x4a] sm:$0xff]  ;;  %v9567_v63 = vld [vmem:[#allocation2 + $0x52] sm:$0xff] }
 0x489   : > { %4583 = vst.msk [vmem:[#allocation2 + $0x61] sm:$0xff] %vm4576_vm15, %v4550_v13  ;;  %5127 = vrot.lane.b32.xlu0 %v9489_v19, %s6794_s27  ;;  %5574 = vrot.lane.b32.xlu1 %v9518_v43, %s6792_s21  ;;  %v9580_v46 = vld [vmem:[#allocation2 + $0x50] sm:$0xff]  ;;  %v4357_v19 = vadd.f32 %v9383_v34, %v4244_v7  ;;  %v4250_v12 = vadd.f32 %v9501_v50, %v4137_v41 }
 0x48a   : > { %4940 = vrot.lane.b32.xlu2 %v9512_v42, %s6792_s21  ;;  %6656 = vmatmul.msk.f32.gmra.mxu0 %vm4576_vm15, %v5961_v54  ;;  %5926 = vst.msk [vmem:[#allocation3 + $0xa0] sm:$0xff] %vm4576_vm15, %v9565_v33  ;;  %v9589_v17 = vld [vmem:[#allocation2 + $0x51] sm:$0xff]  ;;  %v9603_v38 = vpop.f32.mrf.mxu0 }
 0x48b   : > { %5927 = vst.msk [vmem:[#allocation3 + $0xe8] sm:$0xff] %vm4576_vm15, %v9567_v63  ;;  %v4363_v50 = vadd.f32 %v9433_v25, %v4250_v12  ;;  %v4253_v25 = vadd.f32 %v9527_v45, %v4140_v60  ;;  %v4030_v45 = vadd.f32 %v9417_v0, %v9273_v48 }
 0x48c   : > { %v4469_v32 = vpop.f32.mrf.mxu1  ;;  %4648 = vst.msk [vmem:[#allocation3 + $0x1f8] sm:$0xff] %vm4576_vm15, %v9580_v46 }
 0x48d   : > { %v4470_v31 = vadd.f32 %v4469_v32, %v4357_v19  ;;  %5289 = vst.msk [vmem:[#allocation3 + $0x170] sm:$0xff] %vm4576_vm15, %v9589_v17  ;;  %v4143_v9 = vadd.f32 %v9549_v5, %v4030_v45  ;;  %v6067_v5 = vld [vmem:[%s10854_s5 + $0x78] sm:$0xff] }
 0x48e   : > { %6188 = vmatpush.msra.mxu2 %v6067_v5 }
 0x48f   : > { %v4551_v34 = vmax.f32 %v4470_v31, 0.0  ;;  %6646 = vmatmul.msk.f32.gmra.mxu1 %vm2525_vm1, %v3766_v36  ;;  %v9649_v32 = vpop.f32.mrf.mxu2  ;;  %v9654_v36 = vpop.f32.mrf.mxu3  ;;  %v4256_v48 = vadd.f32 %v9559_v47, %v4143_v9  ;;  %v6066_v47 = vld [vmem:[%s10854_s5 + $0x70] sm:$0xff] }
 0x490   : > { %v9633_v14 = vld [vmem:[#allocation2 + $0x61] sm:$0xff]  ;;  %6189 = vmatpush.msra.mxu2 %v6066_v47 }
 0x491   : > { %4584 = vst.msk [vmem:[#allocation2 + $0x69] sm:$0xff] %vm4576_vm15, %v4551_v34  ;;  %v5964_v53 = vld [vmem:[#allocation3 + $0xa0] sm:$0xff]  ;;  %5768 = vrot.lane.b32.xlu0 %v9541_v44, %s6794_s27  ;;  %5384 = vrot.lane.b32.xlu1 %v9510_v55, %s6793_s22  ;;  %v9661_v20 = vld [vmem:[#allocation2 + $0x60] sm:$0xff]  ;;  %v4369_v12 = vadd.f32 %v9476_v18, %v4256_v48  ;;  %v4146_v18 = vadd.f32 %v9591_v40, %v4033_v2  ;;  %v6063_v40 = vld [vmem:[%s10854_s5 + $0x58] sm:$0xff] }
 0x492   : > { %5766 = vrot.lane.b32.xlu2 %v9508_v59, %s6794_s27  ;;  %6657 = vmatmul.msk.f32.gmra.mxu0 %vm4576_vm15, %v5964_v53  ;;  %v3771_v59 = vld [vmem:[#allocation3 + $0x6e0] sm:$0xff]  ;;  %v5967_v21 = vld [vmem:[#allocation3 + $0xe8] sm:$0xff]  ;;  %v9635_v54 = vpop.f32.mrf.mxu0  ;;  %5290 = vst.msk [vmem:[#allocation3 + $0x1b8] sm:$0xff] %vm4576_vm15, %v9633_v14  ;;  %v4366_v53 = vadd.f32 %v9454_v4, %v4253_v25 }
 0x493   : > { %4649 = vst.msk [vmem:[#allocation3 + $0x240] sm:$0xff] %vm4576_vm15, %v9661_v20  ;;  %v4259_v25 = vadd.f32 %v9596_v30, %v4146_v18 }
 0x494   : > { %v4472_v52 = vpop.f32.mrf.mxu1 }
 0x495   : > { %v4473_v10 = vadd.f32 %v4472_v52, %v4360_v3  ;;  %v3781_v52 = vld [vmem:[#allocation3 + $0x770] sm:$0xff]  ;;  %v4372_v30 = vadd.f32 %v9504_v26, %v4259_v25  ;;  %v4036_v26 = vadd.f32 %v9417_v0, %v9292_v37  ;;  %v6061_v37 = vld [vmem:[%s10854_s5 + $0x48] sm:$0xff]  ;;  %v6083_v25 = vld [vmem:[%s10854_s5 + $0xf8] sm:$0xff] }
 0x496   : > { %6301 = vmatpush.msra.mxu3 %v6083_v25 }
 0x497   : > { %v4552_v13 = vmax.f32 %v4473_v10, 0.0  ;;  %6647 = vmatmul.msk.f32.gmra.mxu1 %vm2525_vm1, %v3771_v59  ;;  %v9679_v10 = vpop.f32.mrf.mxu2 }
 0x498   : > { %v9623_v55 = vld [vmem:[#allocation2 + $0x62] sm:$0xff]  ;;  %v9625_v7 = vld [vmem:[#allocation2 + $0x6a] sm:$0xff] }
 0x499   : > { %4585 = vst.msk [vmem:[#allocation2 + $0x79] sm:$0xff] %vm4576_vm15, %v4552_v13  ;;  %4751 = vrot.lane.b32.xlu0 %v9589_v17, %s6793_s22  ;;  %5129 = vrot.lane.b32.xlu1 %v9518_v43, %s6794_s27  ;;  %v3776_v43 = vld [vmem:[#allocation3 + $0x728] sm:$0xff]  ;;  %v9668_v51 = vld [vmem:[#allocation2 + $0x69] sm:$0xff] }
 0x49a   : > { %5386 = vrot.lane.b32.xlu2 %v9512_v42, %s6793_s22  ;;  %6658 = vmatmul.msk.f32.gmra.mxu0 %vm4576_vm15, %v5967_v21  ;;  %5928 = vst.msk [vmem:[#allocation3 + $0x130] sm:$0xff] %vm4576_vm15, %v9623_v55  ;;  %v9663_v1 = vpop.f32.mrf.mxu0  ;;  %v9703_v21 = vpop.f32.mrf.mxu3 }
 0x49b   : > { %5929 = vst.msk [vmem:[#allocation3 + $0x178] sm:$0xff] %vm4576_vm15, %v9625_v7 }
 0x49c   : > { %v4475_v42 = vpop.f32.mrf.mxu1  ;;  %5291 = vst.msk [vmem:[#allocation3 + $0x200] sm:$0xff] %vm4576_vm15, %v9668_v51 }
 0x49d   : > { %v4476_v19 = vadd.f32 %v4475_v42, %v4363_v50  ;;  %v6065_v42 = vld [vmem:[%s10854_s5 + $0x68] sm:$0xff] }
 0x49e   : > { %6190 = vmatpush.msra.mxu2 %v6065_v42 }
 0x49f   : > { %v4553_v31 = vmax.f32 %v4476_v19, 0.0  ;;  %6648 = vmatmul.msk.f32.gmra.mxu1 %vm2525_vm1, %v3776_v43  ;;  %v3786_v43 = vld [vmem:[#allocation3 + $0x7b8] sm:$0xff]  ;;  %v9725_v28 = vpop.f32.mrf.mxu2 }
 0x4a1   : > { %4586 = vst.msk [vmem:[#allocation2 + $0x81] sm:$0xff] %vm4576_vm15, %v4553_v31  ;;  %v5970_v34 = vld [vmem:[#allocation3 + $0x130] sm:$0xff]  ;;  %4942 = vrot.lane.b32.xlu0 %v9565_v33, %s6792_s21  ;;  %4944 = vrot.lane.b32.xlu1 %v9567_v63, %s6792_s21 }
 0x4a2   : > { %4749 = vrot.lane.b32.xlu2 %v9541_v44, %s6793_s22  ;;  %6659 = vmatmul.msk.f32.gmra.mxu0 %vm4576_vm15, %v5970_v34  ;;  %v5973_v4 = vld [vmem:[#allocation3 + $0x178] sm:$0xff]  ;;  %v9707_v50 = vpop.f32.mrf.mxu0  ;;  %v6064_v31 = vld [vmem:[%s10854_s5 + $0x60] sm:$0xff]  ;;  %v9734_v45 = vpop.f32.mrf.mxu3 }
 0x4a3   : > { %6191 = vmatpush.msra.mxu2 %v6064_v31 }
 0x4a4   : > { %v4478_v44 = vpop.f32.mrf.mxu1 }
 0x4a5   : > { %v4479_v3 = vadd.f32 %v4478_v44, %v4366_v53  ;;  %v9738_v53 = vld [vmem:[#allocation2 + $0x68] sm:$0xff]  ;;  %6192 = vmatpush.msra.mxu2 %v6063_v40  ;;  %v4042_v40 = vadd.f32 %v9417_v0, %v9316_v57 }
 0x4a6   : > { %4650 = vst.msk [vmem:[#allocation3 + $0x288] sm:$0xff] %vm4576_vm15, %v9738_v53 }
 0x4a7   : > { %v4554_v41 = vmax.f32 %v4479_v3, 0.0  ;;  %6649 = vmatmul.msk.f32.gmra.mxu1 %vm2525_vm1, %v3781_v52  ;;  %v3791_v3 = vld [vmem:[#allocation3 + $0x800] sm:$0xff]  ;;  %v4149_v52 = vadd.f32 %v9618_v8, %v4036_v26 }
 0x4a8   : > { %v9681_v59 = vld [vmem:[#allocation2 + $0x7a] sm:$0xff]  ;;  %v9683_v13 = vld [vmem:[#allocation2 + $0x82] sm:$0xff] }
 0x4a9   : > { %4587 = vst.msk [vmem:[#allocation2 + $0x91] sm:$0xff] %vm4576_vm15, %v4554_v41  ;;  %5578 = vrot.lane.b32.xlu0 %v9580_v46, %s6792_s21  ;;  %5770 = vrot.lane.b32.xlu1 %v9589_v17, %s6794_s27  ;;  %v4262_v5 = vadd.f32 %v9620_v16, %v4149_v52  ;;  %v9766_v8 = vld [vmem:[#allocation2 + $0x81] sm:$0xff] }
 0x4aa   : > { %5576 = vrot.lane.b32.xlu2 %v9582_v15, %s6792_s21  ;;  %6660 = vmatmul.msk.f32.gmra.mxu0 %vm4576_vm15, %v5973_v4  ;;  %5930 = vst.msk [vmem:[#allocation3 + $0x1c0] sm:$0xff] %vm4576_vm15, %v9681_v59  ;;  %v6060_v16 = vld [vmem:[%s10854_s5 + $0x40] sm:$0xff] }
 0x4ab   : > { %5931 = vst.msk [vmem:[#allocation3 + $0x208] sm:$0xff] %vm4576_vm15, %v9683_v13  ;;  %v6056_v52 = vld [vmem:[%s10854_s5 + $0x20] sm:$0xff] }
 0x4ac   : > { %v4481_v17 = vpop.f32.mrf.mxu1  ;;  %5293 = vst.msk [vmem:[#allocation3 + $0x290] sm:$0xff] %vm4576_vm15, %v9766_v8 }
 0x4ad   : > { %v4482_v19 = vadd.f32 %v4481_v17, %v4369_v12  ;;  %v9768_v12 = vpop.f32.mrf.mxu2  ;;  %v4375_v17 = vadd.f32 %v9531_v24, %v4262_v5  ;;  %v3796_v24 = vld [vmem:[#allocation3 + $0x848] sm:$0xff] }
 0x4af   : > { %v4555_v60 = vmax.f32 %v4482_v19, 0.0  ;;  %6650 = vmatmul.msk.f32.gmra.mxu1 %vm2525_vm1, %v3786_v43  ;;  %v9789_v43 = vpop.f32.mrf.mxu3 }
 0x4b1   : > { %4588 = vst.msk [vmem:[#allocation2 + $0x99] sm:$0xff] %vm4576_vm15, %v4555_v60  ;;  %v5976_v34 = vld [vmem:[#allocation3 + $0x1c0] sm:$0xff]  ;;  %5388 = vrot.lane.b32.xlu0 %v9565_v33, %s6793_s22  ;;  %5390 = vrot.lane.b32.xlu1 %v9567_v63, %s6793_s22  ;;  %v9736_v33 = vld [vmem:[#allocation2 + $0x79] sm:$0xff] }
 0x4b2   : > { %5131 = vrot.lane.b32.xlu2 %v9582_v15, %s6794_s27  ;;  %6661 = vmatmul.msk.f32.gmra.mxu0 %vm4576_vm15, %v5976_v34  ;;  %v9740_v15 = vpop.f32.mrf.mxu0  ;;  %v6062_v63 = vld [vmem:[%s10854_s5 + $0x50] sm:$0xff]  ;;  %5292 = vst.msk [vmem:[#allocation3 + $0x248] sm:$0xff] %vm4576_vm15, %v9736_v33  ;;  %v5979_v47 = vld [vmem:[#allocation3 + $0x208] sm:$0xff] }
 0x4b3   : > { %6193 = vmatpush.msra.mxu2 %v6062_v63  ;;  %v6058_v60 = vld [vmem:[%s10854_s5 + $0x30] sm:$0xff]  ;;  %v9818_v63 = vld [vmem:[#allocation2 + $0x78] sm:$0xff] }
 0x4b4   : > { %v4484_v44 = vpop.f32.mrf.mxu1  ;;  %v6082_v34 = vld [vmem:[%s10854_s5 + $0xf0] sm:$0xff]  ;;  %4651 = vst.msk [vmem:[#allocation3 + $0x2d0] sm:$0xff] %vm4576_vm15, %v9818_v63 }
 0x4b5   : > { %v4485_v9 = vadd.f32 %v4484_v44, %v4372_v30  ;;  %6194 = vmatpush.msra.mxu2 %v6061_v37  ;;  %v9820_v26 = vpop.f32.mrf.mxu2  ;;  %6302 = vmatpush.msra.mxu3 %v6082_v34 }
 0x4b7   : > { %v4556_v41 = vmax.f32 %v4485_v9, 0.0  ;;  %6651 = vmatmul.msk.f32.gmra.mxu1 %vm2525_vm1, %v3791_v3  ;;  %6195 = vmatpush.msra.mxu2 %v6060_v16  ;;  %v3801_v3 = vld [vmem:[#allocation3 + $0x890] sm:$0xff]  ;;  %v9832_v37 = vpop.f32.mrf.mxu3 }
 0x4b8   : > { %v9753_v48 = vld [vmem:[#allocation2 + $0x92] sm:$0xff]  ;;  %v9755_v4 = vld [vmem:[#allocation2 + $0x9a] sm:$0xff] }
 0x4b9   : > { %4589 = vst.msk [vmem:[#allocation2 + $0xa9] sm:$0xff] %vm4576_vm15, %v4556_v41  ;;  %5133 = vrot.lane.b32.xlu0 %v9580_v46, %s6794_s27  ;;  %4753 = vrot.lane.b32.xlu1 %v9633_v14, %s6793_s22  ;;  %v4039_v46 = vadd.f32 %v9417_v0, %v9302_v56  ;;  %v4155_v41 = vadd.f32 %v9679_v10, %v4042_v40 }
 0x4ba   : > { %5772 = vrot.lane.b32.xlu2 %v9633_v14, %s6794_s27  ;;  %6662 = vmatmul.msk.f32.gmra.mxu0 %vm4576_vm15, %v5979_v47  ;;  %5932 = vst.msk [vmem:[#allocation3 + $0x250] sm:$0xff] %vm4576_vm15, %v9753_v48  ;;  %v6059_v14 = vld [vmem:[%s10854_s5 + $0x38] sm:$0xff]  ;;  %v9791_v56 = vpop.f32.mrf.mxu0 }
 0x4bb   : > { %5933 = vst.msk [vmem:[#allocation3 + $0x298] sm:$0xff] %vm4576_vm15, %v9755_v4  ;;  %v4152_v2 = vadd.f32 %v9649_v32, %v4039_v46  ;;  %6196 = vmatpush.msra.mxu2 %v6059_v14  ;;  %v6055_v46 = vld [vmem:[%s10854_s5 + $0x18] sm:$0xff]  ;;  %v6080_v14 = vld [vmem:[%s10854_s5 + $0xe0] sm:$0xff] }
 0x4bc   : > { %v4487_v42 = vpop.f32.mrf.mxu1 }
 0x4bd   : > { %v4488_v19 = vadd.f32 %v4487_v42, %v4375_v17  ;;  %v4265_v31 = vadd.f32 %v9654_v36, %v4152_v2  ;;  %v6057_v36 = vld [vmem:[%s10854_s5 + $0x28] sm:$0xff]  ;;  %6197 = vmatpush.msra.mxu2 %v6058_v60  ;;  %v4268_v17 = vadd.f32 %v9703_v21, %v4155_v41  ;;  %v9853_v2 = vld [vmem:[#allocation2 + $0x80] sm:$0xff]  ;;  %v6079_v21 = vld [vmem:[%s10854_s5 + $0xd8] sm:$0xff]  ;;  %v9879_v25 = vpop.f32.mrf.mxu2 }
 0x4be   : > { %v6053_v60 = vld [vmem:[%s10854_s5 + $0x8] sm:$0xff]  ;;  %4652 = vst.msk [vmem:[#allocation3 + $0x318] sm:$0xff] %vm4576_vm15, %v9853_v2 }
 0x4bf   : > { %v4557_v18 = vmax.f32 %v4488_v19, 0.0  ;;  %6652 = vmatmul.msk.f32.gmra.mxu1 %vm2525_vm1, %v3796_v24  ;;  %v4378_v30 = vadd.f32 %v9561_v58, %v4265_v31  ;;  %6198 = vmatpush.msra.mxu2 %v6057_v36  ;;  %v6081_v58 = vld [vmem:[%s10854_s5 + $0xe8] sm:$0xff]  ;;  %v4381_v19 = vadd.f32 %v9603_v38, %v4268_v17  ;;  %v4045_v31 = vadd.f32 %v9417_v0, %v9329_v6  ;;  %v6078_v38 = vld [vmem:[%s10854_s5 + $0xd0] sm:$0xff]  ;;  %v9883_v40 = vpop.f32.mrf.mxu3  ;;  %v6052_v6 = vld [vmem:[%s10854_s5] sm:$0xff] }
 0x4c0   : > { %6303 = vmatpush.msra.mxu3 %v6081_v58 }
 0x4c1   : > { %4590 = vst.msk [vmem:[#allocation2 + $0xb1] sm:$0xff] %vm4576_vm15, %v4557_v18  ;;  %v5982_v32 = vld [vmem:[#allocation3 + $0x250] sm:$0xff]  ;;  %4948 = vrot.lane.b32.xlu0 %v9625_v7, %s6792_s21  ;;  %5580 = vrot.lane.b32.xlu1 %v9661_v20, %s6792_s21  ;;  %v3806_v18 = vld [vmem:[#allocation3 + $0x8d8] sm:$0xff]  ;;  %v4158_v36 = vadd.f32 %v9725_v28, %v4045_v31 }
 0x4c2   : > { %4755 = vrot.lane.b32.xlu2 %v9668_v51, %s6793_s22  ;;  %6663 = vmatmul.msk.f32.gmra.mxu0 %vm4576_vm15, %v5982_v32  ;;  %v9835_v47 = vpop.f32.mrf.mxu0  ;;  %v5985_v42 = vld [vmem:[#allocation3 + $0x298] sm:$0xff]  ;;  %v6072_v31 = vld [vmem:[%s10854_s5 + $0xa0] sm:$0xff] }
 0x4c3   : > { %6199 = vmatpush.msra.mxu2 %v6056_v52  ;;  %6304 = vmatpush.msra.mxu3 %v6080_v14  ;;  %v4048_v52 = vadd.f32 %v9417_v0, %v9339_v35 }
 0x4c4   : > { %v4744_v44 = vpop.permute.xlu2 %4743  ;;  %v4490_v9 = vpop.f32.mrf.mxu1 }
 0x4c5   : > { %4837 = vst.msk [vmem:[#allocation3 + $0xd8] sm:$0xff] %vm4833_vm8, %v4744_v44  ;;  %v4491_v57 = vadd.f32 %v4490_v9, %v4378_v30  ;;  %6200 = vmatpush.msra.mxu2 %v6055_v46  ;;  %6305 = vmatpush.msra.mxu3 %v6079_v21  ;;  %v6077_v30 = vld [vmem:[%s10854_s5 + $0xc8] sm:$0xff]  ;;  %v4271_v44 = vadd.f32 %v9734_v45, %v4158_v36  ;;  %v6076_v45 = vld [vmem:[%s10854_s5 + $0xc0] sm:$0xff] }
 0x4c6   : > { %v4161_v46 = vadd.f32 %v9768_v12, %v4048_v52 }
 0x4c7   : > { %v4558_v5 = vmax.f32 %v4491_v57, 0.0  ;;  %6653 = vmatmul.msk.f32.gmra.mxu1 %vm2525_vm1, %v3801_v3  ;;  %6306 = vmatpush.msra.mxu3 %v6078_v38  ;;  %v9905_v3 = vld [vmem:[#allocation2 + $0x91] sm:$0xff]  ;;  %v4051_v38 = vadd.f32 %v9417_v0, %v9350_v23 }
 0x4c8   : > { %v9837_v16 = vld [vmem:[#allocation2 + $0xaa] sm:$0xff]  ;;  %v9839_v10 = vld [vmem:[#allocation2 + $0xb2] sm:$0xff]  ;;  %5294 = vst.msk [vmem:[#allocation3 + $0x2d8] sm:$0xff] %vm4576_vm15, %v9905_v3  ;;  %v4274_v12 = vadd.f32 %v9789_v43, %v4161_v46 }
 0x4c9   : > { %4591 = vst.msk [vmem:[#allocation2 + $0xc1] sm:$0xff] %vm4576_vm15, %v4558_v5  ;;  %5774 = vrot.lane.b32.xlu0 %v9668_v51, %s6794_s27  ;;  %5135 = vrot.lane.b32.xlu1 %v9661_v20, %s6794_s27  ;;  %v6054_v51 = vld [vmem:[%s10854_s5 + $0x10] sm:$0xff]  ;;  %v6075_v5 = vld [vmem:[%s10854_s5 + $0xb8] sm:$0xff]  ;;  %v4164_v36 = vadd.f32 %v9820_v26, %v4051_v38 }
 0x4ca   : > { %4946 = vrot.lane.b32.xlu2 %v9623_v55, %s6792_s21  ;;  %6664 = vmatmul.msk.f32.gmra.mxu0 %vm4576_vm15, %v5985_v42  ;;  %5934 = vst.msk [vmem:[#allocation3 + $0x2e0] sm:$0xff] %vm4576_vm15, %v9837_v16  ;;  %v9897_v9 = vpop.f32.mrf.mxu0  ;;  %v4387_v43 = vadd.f32 %v9663_v1, %v4274_v12  ;;  %v6070_v26 = vld [vmem:[%s10854_s5 + $0x90] sm:$0xff] }
 0x4cb   : > { %5935 = vst.msk [vmem:[#allocation3 + $0x328] sm:$0xff] %vm4576_vm15, %v9839_v10  ;;  %6201 = vmatpush.msra.mxu2 %v6054_v51  ;;  %6307 = vmatpush.msra.mxu3 %v6077_v30  ;;  %v6074_v51 = vld [vmem:[%s10854_s5 + $0xb0] sm:$0xff]  ;;  %v6071_v30 = vld [vmem:[%s10854_s5 + $0x98] sm:$0xff]  ;;  %v4277_v23 = vadd.f32 %v9832_v37, %v4164_v36 }
 0x4cc   : > { %v4935_v24 = vpop.permute.xlu2 %4934  ;;  %v4493_v20 = vpop.f32.mrf.mxu1 }
 0x4cd   : > { %v4494_v32 = vadd.f32 %v4493_v20, %v4381_v19  ;;  %6202 = vmatpush.msra.mxu2 %v6053_v60  ;;  %6308 = vmatpush.msra.mxu3 %v6076_v45  ;;  %v9934_v19 = vpop.f32.mrf.mxu3  ;;  %v4390_v37 = vadd.f32 %v9707_v50, %v4277_v23 }
 0x4cf   : > { %v4559_v34 = vmax.f32 %v4494_v32, 0.0  ;;  %6654 = vmatmul.msk.f32.gmra.mxu1 %vm2525_vm1, %v3806_v18  ;;  %6203 = vmatpush.msra.mxu2 %v6052_v6  ;;  %vm5219_vm1 = vcmask 1048320   ;;  %v9953_v32 = vld [vmem:[#allocation2 + $0x99] sm:$0xff] }
 0x4d0   : > { %6309 = vmatpush.msra.mxu3 %v6075_v5  ;;  %5295 = vst.msk [vmem:[#allocation3 + $0x320] sm:$0xff] %vm4576_vm15, %v9953_v32 }
 0x4d1   : > { %4592 = vst.msk [vmem:[#allocation2 + $0xc9] sm:$0xff] %vm4576_vm15, %v4559_v34  ;;  %v5988_v28 = vld [vmem:[#allocation3 + $0x2e0] sm:$0xff]  ;;  %5394 = vrot.lane.b32.xlu0 %v9625_v7, %s6793_s22  ;;  %5776 = vrot.lane.b32.xlu1 %v9736_v33, %s6794_s27  ;;  %v4384_v7 = vadd.f32 %v9635_v54, %v4271_v44  ;;  %v9918_v54 = vpop.f32.mrf.mxu2 }
 0x4d2   : > { %5582 = vrot.lane.b32.xlu2 %v9738_v53, %s6792_s21  ;;  %6665 = vmatmul.msk.f32.gmra.mxu0 %vm4576_vm15, %v5988_v28  ;;  %v5991_v21 = vld [vmem:[#allocation3 + $0x328] sm:$0xff] }
 0x4d3   : > { %v4742_v57 = vpop.permute.xlu1 %4741  ;;  %6310 = vmatpush.msra.mxu3 %v6074_v51 }
 0x4d4   : > { %v5381_v41 = vpop.permute.xlu2 %5380  ;;  %v4496_v58 = vpop.f32.mrf.mxu1  ;;  %4836 = vst.msk [vmem:[#allocation3 + $0x90] sm:$0xff] %vm4833_vm8, %v4742_v57 }
 0x4d5   : > { %5476 = vst.msk [vmem:[#allocation3 + $0x8] sm:$0xff] %vm4833_vm8, %v5381_v41  ;;  %v4497_v35 = vadd.f32 %v4496_v58, %v4384_v7  ;;  %v4054_v41 = vadd.f32 %v9417_v0, %v9358_v29  ;;  %v9988_v5 = vpop.f32.mrf.mxu3  ;;  %v6068_v29 = vld [vmem:[%s10854_s5 + $0x80] sm:$0xff] }
 0x4d6   : > { %5029 = vst.msk [vmem:[#allocation3 + $0x90] sm:$0xff] %vm5026_vm9, %v4935_v24  ;;  %v9936_v24 = vpop.f32.mrf.mxu0 }
 0x4d7   : > { %v4560_v17 = vmax.f32 %v4497_v35, 0.0  ;;  %v4167_v46 = vadd.f32 %v9879_v25, %v4054_v41 }
 0x4d8   : > { %v9921_v42 = vld [vmem:[#allocation2 + $0xc2] sm:$0xff]  ;;  %v9923_v14 = vld [vmem:[#allocation2 + $0xca] sm:$0xff] }
 0x4d9   : > { %4593 = vst.msk [vmem:[#allocation2 + $0xd9] sm:$0xff] %vm4576_vm15, %v4560_v17  ;;  %4757 = vrot.lane.b32.xlu0 %v9736_v33, %s6793_s22  ;;  %4759 = vrot.lane.b32.xlu1 %v9766_v8, %s6793_s22  ;;  %v6073_v33 = vld [vmem:[%s10854_s5 + $0xa8] sm:$0xff]  ;;  %v9962_v6 = vpop.f32.mrf.mxu2  ;;  %v4280_v12 = vadd.f32 %v9883_v40, %v4167_v46  ;;  %v4057_v40 = vadd.f32 %v9417_v0, %v9371_v39 }
 0x4da   : > { %5392 = vrot.lane.b32.xlu2 %v9623_v55, %s6793_s22  ;;  %6666 = vmatmul.msk.f32.gmra.mxu0 %vm4576_vm15, %v5991_v21  ;;  %5936 = vst.msk [vmem:[#allocation3 + $0x370] sm:$0xff] %vm4576_vm15, %v9921_v42 }
 0x4db   : > { %v4937_v55 = vpop.permute.xlu0 %4936  ;;  %5937 = vst.msk [vmem:[#allocation3 + $0x3b8] sm:$0xff] %vm4576_vm15, %v9923_v14  ;;  %v5124_v18 = vpop.permute.xlu1 %5123  ;;  %6311 = vmatpush.msra.mxu3 %v6073_v33  ;;  %v4393_v33 = vadd.f32 %v9740_v15, %v4280_v12  ;;  %v10025_v15 = vld [vmem:[#allocation2 + $0x98] sm:$0xff] }
 0x4dc   : > { %v5126_v20 = vpop.permute.xlu2 %5125  ;;  %5030 = vst.msk [vmem:[#allocation3 + $0xd8] sm:$0xff] %vm5026_vm9, %v4937_v55  ;;  %v4499_v60 = vpop.f32.mrf.mxu1 }
 0x4dd   : > { %5221 = vst.msk [vmem:[#allocation3 + $0x48] sm:$0xff] %vm5219_vm1, %v5126_v20  ;;  %v4500_v1 = vadd.f32 %v4499_v60, %v4387_v43  ;;  %6312 = vmatpush.msra.mxu3 %v6072_v31  ;;  %v4170_v60 = vadd.f32 %v9918_v54, %v4057_v40  ;;  %v4288_v31 = vpop.f32.mrf.mxu3 }
 0x4de   : > { %5220 = vst.msk [vmem:[#allocation3] sm:$0xff] %vm5219_vm1, %v5124_v18  ;;  %v9990_v50 = vpop.f32.mrf.mxu0  ;;  %v10021_v18 = vld [vmem:[#allocation2 + $0x90] sm:$0xff] }
 0x4df   : > { %v4561_v34 = vmax.f32 %v4500_v1, 0.0  ;;  %6313 = vmatpush.msra.mxu3 %v6071_v30  ;;  %4653 = vst.msk [vmem:[#allocation3 + $0x360] sm:$0xff] %vm4576_vm15, %v10021_v18  ;;  %v4283_v54 = vadd.f32 %v9934_v19, %v4170_v60  ;;  %v10048_v19 = vld [vmem:[%s10853_s4] ss:$0 sm:$0xff] }
 0x4e0   : > { %4654 = vst.msk [vmem:[#allocation3 + $0x3a8] sm:$0xff] %vm4576_vm15, %v10025_v15  ;;  %v4060_v30 = vadd.f32 %v10048_v19, %v9380_v27 }
 0x4e1   : > { %4594 = vst.msk [vmem:[#allocation2 + $0xe1] sm:$0xff] %vm4576_vm15, %v4561_v34  ;;  %v5994_v44 = vld [vmem:[#allocation3 + $0x370] sm:$0xff]  ;;  %5584 = vrot.lane.b32.xlu0 %v9818_v63, %s6792_s21  ;;  %4950 = vrot.lane.b32.xlu1 %v9681_v59, %s6792_s21  ;;  %v10006_v25 = vpop.f32.mrf.mxu2  ;;  %v4396_v23 = vadd.f32 %v9791_v56, %v4283_v54 }
 0x4e2   : > { %5137 = vrot.lane.b32.xlu2 %v9738_v53, %s6794_s27  ;;  %6667 = vmatmul.msk.f32.gmra.mxu0 %vm4576_vm15, %v5994_v44  ;;  %v6069_v53 = vld [vmem:[%s10854_s5 + $0x88] sm:$0xff] }
 0x4e3   : > { %v5383_v28 = vpop.permute.xlu0 %5382  ;;  %v9981_v52 = vpop.permute.xlu1 %5764  ;;  %6314 = vmatpush.msra.mxu3 %v6070_v26  ;;  %v5997_v21 = vld [vmem:[#allocation3 + $0x3b8] sm:$0xff] }
 0x4e4   : > { %v4941_v45 = vpop.permute.xlu2 %4940  ;;  %5477 = vst.msk [vmem:[#allocation3 + $0x50] sm:$0xff] %vm4833_vm8, %v5383_v28  ;;  %v4502_v7 = vpop.f32.mrf.mxu1  ;;  %v5959_v0 = vld [vmem:[#allocation3 + $0x48] sm:$0xff] }
 0x4e5   : > { %v4503_v57 = vadd.f32 %v4502_v7, %v4390_v37  ;;  %v5956_v58 = vld [vmem:[#allocation3] sm:$0xff]  ;;  %6315 = vmatpush.msra.mxu3 %v6069_v53  ;;  %v10059_v27 = vpop.f32.mrf.mxu3 }
 0x4e6   : > { %6204 = vmatmul.f32.vlgmr.msra.gmra.mxu2 %v5956_v58  ;;  %v10027_v38 = vpop.f32.mrf.mxu0 }
 0x4e7   : > { %v4562_v35 = vmax.f32 %v4503_v57, 0.0  ;;  %6316 = vmatpush.msra.mxu3 %v6068_v29  ;;  %v10085_v29 = vld [vmem:[#allocation2 + $0xa9] sm:$0xff] }
 0x4e8   : > { %v9993_v17 = vld [vmem:[#allocation2 + $0xda] sm:$0xff]  ;;  %v9995_v51 = vld [vmem:[#allocation2 + $0xe2] sm:$0xff]  ;;  %5296 = vst.msk [vmem:[#allocation3 + $0x368] sm:$0xff] %vm4576_vm15, %v10085_v29 }
 0x4e9   : > { %4595 = vst.msk [vmem:[#allocation2 + $0xf1] sm:$0xff] %vm4576_vm15, %v4562_v35  ;;  %5139 = vrot.lane.b32.xlu0 %v9818_v63, %s6794_s27  ;;  %5586 = vrot.lane.b32.xlu1 %v9853_v2, %s6792_s21  ;;  %v10040_v34 = vpop.f32.mrf.mxu2 }
 0x4ea   : > { %4952 = vrot.lane.b32.xlu2 %v9683_v13, %s6792_s21  ;;  %6668 = vmatmul.msk.f32.gmra.mxu0 %vm4576_vm15, %v5997_v21  ;;  %5938 = vst.msk [vmem:[#allocation3 + $0x400] sm:$0xff] %vm4576_vm15, %v9993_v17 }
 0x4eb   : > { %v4746_v43 = vpop.permute.xlu0 %4745  ;;  %5939 = vst.msk [vmem:[#allocation3 + $0x448] sm:$0xff] %vm4576_vm15, %v9995_v51  ;;  %v4748_v55 = vpop.permute.xlu1 %4747 }
 0x4ec   : > { %v10016_v63 = vpop.permute.xlu2 %5766  ;;  %4838 = vst.msk [vmem:[#allocation3 + $0x120] sm:$0xff] %vm4833_vm8, %v4746_v43  ;;  %v4505_v20 = vpop.f32.mrf.mxu1  ;;  %v10098_v43 = vld [vmem:[#allocation2 + $0xa8] sm:$0xff] }
 0x4ed   : > { %4839 = vst.msk [vmem:[#allocation3 + $0x168] sm:$0xff] %vm4833_vm8, %v4748_v55  ;;  %v4506_v39 = vadd.f32 %v4505_v20, %v4393_v33  ;;  %v4294_v40 = vpop.f32.mrf.mxu3  ;;  %v4066_v55 = vadd.f32 %v10048_v19, %v9389_v62 }
 0x4ee   : > { %5032 = vst.msk [vmem:[#allocation3 + $0x168] sm:$0xff] %vm5026_vm9, %v4941_v45  ;;  %6207 = vmatmul.f32.gmra.mxu2 %v5959_v0  ;;  %v10061_v56 = vpop.f32.mrf.mxu0 }
 0x4ef   : > { %v4563_v1 = vmax.f32 %v4506_v39, 0.0  ;;  %4655 = vst.msk [vmem:[#allocation3 + $0x3f0] sm:$0xff] %vm4576_vm15, %v10098_v43 }
 0x4f1   : > { %4596 = vst.msk [vmem:[#allocation2 + $0xf9] sm:$0xff] %vm4576_vm15, %v4563_v1  ;;  %v6000_v36 = vld [vmem:[#allocation3 + $0x400] sm:$0xff]  ;;  %5780 = vrot.lane.b32.xlu0 %v9905_v3, %s6794_s27  ;;  %5396 = vrot.lane.b32.xlu1 %v9681_v59, %s6793_s22  ;;  %v4173_v59 = vadd.f32 %v9962_v6, %v4060_v30  ;;  %v4179_v1 = vadd.f32 %v10040_v34, %v4066_v55 }
 0x4f2   : > { %5778 = vrot.lane.b32.xlu2 %v9766_v8, %s6794_s27  ;;  %6669 = vmatmul.msk.f32.gmra.mxu0 %vm4576_vm15, %v6000_v36  ;;  %v6003_v6 = vld [vmem:[#allocation3 + $0x448] sm:$0xff] }
 0x4f3   : > { %v5573_v44 = vpop.permute.xlu0 %5572  ;;  %v4939_v8 = vpop.permute.xlu1 %4938  ;;  %v4286_v41 = vadd.f32 %v9988_v5, %v4173_v59 }
 0x4f4   : > { %v5387_v26 = vpop.permute.xlu2 %5386  ;;  %5668 = vst.msk [vmem:[#allocation3 + $0x8] sm:$0xff] %vm5026_vm9, %v5573_v44  ;;  %v4508_v37 = vpop.f32.mrf.mxu1  ;;  %v4292_v44 = vadd.f32 %v10059_v27, %v4179_v1  ;;  %v4069_v27 = vadd.f32 %v10048_v19, %v9392_v61  ;;  %v10148_v61 = vld [vmem:[#allocation2 + $0xc1] sm:$0xff] }
 0x4f5   : > { %5860 = vst.msk [vmem:[#allocation3 + $0x8] sm:$0xff] %vm5219_vm1, %v9981_v52  ;;  %v4509_v28 = vadd.f32 %v4508_v37, %v4396_v23  ;;  %v4399_v52 = vadd.f32 %v9835_v47, %v4286_v41  ;;  %v4181_v47 = vpop.f32.mrf.mxu2 }
 0x4f6   : > { %5479 = vst.msk [vmem:[#allocation3 + $0xe0] sm:$0xff] %vm4833_vm8, %v5387_v26  ;;  %v4297_v26 = vpop.f32.mrf.mxu3 }
 0x4f7   : > { %5031 = vst.msk [vmem:[#allocation3 + $0x120] sm:$0xff] %vm5026_vm9, %v4939_v8  ;;  %v4564_v45 = vmax.f32 %v4509_v28, 0.0  ;;  %v4405_v8 = vadd.f32 %v9936_v24, %v4292_v44 }
 0x4f8   : > { %v10063_v7 = vld [vmem:[#allocation2 + $0xf2] sm:$0xff]  ;;  %v10065_v53 = vld [vmem:[#allocation2 + $0xfa] sm:$0xff]  ;;  %5298 = vst.msk [vmem:[#allocation3 + $0x3f8] sm:$0xff] %vm4576_vm15, %v10148_v61 }
 0x4f9   : > { %4597 = vst.msk [vmem:[#allocation2 + $0x109] sm:$0xff] %vm4576_vm15, %v4564_v45  ;;  %4763 = vrot.lane.b32.xlu0 %v9953_v32, %s6793_s22  ;;  %5141 = vrot.lane.b32.xlu1 %v9853_v2, %s6794_s27  ;;  %v4063_v2 = vadd.f32 %v10048_v19, %v9385_v11 }
 0x4fa   : > { %5398 = vrot.lane.b32.xlu2 %v9683_v13, %s6793_s22  ;;  %6670 = vmatmul.msk.f32.gmra.mxu0 %vm4576_vm15, %v6003_v6  ;;  %5940 = vst.msk [vmem:[#allocation3 + $0x490] sm:$0xff] %vm4576_vm15, %v10063_v7  ;;  %v4182_v6 = vadd.f32 %v4181_v47, %v4069_v27  ;;  %v4072_v47 = vadd.f32 %v10048_v19, %v9395_v49 }
 0x4fb   : > { %v5128_v57 = vpop.permute.xlu0 %5127  ;;  %5941 = vst.msk [vmem:[#allocation3 + $0x4d8] sm:$0xff] %vm4576_vm15, %v10065_v53  ;;  %v5575_v5 = vpop.permute.xlu1 %5574  ;;  %v4176_v12 = vadd.f32 %v10006_v25, %v4063_v2 }
 0x4fc   : > { %v4750_v58 = vpop.permute.xlu2 %4749  ;;  %5222 = vst.msk [vmem:[#allocation3 + $0x90] sm:$0xff] %vm5219_vm1, %v5128_v57  ;;  %v4511_v46 = vpop.f32.mrf.mxu1  ;;  %v5957_v13 = vld [vmem:[#allocation3 + $0x8] sm:$0xff] }
 0x4fd   : > { %5669 = vst.msk [vmem:[#allocation3 + $0x50] sm:$0xff] %vm5026_vm9, %v5575_v5  ;;  %v4512_v35 = vadd.f32 %v4511_v46, %v4399_v52  ;;  %6317 = vmatmul.f32.vlgmr.msra.gmra.mxu3 %v5957_v13  ;;  %v4289_v11 = vadd.f32 %v4288_v31, %v4176_v12  ;;  %v10100_v25 = vpop.f32.mrf.mxu0  ;;  %v10153_v46 = vld [vmem:[#allocation2 + $0xb0] sm:$0xff] }
 0x4fe   : > { %5861 = vst.msk [vmem:[#allocation3 + $0x50] sm:$0xff] %vm5219_vm1, %v10016_v63  ;;  %v10105_v63 = vld [vmem:[#allocation2 + $0xb1] sm:$0xff] }
 0x4ff   : > { %4840 = vst.msk [vmem:[#allocation3 + $0x1b0] sm:$0xff] %vm4833_vm8, %v4750_v58  ;;  %v4565_v21 = vmax.f32 %v4512_v35, 0.0  ;;  %v4402_v20 = vadd.f32 %v9897_v9, %v4289_v11  ;;  %v4184_v9 = vpop.f32.mrf.mxu2  ;;  %v4295_v58 = vadd.f32 %v4294_v40, %v4182_v6 }
 0x500   : > { %5297 = vst.msk [vmem:[#allocation3 + $0x3b0] sm:$0xff] %vm4576_vm15, %v10105_v63 }
 0x501   : > { %4598 = vst.msk [vmem:[#allocation2 + $0x111] sm:$0xff] %vm4576_vm15, %v4565_v21  ;;  %v6006_v33 = vld [vmem:[#allocation3 + $0x490] sm:$0xff]  ;;  %4954 = vrot.lane.b32.xlu0 %v9753_v48, %s6792_s21  ;;  %4956 = vrot.lane.b32.xlu1 %v9755_v4, %s6792_s21  ;;  %v4408_v13 = vadd.f32 %v9990_v50, %v4295_v58  ;;  %v4300_v21 = vpop.f32.mrf.mxu3  ;;  %v4185_v50 = vadd.f32 %v4184_v9, %v4072_v47 }
 0x502   : > { %4761 = vrot.lane.b32.xlu2 %v9905_v3, %s6793_s22  ;;  %6671 = vmatmul.msk.f32.gmra.mxu0 %vm4576_vm15, %v6006_v33  ;;  %v6009_v34 = vld [vmem:[#allocation3 + $0x4d8] sm:$0xff]  ;;  %4656 = vst.msk [vmem:[#allocation3 + $0x438] sm:$0xff] %vm4576_vm15, %v10153_v46 }
 0x503   : > { %v5769_v3 = vpop.permute.xlu0 %5768  ;;  %v5962_v39 = vld [vmem:[#allocation3 + $0x90] sm:$0xff]  ;;  %v5385_v0 = vpop.permute.xlu1 %5384 }
 0x504   : > { %v5577_v60 = vpop.permute.xlu2 %5576  ;;  %v4514_v31 = vpop.f32.mrf.mxu1  ;;  %6210 = vmatmul.f32.gmra.mxu2 %v5962_v39  ;;  %5478 = vst.msk [vmem:[#allocation3 + $0x98] sm:$0xff] %vm4833_vm8, %v5385_v0 }
 0x505   : > { %v4515_v54 = vadd.f32 %v4514_v31, %v4402_v20  ;;  %v5960_v36 = vld [vmem:[#allocation3 + $0x50] sm:$0xff]  ;;  %5670 = vst.msk [vmem:[#allocation3 + $0x98] sm:$0xff] %vm5026_vm9, %v5577_v60  ;;  %v10140_v41 = vpop.f32.mrf.mxu0  ;;  %v4298_v20 = vadd.f32 %v4297_v26, %v4185_v50  ;;  %v4075_v60 = vadd.f32 %v10048_v19, %v9398_v22  ;;  %v10863_v50 = vld [vmem:[#allocation5_spill] sm:$0xff] }
 0x506   : > { %6320 = vmatmul.f32.gmra.mxu3 %v5960_v36  ;;  %5862 = vst.msk [vmem:[#allocation3 + $0x98] sm:$0xff] %vm5219_vm1, %v5769_v3 }
 0x507   : > { %v4566_v62 = vmax.f32 %v4515_v54, 0.0  ;;  %v4187_v57 = vpop.f32.mrf.mxu2  ;;  %v4411_v39 = vadd.f32 %v10027_v38, %v4298_v20  ;;  %v10188_v54 = vld [vmem:[#allocation2 + $0xc9] sm:$0xff] }
 0x508   : > { %v10118_v30 = vld [vmem:[#allocation2 + $0x10a] sm:$0xff]  ;;  %v10120_v23 = vld [vmem:[#allocation2 + $0x112] sm:$0xff]  ;;  %v4188_v36 = vadd.f32 %v4187_v57, %v4075_v60  ;;  %5299 = vst.msk [vmem:[#allocation3 + $0x440] sm:$0xff] %vm4576_vm15, %v10188_v54 }
 0x509   : > { %4599 = vst.msk [vmem:[#allocation2 + $0x121] sm:$0xff] %vm4576_vm15, %v4566_v62  ;;  %5590 = vrot.lane.b32.xlu0 %v10025_v15, %s6792_s21  ;;  %5782 = vrot.lane.b32.xlu1 %v9953_v32, %s6794_s27  ;;  %v4303_v38 = vpop.f32.mrf.mxu3 }
 0x50a   : > { %5588 = vrot.lane.b32.xlu2 %v10021_v18, %s6792_s21  ;;  %6672 = vmatmul.msk.f32.gmra.mxu0 %vm4576_vm15, %v6009_v34  ;;  %5942 = vst.msk [vmem:[#allocation3 + $0x520] sm:$0xff] %vm4576_vm15, %v10118_v30  ;;  %v4301_v9 = vadd.f32 %v4300_v21, %v4188_v36  ;;  %v10199_v34 = vld [vmem:[#allocation2 + $0xc8] sm:$0xff] }
 0x50b   : > { %v4752_v37 = vpop.permute.xlu0 %4751  ;;  %5943 = vst.msk [vmem:[#allocation3 + $0x568] sm:$0xff] %vm4576_vm15, %v10120_v23  ;;  %v5130_v28 = vpop.permute.xlu1 %5129 }
 0x50c   : > { %v5132_v59 = vpop.permute.xlu2 %5131  ;;  %4841 = vst.msk [vmem:[#allocation3 + $0x1f8] sm:$0xff] %vm4833_vm8, %v4752_v37  ;;  %v4517_v45 = vpop.f32.mrf.mxu1  ;;  %v10862_v37 = vld [vmem:[#allocation4_spill] sm:$0xff] }
 0x50d   : > { %5223 = vst.msk [vmem:[#allocation3 + $0xd8] sm:$0xff] %vm5219_vm1, %v5130_v28  ;;  %v4518_v32 = vadd.f32 %v4517_v45, %v4405_v8  ;;  %v5963_v24 = vld [vmem:[#allocation3 + $0x98] sm:$0xff]  ;;  %v10166_v11 = vpop.f32.mrf.mxu0  ;;  %v10206_v8 = vld [vmem:[#allocation2 + $0xc0] sm:$0xff]  ;;  %v4414_v28 = vadd.f32 %v10061_v56, %v4301_v9 }
 0x50e   : > { %5224 = vst.msk [vmem:[#allocation3 + $0x120] sm:$0xff] %vm5219_vm1, %v5132_v59  ;;  %6323 = vmatmul.f32.gmra.mxu3 %v5963_v24  ;;  %v4078_v59 = vadd.f32 %v10048_v19, %v10862_v37 }
 0x50f   : > { %v4567_v52 = vmax.f32 %v4518_v32, 0.0  ;;  %v4190_v49 = vpop.f32.mrf.mxu2  ;;  %4658 = vst.msk [vmem:[#allocation3 + $0x4c8] sm:$0xff] %vm4576_vm15, %v10199_v34 }
 0x510   : > { %4657 = vst.msk [vmem:[#allocation3 + $0x480] sm:$0xff] %vm4576_vm15, %v10206_v8 }
 0x511   : > { %4600 = vst.msk [vmem:[#allocation2 + $0x129] sm:$0xff] %vm4576_vm15, %v4567_v52  ;;  %v6012_v5 = vld [vmem:[#allocation3 + $0x520] sm:$0xff]  ;;  %5400 = vrot.lane.b32.xlu0 %v9753_v48, %s6793_s22  ;;  %5402 = vrot.lane.b32.xlu1 %v9755_v4, %s6793_s22  ;;  %v4191_v52 = vadd.f32 %v4190_v49, %v4078_v59 }
 0x512   : > { %5143 = vrot.lane.b32.xlu2 %v10021_v18, %s6794_s27  ;;  %6673 = vmatmul.msk.f32.gmra.mxu0 %vm4576_vm15, %v6012_v5  ;;  %v6015_v3 = vld [vmem:[#allocation3 + $0x568] sm:$0xff] }
 0x513   : > { %v4943_v2 = vpop.permute.xlu0 %4942  ;;  %v4945_v48 = vpop.permute.xlu1 %4944 }
 0x514   : > { %v10158_v35 = vpop.permute.xlu2 %5772  ;;  %5033 = vst.msk [vmem:[#allocation3 + $0x1b0] sm:$0xff] %vm5026_vm9, %v4943_v2  ;;  %v4520_v18 = vpop.f32.mrf.mxu1  ;;  %v5965_v4 = vld [vmem:[#allocation3 + $0xd8] sm:$0xff] }
 0x515   : > { %5034 = vst.msk [vmem:[#allocation3 + $0x1f8] sm:$0xff] %vm5026_vm9, %v4945_v48  ;;  %v4521_v12 = vadd.f32 %v4520_v18, %v4408_v13  ;;  %6213 = vmatmul.f32.gmra.mxu2 %v5965_v4  ;;  %v10201_v26 = vpop.f32.mrf.mxu0  ;;  %v4306_v13 = vpop.f32.mrf.mxu3  ;;  %v4304_v48 = vadd.f32 %v4303_v38, %v4191_v52 }
 0x517   : > { %v4568_v40 = vmax.f32 %v4521_v12, 0.0  ;;  %v4193_v58 = vpop.f32.mrf.mxu2  ;;  %v4417_v4 = vadd.f32 %v10100_v25, %v4304_v48 }
 0x518   : > { %v10168_v33 = vld [vmem:[#allocation2 + $0x122] sm:$0xff]  ;;  %v10170_v55 = vld [vmem:[#allocation2 + $0x12a] sm:$0xff] }
 0x519   : > { %4601 = vst.msk [vmem:[#allocation2 + $0x139] sm:$0xff] %vm4576_vm15, %v4568_v40  ;;  %5145 = vrot.lane.b32.xlu0 %v10025_v15, %s6794_s27  ;;  %4765 = vrot.lane.b32.xlu1 %v10085_v29, %s6793_s22  ;;  %v4081_v40 = vadd.f32 %v10048_v19, %v10863_v50  ;;  %v10866_v50 = vld [vmem:[#allocation8_spill] sm:$0xff] }
 0x51a   : > { %5784 = vrot.lane.b32.xlu2 %v10085_v29, %s6794_s27  ;;  %6674 = vmatmul.msk.f32.gmra.mxu0 %vm4576_vm15, %v6015_v3  ;;  %5944 = vst.msk [vmem:[#allocation3 + $0x5b0] sm:$0xff] %vm4576_vm15, %v10168_v33  ;;  %v5968_v29 = vld [vmem:[#allocation3 + $0x120] sm:$0xff] }
 0x51b   : > { %v5579_v0 = vpop.permute.xlu0 %5578  ;;  %5945 = vst.msk [vmem:[#allocation3 + $0x5f8] sm:$0xff] %vm4576_vm15, %v10170_v55  ;;  %v5771_v15 = vpop.permute.xlu1 %5770  ;;  %v4194_v25 = vadd.f32 %v4193_v58, %v4081_v40  ;;  %v10281_v58 = vld [vmem:[#allocation2 + $0xd8] sm:$0xff]  ;;  %v4090_v40 = vadd.f32 %v10048_v19, %v10866_v50 }
 0x51c   : > { %v4756_v31 = vpop.permute.xlu2 %4755  ;;  %5671 = vst.msk [vmem:[#allocation3 + $0xe0] sm:$0xff] %vm5026_vm9, %v5579_v0  ;;  %v4523_v1 = vpop.f32.mrf.mxu1  ;;  %v10370_v50 = vld [vmem:[#allocation2 + $0xf8] sm:$0xff] }
 0x51d   : > { %5863 = vst.msk [vmem:[#allocation3 + $0xe0] sm:$0xff] %vm5219_vm1, %v5771_v15  ;;  %v4524_v62 = vadd.f32 %v4523_v1, %v4411_v39  ;;  %6216 = vmatmul.f32.gmra.mxu2 %v5968_v29  ;;  %v10238_v3 = vpop.f32.mrf.mxu0  ;;  %v4307_v60 = vadd.f32 %v4306_v13, %v4194_v25  ;;  %v4309_v0 = vpop.f32.mrf.mxu3  ;;  %v10864_v15 = vld [vmem:[#allocation6_spill] sm:$0xff] }
 0x51e   : > { %4843 = vst.msk [vmem:[#allocation3 + $0x288] sm:$0xff] %vm4833_vm8, %v4756_v31  ;;  %v10250_v31 = vld [vmem:[#allocation2 + $0xd9] sm:$0xff]  ;;  %v4084_v1 = vadd.f32 %v10048_v19, %v10864_v15 }
 0x51f   : > { %v4569_v22 = vmax.f32 %v4524_v62, 0.0  ;;  %v4196_v20 = vpop.f32.mrf.mxu2  ;;  %v4420_v29 = vadd.f32 %v10140_v41, %v4307_v60  ;;  %5300 = vst.msk [vmem:[#allocation3 + $0x488] sm:$0xff] %vm4576_vm15, %v10250_v31 }
 0x520   : > { %v4197_v9 = vadd.f32 %v4196_v20, %v4084_v1  ;;  %4659 = vst.msk [vmem:[#allocation3 + $0x510] sm:$0xff] %vm4576_vm15, %v10281_v58 }
 0x521   : > { %4602 = vst.msk [vmem:[#allocation2 + $0x141] sm:$0xff] %vm4576_vm15, %v4569_v22  ;;  %v6018_v44 = vld [vmem:[#allocation3 + $0x5b0] sm:$0xff]  ;;  %4960 = vrot.lane.b32.xlu0 %v9839_v10, %s6792_s21  ;;  %5592 = vrot.lane.b32.xlu1 %v10098_v43, %s6792_s21 }
 0x522   : > { %4767 = vrot.lane.b32.xlu2 %v10105_v63, %s6793_s22  ;;  %6675 = vmatmul.msk.f32.gmra.mxu0 %vm4576_vm15, %v6018_v44  ;;  %v6021_v18 = vld [vmem:[#allocation3 + $0x5f8] sm:$0xff]  ;;  %4662 = vst.msk [vmem:[#allocation3 + $0x5e8] sm:$0xff] %vm4576_vm15, %v10370_v50 }
 0x523   : > { %v5389_v45 = vpop.permute.xlu0 %5388  ;;  %v5391_v32 = vpop.permute.xlu1 %5390 }
 0x524   : > { %v4947_v27 = vpop.permute.xlu2 %4946  ;;  %5480 = vst.msk [vmem:[#allocation3 + $0x128] sm:$0xff] %vm4833_vm8, %v5389_v45  ;;  %v4526_v24 = vpop.f32.mrf.mxu1  ;;  %v5966_v6 = vld [vmem:[#allocation3 + $0xe0] sm:$0xff] }
 0x525   : > { %5481 = vst.msk [vmem:[#allocation3 + $0x170] sm:$0xff] %vm4833_vm8, %v5391_v32  ;;  %v4527_v57 = vadd.f32 %v4526_v24, %v4414_v28  ;;  %6326 = vmatmul.f32.gmra.mxu3 %v5966_v6  ;;  %v10259_v37 = vpop.f32.mrf.mxu0 }
 0x527   : > { %v4570_v5 = vmax.f32 %v4527_v57, 0.0  ;;  %v4199_v59 = vpop.f32.mrf.mxu2 }
 0x528   : > { %v10217_v2 = vld [vmem:[#allocation2 + $0x13a] sm:$0xff]  ;;  %v10219_v56 = vld [vmem:[#allocation2 + $0x142] sm:$0xff] }
 0x529   : > { %4603 = vst.msk [vmem:[#allocation2 + $0x151] sm:$0xff] %vm4576_vm15, %v4570_v5  ;;  %5786 = vrot.lane.b32.xlu0 %v10105_v63, %s6794_s27  ;;  %5147 = vrot.lane.b32.xlu1 %v10098_v43, %s6794_s27 }
 0x52a   : > { %4958 = vrot.lane.b32.xlu2 %v9837_v16, %s6792_s21  ;;  %6676 = vmatmul.msk.f32.gmra.mxu0 %vm4576_vm15, %v6021_v18  ;;  %5946 = vst.msk [vmem:[#allocation3 + $0x640] sm:$0xff] %vm4576_vm15, %v10217_v2  ;;  %v4312_v18 = vpop.f32.mrf.mxu3 }
 0x52b   : > { %v5134_v47 = vpop.permute.xlu0 %5133  ;;  %5947 = vst.msk [vmem:[#allocation3 + $0x688] sm:$0xff] %vm4576_vm15, %v10219_v56  ;;  %v4754_v21 = vpop.permute.xlu1 %4753 }
 0x52c   : > { %v5583_v12 = vpop.permute.xlu2 %5582  ;;  %5225 = vst.msk [vmem:[#allocation3 + $0x168] sm:$0xff] %vm5219_vm1, %v5134_v47  ;;  %v4529_v63 = vpop.f32.mrf.mxu1 }
 0x52d   : > { %4842 = vst.msk [vmem:[#allocation3 + $0x240] sm:$0xff] %vm4833_vm8, %v4754_v21  ;;  %v4530_v43 = vadd.f32 %v4529_v63, %v4417_v4  ;;  %v10285_v4 = vld [vmem:[#allocation2 + $0xe1] sm:$0xff]  ;;  %v10289_v47 = vpop.f32.mrf.mxu0 }
 0x52e   : > { %5035 = vst.msk [vmem:[#allocation3 + $0x240] sm:$0xff] %vm5026_vm9, %v4947_v27  ;;  %v4310_v27 = vadd.f32 %v4309_v0, %v4197_v9 }
 0x52f   : > { %5673 = vst.msk [vmem:[#allocation3 + $0x170] sm:$0xff] %vm5026_vm9, %v5583_v12  ;;  %v4571_v49 = vmax.f32 %v4530_v43, 0.0  ;;  %v4202_v63 = vpop.f32.mrf.mxu2 }
 0x530   : > { %v4423_v6 = vadd.f32 %v10166_v11, %v4310_v27  ;;  %5301 = vst.msk [vmem:[#allocation3 + $0x4d0] sm:$0xff] %vm4576_vm15, %v10285_v4  ;;  %v10333_v27 = vld [vmem:[#allocation2 + $0xf1] sm:$0xff] }
 0x531   : > { %4604 = vst.msk [vmem:[#allocation2 + $0x159] sm:$0xff] %vm4576_vm15, %v4571_v49  ;;  %v6024_v39 = vld [vmem:[#allocation3 + $0x640] sm:$0xff]  ;;  %5406 = vrot.lane.b32.xlu0 %v9839_v10, %s6793_s22  ;;  %5788 = vrot.lane.b32.xlu1 %v10148_v61, %s6794_s27 }
 0x532   : > { %5594 = vrot.lane.b32.xlu2 %v10153_v46, %s6792_s21  ;;  %6677 = vmatmul.msk.f32.gmra.mxu0 %vm4576_vm15, %v6024_v39  ;;  %v6027_v32 = vld [vmem:[#allocation3 + $0x688] sm:$0xff]  ;;  %5302 = vst.msk [vmem:[#allocation3 + $0x518] sm:$0xff] %vm4576_vm15, %v10333_v27 }
 0x533   : > { %v4949_v36 = vpop.permute.xlu0 %4948  ;;  %v5971_v22 = vld [vmem:[#allocation3 + $0x168] sm:$0xff]  ;;  %v5581_v10 = vpop.permute.xlu1 %5580 }
 0x534   : > { %v5393_v62 = vpop.permute.xlu2 %5392  ;;  %5036 = vst.msk [vmem:[#allocation3 + $0x288] sm:$0xff] %vm5026_vm9, %v4949_v36  ;;  %v4532_v38 = vpop.f32.mrf.mxu1  ;;  %6219 = vmatmul.f32.gmra.mxu2 %v5971_v22 }
 0x535   : > { %5672 = vst.msk [vmem:[#allocation3 + $0x128] sm:$0xff] %vm5026_vm9, %v5581_v10  ;;  %v4533_v44 = vadd.f32 %v4532_v38, %v4420_v29  ;;  %v4315_v29 = vpop.f32.mrf.mxu3 }
 0x536   : > { %5864 = vst.msk [vmem:[#allocation3 + $0x128] sm:$0xff] %vm5219_vm1, %v10158_v35  ;;  %v10865_v35 = vld [vmem:[#allocation7_spill] sm:$0xff] }
 0x537   : > { %5482 = vst.msk [vmem:[#allocation3 + $0x1b8] sm:$0xff] %vm4833_vm8, %v5393_v62  ;;  %v4572_v41 = vmax.f32 %v4533_v44, 0.0  ;;  %v4087_v24 = vadd.f32 %v10048_v19, %v10865_v35 }
 0x538   : > { %v5916_v28 = vld [vmem:[#allocation2 + $0x152] sm:$0xff]  ;;  %v10264_v45 = vld [vmem:[#allocation2 + $0x15a] sm:$0xff] }
 0x539   : > { %4605 = vst.msk [vmem:[#allocation2 + $0x169] sm:$0xff] %vm4576_vm15, %v4572_v41  ;;  %4769 = vrot.lane.b32.xlu0 %v10148_v61, %s6793_s22  ;;  %4771 = vrot.lane.b32.xlu1 %v10188_v54, %s6793_s22  ;;  %v4200_v5 = vadd.f32 %v4199_v59, %v4087_v24  ;;  %v10319_v41 = vld [vmem:[#allocation2 + $0xe0] sm:$0xff] }
 0x53a   : > { %5404 = vrot.lane.b32.xlu2 %v9837_v16, %s6793_s22  ;;  %6678 = vmatmul.msk.f32.gmra.mxu0 %vm4576_vm15, %v6027_v32  ;;  %5948 = vst.msk [vmem:[#allocation3 + $0x6d0] sm:$0xff] %vm4576_vm15, %v5916_v28 }
 0x53b   : > { %v5775_v52 = vpop.permute.xlu0 %5774  ;;  %5949 = vst.msk [vmem:[#allocation3 + $0x718] sm:$0xff] %vm4576_vm15, %v10264_v45  ;;  %v5136_v61 = vpop.permute.xlu1 %5135  ;;  %v4313_v12 = vadd.f32 %v4312_v18, %v4200_v5 }
 0x53c   : > { %v5138_v57 = vpop.permute.xlu2 %5137  ;;  %5865 = vst.msk [vmem:[#allocation3 + $0x170] sm:$0xff] %vm5219_vm1, %v5775_v52  ;;  %v4535_v16 = vpop.f32.mrf.mxu1 }
 0x53d   : > { %5226 = vst.msk [vmem:[#allocation3 + $0x1b0] sm:$0xff] %vm5219_vm1, %v5136_v61  ;;  %v4536_v13 = vadd.f32 %v4535_v16, %v4423_v6  ;;  %v5969_v48 = vld [vmem:[#allocation3 + $0x128] sm:$0xff]  ;;  %v4426_v43 = vadd.f32 %v10201_v26, %v4313_v12  ;;  %v10310_v26 = vpop.f32.mrf.mxu0 }
 0x53e   : > { %5227 = vst.msk [vmem:[#allocation3 + $0x1f8] sm:$0xff] %vm5219_vm1, %v5138_v57  ;;  %6329 = vmatmul.f32.gmra.mxu3 %v5969_v48 }
 0x53f   : > { %v4573_v11 = vmax.f32 %v4536_v13, 0.0  ;;  %4660 = vst.msk [vmem:[#allocation3 + $0x558] sm:$0xff] %vm4576_vm15, %v10319_v41 }
 0x541   : > { %4606 = vst.msk [vmem:[#allocation2 + $0x171] sm:$0xff] %vm4576_vm15, %v4573_v11  ;;  %v6030_v21 = vld [vmem:[#allocation3 + $0x6d0] sm:$0xff]  ;;  %5596 = vrot.lane.b32.xlu0 %v10206_v8, %s6792_s21  ;;  %5598 = vrot.lane.b32.xlu1 %v10199_v34, %s6792_s21 }
 0x542   : > { %5149 = vrot.lane.b32.xlu2 %v10153_v46, %s6794_s27  ;;  %6679 = vmatmul.msk.f32.gmra.mxu0 %vm4576_vm15, %v6030_v21  ;;  %v4203_v46 = vadd.f32 %v4202_v63, %v4090_v40  ;;  %v6033_v19 = vld [vmem:[#allocation3 + $0x718] sm:$0xff] }
 0x543   : > { %v5395_v20 = vpop.permute.xlu0 %5394  ;;  %v5972_v49 = vld [vmem:[#allocation3 + $0x170] sm:$0xff]  ;;  %v5777_v60 = vpop.permute.xlu1 %5776 }
 0x544   : > { %v4953_v25 = vpop.permute.xlu2 %4952  ;;  %5483 = vst.msk [vmem:[#allocation3 + $0x200] sm:$0xff] %vm4833_vm8, %v5395_v20  ;;  %v4538_v39 = vpop.f32.mrf.mxu1  ;;  %v5974_v0 = vld [vmem:[#allocation3 + $0x1b0] sm:$0xff]  ;;  %v4316_v22 = vadd.f32 %v4315_v29, %v4203_v46  ;;  %v10406_v46 = vld [vmem:[#allocation2 + $0x109] sm:$0xff] }
 0x545   : > { %v4539_v15 = vadd.f32 %v4538_v39, %v4426_v43  ;;  %6222 = vmatmul.f32.gmra.mxu2 %v5974_v0  ;;  %v10339_v6 = vpop.f32.mrf.mxu0  ;;  %5304 = vst.msk [vmem:[#allocation3 + $0x5a8] sm:$0xff] %vm4576_vm15, %v10406_v46 }
 0x546   : > { %6332 = vmatmul.f32.gmra.mxu3 %v5972_v49  ;;  %v4429_v10 = vadd.f32 %v10238_v3, %v4316_v22  ;;  %v10388_v49 = vld [vmem:[#allocation2 + $0xf9] sm:$0xff] }
 0x547   : > { %v4574_v1 = vmax.f32 %v4539_v15, 0.0  ;;  %5303 = vst.msk [vmem:[#allocation3 + $0x560] sm:$0xff] %vm4576_vm15, %v10388_v49 }
 0x548   : > { %v5918_v36 = vld [vmem:[#allocation2 + $0x16a] sm:$0xff]  ;;  %v5919_v62 = vld [vmem:[#allocation2 + $0x172] sm:$0xff] }
 0x549   : > { %4607 = vst.msk [vmem:[#allocation2 + $0x181] sm:$0xff] %vm4576_vm15, %v4574_v1  ;;  %5151 = vrot.lane.b32.xlu0 %v10206_v8, %s6794_s27  ;;  %5408 = vrot.lane.b32.xlu1 %v9921_v42, %s6793_s22  ;;  %v10415_v1 = vld [vmem:[%s10855_s6] ss:$0 sm:$0xff] }
 0x54a   : > { %5790 = vrot.lane.b32.xlu2 %v10188_v54, %s6794_s27  ;;  %6680 = vmatmul.msk.f32.gmra.mxu0 %vm4576_vm15, %v6033_v19  ;;  %5950 = vst.msk [vmem:[#allocation3 + $0x760] sm:$0xff] %vm4576_vm15, %v5918_v36  ;;  %v5977_v54 = vld [vmem:[#allocation3 + $0x1f8] sm:$0xff] }
 0x54b   : > { %v4758_v38 = vpop.permute.xlu0 %4757  ;;  %5951 = vst.msk [vmem:[#allocation3 + $0x7a8] sm:$0xff] %vm4576_vm15, %v5919_v62  ;;  %v4760_v44 = vpop.permute.xlu1 %4759 }
 0x54c   : > { %v5779_v9 = vpop.permute.xlu2 %5778  ;;  %4844 = vst.msk [vmem:[#allocation3 + $0x2d0] sm:$0xff] %vm4833_vm8, %v4758_v38  ;;  %v4541_v8 = vpop.f32.mrf.mxu1  ;;  %v5526_v38 = vld [vmem:[#allocation2 + $0x108] sm:$0xff] }
 0x54d   : > { %4845 = vst.msk [vmem:[#allocation3 + $0x318] sm:$0xff] %vm4833_vm8, %v4760_v44  ;;  %v4542_v59 = vadd.f32 %v4541_v8, %v4429_v10  ;;  %6225 = vmatmul.f32.gmra.mxu2 %v5977_v54  ;;  %v10425_v10 = vld [vmem:[#allocation2 + $0x111] sm:$0xff] }
 0x54e   : > { %5038 = vst.msk [vmem:[#allocation3 + $0x318] sm:$0xff] %vm5026_vm9, %v4953_v25 }
 0x54f   : > { %v4575_v28 = vmax.f32 %v4542_v59, 0.0  ;;  %5305 = vst.msk [vmem:[#allocation3 + $0x5f0] sm:$0xff] %vm4576_vm15, %v10425_v10 }
 0x550   : > { %4663 = vst.msk [vmem:[#allocation3 + $0x630] sm:$0xff] %vm4576_vm15, %v5526_v38 }
 0x551   : > { %4608 = vst.msk [vmem:[#allocation2 + $0x189] sm:$0xff] %vm4576_vm15, %v4575_v28  ;;  %v6036_v3 = vld [vmem:[#allocation3 + $0x760] sm:$0xff]  ;;  %5792 = vrot.lane.b32.xlu0 %v10250_v31, %s6794_s27  ;;  %5153 = vrot.lane.b32.xlu1 %v10199_v34, %s6794_s27 }
 0x552   : > { %5410 = vrot.lane.b32.xlu2 %v9923_v14, %s6793_s22  ;;  %6681 = vmatmul.msk.f32.gmra.mxu0 %vm4576_vm15, %v6036_v3  ;;  %v10343_v34 = vld [vmem:[#allocation2 + $0xf0] sm:$0xff]  ;;  %v6039_v61 = vld [vmem:[#allocation3 + $0x7a8] sm:$0xff] }
 0x553   : > { %v5585_v32 = vpop.permute.xlu0 %5584  ;;  %v4951_v24 = vpop.permute.xlu1 %4950  ;;  %4661 = vst.msk [vmem:[#allocation3 + $0x5a0] sm:$0xff] %vm4576_vm15, %v10343_v34 }
 0x554   : > { %v5399_v35 = vpop.permute.xlu2 %5398  ;;  %5674 = vst.msk [vmem:[#allocation3 + $0x1b8] sm:$0xff] %vm5026_vm9, %v5585_v32 }
 0x555   : > { %5037 = vst.msk [vmem:[#allocation3 + $0x2d0] sm:$0xff] %vm5026_vm9, %v4951_v24 }
 0x556   : > { %5866 = vst.msk [vmem:[#allocation3 + $0x1b8] sm:$0xff] %vm5219_vm1, %v5777_v60 }
 0x557   : > { %5485 = vst.msk [vmem:[#allocation3 + $0x290] sm:$0xff] %vm4833_vm8, %v5399_v35 }
 0x558   : > { %v5920_v52 = vld [vmem:[#allocation2 + $0x182] sm:$0xff]  ;;  %v5921_v57 = vld [vmem:[#allocation2 + $0x18a] sm:$0xff] }
 0x559   : > { %5155 = vrot.lane.b32.xlu0 %v10281_v58, %s6794_s27  ;;  %5952 = vst.msk [vmem:[#allocation3 + $0x7f0] sm:$0xff] %vm4576_vm15, %v5920_v52  ;;  %4964 = vrot.lane.b32.xlu1 %v9923_v14, %s6792_s21  ;;  %v5080_v52 = vld [vmem:[#allocation2 + $0x110] sm:$0xff] }
 0x55a   : > { %4962 = vrot.lane.b32.xlu2 %v9921_v42, %s6792_s21  ;;  %6682 = vmatmul.msk.f32.gmra.mxu0 %vm4576_vm15, %v6039_v61  ;;  %5953 = vst.msk [vmem:[#allocation3 + $0x838] sm:$0xff] %vm4576_vm15, %v5921_v57  ;;  %v10360_v42 = vpop.f32.mrf.mxu0 }
 0x55b   : > { %v5140_v16 = vpop.permute.xlu0 %5139  ;;  %v5587_v13 = vpop.permute.xlu1 %5586  ;;  %4664 = vst.msk [vmem:[#allocation3 + $0x678] sm:$0xff] %vm4576_vm15, %v5080_v52 }
 0x55c   : > { %v4762_v5 = vpop.permute.xlu2 %4761  ;;  %5228 = vst.msk [vmem:[#allocation3 + $0x240] sm:$0xff] %vm5219_vm1, %v5140_v16 }
 0x55d   : > { %5675 = vst.msk [vmem:[#allocation3 + $0x200] sm:$0xff] %vm5026_vm9, %v5587_v13  ;;  %v5975_v48 = vld [vmem:[#allocation3 + $0x1b8] sm:$0xff] }
 0x55e   : > { %5867 = vst.msk [vmem:[#allocation3 + $0x200] sm:$0xff] %vm5219_vm1, %v5779_v9  ;;  %6335 = vmatmul.f32.gmra.mxu3 %v5975_v48 }
 0x55f   : > { %4846 = vst.msk [vmem:[#allocation3 + $0x360] sm:$0xff] %vm4833_vm8, %v4762_v5 }
 0x560   : > { %v6042_v14 = vld [vmem:[#allocation3 + $0x7f0] sm:$0xff] }
 0x561   : > { %4775 = vrot.lane.b32.xlu0 %v10285_v4, %s6793_s22  ;;  %5794 = vrot.lane.b32.xlu1 %v10285_v4, %s6794_s27 }
 0x562   : > { %4773 = vrot.lane.b32.xlu2 %v10250_v31, %s6793_s22  ;;  %6683 = vmatmul.msk.f32.gmra.mxu0 %vm4576_vm15, %v6042_v14  ;;  %v6045_v31 = vld [vmem:[#allocation3 + $0x838] sm:$0xff]  ;;  %v10380_v4 = vpop.f32.mrf.mxu0 }
 0x563   : > { %v5781_v18 = vpop.permute.xlu0 %5780  ;;  %v5980_v12 = vld [vmem:[#allocation3 + $0x240] sm:$0xff]  ;;  %v5397_v21 = vpop.permute.xlu1 %5396 }
 0x564   : > { %v5589_v11 = vpop.permute.xlu2 %5588  ;;  %6228 = vmatmul.f32.gmra.mxu2 %v5980_v12  ;;  %5484 = vst.msk [vmem:[#allocation3 + $0x248] sm:$0xff] %vm4833_vm8, %v5397_v21 }
 0x565   : > { %v5978_v63 = vld [vmem:[#allocation3 + $0x200] sm:$0xff]  ;;  %5676 = vst.msk [vmem:[#allocation3 + $0x248] sm:$0xff] %vm5026_vm9, %v5589_v11 }
 0x566   : > { %6338 = vmatmul.f32.gmra.mxu3 %v5978_v63  ;;  %5868 = vst.msk [vmem:[#allocation3 + $0x248] sm:$0xff] %vm5219_vm1, %v5781_v18 }
 0x569   : > { %5602 = vrot.lane.b32.xlu0 %v10319_v41, %s6792_s21  ;;  %5412 = vrot.lane.b32.xlu1 %v9993_v17, %s6793_s22  ;;  %v6205_v15 = vpop.f32.mrf.mxu2 }
 0x56a   : > { %5600 = vrot.lane.b32.xlu2 %v10281_v58, %s6792_s21  ;;  %6684 = vmatmul.msk.f32.gmra.mxu0 %vm4576_vm15, %v6045_v31  ;;  %v6206_v62 = vadd.f32 %v10415_v1, %v6205_v15 }
 0x56b   : > { %v4764_v40 = vpop.permute.xlu0 %4763  ;;  %v5142_v20 = vpop.permute.xlu1 %5141 }
 0x56c   : > { %v5144_v43 = vpop.permute.xlu2 %5143  ;;  %4847 = vst.msk [vmem:[#allocation3 + $0x3a8] sm:$0xff] %vm4833_vm8, %v4764_v40 }
 0x56d   : > { %5229 = vst.msk [vmem:[#allocation3 + $0x288] sm:$0xff] %vm5219_vm1, %v5142_v20  ;;  %v5981_v25 = vld [vmem:[#allocation3 + $0x248] sm:$0xff]  ;;  %v10489_v20 = vld [vmem:[#allocation2 + $0x121] sm:$0xff] }
 0x56e   : > { %5230 = vst.msk [vmem:[#allocation3 + $0x2d0] sm:$0xff] %vm5219_vm1, %v5144_v43  ;;  %6341 = vmatmul.f32.gmra.mxu3 %v5981_v25  ;;  %v5721_v43 = vld [vmem:[#allocation2 + $0x129] sm:$0xff] }
 0x56f   : > { %5306 = vst.msk [vmem:[#allocation3 + $0x638] sm:$0xff] %vm4576_vm15, %v10489_v20 }
 0x570   : > { %5307 = vst.msk [vmem:[#allocation3 + $0x680] sm:$0xff] %vm4576_vm15, %v5721_v43 }
 0x571   : > { %5414 = vrot.lane.b32.xlu0 %v9995_v51, %s6793_s22  ;;  %4777 = vrot.lane.b32.xlu1 %v10333_v27, %s6793_s22  ;;  %v6208_v59 = vpop.f32.mrf.mxu2 }
 0x572   : > { %5157 = vrot.lane.b32.xlu2 %v10319_v41, %s6794_s27  ;;  %v6209_v28 = vadd.f32 %v10415_v1, %v6208_v59 }
 0x573   : > { %v4955_v58 = vpop.permute.xlu0 %4954  ;;  %v4957_v39 = vpop.permute.xlu1 %4956 }
 0x574   : > { %v10398_v60 = vpop.permute.xlu2 %5784  ;;  %5039 = vst.msk [vmem:[#allocation3 + $0x360] sm:$0xff] %vm5026_vm9, %v4955_v58  ;;  %v5983_v0 = vld [vmem:[#allocation3 + $0x288] sm:$0xff] }
 0x575   : > { %5040 = vst.msk [vmem:[#allocation3 + $0x3a8] sm:$0xff] %vm5026_vm9, %v4957_v39  ;;  %6231 = vmatmul.f32.gmra.mxu2 %v5983_v0 }
 0x579   : > { %4966 = vrot.lane.b32.xlu0 %v9993_v17, %s6792_s21  ;;  %5159 = vrot.lane.b32.xlu1 %v10343_v34, %s6794_s27 }
 0x57a   : > { %4968 = vrot.lane.b32.xlu2 %v9995_v51, %s6792_s21  ;;  %v5986_v51 = vld [vmem:[#allocation3 + $0x2d0] sm:$0xff] }
 0x57b   : > { %v5591_v29 = vpop.permute.xlu0 %5590  ;;  %v5783_v36 = vpop.permute.xlu1 %5782 }
 0x57c   : > { %v4768_v17 = vpop.permute.xlu2 %4767  ;;  %5677 = vst.msk [vmem:[#allocation3 + $0x290] sm:$0xff] %vm5026_vm9, %v5591_v29  ;;  %v10503_v29 = vld [vmem:[#allocation2 + $0x128] sm:$0xff] }
 0x57d   : > { %5869 = vst.msk [vmem:[#allocation3 + $0x290] sm:$0xff] %vm5219_vm1, %v5783_v36  ;;  %6234 = vmatmul.f32.gmra.mxu2 %v5986_v51 }
 0x57e   : > { %4849 = vst.msk [vmem:[#allocation3 + $0x438] sm:$0xff] %vm4833_vm8, %v4768_v17 }
 0x57f   : > { %4666 = vst.msk [vmem:[#allocation3 + $0x708] sm:$0xff] %vm4576_vm15, %v10503_v29 }
 0x580   : > { %v6318_v22 = vpop.f32.mrf.mxu3 }
 0x581   : > { %v6319_v19 = vadd.f32 %v6318_v22, %v6206_v62  ;;  %5796 = vrot.lane.b32.xlu0 %v10333_v27, %s6794_s27  ;;  %5606 = vrot.lane.b32.xlu1 %v10370_v50, %s6792_s21  ;;  %v10522_v62 = vld [vmem:[#allocation2 + $0x138] sm:$0xff] }
 0x582   : > { %5604 = vrot.lane.b32.xlu2 %v10343_v34, %s6792_s21  ;;  %4667 = vst.msk [vmem:[#allocation3 + $0x750] sm:$0xff] %vm4576_vm15, %v10522_v62 }
 0x583   : > { %v6432_v9 = vadd.f32 %v10259_v37, %v6319_v19  ;;  %v5401_v44 = vpop.permute.xlu0 %5400  ;;  %v5403_v54 = vpop.permute.xlu1 %5402 }
 0x584   : > { %v4959_v8 = vpop.permute.xlu2 %4958  ;;  %5486 = vst.msk [vmem:[#allocation3 + $0x2d8] sm:$0xff] %vm4833_vm8, %v5401_v44  ;;  %v5984_v41 = vld [vmem:[#allocation3 + $0x290] sm:$0xff] }
 0x585   : > { %6527 = vst [vmem:[%s10432_s30] sm:$0xff] %v6432_v9  ;;  %6344 = vmatmul.f32.gmra.mxu3 %v5984_v41 }
 0x586   : > { %5487 = vst.msk [vmem:[#allocation3 + $0x320] sm:$0xff] %vm4833_vm8, %v5403_v54 }
 0x587   : > { %v6211_v34 = vpop.f32.mrf.mxu2 }
 0x588   : > { %v6212_v57 = vadd.f32 %v10415_v1, %v6211_v34 }
 0x589   : > { %v6321_v3 = vpop.f32.mrf.mxu3  ;;  %5161 = vrot.lane.b32.xlu0 %v10370_v50, %s6794_s27  ;;  %5418 = vrot.lane.b32.xlu1 %v10065_v53, %s6793_s22 }
 0x58a   : > { %4779 = vrot.lane.b32.xlu2 %v10388_v49, %s6793_s22  ;;  %v6322_v37 = vadd.f32 %v6321_v3, %v6209_v28 }
 0x58b   : > { %v5146_v27 = vpop.permute.xlu0 %5145  ;;  %v4766_v24 = vpop.permute.xlu1 %4765 }
 0x58c   : > { %v5595_v32 = vpop.permute.xlu2 %5594  ;;  %v6435_v35 = vadd.f32 %v10289_v47, %v6322_v37  ;;  %5231 = vst.msk [vmem:[#allocation3 + $0x318] sm:$0xff] %vm5219_vm1, %v5146_v27  ;;  %v10545_v27 = vld [vmem:[#allocation2 + $0x140] sm:$0xff] }
 0x58d   : > { %4848 = vst.msk [vmem:[#allocation3 + $0x3f0] sm:$0xff] %vm4833_vm8, %v4766_v24 }
 0x58e   : > { %6528 = vst [vmem:[%s10432_s30 + $0x8] sm:$0xff] %v6435_v35 }
 0x58f   : > { %5041 = vst.msk [vmem:[#allocation3 + $0x3f0] sm:$0xff] %vm5026_vm9, %v4959_v8 }
 0x590   : > { %5679 = vst.msk [vmem:[#allocation3 + $0x320] sm:$0xff] %vm5026_vm9, %v5595_v32  ;;  %v10548_v32 = vld [vmem:[#allocation2 + $0x141] sm:$0xff] }
 0x591   : > { %4972 = vrot.lane.b32.xlu0 %v10065_v53, %s6792_s21  ;;  %4970 = vrot.lane.b32.xlu1 %v10063_v7, %s6792_s21  ;;  %v6324_v47 = vpop.f32.mrf.mxu3  ;;  %v10471_v53 = vld [vmem:[#allocation2 + $0x120] sm:$0xff]  ;;  %4668 = vst.msk [vmem:[#allocation3 + $0x798] sm:$0xff] %vm4576_vm15, %v10545_v27 }
 0x592   : > { %5798 = vrot.lane.b32.xlu2 %v10388_v49, %s6794_s27  ;;  %v6325_v61 = vadd.f32 %v6324_v47, %v6212_v57  ;;  %4665 = vst.msk [vmem:[#allocation3 + $0x6c0] sm:$0xff] %vm4576_vm15, %v10471_v53 }
 0x593   : > { %v4961_v16 = vpop.permute.xlu0 %4960  ;;  %v5989_v13 = vld [vmem:[#allocation3 + $0x318] sm:$0xff]  ;;  %v5593_v48 = vpop.permute.xlu1 %5592  ;;  %5309 = vst.msk [vmem:[#allocation3 + $0x710] sm:$0xff] %vm4576_vm15, %v10548_v32 }
 0x594   : > { %v5405_v5 = vpop.permute.xlu2 %5404  ;;  %5042 = vst.msk [vmem:[#allocation3 + $0x438] sm:$0xff] %vm5026_vm9, %v4961_v16  ;;  %6237 = vmatmul.f32.gmra.mxu2 %v5989_v13  ;;  %v6438_v14 = vadd.f32 %v10310_v26, %v6325_v61  ;;  %v10568_v13 = vld [vmem:[#allocation2 + $0x150] sm:$0xff] }
 0x595   : > { %5678 = vst.msk [vmem:[#allocation3 + $0x2d8] sm:$0xff] %vm5026_vm9, %v5593_v48 }
 0x596   : > { %5870 = vst.msk [vmem:[#allocation3 + $0x2d8] sm:$0xff] %vm5219_vm1, %v10398_v60 }
 0x597   : > { %6529 = vst [vmem:[%s10432_s30 + $0x10] sm:$0xff] %v6438_v14 }
 0x598   : > { %5488 = vst.msk [vmem:[#allocation3 + $0x368] sm:$0xff] %vm4833_vm8, %v5405_v5  ;;  %v6214_v50 = vpop.f32.mrf.mxu2  ;;  %v10566_v5 = vld [vmem:[#allocation2 + $0x151] sm:$0xff] }
 0x599   : > { %4781 = vrot.lane.b32.xlu0 %v10406_v46, %s6793_s22  ;;  %5800 = vrot.lane.b32.xlu1 %v10406_v46, %s6794_s27  ;;  %v6215_v25 = vadd.f32 %v10415_v1, %v6214_v50  ;;  %4669 = vst.msk [vmem:[#allocation3 + $0x7e0] sm:$0xff] %vm4576_vm15, %v10568_v13  ;;  %v6449_v50 = vpop.f32.mrf.mxu0 }
 0x59a   : > { %5416 = vrot.lane.b32.xlu2 %v10063_v7, %s6793_s22  ;;  %5310 = vst.msk [vmem:[#allocation3 + $0x758] sm:$0xff] %vm4576_vm15, %v10566_v5 }
 0x59b   : > { %v5787_v26 = vpop.permute.xlu0 %5786  ;;  %v5148_v11 = vpop.permute.xlu1 %5147 }
 0x59c   : > { %v5150_v18 = vpop.permute.xlu2 %5149  ;;  %5871 = vst.msk [vmem:[#allocation3 + $0x320] sm:$0xff] %vm5219_vm1, %v5787_v26  ;;  %v10582_v26 = vld [vmem:[#allocation2 + $0x159] sm:$0xff] }
 0x59d   : > { %5232 = vst.msk [vmem:[#allocation3 + $0x360] sm:$0xff] %vm5219_vm1, %v5148_v11  ;;  %v5987_v12 = vld [vmem:[#allocation3 + $0x2d8] sm:$0xff] }
 0x59e   : > { %5233 = vst.msk [vmem:[#allocation3 + $0x3a8] sm:$0xff] %vm5219_vm1, %v5150_v18  ;;  %6347 = vmatmul.f32.gmra.mxu3 %v5987_v12  ;;  %v10584_v18 = vld [vmem:[#allocation2 + $0x158] sm:$0xff] }
 0x59f   : > { %5311 = vst.msk [vmem:[#allocation3 + $0x7a0] sm:$0xff] %vm4576_vm15, %v10582_v26 }
 0x5a0   : > { %4670 = vst.msk [vmem:[#allocation3 + $0x828] sm:$0xff] %vm4576_vm15, %v10584_v18 }
 0x5a1   : > { %5608 = vrot.lane.b32.xlu0 %v5526_v38, %s6792_s21  ;;  %4783 = vrot.lane.b32.xlu1 %v10425_v10, %s6793_s22 }
 0x5a2   : > { %5163 = vrot.lane.b32.xlu2 %v5526_v38, %s6794_s27 }
 0x5a3   : > { %v5407_v7 = vpop.permute.xlu0 %5406  ;;  %v5990_v63 = vld [vmem:[#allocation3 + $0x320] sm:$0xff]  ;;  %v5789_v31 = vpop.permute.xlu1 %5788 }
 0x5a4   : > { %v5791_v21 = vpop.permute.xlu2 %5790  ;;  %5489 = vst.msk [vmem:[#allocation3 + $0x3b0] sm:$0xff] %vm4833_vm8, %v5407_v7  ;;  %v5992_v40 = vld [vmem:[#allocation3 + $0x360] sm:$0xff] }
 0x5a5   : > { %6240 = vmatmul.f32.gmra.mxu2 %v5992_v40  ;;  %v5995_v15 = vld [vmem:[#allocation3 + $0x3a8] sm:$0xff] }
 0x5a6   : > { %6350 = vmatmul.f32.gmra.mxu3 %v5990_v63 }
 0x5a8   : > { %v6327_v49 = vpop.f32.mrf.mxu3 }
 0x5a9   : > { %v6328_v58 = vadd.f32 %v6327_v49, %v6215_v25  ;;  %5802 = vrot.lane.b32.xlu0 %v10425_v10, %s6794_s27  ;;  %5165 = vrot.lane.b32.xlu1 %v5080_v52, %s6794_s27  ;;  %v6217_v10 = vpop.f32.mrf.mxu2 }
 0x5aa   : > { %5610 = vrot.lane.b32.xlu2 %v5080_v52, %s6792_s21 }
 0x5ab   : > { %v6441_v60 = vadd.f32 %v10339_v6, %v6328_v58  ;;  %v4770_v39 = vpop.permute.xlu0 %4769  ;;  %v4772_v46 = vpop.permute.xlu1 %4771  ;;  %v10512_v6 = vld [vmem:[#allocation2 + $0x139] sm:$0xff] }
 0x5ac   : > { %v5411_v0 = vpop.permute.xlu2 %5410  ;;  %4850 = vst.msk [vmem:[#allocation3 + $0x480] sm:$0xff] %vm4833_vm8, %v4770_v39 }
 0x5ad   : > { %6530 = vst [vmem:[%s10432_s30 + $0x18] sm:$0xff] %v6441_v60  ;;  %6243 = vmatmul.f32.gmra.mxu2 %v5995_v15 }
 0x5ae   : > { %4851 = vst.msk [vmem:[#allocation3 + $0x4c8] sm:$0xff] %vm4833_vm8, %v4772_v46  ;;  %v10621_v46 = vld [vmem:[#allocation2 + $0x170] sm:$0xff] }
 0x5af   : > { %5491 = vst.msk [vmem:[#allocation3 + $0x440] sm:$0xff] %vm4833_vm8, %v5411_v0  ;;  %v10619_v0 = vld [vmem:[#allocation2 + $0x171] sm:$0xff] }
 0x5b0   : > { %5308 = vst.msk [vmem:[#allocation3 + $0x6c8] sm:$0xff] %vm4576_vm15, %v10512_v6 }
 0x5b1   : > { %5420 = vrot.lane.b32.xlu0 %v10118_v30, %s6793_s22  ;;  %4976 = vrot.lane.b32.xlu1 %v10120_v23, %s6792_s21  ;;  %4672 = vst.msk [vmem:[#allocation3 + $0x8b8] sm:$0xff] %vm4576_vm15, %v10621_v46 }
 0x5b2   : > { %5422 = vrot.lane.b32.xlu2 %v10120_v23, %s6793_s22  ;;  %5313 = vst.msk [vmem:[#allocation3 + $0x830] sm:$0xff] %vm4576_vm15, %v10619_v0 }
 0x5b3   : > { %v5597_v17 = vpop.permute.xlu0 %5596  ;;  %v5599_v51 = vpop.permute.xlu1 %5598 }
 0x5b4   : > { %v4963_v36 = vpop.permute.xlu2 %4962  ;;  %5680 = vst.msk [vmem:[#allocation3 + $0x368] sm:$0xff] %vm5026_vm9, %v5597_v17 }
 0x5b5   : > { %5681 = vst.msk [vmem:[#allocation3 + $0x3b0] sm:$0xff] %vm5026_vm9, %v5599_v51 }
 0x5b6   : > { %5873 = vst.msk [vmem:[#allocation3 + $0x3b0] sm:$0xff] %vm5219_vm1, %v5791_v21 }
 0x5b7   : > { %5872 = vst.msk [vmem:[#allocation3 + $0x368] sm:$0xff] %vm5219_vm1, %v5789_v31  ;;  %v6220_v3 = vpop.f32.mrf.mxu2 }
 0x5b8   : > { %5043 = vst.msk [vmem:[#allocation3 + $0x480] sm:$0xff] %vm5026_vm9, %v4963_v36  ;;  %v6221_v35 = vadd.f32 %v10415_v1, %v6220_v3 }
 0x5b9   : > { %5167 = vrot.lane.b32.xlu0 %v10471_v53, %s6794_s27  ;;  %5612 = vrot.lane.b32.xlu1 %v10471_v53, %s6792_s21 }
 0x5ba   : > { %4974 = vrot.lane.b32.xlu2 %v10118_v30, %s6792_s21  ;;  %v6218_v30 = vadd.f32 %v10415_v1, %v6217_v10 }
 0x5bb   : > { %v5152_v23 = vpop.permute.xlu0 %5151  ;;  %v5409_v19 = vpop.permute.xlu1 %5408 }
 0x5bc   : > { %v4774_v22 = vpop.permute.xlu2 %4773  ;;  %5234 = vst.msk [vmem:[#allocation3 + $0x3f0] sm:$0xff] %vm5219_vm1, %v5152_v23 }
 0x5bd   : > { %5490 = vst.msk [vmem:[#allocation3 + $0x3f8] sm:$0xff] %vm4833_vm8, %v5409_v19  ;;  %v5996_v37 = vld [vmem:[#allocation3 + $0x3b0] sm:$0xff] }
 0x5be   : > { %4852 = vst.msk [vmem:[#allocation3 + $0x510] sm:$0xff] %vm4833_vm8, %v4774_v22  ;;  %v5993_v38 = vld [vmem:[#allocation3 + $0x368] sm:$0xff]  ;;  %v10637_v19 = vld [vmem:[#allocation2 + $0x181] sm:$0xff] }
 0x5bf   : > { %6353 = vmatmul.f32.gmra.mxu3 %v5993_v38  ;;  %5314 = vst.msk [vmem:[#allocation3 + $0x878] sm:$0xff] %vm4576_vm15, %v10637_v19 }
 0x5c1   : > { %v6330_v9 = vpop.f32.mrf.mxu3  ;;  %4787 = vrot.lane.b32.xlu0 %v5721_v43, %s6793_s22  ;;  %5806 = vrot.lane.b32.xlu1 %v5721_v43, %s6794_s27 }
 0x5c2   : > { %4785 = vrot.lane.b32.xlu2 %v10489_v20, %s6793_s22  ;;  %v6331_v44 = vadd.f32 %v6330_v9, %v6218_v30 }
 0x5c3   : > { %v5793_v8 = vpop.permute.xlu0 %5792  ;;  %v5998_v41 = vld [vmem:[#allocation3 + $0x3f0] sm:$0xff]  ;;  %v5154_v28 = vpop.permute.xlu1 %5153 }
 0x5c4   : > { %v5601_v54 = vpop.permute.xlu2 %5600  ;;  %v6444_v59 = vadd.f32 %v10360_v42, %v6331_v44  ;;  %6246 = vmatmul.f32.gmra.mxu2 %v5998_v41  ;;  %5235 = vst.msk [vmem:[#allocation3 + $0x438] sm:$0xff] %vm5219_vm1, %v5154_v28 }
 0x5c5   : > { %5682 = vst.msk [vmem:[#allocation3 + $0x3f8] sm:$0xff] %vm5026_vm9, %v5601_v54 }
 0x5c6   : > { %6531 = vst [vmem:[%s10432_s30 + $0x20] sm:$0xff] %v6444_v59 }
 0x5c7   : > { %5874 = vst.msk [vmem:[#allocation3 + $0x3f8] sm:$0xff] %vm5219_vm1, %v5793_v8  ;;  %6356 = vmatmul.f32.gmra.mxu3 %v5996_v37 }
 0x5c8   : > { %v6223_v11 = vpop.f32.mrf.mxu2 }
 0x5c9   : > { %v6333_v42 = vpop.f32.mrf.mxu3  ;;  %5614 = vrot.lane.b32.xlu0 %v10503_v29, %s6792_s21  ;;  %5424 = vrot.lane.b32.xlu1 %v10168_v33, %s6793_s22  ;;  %v6224_v31 = vadd.f32 %v10415_v1, %v6223_v11 }
 0x5ca   : > { %5804 = vrot.lane.b32.xlu2 %v10489_v20, %s6794_s27  ;;  %v6334_v24 = vadd.f32 %v6333_v42, %v6221_v35 }
 0x5cb   : > { %v5156_v34 = vpop.permute.xlu0 %5155  ;;  %v4965_v47 = vpop.permute.xlu1 %4964  ;;  %v6001_v61 = vld [vmem:[#allocation3 + $0x438] sm:$0xff] }
 0x5cc   : > { %v5158_v52 = vpop.permute.xlu2 %5157  ;;  %v6447_v57 = vadd.f32 %v10380_v4, %v6334_v24  ;;  %5236 = vst.msk [vmem:[#allocation3 + $0x480] sm:$0xff] %vm5219_vm1, %v5156_v34  ;;  %6249 = vmatmul.f32.gmra.mxu2 %v6001_v61 }
 0x5cd   : > { %5044 = vst.msk [vmem:[#allocation3 + $0x4c8] sm:$0xff] %vm5026_vm9, %v4965_v47 }
 0x5ce   : > { %6532 = vst [vmem:[%s10432_s30 + $0x28] sm:$0xff] %v6447_v57  ;;  %v5999_v16 = vld [vmem:[#allocation3 + $0x3f8] sm:$0xff] }
 0x5cf   : > { %5237 = vst.msk [vmem:[#allocation3 + $0x4c8] sm:$0xff] %vm5219_vm1, %v5158_v52  ;;  %6359 = vmatmul.f32.gmra.mxu3 %v5999_v16 }
 0x5d0   : > { %v6226_v60 = vpop.f32.mrf.mxu2 }
 0x5d1   : > { %5426 = vrot.lane.b32.xlu0 %v10170_v55, %s6793_s22  ;;  %4789 = vrot.lane.b32.xlu1 %v10512_v6, %s6793_s22  ;;  %v6227_v15 = vadd.f32 %v10415_v1, %v6226_v60 }
 0x5d2   : > { %5169 = vrot.lane.b32.xlu2 %v10503_v29, %s6794_s27 }
 0x5d3   : > { %v4776_v4 = vpop.permute.xlu0 %4775  ;;  %v6004_v14 = vld [vmem:[#allocation3 + $0x480] sm:$0xff]  ;;  %v5795_v53 = vpop.permute.xlu1 %5794 }
 0x5d4   : > { %v4969_v48 = vpop.permute.xlu2 %4968  ;;  %4853 = vst.msk [vmem:[#allocation3 + $0x558] sm:$0xff] %vm4833_vm8, %v4776_v4  ;;  %6252 = vmatmul.f32.gmra.mxu2 %v6004_v14 }
 0x5d5   : > { %5046 = vst.msk [vmem:[#allocation3 + $0x558] sm:$0xff] %vm5026_vm9, %v4969_v48 }
 0x5d6   : > { %v6007_v63 = vld [vmem:[#allocation3 + $0x4c8] sm:$0xff] }
 0x5d9   : > { %4978 = vrot.lane.b32.xlu0 %v10168_v33, %s6792_s21  ;;  %5171 = vrot.lane.b32.xlu1 %v10522_v62, %s6794_s27  ;;  %v10600_v33 = vld [vmem:[#allocation2 + $0x168] sm:$0xff] }
 0x5da   : > { %4980 = vrot.lane.b32.xlu2 %v10170_v55, %s6792_s21  ;;  %v10602_v55 = vld [vmem:[#allocation2 + $0x169] sm:$0xff]  ;;  %4671 = vst.msk [vmem:[#allocation3 + $0x870] sm:$0xff] %vm4576_vm15, %v10600_v33 }
 0x5db   : > { %v5603_v12 = vpop.permute.xlu0 %5602  ;;  %v5413_v21 = vpop.permute.xlu1 %5412  ;;  %5312 = vst.msk [vmem:[#allocation3 + $0x7e8] sm:$0xff] %vm4576_vm15, %v10602_v55 }
 0x5dc   : > { %v5605_v7 = vpop.permute.xlu2 %5604  ;;  %5683 = vst.msk [vmem:[#allocation3 + $0x440] sm:$0xff] %vm5026_vm9, %v5603_v12  ;;  %6255 = vmatmul.f32.gmra.mxu2 %v6007_v63 }
 0x5dd   : > { %5492 = vst.msk [vmem:[#allocation3 + $0x488] sm:$0xff] %vm4833_vm8, %v5413_v21 }
 0x5de   : > { %5875 = vst.msk [vmem:[#allocation3 + $0x440] sm:$0xff] %vm5219_vm1, %v5795_v53  ;;  %v5342_v53 = vld [vmem:[#allocation2 + $0x152] sm:$0xff] }
 0x5df   : > { %5684 = vst.msk [vmem:[#allocation3 + $0x488] sm:$0xff] %vm5026_vm9, %v5605_v7 }
 0x5e1   : > { %v6336_v40 = vpop.f32.mrf.mxu3  ;;  %5808 = vrot.lane.b32.xlu0 %v10512_v6, %s6794_s27  ;;  %5618 = vrot.lane.b32.xlu1 %v10545_v27, %s6792_s21  ;;  %v6452_v6 = vpop.f32.mrf.mxu0 }
 0x5e2   : > { %5616 = vrot.lane.b32.xlu2 %v10522_v62, %s6792_s21  ;;  %v6337_v43 = vadd.f32 %v6336_v40, %v6224_v31 }
 0x5e3   : > { %v5415_v20 = vpop.permute.xlu0 %5414  ;;  %v4778_v58 = vpop.permute.xlu1 %4777 }
 0x5e4   : > { %v4780_v25 = vpop.permute.xlu2 %4779  ;;  %v6450_v49 = vadd.f32 %v6449_v50, %v6337_v43  ;;  %5493 = vst.msk [vmem:[#allocation3 + $0x4d0] sm:$0xff] %vm4833_vm8, %v5415_v20 }
 0x5e5   : > { %4854 = vst.msk [vmem:[#allocation3 + $0x5a0] sm:$0xff] %vm4833_vm8, %v4778_v58  ;;  %v6002_v39 = vld [vmem:[#allocation3 + $0x440] sm:$0xff] }
 0x5e6   : > { %6533 = vst [vmem:[%s10432_s30 + $0x30] sm:$0xff] %v6450_v49  ;;  %6362 = vmatmul.f32.gmra.mxu3 %v6002_v39 }
 0x5e7   : > { %4855 = vst.msk [vmem:[#allocation3 + $0x5e8] sm:$0xff] %vm4833_vm8, %v4780_v25  ;;  %v6229_v22 = vpop.f32.mrf.mxu2 }
 0x5e8   : > { %v6230_v10 = vadd.f32 %v10415_v1, %v6229_v22 }
 0x5e9   : > { %v6339_v29 = vpop.f32.mrf.mxu3  ;;  %5173 = vrot.lane.b32.xlu0 %v10545_v27, %s6794_s27  ;;  %5430 = vrot.lane.b32.xlu1 %v10219_v56, %s6793_s22  ;;  %v6455_v8 = vpop.f32.mrf.mxu0 }
 0x5ea   : > { %4791 = vrot.lane.b32.xlu2 %v10548_v32, %s6793_s22  ;;  %v6340_v17 = vadd.f32 %v6339_v29, %v6227_v15 }
 0x5eb   : > { %v4967_v36 = vpop.permute.xlu0 %4966  ;;  %v5160_v23 = vpop.permute.xlu1 %5159 }
 0x5ec   : > { %v5799_v51 = vpop.permute.xlu2 %5798  ;;  %v6453_v62 = vadd.f32 %v6452_v6, %v6340_v17  ;;  %5045 = vst.msk [vmem:[#allocation3 + $0x510] sm:$0xff] %vm5026_vm9, %v4967_v36  ;;  %v5344_v17 = vld [vmem:[#allocation2 + $0x16a] sm:$0xff] }
 0x5ed   : > { %5238 = vst.msk [vmem:[#allocation3 + $0x510] sm:$0xff] %vm5219_vm1, %v5160_v23 }
 0x5ee   : > { %6534 = vst [vmem:[%s10432_s30 + $0x38] sm:$0xff] %v6453_v62 }
 0x5f1   : > { %4984 = vrot.lane.b32.xlu0 %v10219_v56, %s6792_s21  ;;  %4982 = vrot.lane.b32.xlu1 %v10217_v2, %s6792_s21  ;;  %v6342_v38 = vpop.f32.mrf.mxu3  ;;  %v10652_v56 = vld [vmem:[#allocation2 + $0x189] sm:$0xff]  ;;  %v5340_v2 = vld [vmem:[#allocation2 + $0x13a] sm:$0xff]  ;;  %v6458_v16 = vpop.f32.mrf.mxu0 }
 0x5f2   : > { %5810 = vrot.lane.b32.xlu2 %v10548_v32, %s6794_s27  ;;  %v6343_v30 = vadd.f32 %v6342_v38, %v6230_v10  ;;  %5315 = vst.msk [vmem:[#allocation3 + $0x8c0] sm:$0xff] %vm4576_vm15, %v10652_v56  ;;  %v10721_v10 = vld [vmem:[#allocation2 + $0x172] sm:$0xff] }
 0x5f3   : > { %v5797_v9 = vpop.permute.xlu0 %5796  ;;  %v5607_v54 = vpop.permute.xlu1 %5606 }
 0x5f4   : > { %v5417_v44 = vpop.permute.xlu2 %5416  ;;  %5876 = vst.msk [vmem:[#allocation3 + $0x488] sm:$0xff] %vm5219_vm1, %v5797_v9  ;;  %v6010_v41 = vld [vmem:[#allocation3 + $0x510] sm:$0xff]  ;;  %v6456_v59 = vadd.f32 %v6455_v8, %v6343_v30 }
 0x5f5   : > { %5685 = vst.msk [vmem:[#allocation3 + $0x4d0] sm:$0xff] %vm5026_vm9, %v5607_v54  ;;  %6258 = vmatmul.f32.gmra.mxu2 %v6010_v41  ;;  %v5537_v54 = vld [vmem:[#allocation2 + $0x188] sm:$0xff] }
 0x5f6   : > { %5877 = vst.msk [vmem:[#allocation3 + $0x4d0] sm:$0xff] %vm5219_vm1, %v5799_v51 }
 0x5f7   : > { %6535 = vst [vmem:[%s10432_s30 + $0x40] sm:$0xff] %v6456_v59 }
 0x5f8   : > { %5494 = vst.msk [vmem:[#allocation3 + $0x518] sm:$0xff] %vm4833_vm8, %v5417_v44  ;;  %v6232_v34 = vpop.f32.mrf.mxu2 }
 0x5f9   : > { %4793 = vrot.lane.b32.xlu0 %v10566_v5, %s6793_s22  ;;  %5812 = vrot.lane.b32.xlu1 %v10566_v5, %s6794_s27  ;;  %v6233_v57 = vadd.f32 %v10415_v1, %v6232_v34  ;;  %v6461_v31 = vpop.f32.mrf.mxu0 }
 0x5fa   : > { %5428 = vrot.lane.b32.xlu2 %v5340_v2, %s6793_s22 }
 0x5fb   : > { %v5162_v28 = vpop.permute.xlu0 %5161  ;;  %v6005_v37 = vld [vmem:[#allocation3 + $0x488] sm:$0xff]  ;;  %v5419_v27 = vpop.permute.xlu1 %5418 }
 0x5fc   : > { %v5164_v3 = vpop.permute.xlu2 %5163  ;;  %5239 = vst.msk [vmem:[#allocation3 + $0x558] sm:$0xff] %vm5219_vm1, %v5162_v28  ;;  %6365 = vmatmul.f32.gmra.mxu3 %v6005_v37 }
 0x5fd   : > { %5495 = vst.msk [vmem:[#allocation3 + $0x560] sm:$0xff] %vm4833_vm8, %v5419_v27  ;;  %v6008_v24 = vld [vmem:[#allocation3 + $0x4d0] sm:$0xff] }
 0x600   : > { %v6235_v63 = vpop.f32.mrf.mxu2 }
 0x601   : > { %5620 = vrot.lane.b32.xlu0 %v10568_v13, %s6792_s21  ;;  %4795 = vrot.lane.b32.xlu1 %v10582_v26, %s6793_s22  ;;  %v6236_v40 = vadd.f32 %v10415_v1, %v6235_v63 }
 0x602   : > { %5175 = vrot.lane.b32.xlu2 %v10568_v13, %s6794_s27 }
 0x603   : > { %v4973_v32 = vpop.permute.xlu0 %4972  ;;  %v6013_v42 = vld [vmem:[#allocation3 + $0x558] sm:$0xff]  ;;  %v4971_v52 = vpop.permute.xlu1 %4970 }
 0x604   : > { %v5611_v35 = vpop.permute.xlu2 %5610  ;;  %5048 = vst.msk [vmem:[#allocation3 + $0x5e8] sm:$0xff] %vm5026_vm9, %v4973_v32  ;;  %6261 = vmatmul.f32.gmra.mxu2 %v6013_v42  ;;  %6368 = vmatmul.f32.gmra.mxu3 %v6008_v24 }
 0x605   : > { %5047 = vst.msk [vmem:[#allocation3 + $0x5a0] sm:$0xff] %vm5026_vm9, %v4971_v52 }
 0x606   : > { %5240 = vst.msk [vmem:[#allocation3 + $0x5a0] sm:$0xff] %vm5219_vm1, %v5164_v3  ;;  %v5730_v3 = vld [vmem:[#allocation2 + $0x199] sm:$0xff] }
 0x607   : > { %5687 = vst.msk [vmem:[#allocation3 + $0x560] sm:$0xff] %vm5026_vm9, %v5611_v35 }
 0x608   : > { %v6345_v47 = vpop.f32.mrf.mxu3 }
 0x609   : > { %v6346_v61 = vadd.f32 %v6345_v47, %v6233_v57  ;;  %5814 = vrot.lane.b32.xlu0 %v10582_v26, %s6794_s27  ;;  %5177 = vrot.lane.b32.xlu1 %v10584_v18, %s6794_s27  ;;  %v5343_v26 = vld [vmem:[#allocation2 + $0x15a] sm:$0xff] }
 0x60a   : > { %5622 = vrot.lane.b32.xlu2 %v10584_v18, %s6792_s21 }
 0x60b   : > { %v6459_v5 = vadd.f32 %v6458_v16, %v6346_v61  ;;  %v4782_v13 = vpop.permute.xlu0 %4781  ;;  %v5801_v48 = vpop.permute.xlu1 %5800  ;;  %v5347_v61 = vld [vmem:[#allocation2 + $0x18a] sm:$0xff]  ;;  %v6781_v16 = vld [vmem:[#allocation2] sm:$0xff] }
 0x60c   : > { %v5423_v4 = vpop.permute.xlu2 %5422  ;;  %4856 = vst.msk [vmem:[#allocation3 + $0x630] sm:$0xff] %vm4833_vm8, %v4782_v13 }
 0x60d   : > { %6536 = vst [vmem:[%s10432_s30 + $0x48] sm:$0xff] %v6459_v5  ;;  %v6016_v14 = vld [vmem:[#allocation3 + $0x5a0] sm:$0xff] }
 0x60e   : > { %5497 = vst.msk [vmem:[#allocation3 + $0x5f0] sm:$0xff] %vm4833_vm8, %v5423_v4  ;;  %6264 = vmatmul.f32.gmra.mxu2 %v6016_v14 }
 0x611   : > { %5432 = vrot.lane.b32.xlu0 %v5342_v53, %s6793_s22  ;;  %4988 = vrot.lane.b32.xlu1 %v10264_v45, %s6792_s21 }
 0x612   : > { %5434 = vrot.lane.b32.xlu2 %v5343_v26, %s6793_s22 }
 0x613   : > { %v5609_v18 = vpop.permute.xlu0 %5608  ;;  %v4784_v12 = vpop.permute.xlu1 %4783 }
 0x614   : > { %v4975_v11 = vpop.permute.xlu2 %4974  ;;  %5686 = vst.msk [vmem:[#allocation3 + $0x518] sm:$0xff] %vm5026_vm9, %v5609_v18 }
 0x615   : > { %4857 = vst.msk [vmem:[#allocation3 + $0x678] sm:$0xff] %vm4833_vm8, %v4784_v12 }
 0x616   : > { %5878 = vst.msk [vmem:[#allocation3 + $0x518] sm:$0xff] %vm5219_vm1, %v5801_v48 }
 0x617   : > { %5049 = vst.msk [vmem:[#allocation3 + $0x630] sm:$0xff] %vm5026_vm9, %v4975_v11  ;;  %v6238_v15 = vpop.f32.mrf.mxu2 }
 0x618   : > { %v6239_v29 = vadd.f32 %v10415_v1, %v6238_v15 }
 0x619   : > { %5179 = vrot.lane.b32.xlu0 %v10600_v33, %s6794_s27  ;;  %5624 = vrot.lane.b32.xlu1 %v10600_v33, %s6792_s21 }
 0x61a   : > { %4986 = vrot.lane.b32.xlu2 %v5342_v53, %s6792_s21 }
 0x61b   : > { %v5803_v45 = vpop.permute.xlu0 %5802  ;;  %v5166_v21 = vpop.permute.xlu1 %5165 }
 0x61c   : > { %v4786_v7 = vpop.permute.xlu2 %4785  ;;  %5879 = vst.msk [vmem:[#allocation3 + $0x560] sm:$0xff] %vm5219_vm1, %v5803_v45 }
 0x61d   : > { %5241 = vst.msk [vmem:[#allocation3 + $0x5e8] sm:$0xff] %vm5219_vm1, %v5166_v21  ;;  %v6011_v50 = vld [vmem:[#allocation3 + $0x518] sm:$0xff] }
 0x61e   : > { %4858 = vst.msk [vmem:[#allocation3 + $0x6c0] sm:$0xff] %vm4833_vm8, %v4786_v7  ;;  %6371 = vmatmul.f32.gmra.mxu3 %v6011_v50 }
 0x621   : > { %v6348_v43 = vpop.f32.mrf.mxu3  ;;  %4799 = vrot.lane.b32.xlu0 %v10619_v0, %s6793_s22  ;;  %5818 = vrot.lane.b32.xlu1 %v10619_v0, %s6794_s27  ;;  %v6464_v0 = vpop.f32.mrf.mxu0 }
 0x622   : > { %4797 = vrot.lane.b32.xlu2 %v10602_v55, %s6793_s22  ;;  %v6349_v33 = vadd.f32 %v6348_v43, %v6236_v40  ;;  %v5731_v43 = vld [vmem:[#allocation2 + $0x1a1] sm:$0xff] }
 0x623   : > { %v5421_v20 = vpop.permute.xlu0 %5420  ;;  %v6014_v49 = vld [vmem:[#allocation3 + $0x560] sm:$0xff]  ;;  %v4977_v60 = vpop.permute.xlu1 %4976 }
 0x624   : > { %v5805_v25 = vpop.permute.xlu2 %5804  ;;  %v6462_v58 = vadd.f32 %v6461_v31, %v6349_v33  ;;  %5496 = vst.msk [vmem:[#allocation3 + $0x5a8] sm:$0xff] %vm4833_vm8, %v5421_v20  ;;  %v6019_v39 = vld [vmem:[#allocation3 + $0x5e8] sm:$0xff] }
 0x625   : > { %5050 = vst.msk [vmem:[#allocation3 + $0x678] sm:$0xff] %vm5026_vm9, %v4977_v60  ;;  %6267 = vmatmul.f32.gmra.mxu2 %v6019_v39 }
 0x626   : > { %6537 = vst [vmem:[%s10432_s30 + $0x50] sm:$0xff] %v6462_v58  ;;  %6374 = vmatmul.f32.gmra.mxu3 %v6014_v49 }
 0x628   : > { %v6241_v2 = vpop.f32.mrf.mxu2 }
 0x629   : > { %v6351_v6 = vpop.f32.mrf.mxu3  ;;  %5626 = vrot.lane.b32.xlu0 %v10621_v46, %s6792_s21  ;;  %5436 = vrot.lane.b32.xlu1 %v5344_v17, %s6793_s22  ;;  %v6467_v37 = vpop.f32.mrf.mxu0  ;;  %v6242_v27 = vadd.f32 %v10415_v1, %v6241_v2 }
 0x62a   : > { %5816 = vrot.lane.b32.xlu2 %v10602_v55, %s6794_s27  ;;  %v6352_v36 = vadd.f32 %v6351_v6, %v6239_v29  ;;  %v5089_v55 = vld [vmem:[#allocation2 + $0x180] sm:$0xff] }
 0x62b   : > { %v5168_v51 = vpop.permute.xlu0 %5167  ;;  %v5613_v22 = vpop.permute.xlu1 %5612 }
 0x62c   : > { %v5170_v62 = vpop.permute.xlu2 %5169  ;;  %v6465_v23 = vadd.f32 %v6464_v0, %v6352_v36  ;;  %5242 = vst.msk [vmem:[#allocation3 + $0x630] sm:$0xff] %vm5219_vm1, %v5168_v51 }
 0x62d   : > { %5688 = vst.msk [vmem:[#allocation3 + $0x5a8] sm:$0xff] %vm5026_vm9, %v5613_v22 }
 0x62e   : > { %6538 = vst [vmem:[%s10432_s30 + $0x58] sm:$0xff] %v6465_v23 }
 0x62f   : > { %5880 = vst.msk [vmem:[#allocation3 + $0x5a8] sm:$0xff] %vm5219_vm1, %v5805_v25 }
 0x630   : > { %5243 = vst.msk [vmem:[#allocation3 + $0x678] sm:$0xff] %vm5219_vm1, %v5170_v62  ;;  %v6244_v47 = vpop.f32.mrf.mxu2 }
 0x631   : > { %5438 = vrot.lane.b32.xlu0 %v10721_v10, %s6793_s22  ;;  %5183 = vrot.lane.b32.xlu1 %v5089_v55, %s6794_s27  ;;  %v6470_v5 = vpop.f32.mrf.mxu0 }
 0x632   : > { %5181 = vrot.lane.b32.xlu2 %v10621_v46, %s6794_s27 }
 0x633   : > { %v4788_v38 = vpop.permute.xlu0 %4787  ;;  %v6022_v9 = vld [vmem:[#allocation3 + $0x630] sm:$0xff]  ;;  %v5807_v44 = vpop.permute.xlu1 %5806 }
 0x634   : > { %v4981_v30 = vpop.permute.xlu2 %4980  ;;  %4859 = vst.msk [vmem:[#allocation3 + $0x708] sm:$0xff] %vm4833_vm8, %v4788_v38  ;;  %6270 = vmatmul.f32.gmra.mxu2 %v6022_v9 }
 0x635   : > { %5052 = vst.msk [vmem:[#allocation3 + $0x708] sm:$0xff] %vm5026_vm9, %v4981_v30 }
 0x636   : > { %v6017_v8 = vld [vmem:[#allocation3 + $0x5a8] sm:$0xff] }
 0x637   : > { %6377 = vmatmul.f32.gmra.mxu3 %v6017_v8  ;;  %v6025_v59 = vld [vmem:[#allocation3 + $0x678] sm:$0xff] }
 0x639   : > { %4990 = vrot.lane.b32.xlu0 %v5344_v17, %s6792_s21  ;;  %5630 = vrot.lane.b32.xlu1 %v5537_v54, %s6792_s21  ;;  %v6473_v63 = vpop.f32.mrf.mxu0 }
 0x63a   : > { %5628 = vrot.lane.b32.xlu2 %v5089_v55, %s6792_s21 }
 0x63b   : > { %v5615_v46 = vpop.permute.xlu0 %5614  ;;  %v5425_v28 = vpop.permute.xlu1 %5424 }
 0x63c   : > { %v5617_v41 = vpop.permute.xlu2 %5616  ;;  %5689 = vst.msk [vmem:[#allocation3 + $0x5f0] sm:$0xff] %vm5026_vm9, %v5615_v46  ;;  %6273 = vmatmul.f32.gmra.mxu2 %v6025_v59 }
 0x63d   : > { %5498 = vst.msk [vmem:[#allocation3 + $0x638] sm:$0xff] %vm4833_vm8, %v5425_v28 }
 0x63e   : > { %5881 = vst.msk [vmem:[#allocation3 + $0x5f0] sm:$0xff] %vm5219_vm1, %v5807_v44 }
 0x63f   : > { %5690 = vst.msk [vmem:[#allocation3 + $0x638] sm:$0xff] %vm5026_vm9, %v5617_v41 }
 0x641   : > { %5820 = vrot.lane.b32.xlu0 %v10637_v19, %s6794_s27  ;;  %5824 = vrot.lane.b32.xlu1 %v5730_v3, %s6794_s27  ;;  %v5346_v19 = vld [vmem:[#allocation2 + $0x182] sm:$0xff]  ;;  %v6476_v36 = vpop.f32.mrf.mxu0 }
 0x642   : > { %5822 = vrot.lane.b32.xlu2 %v10652_v56, %s6794_s27  ;;  %v6354_v32 = vpop.f32.mrf.mxu3  ;;  %v6245_v56 = vadd.f32 %v10415_v1, %v6244_v47 }
 0x643   : > { %v6355_v35 = vadd.f32 %v6354_v32, %v6242_v27  ;;  %v5427_v42 = vpop.permute.xlu0 %5426  ;;  %v4790_v34 = vpop.permute.xlu1 %4789 }
 0x644   : > { %v4792_v24 = vpop.permute.xlu2 %4791  ;;  %5499 = vst.msk [vmem:[#allocation3 + $0x680] sm:$0xff] %vm4833_vm8, %v5427_v42 }
 0x645   : > { %v6468_v52 = vadd.f32 %v6467_v37, %v6355_v35  ;;  %4860 = vst.msk [vmem:[#allocation3 + $0x750] sm:$0xff] %vm4833_vm8, %v4790_v34  ;;  %v6020_v57 = vld [vmem:[#allocation3 + $0x5f0] sm:$0xff] }
 0x646   : > { %4861 = vst.msk [vmem:[#allocation3 + $0x798] sm:$0xff] %vm4833_vm8, %v4792_v24  ;;  %6380 = vmatmul.f32.gmra.mxu3 %v6020_v57 }
 0x647   : > { %6539 = vst [vmem:[%s10432_s30 + $0x60] sm:$0xff] %v6468_v52  ;;  %v6247_v18 = vpop.f32.mrf.mxu2 }
 0x648   : > { %v6248_v11 = vadd.f32 %v10415_v1, %v6247_v18 }
 0x649   : > { %5632 = vrot.lane.b32.xlu0 %v6781_v16, %s6792_s21  ;;  %5442 = vrot.lane.b32.xlu1 %v5347_v61, %s6793_s22  ;;  %v6479_v2 = vpop.f32.mrf.mxu0 }
 0x64a   : > { %5440 = vrot.lane.b32.xlu2 %v5346_v19, %s6793_s22  ;;  %v6357_v13 = vpop.f32.mrf.mxu3 }
 0x64b   : > { %v6358_v4 = vadd.f32 %v6357_v13, %v6245_v56  ;;  %v4979_v48 = vpop.permute.xlu0 %4978  ;;  %v5172_v53 = vpop.permute.xlu1 %5171 }
 0x64c   : > { %v5811_v14 = vpop.permute.xlu2 %5810  ;;  %5051 = vst.msk [vmem:[#allocation3 + $0x6c0] sm:$0xff] %vm5026_vm9, %v4979_v48 }
 0x64d   : > { %v6471_v26 = vadd.f32 %v6470_v5, %v6358_v4  ;;  %5244 = vst.msk [vmem:[#allocation3 + $0x6c0] sm:$0xff] %vm5219_vm1, %v5172_v53 }
 0x64f   : > { %6540 = vst [vmem:[%s10432_s30 + $0x68] sm:$0xff] %v6471_v26  ;;  %v6250_v6 = vpop.f32.mrf.mxu2 }
 0x650   : > { %v6251_v17 = vadd.f32 %v10415_v1, %v6250_v6 }
 0x651   : > { %5185 = vrot.lane.b32.xlu0 %v5537_v54, %s6794_s27  ;;  %v6482_v19 = vpop.f32.mrf.mxu0 }
 0x652   : > { %4992 = vrot.lane.b32.xlu2 %v10721_v10, %s6792_s21  ;;  %v6360_v12 = vpop.f32.mrf.mxu3 }
 0x653   : > { %v6361_v45 = vadd.f32 %v6360_v12, %v6248_v11  ;;  %v5809_v7 = vpop.permute.xlu0 %5808  ;;  %v5619_v50 = vpop.permute.xlu1 %5618 }
 0x654   : > { %v5429_v21 = vpop.permute.xlu2 %5428  ;;  %5882 = vst.msk [vmem:[#allocation3 + $0x638] sm:$0xff] %vm5219_vm1, %v5809_v7  ;;  %v6028_v31 = vld [vmem:[#allocation3 + $0x6c0] sm:$0xff] }
 0x655   : > { %v6474_v40 = vadd.f32 %v6473_v63, %v6361_v45  ;;  %5691 = vst.msk [vmem:[#allocation3 + $0x680] sm:$0xff] %vm5026_vm9, %v5619_v50  ;;  %6276 = vmatmul.f32.gmra.mxu2 %v6028_v31 }
 0x656   : > { %5883 = vst.msk [vmem:[#allocation3 + $0x680] sm:$0xff] %vm5219_vm1, %v5811_v14 }
 0x657   : > { %6541 = vst [vmem:[%s10432_s30 + $0x70] sm:$0xff] %v6474_v40  ;;  %v6253_v44 = vpop.f32.mrf.mxu2 }
 0x658   : > { %5500 = vst.msk [vmem:[#allocation3 + $0x6c8] sm:$0xff] %vm4833_vm8, %v5429_v21  ;;  %v6254_v59 = vadd.f32 %v10415_v1, %v6253_v44  ;;  %v10788_v1 = vld [vmem:[%s10855_s6] ss:$0 sm:$0xff] }
 0x659   : > { %5826 = vrot.lane.b32.xlu0 %v5731_v43, %s6794_s27  ;;  %v6485_v21 = vpop.f32.mrf.mxu0 }
 0x65a   : > { %5634 = vrot.lane.b32.xlu2 %v6781_v16, %s6792_s21 }
 0x65b   : > { %v5174_v33 = vpop.permute.xlu0 %5173  ;;  %v6023_v25 = vld [vmem:[#allocation3 + $0x638] sm:$0xff]  ;;  %v5431_v49 = vpop.permute.xlu1 %5430 }
 0x65c   : > { %v5176_v20 = vpop.permute.xlu2 %5175  ;;  %5245 = vst.msk [vmem:[#allocation3 + $0x708] sm:$0xff] %vm5219_vm1, %v5174_v33  ;;  %6383 = vmatmul.f32.gmra.mxu3 %v6023_v25 }
 0x65d   : > { %5501 = vst.msk [vmem:[#allocation3 + $0x710] sm:$0xff] %vm4833_vm8, %v5431_v49  ;;  %v6026_v15 = vld [vmem:[#allocation3 + $0x680] sm:$0xff] }
 0x65f   : > { %v6256_v37 = vpop.f32.mrf.mxu2 }
 0x660   : > { %v6257_v52 = vadd.f32 %v10788_v1, %v6256_v37 }
 0x663   : > { %v4985_v58 = vpop.permute.xlu0 %4984  ;;  %v6031_v39 = vld [vmem:[#allocation3 + $0x708] sm:$0xff]  ;;  %v4983_v29 = vpop.permute.xlu1 %4982 }
 0x664   : > { %v5623_v60 = vpop.permute.xlu2 %5622  ;;  %5054 = vst.msk [vmem:[#allocation3 + $0x798] sm:$0xff] %vm5026_vm9, %v4985_v58  ;;  %6279 = vmatmul.f32.gmra.mxu2 %v6031_v39  ;;  %6386 = vmatmul.f32.gmra.mxu3 %v6026_v15  ;;  %v6488_v39 = vpop.f32.mrf.mxu0 }
 0x665   : > { %5053 = vst.msk [vmem:[#allocation3 + $0x750] sm:$0xff] %vm5026_vm9, %v4983_v29 }
 0x666   : > { %5246 = vst.msk [vmem:[#allocation3 + $0x750] sm:$0xff] %vm5219_vm1, %v5176_v20 }
 0x667   : > { %5693 = vst.msk [vmem:[#allocation3 + $0x710] sm:$0xff] %vm5026_vm9, %v5623_v60 }
 0x669   : > { %v6363_v0 = vpop.f32.mrf.mxu3 }
 0x66a   : > { %v6364_v51 = vadd.f32 %v6363_v0, %v6251_v17 }
 0x66b   : > { %v4794_v62 = vpop.permute.xlu0 %4793  ;;  %v5813_v10 = vpop.permute.xlu1 %5812 }
 0x66c   : > { %v5435_v23 = vpop.permute.xlu2 %5434  ;;  %v6477_v22 = vadd.f32 %v6476_v36, %v6364_v51  ;;  %4862 = vst.msk [vmem:[#allocation3 + $0x7e0] sm:$0xff] %vm4833_vm8, %v4794_v62  ;;  %v6048_v51 = vld [vmem:[#allocation3 + $0x880] sm:$0xff]  ;;  %v6491_v44 = vpop.f32.mrf.mxu0 }
 0x66d   : > { %5503 = vst.msk [vmem:[#allocation3 + $0x7a0] sm:$0xff] %vm4833_vm8, %v5435_v23  ;;  %v6034_v55 = vld [vmem:[#allocation3 + $0x750] sm:$0xff]  ;;  %6685 = vmatmul.msk.f32.gmra.mxu0 %vm4576_vm15, %v6048_v51 }
 0x66e   : > { %6542 = vst [vmem:[%s10432_s30 + $0x78] sm:$0xff] %v6477_v22  ;;  %6282 = vmatmul.f32.gmra.mxu2 %v6034_v55  ;;  %v6051_v55 = vld [vmem:[#allocation3 + $0x8c8] sm:$0xff] }
 0x673   : > { %v5621_v38 = vpop.permute.xlu0 %5620  ;;  %v4796_v9 = vpop.permute.xlu1 %4795 }
 0x674   : > { %v4987_v30 = vpop.permute.xlu2 %4986  ;;  %5692 = vst.msk [vmem:[#allocation3 + $0x6c8] sm:$0xff] %vm5026_vm9, %v5621_v38 }
 0x675   : > { %4863 = vst.msk [vmem:[#allocation3 + $0x828] sm:$0xff] %vm4833_vm8, %v4796_v9  ;;  %6686 = vmatmul.msk.f32.gmra.mxu0 %vm4576_vm15, %v6051_v55 }
 0x676   : > { %5884 = vst.msk [vmem:[#allocation3 + $0x6c8] sm:$0xff] %vm5219_vm1, %v5813_v10 }
 0x677   : > { %5055 = vst.msk [vmem:[#allocation3 + $0x7e0] sm:$0xff] %vm5026_vm9, %v4987_v30 }
 0x678   : > { %v6259_v12 = vpop.f32.mrf.mxu2 }
 0x679   : > { %v6260_v7 = vadd.f32 %v10788_v1, %v6259_v12 }
 0x67b   : > { %v5815_v8 = vpop.permute.xlu0 %5814  ;;  %v5178_v46 = vpop.permute.xlu1 %5177 }
 0x67c   : > { %v4798_v54 = vpop.permute.xlu2 %4797  ;;  %5885 = vst.msk [vmem:[#allocation3 + $0x710] sm:$0xff] %vm5219_vm1, %v5815_v8 }
 0x67d   : > { %5247 = vst.msk [vmem:[#allocation3 + $0x798] sm:$0xff] %vm5219_vm1, %v5178_v46  ;;  %v6029_v41 = vld [vmem:[#allocation3 + $0x6c8] sm:$0xff] }
 0x67e   : > { %4864 = vst.msk [vmem:[#allocation3 + $0x870] sm:$0xff] %vm4833_vm8, %v4798_v54  ;;  %6389 = vmatmul.f32.gmra.mxu3 %v6029_v41 }
 0x67f   : > { %v6366_v28 = vpop.f32.mrf.mxu3 }
 0x680   : > { %v6367_v3 = vadd.f32 %v6366_v28, %v6254_v59 }
 0x682   : > { %v6480_v27 = vadd.f32 %v6479_v2, %v6367_v3 }
 0x683   : > { %v5433_v32 = vpop.permute.xlu0 %5432  ;;  %v6032_v42 = vld [vmem:[#allocation3 + $0x710] sm:$0xff]  ;;  %v4989_v24 = vpop.permute.xlu1 %4988 }
 0x684   : > { %v5817_v35 = vpop.permute.xlu2 %5816  ;;  %6543 = vst [vmem:[%s10432_s30 + $0x80] sm:$0xff] %v6480_v27  ;;  %v6037_v34 = vld [vmem:[#allocation3 + $0x798] sm:$0xff]  ;;  %v6494_v27 = vpop.f32.mrf.mxu0 }
 0x685   : > { %5056 = vst.msk [vmem:[#allocation3 + $0x828] sm:$0xff] %vm5026_vm9, %v4989_v24  ;;  %6285 = vmatmul.f32.gmra.mxu2 %v6037_v34 }
 0x686   : > { %5502 = vst.msk [vmem:[#allocation3 + $0x758] sm:$0xff] %vm4833_vm8, %v5433_v32  ;;  %6392 = vmatmul.f32.gmra.mxu3 %v6032_v42 }
 0x687   : > { %v6369_v57 = vpop.f32.mrf.mxu3  ;;  %v6262_v20 = vpop.f32.mrf.mxu2 }
 0x688   : > { %v6370_v47 = vadd.f32 %v6369_v57, %v6257_v52  ;;  %v6263_v49 = vadd.f32 %v10788_v1, %v6262_v20 }
 0x68a   : > { %v6483_v56 = vadd.f32 %v6482_v19, %v6370_v47 }
 0x68b   : > { %v5180_v61 = vpop.permute.xlu0 %5179  ;;  %v5625_v5 = vpop.permute.xlu1 %5624 }
 0x68c   : > { %v5182_v16 = vpop.permute.xlu2 %5181  ;;  %6544 = vst [vmem:[%s10432_s30 + $0x88] sm:$0xff] %v6483_v56  ;;  %v6497_v47 = vpop.f32.mrf.mxu0 }
 0x68d   : > { %5694 = vst.msk [vmem:[#allocation3 + $0x758] sm:$0xff] %vm5026_vm9, %v5625_v5 }
 0x68e   : > { %5886 = vst.msk [vmem:[#allocation3 + $0x758] sm:$0xff] %vm5219_vm1, %v5817_v35 }
 0x68f   : > { %5248 = vst.msk [vmem:[#allocation3 + $0x7e0] sm:$0xff] %vm5219_vm1, %v5180_v61 }
 0x690   : > { %5249 = vst.msk [vmem:[#allocation3 + $0x828] sm:$0xff] %vm5219_vm1, %v5182_v16 }
 0x691   : > { %v6265_v62 = vpop.f32.mrf.mxu2 }
 0x692   : > { %v6266_v22 = vadd.f32 %v10788_v1, %v6265_v62 }
 0x693   : > { %v4800_v13 = vpop.permute.xlu0 %4799  ;;  %v5819_v48 = vpop.permute.xlu1 %5818 }
 0x694   : > { %v5629_v4 = vpop.permute.xlu2 %5628  ;;  %4865 = vst.msk [vmem:[#allocation3 + $0x8b8] sm:$0xff] %vm4833_vm8, %v4800_v13 }
 0x695   : > { %v6035_v14 = vld [vmem:[#allocation3 + $0x758] sm:$0xff] }
 0x696   : > { %v6040_v53 = vld [vmem:[#allocation3 + $0x7e0] sm:$0xff]  ;;  %6395 = vmatmul.f32.gmra.mxu3 %v6035_v14 }
 0x697   : > { %6288 = vmatmul.f32.gmra.mxu2 %v6040_v53  ;;  %v6043_v45 = vld [vmem:[#allocation3 + $0x828] sm:$0xff] }
 0x69b   : > { %v5627_v26 = vpop.permute.xlu0 %5626  ;;  %v5437_v11 = vpop.permute.xlu1 %5436 }
 0x69c   : > { %v5823_v18 = vpop.permute.xlu2 %5822  ;;  %5695 = vst.msk [vmem:[#allocation3 + $0x7a0] sm:$0xff] %vm5026_vm9, %v5627_v26 }
 0x69d   : > { %5504 = vst.msk [vmem:[#allocation3 + $0x7e8] sm:$0xff] %vm4833_vm8, %v5437_v11 }
 0x69e   : > { %5696 = vst.msk [vmem:[#allocation3 + $0x7e8] sm:$0xff] %vm5026_vm9, %v5629_v4 }
 0x69f   : > { %5887 = vst.msk [vmem:[#allocation3 + $0x7a0] sm:$0xff] %vm5219_vm1, %v5819_v48  ;;  %6291 = vmatmul.f32.gmra.mxu2 %v6043_v45  ;;  %v6500_v48 = vpop.f32.mrf.mxu0 }
 0x6a1   : > { %v6372_v63 = vpop.f32.mrf.mxu3 }
 0x6a2   : > { %v6373_v50 = vadd.f32 %v6372_v63, %v6260_v7 }
 0x6a3   : > { %v5439_v31 = vpop.permute.xlu0 %5438  ;;  %v5184_v33 = vpop.permute.xlu1 %5183 }
 0x6a4   : > { %v5441_v40 = vpop.permute.xlu2 %5440  ;;  %v6486_v43 = vadd.f32 %v6485_v21, %v6373_v50  ;;  %5505 = vst.msk [vmem:[#allocation3 + $0x830] sm:$0xff] %vm4833_vm8, %v5439_v31 }
 0x6a5   : > { %5506 = vst.msk [vmem:[#allocation3 + $0x878] sm:$0xff] %vm4833_vm8, %v5441_v40 }
 0x6a6   : > { %6545 = vst [vmem:[%s10432_s30 + $0x90] sm:$0xff] %v6486_v43  ;;  %v6038_v25 = vld [vmem:[#allocation3 + $0x7a0] sm:$0xff] }
 0x6a7   : > { %6398 = vmatmul.f32.gmra.mxu3 %v6038_v25 }
 0x6a8   : > { %v6268_v2 = vpop.f32.mrf.mxu2 }
 0x6a9   : > { %v6375_v58 = vpop.f32.mrf.mxu3  ;;  %v6269_v28 = vadd.f32 %v10788_v1, %v6268_v2 }
 0x6aa   : > { %v6376_v60 = vadd.f32 %v6375_v58, %v6263_v49 }
 0x6ab   : > { %v4991_v15 = vpop.permute.xlu0 %4990  ;;  %v5631_v6 = vpop.permute.xlu1 %5630 }
 0x6ac   : > { %v6489_v29 = vadd.f32 %v6488_v39, %v6376_v60  ;;  %5057 = vst.msk [vmem:[#allocation3 + $0x870] sm:$0xff] %vm5026_vm9, %v4991_v15  ;;  %v4993_v17 = vpop.permute.xlu2 %4992 }
 0x6ad   : > { %5697 = vst.msk [vmem:[#allocation3 + $0x830] sm:$0xff] %vm5026_vm9, %v5631_v6 }
 0x6ae   : > { %6546 = vst [vmem:[%s10432_s30 + $0x98] sm:$0xff] %v6489_v29 }
 0x6af   : > { %5889 = vst.msk [vmem:[#allocation3 + $0x830] sm:$0xff] %vm5219_vm1, %v5823_v18  ;;  %v6503_v18 = vpop.f32.mrf.mxu0 }
 0x6b0   : > { %5250 = vst.msk [vmem:[#allocation3 + $0x870] sm:$0xff] %vm5219_vm1, %v5184_v33 }
 0x6b1   : > { %5058 = vst.msk [vmem:[#allocation3 + $0x8b8] sm:$0xff] %vm5026_vm9, %v4993_v17 }
 0x6b3   : > { %v5821_v0 = vpop.permute.xlu0 %5820  ;;  %v5825_v36 = vpop.permute.xlu1 %5824 }
 0x6b4   : > { %5888 = vst.msk [vmem:[#allocation3 + $0x7e8] sm:$0xff] %vm5219_vm1, %v5821_v0  ;;  %v5635_v46 = vpop.permute.xlu2 %5634 }
 0x6b6   : > { %v6044_v59 = vld [vmem:[#allocation3 + $0x830] sm:$0xff] }
 0x6b7   : > { %v6046_v23 = vld [vmem:[#allocation3 + $0x870] sm:$0xff]  ;;  %v6271_v52 = vpop.f32.mrf.mxu2  ;;  %v6506_v31 = vpop.f32.mrf.mxu0 }
 0x6b8   : > { %6294 = vmatmul.f32.gmra.mxu2 %v6046_v23  ;;  %v6272_v57 = vadd.f32 %v10788_v1, %v6271_v52 }
 0x6ba   : > { %v6378_v10 = vpop.f32.mrf.mxu3 }
 0x6bb   : > { %v6379_v38 = vadd.f32 %v6378_v10, %v6266_v22  ;;  %v5633_v30 = vpop.permute.xlu0 %5632  ;;  %v6041_v9 = vld [vmem:[#allocation3 + $0x7e8] sm:$0xff]  ;;  %v5443_v8 = vpop.permute.xlu1 %5442 }
 0x6bc   : > { %5698 = vst.msk [vmem:[#allocation3 + $0x878] sm:$0xff] %vm5026_vm9, %v5633_v30  ;;  %6401 = vmatmul.f32.gmra.mxu3 %v6041_v9 }
 0x6bd   : > { %v6492_v54 = vadd.f32 %v6491_v44, %v6379_v38  ;;  %5507 = vst.msk [vmem:[#allocation3 + $0x8c0] sm:$0xff] %vm4833_vm8, %v5443_v8 }
 0x6be   : > { %5890 = vst.msk [vmem:[#allocation3 + $0x878] sm:$0xff] %vm5219_vm1, %v5825_v36 }
 0x6bf   : > { %6547 = vst [vmem:[%s10432_s30 + $0xa0] sm:$0xff] %v6492_v54  ;;  %v6274_v16 = vpop.f32.mrf.mxu2  ;;  %v6509_v49 = vpop.f32.mrf.mxu0 }
 0x6c0   : > { %5699 = vst.msk [vmem:[#allocation3 + $0x8c0] sm:$0xff] %vm5026_vm9, %v5635_v46  ;;  %v6275_v5 = vadd.f32 %v10788_v1, %v6274_v16 }
 0x6c3   : > { %v5186_v41 = vpop.permute.xlu0 %5185 }
 0x6c4   : > { %5251 = vst.msk [vmem:[#allocation3 + $0x8b8] sm:$0xff] %vm5219_vm1, %v5186_v41  ;;  %6404 = vmatmul.f32.gmra.mxu3 %v6044_v59 }
 0x6c5   : > { %v6047_v42 = vld [vmem:[#allocation3 + $0x878] sm:$0xff] }
 0x6c7   : > { %v6512_v6 = vpop.f32.mrf.mxu0 }
 0x6c9   : > { %v6381_v3 = vpop.f32.mrf.mxu3 }
 0x6ca   : > { %v6382_v37 = vadd.f32 %v6381_v3, %v6269_v28 }
 0x6cb   : > { %v5827_v32 = vpop.permute.xlu0 %5826  ;;  %v6049_v35 = vld [vmem:[#allocation3 + $0x8b8] sm:$0xff] }
 0x6cc   : > { %v6495_v24 = vadd.f32 %v6494_v27, %v6382_v37  ;;  %5891 = vst.msk [vmem:[#allocation3 + $0x8c0] sm:$0xff] %vm5219_vm1, %v5827_v32  ;;  %6297 = vmatmul.f32.gmra.mxu2 %v6049_v35  ;;  %6407 = vmatmul.f32.gmra.mxu3 %v6047_v42 }
 0x6ce   : > { %6548 = vst [vmem:[%s10432_s30 + $0xa8] sm:$0xff] %v6495_v24 }
 0x6cf   : > { %v6515_v36 = vpop.f32.mrf.mxu0 }
 0x6d3   : > { %v6050_v34 = vld [vmem:[#allocation3 + $0x8c0] sm:$0xff] }
 0x6d4   : > { %6410 = vmatmul.f32.gmra.mxu3 %v6050_v34 }
 0x6d7   : > { %v6518_v55 = vpop.f32.mrf.mxu0 }
 0x6d8   : > { %v6277_v53 = vpop.f32.mrf.mxu2 }
 0x6d9   : > { %v6278_v26 = vadd.f32 %v10788_v1, %v6277_v53 }
 0x6df   : > { %v6384_v19 = vpop.f32.mrf.mxu3 }
 0x6e0   : > { %v6385_v56 = vadd.f32 %v6384_v19, %v6272_v57 }
 0x6e2   : > { %v6498_v61 = vadd.f32 %v6497_v47, %v6385_v56 }
 0x6e4   : > { %6549 = vst [vmem:[%s10432_s30 + $0xb0] sm:$0xff] %v6498_v61 }
 0x6e7   : > { %v6387_v13 = vpop.f32.mrf.mxu3  ;;  %v6280_v7 = vpop.f32.mrf.mxu2 }
 0x6e8   : > { %v6388_v4 = vadd.f32 %v6387_v13, %v6275_v5  ;;  %v6281_v21 = vadd.f32 %v10788_v1, %v6280_v7 }
 0x6ea   : > { %v6501_v14 = vadd.f32 %v6500_v48, %v6388_v4  ;;  %v6521_v54 = vpop.f32.mrf.mxu0 }
 0x6ec   : > { %6550 = vst [vmem:[%s10432_s30 + $0xb8] sm:$0xff] %v6501_v14 }
 0x6f1   : > { %v6283_v43 = vpop.f32.mrf.mxu2 }
 0x6f2   : > { %v6284_v33 = vadd.f32 %v10788_v1, %v6283_v43  ;;  %v6524_v27 = vpop.f32.mrf.mxu0 }
 0x701   : > { %v6390_v11 = vpop.f32.mrf.mxu3 }
 0x702   : > { %v6391_v12 = vadd.f32 %v6390_v11, %v6278_v26 }
 0x704   : > { %v6504_v45 = vadd.f32 %v6503_v18, %v6391_v12 }
 0x706   : > { %6551 = vst [vmem:[%s10432_s30 + $0xc0] sm:$0xff] %v6504_v45 }
 0x708   : > { %v6286_v60 = vpop.f32.mrf.mxu2 }
 0x709   : > { %v6393_v63 = vpop.f32.mrf.mxu3  ;;  %v6287_v39 = vadd.f32 %v10788_v1, %v6286_v60 }
 0x70a   : > { %v6394_v50 = vadd.f32 %v6393_v63, %v6281_v21 }
 0x70c   : > { %v6507_v40 = vadd.f32 %v6506_v31, %v6394_v50 }
 0x70e   : > { %6552 = vst [vmem:[%s10432_s30 + $0xc8] sm:$0xff] %v6507_v40 }
 0x719   : > { %v6396_v20 = vpop.f32.mrf.mxu3 }
 0x71a   : > { %v6397_v25 = vadd.f32 %v6396_v20, %v6284_v33  ;;  %v6289_v0 = vpop.f32.mrf.mxu2 }
 0x71b   : > { %v6290_v51 = vadd.f32 %v10788_v1, %v6289_v0 }
 0x71c   : > { %v6510_v58 = vadd.f32 %v6509_v49, %v6397_v25 }
 0x71e   : > { %6553 = vst [vmem:[%s10432_s30 + $0xd0] sm:$0xff] %v6510_v58 }
 0x722   : > { %v6292_v10 = vpop.f32.mrf.mxu2 }
 0x723   : > { %v6293_v38 = vadd.f32 %v10788_v1, %v6292_v10 }
 0x72a   : > { %v6399_v15 = vpop.f32.mrf.mxu3 }
 0x72b   : > { %v6400_v29 = vadd.f32 %v6399_v15, %v6287_v39 }
 0x72d   : > { %v6513_v17 = vadd.f32 %v6512_v6, %v6400_v29 }
 0x72f   : > { %6554 = vst [vmem:[%s10432_s30 + $0xd8] sm:$0xff] %v6513_v17 }
 0x73b   : > { %v6295_v8 = vpop.f32.mrf.mxu2 }
 0x73c   : > { %v6296_v46 = vadd.f32 %v10788_v1, %v6295_v8 }
 0x73f   : > { %v6402_v62 = vpop.f32.mrf.mxu3 }
 0x740   : > { %v6403_v23 = vadd.f32 %v6402_v62, %v6290_v51 }
 0x742   : > { %v6516_v22 = vadd.f32 %v6515_v36, %v6403_v23 }
 0x744   : > { %6555 = vst [vmem:[%s10432_s30 + $0xe0] sm:$0xff] %v6516_v22 }
 0x747   : > { %v6405_v30 = vpop.f32.mrf.mxu3 }
 0x748   : > { %v6406_v9 = vadd.f32 %v6405_v30, %v6293_v38 }
 0x74a   : > { %v6519_v44 = vadd.f32 %v6518_v55, %v6406_v9 }
 0x74c   : > { %6556 = vst [vmem:[%s10432_s30 + $0xe8] sm:$0xff] %v6519_v44 }
 0x74f   : > { %v6408_v41 = vpop.f32.mrf.mxu3  ;;  %v6298_v28 = vpop.f32.mrf.mxu2 }
 0x750   : > { %v6409_v59 = vadd.f32 %v6408_v41, %v6296_v46  ;;  %v6299_v3 = vadd.f32 %v10788_v1, %v6298_v28 }
 0x752   : > { %v6522_v2 = vadd.f32 %v6521_v54, %v6409_v59 }
 0x754   : > { %6557 = vst [vmem:[%s10432_s30 + $0xf0] sm:$0xff] %v6522_v2 }
 0x757   : > { %v6411_v37 = vpop.f32.mrf.mxu3 }
 0x758   : > { %v6412_v32 = vadd.f32 %v6411_v37, %v6299_v3 }
 0x75a   : > { %v6525_v35 = vadd.f32 %v6524_v27, %v6412_v32 }
 0x75c   : > { %6558 = vst [vmem:[%s10432_s30 + $0xf8] sm:$0xff] %v6525_v35 }
 0x75d PF: > { %s17_s24 = sadd.s32 1, %s6789_s24  }
 0x75e   : > { %p14_p4 = scmp.ge.s32.totalorder %s17_s24, 4  }
 0x760   :  { %16 = sbr.rel (!%p14_p4) target bundleno = 1 (0x1), region = 80 }

</bundles_post_ra>
